<compile_context>
chip_gen: v6e
topology: v6e:2x2x1
jax: 0.10.0
libtpu: 0.0.40
codegen_flags: <defaults>
</compile_context>

<pallas_src>
import functools

import jax
import jax.numpy as jnp
from jax.experimental import pallas as pl
from jax.experimental.pallas import tpu as pltpu

# ----- scaled-down ResNet50 config (standard structure [3,4,6,3], reduced width) -----
BASE = 8            # torchvision ResNet50 uses 64; reduced for a small synthetic run
NUM_CLASSES = 10
BLOCKS = (3, 4, 6, 3)
EXPANSION = 4
ACT_DTYPE = jnp.bfloat16
LANE = 128

_VMEM = pl.BlockSpec(memory_space=pltpu.MemorySpace.VMEM)
_PARALLEL_1D = pltpu.CompilerParams(dimension_semantics=("parallel",))


def _cdiv(a, b):
    return (a + b - 1) // b


def _pad_up(n, m=LANE):
    return _cdiv(n, m) * m


def _row_block(m, max_bm=128):
    bm = min(max_bm, m)
    return bm, _cdiv(m, bm)


# ============================ Pallas kernels ============================

def _conv_bias_kernel(relu, x_ref, w_ref, b_ref, o_ref):
    # [bm, K] @ [K, Cout] + bias (+ ReLU); BN scale pre-folded into w.
    acc = jnp.dot(x_ref[...], w_ref[...], preferred_element_type=jnp.float32) + b_ref[...]
    if relu:
        acc = jnp.maximum(acc, 0.0)
    o_ref[...] = acc.astype(o_ref.dtype)


def _c1_ds_kernel(x_ref, w1_ref, b1_ref, wd_ref, bd_ref, h1_ref, ds_ref):
    # Fused bottleneck entry: c1 (1x1 conv + BN + ReLU) and downsample (1x1 conv + BN).
    x = x_ref[...]
    a1 = jnp.dot(x, w1_ref[...], preferred_element_type=jnp.float32) + b1_ref[...]
    h1_ref[...] = jnp.maximum(a1, 0.0).astype(h1_ref.dtype)
    ad = jnp.dot(x, wd_ref[...], preferred_element_type=jnp.float32) + bd_ref[...]
    ds_ref[...] = ad.astype(ds_ref.dtype)


def _c2_c3_res_kernel(p_ref, w2_ref, b2_ref, w3_ref, b3_ref, id_ref, o_ref):
    # Fused bottleneck tail: c2 (3x3 im2col matmul + BN + ReLU) -> c3 (1x1 + BN)
    # -> + identity -> ReLU, all in one kernel (no intermediate HBM traffic).
    h2 = jnp.dot(p_ref[...], w2_ref[...], preferred_element_type=jnp.float32) + b2_ref[...]
    h2 = jnp.maximum(h2, 0.0).astype(ACT_DTYPE)
    y = jnp.dot(h2, w3_ref[...], preferred_element_type=jnp.float32) + b3_ref[...]
    y = y + id_ref[...].astype(jnp.float32)
    o_ref[...] = jnp.maximum(y, 0.0).astype(o_ref.dtype)


def _maxpool_kernel(p_ref, o_ref):
    # p_ref: [M, KK, C] -> max over the pooling-window axis.
    o_ref[...] = jnp.max(p_ref[...].astype(jnp.float32), axis=1).astype(o_ref.dtype)


def _head_kernel(x_ref, w_ref, b_ref, labels_ref, logits_ref, loss_ref):
    # Fused tail: global avg-pool + FC + CrossEntropyLoss(mean).
    feat = jnp.mean(x_ref[...].astype(jnp.float32), axis=1)            # [N, C]
    logits = jnp.dot(feat.astype(ACT_DTYPE), w_ref[...],
                     preferred_element_type=jnp.float32) + b_ref[...]  # [N, Cpad]
    logits_ref[...] = logits.astype(logits_ref.dtype)
    cls = jax.lax.broadcasted_iota(jnp.int32, logits.shape, 1)
    masked = jnp.where(cls < NUM_CLASSES, logits, -1e30)               # ignore padded cols
    m = jnp.max(masked, axis=-1, keepdims=True)
    lse = m + jnp.log(jnp.sum(jnp.exp(masked - m), axis=-1, keepdims=True))
    picked = jnp.sum(jnp.where(cls == labels_ref[...], logits, 0.0),
                     axis=-1, keepdims=True)
    loss_ref[...] = jnp.mean(lse - picked, axis=0, keepdims=True)


# ============================ Pallas wrappers ============================

def conv_bias(x2d, w, b, relu):
    m, k = x2d.shape
    cout = w.shape[1]
    bm, g = _row_block(m)
    return pl.pallas_call(
        functools.partial(_conv_bias_kernel, relu),
        out_shape=jax.ShapeDtypeStruct((m, cout), ACT_DTYPE),
        grid=(g,),
        in_specs=[pl.BlockSpec((bm, k), lambda i: (i, 0)),
                  pl.BlockSpec((k, cout), lambda i: (0, 0)),
                  pl.BlockSpec((1, cout), lambda i: (0, 0))],
        out_specs=pl.BlockSpec((bm, cout), lambda i: (i, 0)),
        compiler_params=_PARALLEL_1D,
    )(x2d, w, b)


def conv1x1_with_downsample(x2d, c1, dn):
    m, k = x2d.shape
    p_out = c1['w'].shape[1]
    d_out = dn['w'].shape[1]
    bm, g = _row_block(m)
    return pl.pallas_call(
        _c1_ds_kernel,
        out_shape=(jax.ShapeDtypeStruct((m, p_out), ACT_DTYPE),
                   jax.ShapeDtypeStruct((m, d_out), ACT_DTYPE)),
        grid=(g,),
        in_specs=[pl.BlockSpec((bm, k), lambda i: (i, 0)),
                  pl.BlockSpec((k, p_out), lambda i: (0, 0)),
                  pl.BlockSpec((1, p_out), lambda i: (0, 0)),
                  pl.BlockSpec((k, d_out), lambda i: (0, 0)),
                  pl.BlockSpec((1, d_out), lambda i: (0, 0))],
        out_specs=[pl.BlockSpec((bm, p_out), lambda i: (i, 0)),
                   pl.BlockSpec((bm, d_out), lambda i: (i, 0))],
        compiler_params=_PARALLEL_1D,
    )(x2d, c1['w'], c1['b'], dn['w'], dn['b'])


def conv3x3_conv1x1_residual(p2, c2, c3, identity):
    m, k2 = p2.shape
    pmid = c2['w'].shape[1]
    cout = c3['w'].shape[1]
    bm, g = _row_block(m)
    return pl.pallas_call(
        _c2_c3_res_kernel,
        out_shape=jax.ShapeDtypeStruct((m, cout), ACT_DTYPE),
        grid=(g,),
        in_specs=[pl.BlockSpec((bm, k2), lambda i: (i, 0)),
                  pl.BlockSpec((k2, pmid), lambda i: (0, 0)),
                  pl.BlockSpec((1, pmid), lambda i: (0, 0)),
                  pl.BlockSpec((pmid, cout), lambda i: (0, 0)),
                  pl.BlockSpec((1, cout), lambda i: (0, 0)),
                  pl.BlockSpec((bm, cout), lambda i: (i, 0))],
        out_specs=pl.BlockSpec((bm, cout), lambda i: (i, 0)),
        compiler_params=_PARALLEL_1D,
    )(p2, c2['w'], c2['b'], c3['w'], c3['b'], identity)


def extract_patches(x, kh, kw, stride, pad, pad_value=0.0):
    """im2col glue.  x: [N,H,W,C] -> ([N,OH,OW,kh*kw,C], OH, OW)."""
    if pad > 0:
        x = jnp.pad(x, ((0, 0), (pad, pad), (pad, pad), (0, 0)),
                    constant_values=jnp.asarray(pad_value, x.dtype))
    n, h, w, c = x.shape
    oh = (h - kh) // stride + 1
    ow = (w - kw) // stride + 1
    cols = []
    for i in range(kh):
        for j in range(kw):
            cols.append(x[:, i:i + stride * (oh - 1) + 1:stride,
                           j:j + stride * (ow - 1) + 1:stride, :])
    patches = jnp.stack(cols, axis=3)  # [N, OH, OW, kh*kw, C]
    return patches, oh, ow


def maxpool2d(x4d, k, stride, pad):
    # Post-ReLU input is non-negative, so 0-padding is equivalent to -inf padding.
    n, _, _, c = x4d.shape
    patches, oh, ow = extract_patches(x4d, k, k, stride, pad, pad_value=0.0)
    p3 = patches.reshape(n * oh * ow, k * k, c)
    out = pl.pallas_call(
        _maxpool_kernel,
        out_shape=jax.ShapeDtypeStruct((n * oh * ow, c), ACT_DTYPE),
        in_specs=[_VMEM],
        out_specs=_VMEM,
    )(p3)
    return out, oh, ow


def head(x2d, n, hw, fc_w, fc_b, labels):
    c = x2d.shape[1]
    logits_p, loss = pl.pallas_call(
        _head_kernel,
        out_shape=(jax.ShapeDtypeStruct((n, fc_w.shape[1]), ACT_DTYPE),
                   jax.ShapeDtypeStruct((1, 1), jnp.float32)),
        in_specs=[_VMEM] * 4,
        out_specs=[_VMEM, _VMEM],
    )(x2d.reshape(n, hw, c), fc_w, fc_b, labels)
    return logits_p[:, :NUM_CLASSES], loss[0, 0]


# ============================ parameters ============================

def make_params(key):
    counter = [0]

    def next_key():
        counter[0] += 1
        return jax.random.fold_in(key, counter[0])

    def conv_bn(kh, kw, cin, cout, cin_stored=None, k_pad_to=None):
        # BN (inference) folded: scale pre-multiplied into the weight, bias kept separate.
        cin_stored = _pad_up(cin) if cin_stored is None else cin_stored
        cout_p = _pad_up(cout)
        w = (jax.random.normal(next_key(), (kh, kw, cin, cout), jnp.float32)
             * (2.0 / (kh * kw * cin)) ** 0.5)
        eps = 1e-5
        gamma = jnp.ones((cout,), jnp.float32)
        beta = jnp.zeros((cout,), jnp.float32)
        mean = jnp.zeros((cout,), jnp.float32)
        var = jnp.ones((cout,), jnp.float32)
        scale = gamma / jnp.sqrt(var + eps)
        bias = beta - mean * scale
        w_folded = w * scale                                   # fold scale into weight
        w_p = jnp.zeros((kh, kw, cin_stored, cout_p), jnp.float32)
        w_p = w_p.at[:, :, :cin, :cout].set(w_folded)
        w_p = w_p.reshape(kh * kw * cin_stored, cout_p)
        if k_pad_to is not None and w_p.shape[0] < k_pad_to:
            w_p = jnp.pad(w_p, ((0, k_pad_to - w_p.shape[0]), (0, 0)))
        b_p = jnp.zeros((1, cout_p), jnp.float32).at[0, :cout].set(bias)
        return {'k': (kh, kw), 'w': w_p.astype(ACT_DTYPE), 'b': b_p}

    params = {'stem': conv_bn(7, 7, 3, BASE, cin_stored=3, k_pad_to=256)}
    in_ch = BASE
    planes_list = (BASE, 2 * BASE, 4 * BASE, 8 * BASE)
    strides = (1, 2, 2, 2)
    for si in range(4):
        planes = planes_list[si]
        for bi in range(BLOCKS[si]):
            blk = {
                'c1': conv_bn(1, 1, in_ch, planes),
                'c2': conv_bn(3, 3, planes, planes),
                'c3': conv_bn(1, 1, planes, planes * EXPANSION),
            }
            if bi == 0 and (strides[si] != 1 or in_ch != planes * EXPANSION):
                blk['down'] = conv_bn(1, 1, in_ch, planes * EXPANSION)
            params[f's{si}b{bi}'] = blk
            in_ch = planes * EXPANSION
    feat_p = _pad_up(in_ch)
    fcw = (jax.random.normal(next_key(), (in_ch, NUM_CLASSES), jnp.float32)
           * (1.0 / in_ch) ** 0.5)
    fcw_p = jnp.zeros((feat_p, LANE), jnp.float32).at[:in_ch, :NUM_CLASSES].set(fcw)
    params['fc_w'] = fcw_p.astype(ACT_DTYPE)
    params['fc_b'] = jnp.zeros((1, LANE), jnp.float32)
    return params


# ============================ forward ============================

def resnet50_backbone(params, x_nchw):
    n = x_nchw.shape[0]
    x = jnp.transpose(x_nchw, (0, 2, 3, 1)).astype(ACT_DTYPE)   # NCHW -> NHWC; x.half()

    # stem: 7x7/2 conv + BN + ReLU  (im2col K zero-padded 147 -> 256)
    stem = params['stem']
    patches, h, w = extract_patches(x, 7, 7, 2, 3)
    p2 = patches.reshape(n * h * w, -1)
    p2 = jnp.pad(p2, ((0, 0), (0, stem['w'].shape[0] - p2.shape[1])))
    x2d = conv_bias(p2, stem['w'], stem['b'], relu=True)        # [n*16*16, 128]

    # maxpool 3x3/2
    c = x2d.shape[1]
    x2d, h, w = maxpool2d(x2d.reshape(n, h, w, c), 3, 2, 1)     # [n*8*8, 128]

    strides = (1, 2, 2, 2)
    for si in range(4):
        for bi in range(BLOCKS[si]):
            blk = params[f's{si}b{bi}']
            s = strides[si] if bi == 0 else 1
            if 'down' in blk:
                h1, ds = conv1x1_with_downsample(x2d, blk['c1'], blk['down'])
                if s != 1:   # downsample computed at full res; decimate in glue
                    dch = ds.shape[1]
                    ds = ds.reshape(n, h, w, dch)[:, ::s, ::s, :].reshape(-1, dch)
                identity = ds
            else:
                h1 = conv_bias(x2d, blk['c1']['w'], blk['c1']['b'], relu=True)
                identity = x2d
            pch = h1.shape[1]
            patches, oh, ow = extract_patches(h1.reshape(n, h, w, pch), 3, 3, s, 1)
            p2 = patches.reshape(n * oh * ow, 9 * pch)
            x2d = conv3x3_conv1x1_residual(p2, blk['c2'], blk['c3'], identity)
            h, w = oh, ow
    return x2d, n, h * w


def classification_model_forward(params, x, labels):
    x2d, n, hw = resnet50_backbone(params, x)
    if labels is None:
        logits, _ = head(x2d, n, hw, params['fc_w'], params['fc_b'],
                         jnp.zeros((n, 1), jnp.int32))
        return logits
    logits, loss = head(x2d, n, hw, params['fc_w'], params['fc_b'], labels)
    # poptorch.identity_loss(loss, reduction='sum') on a scalar == the scalar itself
    return logits, jnp.sum(loss)


# ============================ main ============================

if __name__ == "__main__":
    key = jax.random.PRNGKey(0)
    params = make_params(jax.random.fold_in(key, 1))

    x = jax.random.normal(jax.random.fold_in(key, 2), (2, 3, 32, 32), jnp.float32)
    labels = jax.random.randint(jax.random.fold_in(key, 3), (2, 1), 0, NUM_CLASSES,
                                dtype=jnp.int32)

    fwd = jax.jit(lambda xx, ll: classification_model_forward(params, xx, ll))
    output, loss = fwd(x, labels)
    jax.block_until_ready((output, loss))

    assert output.shape == (2, NUM_CLASSES) and output.dtype == ACT_DTYPE
    assert loss.shape == () and loss.dtype == jnp.float32
    print("KERNEL_OK")
</pallas_src>

<mosaic_0001>
module attributes {stable_mosaic.version = 11 : i64} {
  func.func @_conv_bias_kernel(%arg0: i32, %arg1: memref<128x256xbf16, #tpu.memory_space<vmem>>, %arg2: memref<256x128xbf16, #tpu.memory_space<vmem>>, %arg3: memref<1x128xf32, #tpu.memory_space<vmem>>, %arg4: memref<128x128xbf16, #tpu.memory_space<vmem>>) attributes {dimension_semantics = [#tpu.dimension_semantics<parallel>], iteration_bounds = array<i64: 4>, scalar_prefetch = 0 : i64, scratch_operands = 0 : i64, tpu.core_type = #tpu.core_type<tc>, window_params = [{transform_indices = @transform_0, window_bounds = array<i64: 128, 256>}, {pipeline_mode = #tpu.pipeline_mode<synchronous>, transform_indices = @transform_1, window_bounds = array<i64: 256, 128>}, {pipeline_mode = #tpu.pipeline_mode<synchronous>, transform_indices = @transform_2, window_bounds = array<i64: 1, 128>}, {transform_indices = @transform_3, window_bounds = array<i64: 128, 128>}]} {
    %c0 = arith.constant 0 : index
    %c0_0 = arith.constant 0 : index
    %0 = vector.load %arg1[%c0, %c0_0] : memref<128x256xbf16, #tpu.memory_space<vmem>>, vector<128x256xbf16>
    %c0_1 = arith.constant 0 : index
    %c0_2 = arith.constant 0 : index
    %1 = vector.load %arg2[%c0_1, %c0_2] : memref<256x128xbf16, #tpu.memory_space<vmem>>, vector<256x128xbf16>
    %cst = arith.constant dense<0.000000e+00> : vector<128x128xf32>
    %2 = tpu.matmul %0, %1, %cst {dimension_numbers = #tpu.dot_dimension_numbers<[1], [0], [0], [1], [0, 0, 1, 1], [], []>} : vector<128x256xbf16>, vector<256x128xbf16>, vector<128x128xf32> -> vector<128x128xf32>
    %c0_3 = arith.constant 0 : index
    %c0_4 = arith.constant 0 : index
    %3 = vector.load %arg3[%c0_3, %c0_4] : memref<1x128xf32, #tpu.memory_space<vmem>>, vector<1x128xf32>
    %4 = vector.broadcast %3 : vector<1x128xf32> to vector<128x128xf32>
    %5 = arith.addf %2, %4 : vector<128x128xf32>
    %cst_5 = arith.constant 0.000000e+00 : f32
    %6 = vector.broadcast %cst_5 : f32 to vector<128x128xf32>
    %7 = arith.maximumf %5, %6 : vector<128x128xf32>
    %8 = arith.truncf %7 : vector<128x128xf32> to vector<128x128xbf16>
    %c0_6 = arith.constant 0 : index
    %c0_7 = arith.constant 0 : index
    %9 = vector.load %arg4[%c0_6, %c0_7] : memref<128x128xbf16, #tpu.memory_space<vmem>>, vector<128x128xbf16>
    tpu.vector_store %arg4[%c0_6, %c0_7], %8 {strides = array<i32>} : memref<128x128xbf16, #tpu.memory_space<vmem>>, vector<128x128xbf16>,
    return
  }
  func.func @transform_0(%arg0: i32) -> (i32, i32) {
    %c0_i32 = arith.constant 0 : i32
    %c0_i32_0 = arith.constant 0 : i32
    return %arg0, %c0_i32 : i32, i32
  }
  func.func @transform_1(%arg0: i32) -> (i32, i32) {
    %c0_i32 = arith.constant 0 : i32
    %c0_i32_0 = arith.constant 0 : i32
    %c0_i32_1 = arith.constant 0 : i32
    return %c0_i32, %c0_i32_0 : i32, i32
  }
  func.func @transform_2(%arg0: i32) -> (i32, i32) {
    %c0_i32 = arith.constant 0 : i32
    %c0_i32_0 = arith.constant 0 : i32
    %c0_i32_1 = arith.constant 0 : i32
    return %c0_i32, %c0_i32_0 : i32, i32
  }
  func.func @transform_3(%arg0: i32) -> (i32, i32) {
    %c0_i32 = arith.constant 0 : i32
    %c0_i32_0 = arith.constant 0 : i32
    return %arg0, %c0_i32 : i32, i32
  }
}

module attributes {stable_mosaic.version = 11 : i64} {
  func.func @_maxpool_kernel(%arg0: memref<128x9x128xbf16, #tpu.memory_space<vmem>>, %arg1: memref<128x128xbf16, #tpu.memory_space<vmem>>) attributes {dimension_semantics = [], scalar_prefetch = 0 : i64, scratch_operands = 0 : i64, tpu.core_type = #tpu.core_type<tc>} {
    %c0 = arith.constant 0 : index
    %c0_0 = arith.constant 0 : index
    %c0_1 = arith.constant 0 : index
    %0 = vector.load %arg0[%c0, %c0_0, %c0_1] : memref<128x9x128xbf16, #tpu.memory_space<vmem>>, vector<128x9x128xbf16>
    %1 = arith.extf %0 : vector<128x9x128xbf16> to vector<128x9x128xf32>
    %cst = arith.constant dense<0xFF800000> : vector<128x128xf32>
    %2 = vector.multi_reduction <maximumf>, %1, %cst [1] : vector<128x9x128xf32> to vector<128x128xf32>
    %3 = arith.truncf %2 : vector<128x128xf32> to vector<128x128xbf16>
    %c0_2 = arith.constant 0 : index
    %c0_3 = arith.constant 0 : index
    %4 = vector.load %arg1[%c0_2, %c0_3] : memref<128x128xbf16, #tpu.memory_space<vmem>>, vector<128x128xbf16>
    tpu.vector_store %arg1[%c0_2, %c0_3], %3 {strides = array<i32>} : memref<128x128xbf16, #tpu.memory_space<vmem>>, vector<128x128xbf16>,
    return
  }
}

module attributes {stable_mosaic.version = 11 : i64} {
  func.func @_c1_ds_kernel(%arg0: i32, %arg1: memref<128x128xbf16, #tpu.memory_space<vmem>>, %arg2: memref<128x128xbf16, #tpu.memory_space<vmem>>, %arg3: memref<1x128xf32, #tpu.memory_space<vmem>>, %arg4: memref<128x128xbf16, #tpu.memory_space<vmem>>, %arg5: memref<1x128xf32, #tpu.memory_space<vmem>>, %arg6: memref<128x128xbf16, #tpu.memory_space<vmem>>, %arg7: memref<128x128xbf16, #tpu.memory_space<vmem>>) attributes {dimension_semantics = [#tpu.dimension_semantics<parallel>], iteration_bounds = array<i64: 1>, scalar_prefetch = 0 : i64, scratch_operands = 0 : i64, tpu.core_type = #tpu.core_type<tc>, window_params = [{transform_indices = @transform_0, window_bounds = array<i64: 128, 128>}, {pipeline_mode = #tpu.pipeline_mode<synchronous>, transform_indices = @transform_1, window_bounds = array<i64: 128, 128>}, {pipeline_mode = #tpu.pipeline_mode<synchronous>, transform_indices = @transform_2, window_bounds = array<i64: 1, 128>}, {pipeline_mode = #tpu.pipeline_mode<synchronous>, transform_indices = @transform_3, window_bounds = array<i64: 128, 128>}, {pipeline_mode = #tpu.pipeline_mode<synchronous>, transform_indices = @transform_4, window_bounds = array<i64: 1, 128>}, {transform_indices = @transform_5, window_bounds = array<i64: 128, 128>}, {transform_indices = @transform_6, window_bounds = array<i64: 128, 128>}]} {
    %c0 = arith.constant 0 : index
    %c0_0 = arith.constant 0 : index
    %0 = vector.load %arg1[%c0, %c0_0] : memref<128x128xbf16, #tpu.memory_space<vmem>>, vector<128x128xbf16>
    %c0_1 = arith.constant 0 : index
    %c0_2 = arith.constant 0 : index
    %1 = vector.load %arg2[%c0_1, %c0_2] : memref<128x128xbf16, #tpu.memory_space<vmem>>, vector<128x128xbf16>
    %cst = arith.constant dense<0.000000e+00> : vector<128x128xf32>
    %2 = tpu.matmul %0, %1, %cst {dimension_numbers = #tpu.dot_dimension_numbers<[1], [0], [0], [1], [0, 0, 1, 1], [], []>} : vector<128x128xbf16>, vector<128x128xbf16>, vector<128x128xf32> -> vector<128x128xf32>
    %c0_3 = arith.constant 0 : index
    %c0_4 = arith.constant 0 : index
    %3 = vector.load %arg3[%c0_3, %c0_4] : memref<1x128xf32, #tpu.memory_space<vmem>>, vector<1x128xf32>
    %4 = vector.broadcast %3 : vector<1x128xf32> to vector<128x128xf32>
    %5 = arith.addf %2, %4 : vector<128x128xf32>
    %cst_5 = arith.constant 0.000000e+00 : f32
    %6 = vector.broadcast %cst_5 : f32 to vector<128x128xf32>
    %7 = arith.maximumf %5, %6 : vector<128x128xf32>
    %8 = arith.truncf %7 : vector<128x128xf32> to vector<128x128xbf16>
    %c0_6 = arith.constant 0 : index
    %c0_7 = arith.constant 0 : index
    %9 = vector.load %arg6[%c0_6, %c0_7] : memref<128x128xbf16, #tpu.memory_space<vmem>>, vector<128x128xbf16>
    tpu.vector_store %arg6[%c0_6, %c0_7], %8 {strides = array<i32>} : memref<128x128xbf16, #tpu.memory_space<vmem>>, vector<128x128xbf16>,
    %c0_8 = arith.constant 0 : index
    %c0_9 = arith.constant 0 : index
    %10 = vector.load %arg4[%c0_8, %c0_9] : memref<128x128xbf16, #tpu.memory_space<vmem>>, vector<128x128xbf16>
    %cst_10 = arith.constant dense<0.000000e+00> : vector<128x128xf32>
    %11 = tpu.matmul %0, %10, %cst_10 {dimension_numbers = #tpu.dot_dimension_numbers<[1], [0], [0], [1], [0, 0, 1, 1], [], []>} : vector<128x128xbf16>, vector<128x128xbf16>, vector<128x128xf32> -> vector<128x128xf32>
    %c0_11 = arith.constant 0 : index
    %c0_12 = arith.constant 0 : index
    %12 = vector.load %arg5[%c0_11, %c0_12] : memref<1x128xf32, #tpu.memory_space<vmem>>, vector<1x128xf32>
    %13 = vector.broadcast %12 : vector<1x128xf32> to vector<128x128xf32>
    %14 = arith.addf %11, %13 : vector<128x128xf32>
    %15 = arith.truncf %14 : vector<128x128xf32> to vector<128x128xbf16>
    %c0_13 = arith.constant 0 : index
    %c0_14 = arith.constant 0 : index
    %16 = vector.load %arg7[%c0_13, %c0_14] : memref<128x128xbf16, #tpu.memory_space<vmem>>, vector<128x128xbf16>
    tpu.vector_store %arg7[%c0_13, %c0_14], %15 {strides = array<i32>} : memref<128x128xbf16, #tpu.memory_space<vmem>>, vector<128x128xbf16>,
    return
  }
  func.func @transform_0(%arg0: i32) -> (i32, i32) {
    %c0_i32 = arith.constant 0 : i32
    %c0_i32_0 = arith.constant 0 : i32
    return %arg0, %c0_i32 : i32, i32
  }
  func.func @transform_1(%arg0: i32) -> (i32, i32) {
    %c0_i32 = arith.constant 0 : i32
    %c0_i32_0 = arith.constant 0 : i32
    %c0_i32_1 = arith.constant 0 : i32
    return %c0_i32, %c0_i32_0 : i32, i32
  }
  func.func @transform_2(%arg0: i32) -> (i32, i32) {
    %c0_i32 = arith.constant 0 : i32
    %c0_i32_0 = arith.constant 0 : i32
    %c0_i32_1 = arith.constant 0 : i32
    return %c0_i32, %c0_i32_0 : i32, i32
  }
  func.func @transform_3(%arg0: i32) -> (i32, i32) {
    %c0_i32 = arith.constant 0 : i32
    %c0_i32_0 = arith.constant 0 : i32
    %c0_i32_1 = arith.constant 0 : i32
    return %c0_i32, %c0_i32_0 : i32, i32
  }
  func.func @transform_4(%arg0: i32) -> (i32, i32) {
    %c0_i32 = arith.constant 0 : i32
    %c0_i32_0 = arith.constant 0 : i32
    %c0_i32_1 = arith.constant 0 : i32
    return %c0_i32, %c0_i32_0 : i32, i32
  }
  func.func @transform_5(%arg0: i32) -> (i32, i32) {
    %c0_i32 = arith.constant 0 : i32
    %c0_i32_0 = arith.constant 0 : i32
    return %arg0, %c0_i32 : i32, i32
  }
  func.func @transform_6(%arg0: i32) -> (i32, i32) {
    %c0_i32 = arith.constant 0 : i32
    %c0_i32_0 = arith.constant 0 : i32
    return %arg0, %c0_i32 : i32, i32
  }
}

module attributes {stable_mosaic.version = 11 : i64} {
  func.func @_c2_c3_res_kernel(%arg0: i32, %arg1: memref<128x1152xbf16, #tpu.memory_space<vmem>>, %arg2: memref<1152x128xbf16, #tpu.memory_space<vmem>>, %arg3: memref<1x128xf32, #tpu.memory_space<vmem>>, %arg4: memref<128x128xbf16, #tpu.memory_space<vmem>>, %arg5: memref<1x128xf32, #tpu.memory_space<vmem>>, %arg6: memref<128x128xbf16, #tpu.memory_space<vmem>>, %arg7: memref<128x128xbf16, #tpu.memory_space<vmem>>) attributes {dimension_semantics = [#tpu.dimension_semantics<parallel>], iteration_bounds = array<i64: 1>, scalar_prefetch = 0 : i64, scratch_operands = 0 : i64, tpu.core_type = #tpu.core_type<tc>, window_params = [{transform_indices = @transform_0, window_bounds = array<i64: 128, 1152>}, {pipeline_mode = #tpu.pipeline_mode<synchronous>, transform_indices = @transform_1, window_bounds = array<i64: 1152, 128>}, {pipeline_mode = #tpu.pipeline_mode<synchronous>, transform_indices = @transform_2, window_bounds = array<i64: 1, 128>}, {pipeline_mode = #tpu.pipeline_mode<synchronous>, transform_indices = @transform_3, window_bounds = array<i64: 128, 128>}, {pipeline_mode = #tpu.pipeline_mode<synchronous>, transform_indices = @transform_4, window_bounds = array<i64: 1, 128>}, {transform_indices = @transform_5, window_bounds = array<i64: 128, 128>}, {transform_indices = @transform_6, window_bounds = array<i64: 128, 128>}]} {
    %c0 = arith.constant 0 : index
    %c0_0 = arith.constant 0 : index
    %0 = vector.load %arg1[%c0, %c0_0] : memref<128x1152xbf16, #tpu.memory_space<vmem>>, vector<128x1152xbf16>
    %c0_1 = arith.constant 0 : index
    %c0_2 = arith.constant 0 : index
    %1 = vector.load %arg2[%c0_1, %c0_2] : memref<1152x128xbf16, #tpu.memory_space<vmem>>, vector<1152x128xbf16>
    %cst = arith.constant dense<0.000000e+00> : vector<128x128xf32>
    %2 = tpu.matmul %0, %1, %cst {dimension_numbers = #tpu.dot_dimension_numbers<[1], [0], [0], [1], [0, 0, 1, 1], [], []>} : vector<128x1152xbf16>, vector<1152x128xbf16>, vector<128x128xf32> -> vector<128x128xf32>
    %c0_3 = arith.constant 0 : index
    %c0_4 = arith.constant 0 : index
    %3 = vector.load %arg3[%c0_3, %c0_4] : memref<1x128xf32, #tpu.memory_space<vmem>>, vector<1x128xf32>
    %4 = vector.broadcast %3 : vector<1x128xf32> to vector<128x128xf32>
    %5 = arith.addf %2, %4 : vector<128x128xf32>
    %cst_5 = arith.constant 0.000000e+00 : f32
    %6 = vector.broadcast %cst_5 : f32 to vector<128x128xf32>
    %7 = arith.maximumf %5, %6 : vector<128x128xf32>
    %8 = arith.truncf %7 : vector<128x128xf32> to vector<128x128xbf16>
    %c0_6 = arith.constant 0 : index
    %c0_7 = arith.constant 0 : index
    %9 = vector.load %arg4[%c0_6, %c0_7] : memref<128x128xbf16, #tpu.memory_space<vmem>>, vector<128x128xbf16>
    %cst_8 = arith.constant dense<0.000000e+00> : vector<128x128xf32>
    %10 = tpu.matmul %8, %9, %cst_8 {dimension_numbers = #tpu.dot_dimension_numbers<[1], [0], [0], [1], [0, 0, 1, 1], [], []>} : vector<128x128xbf16>, vector<128x128xbf16>, vector<128x128xf32> -> vector<128x128xf32>
    %c0_9 = arith.constant 0 : index
    %c0_10 = arith.constant 0 : index
    %11 = vector.load %arg5[%c0_9, %c0_10] : memref<1x128xf32, #tpu.memory_space<vmem>>, vector<1x128xf32>
    %12 = vector.broadcast %11 : vector<1x128xf32> to vector<128x128xf32>
    %13 = arith.addf %10, %12 : vector<128x128xf32>
    %c0_11 = arith.constant 0 : index
    %c0_12 = arith.constant 0 : index
    %14 = vector.load %arg6[%c0_11, %c0_12] : memref<128x128xbf16, #tpu.memory_space<vmem>>, vector<128x128xbf16>
    %15 = arith.extf %14 : vector<128x128xbf16> to vector<128x128xf32>
    %16 = arith.addf %13, %15 : vector<128x128xf32>
    %cst_13 = arith.constant 0.000000e+00 : f32
    %17 = vector.broadcast %cst_13 : f32 to vector<128x128xf32>
    %18 = arith.maximumf %16, %17 : vector<128x128xf32>
    %19 = arith.truncf %18 : vector<128x128xf32> to vector<128x128xbf16>
    %c0_14 = arith.constant 0 : index
    %c0_15 = arith.constant 0 : index
    %20 = vector.load %arg7[%c0_14, %c0_15] : memref<128x128xbf16, #tpu.memory_space<vmem>>, vector<128x128xbf16>
    tpu.vector_store %arg7[%c0_14, %c0_15], %19 {strides = array<i32>} : memref<128x128xbf16, #tpu.memory_space<vmem>>, vector<128x128xbf16>,
    return
  }
  func.func @transform_0(%arg0: i32) -> (i32, i32) {
    %c0_i32 = arith.constant 0 : i32
    %c0_i32_0 = arith.constant 0 : i32
    return %arg0, %c0_i32 : i32, i32
  }
  func.func @transform_1(%arg0: i32) -> (i32, i32) {
    %c0_i32 = arith.constant 0 : i32
    %c0_i32_0 = arith.constant 0 : i32
    %c0_i32_1 = arith.constant 0 : i32
    return %c0_i32, %c0_i32_0 : i32, i32
  }
  func.func @transform_2(%arg0: i32) -> (i32, i32) {
    %c0_i32 = arith.constant 0 : i32
    %c0_i32_0 = arith.constant 0 : i32
    %c0_i32_1 = arith.constant 0 : i32
    return %c0_i32, %c0_i32_0 : i32, i32
  }
  func.func @transform_3(%arg0: i32) -> (i32, i32) {
    %c0_i32 = arith.constant 0 : i32
    %c0_i32_0 = arith.constant 0 : i32
    %c0_i32_1 = arith.constant 0 : i32
    return %c0_i32, %c0_i32_0 : i32, i32
  }
  func.func @transform_4(%arg0: i32) -> (i32, i32) {
    %c0_i32 = arith.constant 0 : i32
    %c0_i32_0 = arith.constant 0 : i32
    %c0_i32_1 = arith.constant 0 : i32
    return %c0_i32, %c0_i32_0 : i32, i32
  }
  func.func @transform_5(%arg0: i32) -> (i32, i32) {
    %c0_i32 = arith.constant 0 : i32
    %c0_i32_0 = arith.constant 0 : i32
    return %arg0, %c0_i32 : i32, i32
  }
  func.func @transform_6(%arg0: i32) -> (i32, i32) {
    %c0_i32 = arith.constant 0 : i32
    %c0_i32_0 = arith.constant 0 : i32
    return %arg0, %c0_i32 : i32, i32
  }
}

module attributes {stable_mosaic.version = 11 : i64} {
  func.func @_conv_bias_kernel(%arg0: i32, %arg1: memref<128x128xbf16, #tpu.memory_space<vmem>>, %arg2: memref<128x128xbf16, #tpu.memory_space<vmem>>, %arg3: memref<1x128xf32, #tpu.memory_space<vmem>>, %arg4: memref<128x128xbf16, #tpu.memory_space<vmem>>) attributes {dimension_semantics = [#tpu.dimension_semantics<parallel>], iteration_bounds = array<i64: 1>, scalar_prefetch = 0 : i64, scratch_operands = 0 : i64, tpu.core_type = #tpu.core_type<tc>, window_params = [{transform_indices = @transform_0, window_bounds = array<i64: 128, 128>}, {pipeline_mode = #tpu.pipeline_mode<synchronous>, transform_indices = @transform_1, window_bounds = array<i64: 128, 128>}, {pipeline_mode = #tpu.pipeline_mode<synchronous>, transform_indices = @transform_2, window_bounds = array<i64: 1, 128>}, {transform_indices = @transform_3, window_bounds = array<i64: 128, 128>}]} {
    %c0 = arith.constant 0 : index
    %c0_0 = arith.constant 0 : index
    %0 = vector.load %arg1[%c0, %c0_0] : memref<128x128xbf16, #tpu.memory_space<vmem>>, vector<128x128xbf16>
    %c0_1 = arith.constant 0 : index
    %c0_2 = arith.constant 0 : index
    %1 = vector.load %arg2[%c0_1, %c0_2] : memref<128x128xbf16, #tpu.memory_space<vmem>>, vector<128x128xbf16>
    %cst = arith.constant dense<0.000000e+00> : vector<128x128xf32>
    %2 = tpu.matmul %0, %1, %cst {dimension_numbers = #tpu.dot_dimension_numbers<[1], [0], [0], [1], [0, 0, 1, 1], [], []>} : vector<128x128xbf16>, vector<128x128xbf16>, vector<128x128xf32> -> vector<128x128xf32>
    %c0_3 = arith.constant 0 : index
    %c0_4 = arith.constant 0 : index
    %3 = vector.load %arg3[%c0_3, %c0_4] : memref<1x128xf32, #tpu.memory_space<vmem>>, vector<1x128xf32>
    %4 = vector.broadcast %3 : vector<1x128xf32> to vector<128x128xf32>
    %5 = arith.addf %2, %4 : vector<128x128xf32>
    %cst_5 = arith.constant 0.000000e+00 : f32
    %6 = vector.broadcast %cst_5 : f32 to vector<128x128xf32>
    %7 = arith.maximumf %5, %6 : vector<128x128xf32>
    %8 = arith.truncf %7 : vector<128x128xf32> to vector<128x128xbf16>
    %c0_6 = arith.constant 0 : index
    %c0_7 = arith.constant 0 : index
    %9 = vector.load %arg4[%c0_6, %c0_7] : memref<128x128xbf16, #tpu.memory_space<vmem>>, vector<128x128xbf16>
    tpu.vector_store %arg4[%c0_6, %c0_7], %8 {strides = array<i32>} : memref<128x128xbf16, #tpu.memory_space<vmem>>, vector<128x128xbf16>,
    return
  }
  func.func @transform_0(%arg0: i32) -> (i32, i32) {
    %c0_i32 = arith.constant 0 : i32
    %c0_i32_0 = arith.constant 0 : i32
    return %arg0, %c0_i32 : i32, i32
  }
  func.func @transform_1(%arg0: i32) -> (i32, i32) {
    %c0_i32 = arith.constant 0 : i32
    %c0_i32_0 = arith.constant 0 : i32
    %c0_i32_1 = arith.constant 0 : i32
    return %c0_i32, %c0_i32_0 : i32, i32
  }
  func.func @transform_2(%arg0: i32) -> (i32, i32) {
    %c0_i32 = arith.constant 0 : i32
    %c0_i32_0 = arith.constant 0 : i32
    %c0_i32_1 = arith.constant 0 : i32
    return %c0_i32, %c0_i32_0 : i32, i32
  }
  func.func @transform_3(%arg0: i32) -> (i32, i32) {
    %c0_i32 = arith.constant 0 : i32
    %c0_i32_0 = arith.constant 0 : i32
    return %arg0, %c0_i32 : i32, i32
  }
}

module attributes {stable_mosaic.version = 11 : i64} {
  func.func @_conv_bias_kernel(%arg0: i32, %arg1: memref<32x128xbf16, #tpu.memory_space<vmem>>, %arg2: memref<128x128xbf16, #tpu.memory_space<vmem>>, %arg3: memref<1x128xf32, #tpu.memory_space<vmem>>, %arg4: memref<32x128xbf16, #tpu.memory_space<vmem>>) attributes {dimension_semantics = [#tpu.dimension_semantics<parallel>], iteration_bounds = array<i64: 1>, scalar_prefetch = 0 : i64, scratch_operands = 0 : i64, tpu.core_type = #tpu.core_type<tc>, window_params = [{transform_indices = @transform_0, window_bounds = array<i64: 32, 128>}, {pipeline_mode = #tpu.pipeline_mode<synchronous>, transform_indices = @transform_1, window_bounds = array<i64: 128, 128>}, {pipeline_mode = #tpu.pipeline_mode<synchronous>, transform_indices = @transform_2, window_bounds = array<i64: 1, 128>}, {transform_indices = @transform_3, window_bounds = array<i64: 32, 128>}]} {
    %c0 = arith.constant 0 : index
    %c0_0 = arith.constant 0 : index
    %0 = vector.load %arg1[%c0, %c0_0] : memref<32x128xbf16, #tpu.memory_space<vmem>>, vector<32x128xbf16>
    %c0_1 = arith.constant 0 : index
    %c0_2 = arith.constant 0 : index
    %1 = vector.load %arg2[%c0_1, %c0_2] : memref<128x128xbf16, #tpu.memory_space<vmem>>, vector<128x128xbf16>
    %cst = arith.constant dense<0.000000e+00> : vector<32x128xf32>
    %2 = tpu.matmul %0, %1, %cst {dimension_numbers = #tpu.dot_dimension_numbers<[1], [0], [0], [1], [0, 0, 1, 1], [], []>} : vector<32x128xbf16>, vector<128x128xbf16>, vector<32x128xf32> -> vector<32x128xf32>
    %c0_3 = arith.constant 0 : index
    %c0_4 = arith.constant 0 : index
    %3 = vector.load %arg3[%c0_3, %c0_4] : memref<1x128xf32, #tpu.memory_space<vmem>>, vector<1x128xf32>
    %4 = vector.broadcast %3 : vector<1x128xf32> to vector<32x128xf32>
    %5 = arith.addf %2, %4 : vector<32x128xf32>
    %cst_5 = arith.constant 0.000000e+00 : f32
    %6 = vector.broadcast %cst_5 : f32 to vector<32x128xf32>
    %7 = arith.maximumf %5, %6 : vector<32x128xf32>
    %8 = arith.truncf %7 : vector<32x128xf32> to vector<32x128xbf16>
    %c0_6 = arith.constant 0 : index
    %c0_7 = arith.constant 0 : index
    %9 = vector.load %arg4[%c0_6, %c0_7] : memref<32x128xbf16, #tpu.memory_space<vmem>>, vector<32x128xbf16>
    tpu.vector_store %arg4[%c0_6, %c0_7], %8 {strides = array<i32>} : memref<32x128xbf16, #tpu.memory_space<vmem>>, vector<32x128xbf16>,
    return
  }
  func.func @transform_0(%arg0: i32) -> (i32, i32) {
    %c0_i32 = arith.constant 0 : i32
    %c0_i32_0 = arith.constant 0 : i32
    return %arg0, %c0_i32 : i32, i32
  }
  func.func @transform_1(%arg0: i32) -> (i32, i32) {
    %c0_i32 = arith.constant 0 : i32
    %c0_i32_0 = arith.constant 0 : i32
    %c0_i32_1 = arith.constant 0 : i32
    return %c0_i32, %c0_i32_0 : i32, i32
  }
  func.func @transform_2(%arg0: i32) -> (i32, i32) {
    %c0_i32 = arith.constant 0 : i32
    %c0_i32_0 = arith.constant 0 : i32
    %c0_i32_1 = arith.constant 0 : i32
    return %c0_i32, %c0_i32_0 : i32, i32
  }
  func.func @transform_3(%arg0: i32) -> (i32, i32) {
    %c0_i32 = arith.constant 0 : i32
    %c0_i32_0 = arith.constant 0 : i32
    return %arg0, %c0_i32 : i32, i32
  }
}

module attributes {stable_mosaic.version = 11 : i64} {
  func.func @_c2_c3_res_kernel(%arg0: i32, %arg1: memref<32x1152xbf16, #tpu.memory_space<vmem>>, %arg2: memref<1152x128xbf16, #tpu.memory_space<vmem>>, %arg3: memref<1x128xf32, #tpu.memory_space<vmem>>, %arg4: memref<128x128xbf16, #tpu.memory_space<vmem>>, %arg5: memref<1x128xf32, #tpu.memory_space<vmem>>, %arg6: memref<32x128xbf16, #tpu.memory_space<vmem>>, %arg7: memref<32x128xbf16, #tpu.memory_space<vmem>>) attributes {dimension_semantics = [#tpu.dimension_semantics<parallel>], iteration_bounds = array<i64: 1>, scalar_prefetch = 0 : i64, scratch_operands = 0 : i64, tpu.core_type = #tpu.core_type<tc>, window_params = [{transform_indices = @transform_0, window_bounds = array<i64: 32, 1152>}, {pipeline_mode = #tpu.pipeline_mode<synchronous>, transform_indices = @transform_1, window_bounds = array<i64: 1152, 128>}, {pipeline_mode = #tpu.pipeline_mode<synchronous>, transform_indices = @transform_2, window_bounds = array<i64: 1, 128>}, {pipeline_mode = #tpu.pipeline_mode<synchronous>, transform_indices = @transform_3, window_bounds = array<i64: 128, 128>}, {pipeline_mode = #tpu.pipeline_mode<synchronous>, transform_indices = @transform_4, window_bounds = array<i64: 1, 128>}, {transform_indices = @transform_5, window_bounds = array<i64: 32, 128>}, {transform_indices = @transform_6, window_bounds = array<i64: 32, 128>}]} {
    %c0 = arith.constant 0 : index
    %c0_0 = arith.constant 0 : index
    %0 = vector.load %arg1[%c0, %c0_0] : memref<32x1152xbf16, #tpu.memory_space<vmem>>, vector<32x1152xbf16>
    %c0_1 = arith.constant 0 : index
    %c0_2 = arith.constant 0 : index
    %1 = vector.load %arg2[%c0_1, %c0_2] : memref<1152x128xbf16, #tpu.memory_space<vmem>>, vector<1152x128xbf16>
    %cst = arith.constant dense<0.000000e+00> : vector<32x128xf32>
    %2 = tpu.matmul %0, %1, %cst {dimension_numbers = #tpu.dot_dimension_numbers<[1], [0], [0], [1], [0, 0, 1, 1], [], []>} : vector<32x1152xbf16>, vector<1152x128xbf16>, vector<32x128xf32> -> vector<32x128xf32>
    %c0_3 = arith.constant 0 : index
    %c0_4 = arith.constant 0 : index
    %3 = vector.load %arg3[%c0_3, %c0_4] : memref<1x128xf32, #tpu.memory_space<vmem>>, vector<1x128xf32>
    %4 = vector.broadcast %3 : vector<1x128xf32> to vector<32x128xf32>
    %5 = arith.addf %2, %4 : vector<32x128xf32>
    %cst_5 = arith.constant 0.000000e+00 : f32
    %6 = vector.broadcast %cst_5 : f32 to vector<32x128xf32>
    %7 = arith.maximumf %5, %6 : vector<32x128xf32>
    %8 = arith.truncf %7 : vector<32x128xf32> to vector<32x128xbf16>
    %c0_6 = arith.constant 0 : index
    %c0_7 = arith.constant 0 : index
    %9 = vector.load %arg4[%c0_6, %c0_7] : memref<128x128xbf16, #tpu.memory_space<vmem>>, vector<128x128xbf16>
    %cst_8 = arith.constant dense<0.000000e+00> : vector<32x128xf32>
    %10 = tpu.matmul %8, %9, %cst_8 {dimension_numbers = #tpu.dot_dimension_numbers<[1], [0], [0], [1], [0, 0, 1, 1], [], []>} : vector<32x128xbf16>, vector<128x128xbf16>, vector<32x128xf32> -> vector<32x128xf32>
    %c0_9 = arith.constant 0 : index
    %c0_10 = arith.constant 0 : index
    %11 = vector.load %arg5[%c0_9, %c0_10] : memref<1x128xf32, #tpu.memory_space<vmem>>, vector<1x128xf32>
    %12 = vector.broadcast %11 : vector<1x128xf32> to vector<32x128xf32>
    %13 = arith.addf %10, %12 : vector<32x128xf32>
    %c0_11 = arith.constant 0 : index
    %c0_12 = arith.constant 0 : index
    %14 = vector.load %arg6[%c0_11, %c0_12] : memref<32x128xbf16, #tpu.memory_space<vmem>>, vector<32x128xbf16>
    %15 = arith.extf %14 : vector<32x128xbf16> to vector<32x128xf32>
    %16 = arith.addf %13, %15 : vector<32x128xf32>
    %cst_13 = arith.constant 0.000000e+00 : f32
    %17 = vector.broadcast %cst_13 : f32 to vector<32x128xf32>
    %18 = arith.maximumf %16, %17 : vector<32x128xf32>
    %19 = arith.truncf %18 : vector<32x128xf32> to vector<32x128xbf16>
    %c0_14 = arith.constant 0 : index
    %c0_15 = arith.constant 0 : index
    %20 = vector.load %arg7[%c0_14, %c0_15] : memref<32x128xbf16, #tpu.memory_space<vmem>>, vector<32x128xbf16>
    tpu.vector_store %arg7[%c0_14, %c0_15], %19 {strides = array<i32>} : memref<32x128xbf16, #tpu.memory_space<vmem>>, vector<32x128xbf16>,
    return
  }
  func.func @transform_0(%arg0: i32) -> (i32, i32) {
    %c0_i32 = arith.constant 0 : i32
    %c0_i32_0 = arith.constant 0 : i32
    return %arg0, %c0_i32 : i32, i32
  }
  func.func @transform_1(%arg0: i32) -> (i32, i32) {
    %c0_i32 = arith.constant 0 : i32
    %c0_i32_0 = arith.constant 0 : i32
    %c0_i32_1 = arith.constant 0 : i32
    return %c0_i32, %c0_i32_0 : i32, i32
  }
  func.func @transform_2(%arg0: i32) -> (i32, i32) {
    %c0_i32 = arith.constant 0 : i32
    %c0_i32_0 = arith.constant 0 : i32
    %c0_i32_1 = arith.constant 0 : i32
    return %c0_i32, %c0_i32_0 : i32, i32
  }
  func.func @transform_3(%arg0: i32) -> (i32, i32) {
    %c0_i32 = arith.constant 0 : i32
    %c0_i32_0 = arith.constant 0 : i32
    %c0_i32_1 = arith.constant 0 : i32
    return %c0_i32, %c0_i32_0 : i32, i32
  }
  func.func @transform_4(%arg0: i32) -> (i32, i32) {
    %c0_i32 = arith.constant 0 : i32
    %c0_i32_0 = arith.constant 0 : i32
    %c0_i32_1 = arith.constant 0 : i32
    return %c0_i32, %c0_i32_0 : i32, i32
  }
  func.func @transform_5(%arg0: i32) -> (i32, i32) {
    %c0_i32 = arith.constant 0 : i32
    %c0_i32_0 = arith.constant 0 : i32
    return %arg0, %c0_i32 : i32, i32
  }
  func.func @transform_6(%arg0: i32) -> (i32, i32) {
    %c0_i32 = arith.constant 0 : i32
    %c0_i32_0 = arith.constant 0 : i32
    return %arg0, %c0_i32 : i32, i32
  }
}

module attributes {stable_mosaic.version = 11 : i64} {
  func.func @_c1_ds_kernel(%arg0: i32, %arg1: memref<32x128xbf16, #tpu.memory_space<vmem>>, %arg2: memref<128x128xbf16, #tpu.memory_space<vmem>>, %arg3: memref<1x128xf32, #tpu.memory_space<vmem>>, %arg4: memref<128x128xbf16, #tpu.memory_space<vmem>>, %arg5: memref<1x128xf32, #tpu.memory_space<vmem>>, %arg6: memref<32x128xbf16, #tpu.memory_space<vmem>>, %arg7: memref<32x128xbf16, #tpu.memory_space<vmem>>) attributes {dimension_semantics = [#tpu.dimension_semantics<parallel>], iteration_bounds = array<i64: 1>, scalar_prefetch = 0 : i64, scratch_operands = 0 : i64, tpu.core_type = #tpu.core_type<tc>, window_params = [{transform_indices = @transform_0, window_bounds = array<i64: 32, 128>}, {pipeline_mode = #tpu.pipeline_mode<synchronous>, transform_indices = @transform_1, window_bounds = array<i64: 128, 128>}, {pipeline_mode = #tpu.pipeline_mode<synchronous>, transform_indices = @transform_2, window_bounds = array<i64: 1, 128>}, {pipeline_mode = #tpu.pipeline_mode<synchronous>, transform_indices = @transform_3, window_bounds = array<i64: 128, 128>}, {pipeline_mode = #tpu.pipeline_mode<synchronous>, transform_indices = @transform_4, window_bounds = array<i64: 1, 128>}, {transform_indices = @transform_5, window_bounds = array<i64: 32, 128>}, {transform_indices = @transform_6, window_bounds = array<i64: 32, 128>}]} {
    %c0 = arith.constant 0 : index
    %c0_0 = arith.constant 0 : index
    %0 = vector.load %arg1[%c0, %c0_0] : memref<32x128xbf16, #tpu.memory_space<vmem>>, vector<32x128xbf16>
    %c0_1 = arith.constant 0 : index
    %c0_2 = arith.constant 0 : index
    %1 = vector.load %arg2[%c0_1, %c0_2] : memref<128x128xbf16, #tpu.memory_space<vmem>>, vector<128x128xbf16>
    %cst = arith.constant dense<0.000000e+00> : vector<32x128xf32>
    %2 = tpu.matmul %0, %1, %cst {dimension_numbers = #tpu.dot_dimension_numbers<[1], [0], [0], [1], [0, 0, 1, 1], [], []>} : vector<32x128xbf16>, vector<128x128xbf16>, vector<32x128xf32> -> vector<32x128xf32>
    %c0_3 = arith.constant 0 : index
    %c0_4 = arith.constant 0 : index
    %3 = vector.load %arg3[%c0_3, %c0_4] : memref<1x128xf32, #tpu.memory_space<vmem>>, vector<1x128xf32>
    %4 = vector.broadcast %3 : vector<1x128xf32> to vector<32x128xf32>
    %5 = arith.addf %2, %4 : vector<32x128xf32>
    %cst_5 = arith.constant 0.000000e+00 : f32
    %6 = vector.broadcast %cst_5 : f32 to vector<32x128xf32>
    %7 = arith.maximumf %5, %6 : vector<32x128xf32>
    %8 = arith.truncf %7 : vector<32x128xf32> to vector<32x128xbf16>
    %c0_6 = arith.constant 0 : index
    %c0_7 = arith.constant 0 : index
    %9 = vector.load %arg6[%c0_6, %c0_7] : memref<32x128xbf16, #tpu.memory_space<vmem>>, vector<32x128xbf16>
    tpu.vector_store %arg6[%c0_6, %c0_7], %8 {strides = array<i32>} : memref<32x128xbf16, #tpu.memory_space<vmem>>, vector<32x128xbf16>,
    %c0_8 = arith.constant 0 : index
    %c0_9 = arith.constant 0 : index
    %10 = vector.load %arg4[%c0_8, %c0_9] : memref<128x128xbf16, #tpu.memory_space<vmem>>, vector<128x128xbf16>
    %cst_10 = arith.constant dense<0.000000e+00> : vector<32x128xf32>
    %11 = tpu.matmul %0, %10, %cst_10 {dimension_numbers = #tpu.dot_dimension_numbers<[1], [0], [0], [1], [0, 0, 1, 1], [], []>} : vector<32x128xbf16>, vector<128x128xbf16>, vector<32x128xf32> -> vector<32x128xf32>
    %c0_11 = arith.constant 0 : index
    %c0_12 = arith.constant 0 : index
    %12 = vector.load %arg5[%c0_11, %c0_12] : memref<1x128xf32, #tpu.memory_space<vmem>>, vector<1x128xf32>
    %13 = vector.broadcast %12 : vector<1x128xf32> to vector<32x128xf32>
    %14 = arith.addf %11, %13 : vector<32x128xf32>
    %15 = arith.truncf %14 : vector<32x128xf32> to vector<32x128xbf16>
    %c0_13 = arith.constant 0 : index
    %c0_14 = arith.constant 0 : index
    %16 = vector.load %arg7[%c0_13, %c0_14] : memref<32x128xbf16, #tpu.memory_space<vmem>>, vector<32x128xbf16>
    tpu.vector_store %arg7[%c0_13, %c0_14], %15 {strides = array<i32>} : memref<32x128xbf16, #tpu.memory_space<vmem>>, vector<32x128xbf16>,
    return
  }
  func.func @transform_0(%arg0: i32) -> (i32, i32) {
    %c0_i32 = arith.constant 0 : i32
    %c0_i32_0 = arith.constant 0 : i32
    return %arg0, %c0_i32 : i32, i32
  }
  func.func @transform_1(%arg0: i32) -> (i32, i32) {
    %c0_i32 = arith.constant 0 : i32
    %c0_i32_0 = arith.constant 0 : i32
    %c0_i32_1 = arith.constant 0 : i32
    return %c0_i32, %c0_i32_0 : i32, i32
  }
  func.func @transform_2(%arg0: i32) -> (i32, i32) {
    %c0_i32 = arith.constant 0 : i32
    %c0_i32_0 = arith.constant 0 : i32
    %c0_i32_1 = arith.constant 0 : i32
    return %c0_i32, %c0_i32_0 : i32, i32
  }
  func.func @transform_3(%arg0: i32) -> (i32, i32) {
    %c0_i32 = arith.constant 0 : i32
    %c0_i32_0 = arith.constant 0 : i32
    %c0_i32_1 = arith.constant 0 : i32
    return %c0_i32, %c0_i32_0 : i32, i32
  }
  func.func @transform_4(%arg0: i32) -> (i32, i32) {
    %c0_i32 = arith.constant 0 : i32
    %c0_i32_0 = arith.constant 0 : i32
    %c0_i32_1 = arith.constant 0 : i32
    return %c0_i32, %c0_i32_0 : i32, i32
  }
  func.func @transform_5(%arg0: i32) -> (i32, i32) {
    %c0_i32 = arith.constant 0 : i32
    %c0_i32_0 = arith.constant 0 : i32
    return %arg0, %c0_i32 : i32, i32
  }
  func.func @transform_6(%arg0: i32) -> (i32, i32) {
    %c0_i32 = arith.constant 0 : i32
    %c0_i32_0 = arith.constant 0 : i32
    return %arg0, %c0_i32 : i32, i32
  }
}

module attributes {stable_mosaic.version = 11 : i64} {
  func.func @_conv_bias_kernel(%arg0: i32, %arg1: memref<8x128xbf16, #tpu.memory_space<vmem>>, %arg2: memref<128x128xbf16, #tpu.memory_space<vmem>>, %arg3: memref<1x128xf32, #tpu.memory_space<vmem>>, %arg4: memref<8x128xbf16, #tpu.memory_space<vmem>>) attributes {dimension_semantics = [#tpu.dimension_semantics<parallel>], iteration_bounds = array<i64: 1>, scalar_prefetch = 0 : i64, scratch_operands = 0 : i64, tpu.core_type = #tpu.core_type<tc>, window_params = [{transform_indices = @transform_0, window_bounds = array<i64: 8, 128>}, {pipeline_mode = #tpu.pipeline_mode<synchronous>, transform_indices = @transform_1, window_bounds = array<i64: 128, 128>}, {pipeline_mode = #tpu.pipeline_mode<synchronous>, transform_indices = @transform_2, window_bounds = array<i64: 1, 128>}, {transform_indices = @transform_3, window_bounds = array<i64: 8, 128>}]} {
    %c0 = arith.constant 0 : index
    %c0_0 = arith.constant 0 : index
    %0 = vector.load %arg1[%c0, %c0_0] : memref<8x128xbf16, #tpu.memory_space<vmem>>, vector<8x128xbf16>
    %c0_1 = arith.constant 0 : index
    %c0_2 = arith.constant 0 : index
    %1 = vector.load %arg2[%c0_1, %c0_2] : memref<128x128xbf16, #tpu.memory_space<vmem>>, vector<128x128xbf16>
    %cst = arith.constant dense<0.000000e+00> : vector<8x128xf32>
    %2 = tpu.matmul %0, %1, %cst {dimension_numbers = #tpu.dot_dimension_numbers<[1], [0], [0], [1], [0, 0, 1, 1], [], []>} : vector<8x128xbf16>, vector<128x128xbf16>, vector<8x128xf32> -> vector<8x128xf32>
    %c0_3 = arith.constant 0 : index
    %c0_4 = arith.constant 0 : index
    %3 = vector.load %arg3[%c0_3, %c0_4] : memref<1x128xf32, #tpu.memory_space<vmem>>, vector<1x128xf32>
    %4 = vector.broadcast %3 : vector<1x128xf32> to vector<8x128xf32>
    %5 = arith.addf %2, %4 : vector<8x128xf32>
    %cst_5 = arith.constant 0.000000e+00 : f32
    %6 = vector.broadcast %cst_5 : f32 to vector<8x128xf32>
    %7 = arith.maximumf %5, %6 : vector<8x128xf32>
    %8 = arith.truncf %7 : vector<8x128xf32> to vector<8x128xbf16>
    %c0_6 = arith.constant 0 : index
    %c0_7 = arith.constant 0 : index
    %9 = vector.load %arg4[%c0_6, %c0_7] : memref<8x128xbf16, #tpu.memory_space<vmem>>, vector<8x128xbf16>
    tpu.vector_store %arg4[%c0_6, %c0_7], %8 {strides = array<i32>} : memref<8x128xbf16, #tpu.memory_space<vmem>>, vector<8x128xbf16>,
    return
  }
  func.func @transform_0(%arg0: i32) -> (i32, i32) {
    %c0_i32 = arith.constant 0 : i32
    %c0_i32_0 = arith.constant 0 : i32
    return %arg0, %c0_i32 : i32, i32
  }
  func.func @transform_1(%arg0: i32) -> (i32, i32) {
    %c0_i32 = arith.constant 0 : i32
    %c0_i32_0 = arith.constant 0 : i32
    %c0_i32_1 = arith.constant 0 : i32
    return %c0_i32, %c0_i32_0 : i32, i32
  }
  func.func @transform_2(%arg0: i32) -> (i32, i32) {
    %c0_i32 = arith.constant 0 : i32
    %c0_i32_0 = arith.constant 0 : i32
    %c0_i32_1 = arith.constant 0 : i32
    return %c0_i32, %c0_i32_0 : i32, i32
  }
  func.func @transform_3(%arg0: i32) -> (i32, i32) {
    %c0_i32 = arith.constant 0 : i32
    %c0_i32_0 = arith.constant 0 : i32
    return %arg0, %c0_i32 : i32, i32
  }
}

module attributes {stable_mosaic.version = 11 : i64} {
  func.func @_c2_c3_res_kernel(%arg0: i32, %arg1: memref<8x1152xbf16, #tpu.memory_space<vmem>>, %arg2: memref<1152x128xbf16, #tpu.memory_space<vmem>>, %arg3: memref<1x128xf32, #tpu.memory_space<vmem>>, %arg4: memref<128x128xbf16, #tpu.memory_space<vmem>>, %arg5: memref<1x128xf32, #tpu.memory_space<vmem>>, %arg6: memref<8x128xbf16, #tpu.memory_space<vmem>>, %arg7: memref<8x128xbf16, #tpu.memory_space<vmem>>) attributes {dimension_semantics = [#tpu.dimension_semantics<parallel>], iteration_bounds = array<i64: 1>, scalar_prefetch = 0 : i64, scratch_operands = 0 : i64, tpu.core_type = #tpu.core_type<tc>, window_params = [{transform_indices = @transform_0, window_bounds = array<i64: 8, 1152>}, {pipeline_mode = #tpu.pipeline_mode<synchronous>, transform_indices = @transform_1, window_bounds = array<i64: 1152, 128>}, {pipeline_mode = #tpu.pipeline_mode<synchronous>, transform_indices = @transform_2, window_bounds = array<i64: 1, 128>}, {pipeline_mode = #tpu.pipeline_mode<synchronous>, transform_indices = @transform_3, window_bounds = array<i64: 128, 128>}, {pipeline_mode = #tpu.pipeline_mode<synchronous>, transform_indices = @transform_4, window_bounds = array<i64: 1, 128>}, {transform_indices = @transform_5, window_bounds = array<i64: 8, 128>}, {transform_indices = @transform_6, window_bounds = array<i64: 8, 128>}]} {
    %c0 = arith.constant 0 : index
    %c0_0 = arith.constant 0 : index
    %0 = vector.load %arg1[%c0, %c0_0] : memref<8x1152xbf16, #tpu.memory_space<vmem>>, vector<8x1152xbf16>
    %c0_1 = arith.constant 0 : index
    %c0_2 = arith.constant 0 : index
    %1 = vector.load %arg2[%c0_1, %c0_2] : memref<1152x128xbf16, #tpu.memory_space<vmem>>, vector<1152x128xbf16>
    %cst = arith.constant dense<0.000000e+00> : vector<8x128xf32>
    %2 = tpu.matmul %0, %1, %cst {dimension_numbers = #tpu.dot_dimension_numbers<[1], [0], [0], [1], [0, 0, 1, 1], [], []>} : vector<8x1152xbf16>, vector<1152x128xbf16>, vector<8x128xf32> -> vector<8x128xf32>
    %c0_3 = arith.constant 0 : index
    %c0_4 = arith.constant 0 : index
    %3 = vector.load %arg3[%c0_3, %c0_4] : memref<1x128xf32, #tpu.memory_space<vmem>>, vector<1x128xf32>
    %4 = vector.broadcast %3 : vector<1x128xf32> to vector<8x128xf32>
    %5 = arith.addf %2, %4 : vector<8x128xf32>
    %cst_5 = arith.constant 0.000000e+00 : f32
    %6 = vector.broadcast %cst_5 : f32 to vector<8x128xf32>
    %7 = arith.maximumf %5, %6 : vector<8x128xf32>
    %8 = arith.truncf %7 : vector<8x128xf32> to vector<8x128xbf16>
    %c0_6 = arith.constant 0 : index
    %c0_7 = arith.constant 0 : index
    %9 = vector.load %arg4[%c0_6, %c0_7] : memref<128x128xbf16, #tpu.memory_space<vmem>>, vector<128x128xbf16>
    %cst_8 = arith.constant dense<0.000000e+00> : vector<8x128xf32>
    %10 = tpu.matmul %8, %9, %cst_8 {dimension_numbers = #tpu.dot_dimension_numbers<[1], [0], [0], [1], [0, 0, 1, 1], [], []>} : vector<8x128xbf16>, vector<128x128xbf16>, vector<8x128xf32> -> vector<8x128xf32>
    %c0_9 = arith.constant 0 : index
    %c0_10 = arith.constant 0 : index
    %11 = vector.load %arg5[%c0_9, %c0_10] : memref<1x128xf32, #tpu.memory_space<vmem>>, vector<1x128xf32>
    %12 = vector.broadcast %11 : vector<1x128xf32> to vector<8x128xf32>
    %13 = arith.addf %10, %12 : vector<8x128xf32>
    %c0_11 = arith.constant 0 : index
    %c0_12 = arith.constant 0 : index
    %14 = vector.load %arg6[%c0_11, %c0_12] : memref<8x128xbf16, #tpu.memory_space<vmem>>, vector<8x128xbf16>
    %15 = arith.extf %14 : vector<8x128xbf16> to vector<8x128xf32>
    %16 = arith.addf %13, %15 : vector<8x128xf32>
    %cst_13 = arith.constant 0.000000e+00 : f32
    %17 = vector.broadcast %cst_13 : f32 to vector<8x128xf32>
    %18 = arith.maximumf %16, %17 : vector<8x128xf32>
    %19 = arith.truncf %18 : vector<8x128xf32> to vector<8x128xbf16>
    %c0_14 = arith.constant 0 : index
    %c0_15 = arith.constant 0 : index
    %20 = vector.load %arg7[%c0_14, %c0_15] : memref<8x128xbf16, #tpu.memory_space<vmem>>, vector<8x128xbf16>
    tpu.vector_store %arg7[%c0_14, %c0_15], %19 {strides = array<i32>} : memref<8x128xbf16, #tpu.memory_space<vmem>>, vector<8x128xbf16>,
    return
  }
  func.func @transform_0(%arg0: i32) -> (i32, i32) {
    %c0_i32 = arith.constant 0 : i32
    %c0_i32_0 = arith.constant 0 : i32
    return %arg0, %c0_i32 : i32, i32
  }
  func.func @transform_1(%arg0: i32) -> (i32, i32) {
    %c0_i32 = arith.constant 0 : i32
    %c0_i32_0 = arith.constant 0 : i32
    %c0_i32_1 = arith.constant 0 : i32
    return %c0_i32, %c0_i32_0 : i32, i32
  }
  func.func @transform_2(%arg0: i32) -> (i32, i32) {
    %c0_i32 = arith.constant 0 : i32
    %c0_i32_0 = arith.constant 0 : i32
    %c0_i32_1 = arith.constant 0 : i32
    return %c0_i32, %c0_i32_0 : i32, i32
  }
  func.func @transform_3(%arg0: i32) -> (i32, i32) {
    %c0_i32 = arith.constant 0 : i32
    %c0_i32_0 = arith.constant 0 : i32
    %c0_i32_1 = arith.constant 0 : i32
    return %c0_i32, %c0_i32_0 : i32, i32
  }
  func.func @transform_4(%arg0: i32) -> (i32, i32) {
    %c0_i32 = arith.constant 0 : i32
    %c0_i32_0 = arith.constant 0 : i32
    %c0_i32_1 = arith.constant 0 : i32
    return %c0_i32, %c0_i32_0 : i32, i32
  }
  func.func @transform_5(%arg0: i32) -> (i32, i32) {
    %c0_i32 = arith.constant 0 : i32
    %c0_i32_0 = arith.constant 0 : i32
    return %arg0, %c0_i32 : i32, i32
  }
  func.func @transform_6(%arg0: i32) -> (i32, i32) {
    %c0_i32 = arith.constant 0 : i32
    %c0_i32_0 = arith.constant 0 : i32
    return %arg0, %c0_i32 : i32, i32
  }
}

module attributes {stable_mosaic.version = 11 : i64} {
  func.func @_c1_ds_kernel(%arg0: i32, %arg1: memref<8x128xbf16, #tpu.memory_space<vmem>>, %arg2: memref<128x128xbf16, #tpu.memory_space<vmem>>, %arg3: memref<1x128xf32, #tpu.memory_space<vmem>>, %arg4: memref<128x256xbf16, #tpu.memory_space<vmem>>, %arg5: memref<1x256xf32, #tpu.memory_space<vmem>>, %arg6: memref<8x128xbf16, #tpu.memory_space<vmem>>, %arg7: memref<8x256xbf16, #tpu.memory_space<vmem>>) attributes {dimension_semantics = [#tpu.dimension_semantics<parallel>], iteration_bounds = array<i64: 1>, scalar_prefetch = 0 : i64, scratch_operands = 0 : i64, tpu.core_type = #tpu.core_type<tc>, window_params = [{transform_indices = @transform_0, window_bounds = array<i64: 8, 128>}, {pipeline_mode = #tpu.pipeline_mode<synchronous>, transform_indices = @transform_1, window_bounds = array<i64: 128, 128>}, {pipeline_mode = #tpu.pipeline_mode<synchronous>, transform_indices = @transform_2, window_bounds = array<i64: 1, 128>}, {pipeline_mode = #tpu.pipeline_mode<synchronous>, transform_indices = @transform_3, window_bounds = array<i64: 128, 256>}, {pipeline_mode = #tpu.pipeline_mode<synchronous>, transform_indices = @transform_4, window_bounds = array<i64: 1, 256>}, {transform_indices = @transform_5, window_bounds = array<i64: 8, 128>}, {transform_indices = @transform_6, window_bounds = array<i64: 8, 256>}]} {
    %c0 = arith.constant 0 : index
    %c0_0 = arith.constant 0 : index
    %0 = vector.load %arg1[%c0, %c0_0] : memref<8x128xbf16, #tpu.memory_space<vmem>>, vector<8x128xbf16>
    %c0_1 = arith.constant 0 : index
    %c0_2 = arith.constant 0 : index
    %1 = vector.load %arg2[%c0_1, %c0_2] : memref<128x128xbf16, #tpu.memory_space<vmem>>, vector<128x128xbf16>
    %cst = arith.constant dense<0.000000e+00> : vector<8x128xf32>
    %2 = tpu.matmul %0, %1, %cst {dimension_numbers = #tpu.dot_dimension_numbers<[1], [0], [0], [1], [0, 0, 1, 1], [], []>} : vector<8x128xbf16>, vector<128x128xbf16>, vector<8x128xf32> -> vector<8x128xf32>
    %c0_3 = arith.constant 0 : index
    %c0_4 = arith.constant 0 : index
    %3 = vector.load %arg3[%c0_3, %c0_4] : memref<1x128xf32, #tpu.memory_space<vmem>>, vector<1x128xf32>
    %4 = vector.broadcast %3 : vector<1x128xf32> to vector<8x128xf32>
    %5 = arith.addf %2, %4 : vector<8x128xf32>
    %cst_5 = arith.constant 0.000000e+00 : f32
    %6 = vector.broadcast %cst_5 : f32 to vector<8x128xf32>
    %7 = arith.maximumf %5, %6 : vector<8x128xf32>
    %8 = arith.truncf %7 : vector<8x128xf32> to vector<8x128xbf16>
    %c0_6 = arith.constant 0 : index
    %c0_7 = arith.constant 0 : index
    %9 = vector.load %arg6[%c0_6, %c0_7] : memref<8x128xbf16, #tpu.memory_space<vmem>>, vector<8x128xbf16>
    tpu.vector_store %arg6[%c0_6, %c0_7], %8 {strides = array<i32>} : memref<8x128xbf16, #tpu.memory_space<vmem>>, vector<8x128xbf16>,
    %c0_8 = arith.constant 0 : index
    %c0_9 = arith.constant 0 : index
    %10 = vector.load %arg4[%c0_8, %c0_9] : memref<128x256xbf16, #tpu.memory_space<vmem>>, vector<128x256xbf16>
    %cst_10 = arith.constant dense<0.000000e+00> : vector<8x256xf32>
    %11 = tpu.matmul %0, %10, %cst_10 {dimension_numbers = #tpu.dot_dimension_numbers<[1], [0], [0], [1], [0, 0, 1, 1], [], []>} : vector<8x128xbf16>, vector<128x256xbf16>, vector<8x256xf32> -> vector<8x256xf32>
    %c0_11 = arith.constant 0 : index
    %c0_12 = arith.constant 0 : index
    %12 = vector.load %arg5[%c0_11, %c0_12] : memref<1x256xf32, #tpu.memory_space<vmem>>, vector<1x256xf32>
    %13 = vector.broadcast %12 : vector<1x256xf32> to vector<8x256xf32>
    %14 = arith.addf %11, %13 : vector<8x256xf32>
    %15 = arith.truncf %14 : vector<8x256xf32> to vector<8x256xbf16>
    %c0_13 = arith.constant 0 : index
    %c0_14 = arith.constant 0 : index
    %16 = vector.load %arg7[%c0_13, %c0_14] : memref<8x256xbf16, #tpu.memory_space<vmem>>, vector<8x256xbf16>
    tpu.vector_store %arg7[%c0_13, %c0_14], %15 {strides = array<i32>} : memref<8x256xbf16, #tpu.memory_space<vmem>>, vector<8x256xbf16>,
    return
  }
  func.func @transform_0(%arg0: i32) -> (i32, i32) {
    %c0_i32 = arith.constant 0 : i32
    %c0_i32_0 = arith.constant 0 : i32
    return %arg0, %c0_i32 : i32, i32
  }
  func.func @transform_1(%arg0: i32) -> (i32, i32) {
    %c0_i32 = arith.constant 0 : i32
    %c0_i32_0 = arith.constant 0 : i32
    %c0_i32_1 = arith.constant 0 : i32
    return %c0_i32, %c0_i32_0 : i32, i32
  }
  func.func @transform_2(%arg0: i32) -> (i32, i32) {
    %c0_i32 = arith.constant 0 : i32
    %c0_i32_0 = arith.constant 0 : i32
    %c0_i32_1 = arith.constant 0 : i32
    return %c0_i32, %c0_i32_0 : i32, i32
  }
  func.func @transform_3(%arg0: i32) -> (i32, i32) {
    %c0_i32 = arith.constant 0 : i32
    %c0_i32_0 = arith.constant 0 : i32
    %c0_i32_1 = arith.constant 0 : i32
    return %c0_i32, %c0_i32_0 : i32, i32
  }
  func.func @transform_4(%arg0: i32) -> (i32, i32) {
    %c0_i32 = arith.constant 0 : i32
    %c0_i32_0 = arith.constant 0 : i32
    %c0_i32_1 = arith.constant 0 : i32
    return %c0_i32, %c0_i32_0 : i32, i32
  }
  func.func @transform_5(%arg0: i32) -> (i32, i32) {
    %c0_i32 = arith.constant 0 : i32
    %c0_i32_0 = arith.constant 0 : i32
    return %arg0, %c0_i32 : i32, i32
  }
  func.func @transform_6(%arg0: i32) -> (i32, i32) {
    %c0_i32 = arith.constant 0 : i32
    %c0_i32_0 = arith.constant 0 : i32
    return %arg0, %c0_i32 : i32, i32
  }
}

module attributes {stable_mosaic.version = 11 : i64} {
  func.func @_conv_bias_kernel(%arg0: i32, %arg1: memref<2x256xbf16, #tpu.memory_space<vmem>>, %arg2: memref<256x128xbf16, #tpu.memory_space<vmem>>, %arg3: memref<1x128xf32, #tpu.memory_space<vmem>>, %arg4: memref<2x128xbf16, #tpu.memory_space<vmem>>) attributes {dimension_semantics = [#tpu.dimension_semantics<parallel>], iteration_bounds = array<i64: 1>, scalar_prefetch = 0 : i64, scratch_operands = 0 : i64, tpu.core_type = #tpu.core_type<tc>, window_params = [{transform_indices = @transform_0, window_bounds = array<i64: 2, 256>}, {pipeline_mode = #tpu.pipeline_mode<synchronous>, transform_indices = @transform_1, window_bounds = array<i64: 256, 128>}, {pipeline_mode = #tpu.pipeline_mode<synchronous>, transform_indices = @transform_2, window_bounds = array<i64: 1, 128>}, {transform_indices = @transform_3, window_bounds = array<i64: 2, 128>}]} {
    %c0 = arith.constant 0 : index
    %c0_0 = arith.constant 0 : index
    %0 = vector.load %arg1[%c0, %c0_0] : memref<2x256xbf16, #tpu.memory_space<vmem>>, vector<2x256xbf16>
    %c0_1 = arith.constant 0 : index
    %c0_2 = arith.constant 0 : index
    %1 = vector.load %arg2[%c0_1, %c0_2] : memref<256x128xbf16, #tpu.memory_space<vmem>>, vector<256x128xbf16>
    %cst = arith.constant dense<0.000000e+00> : vector<2x128xf32>
    %2 = tpu.matmul %0, %1, %cst {dimension_numbers = #tpu.dot_dimension_numbers<[1], [0], [0], [1], [0, 0, 1, 1], [], []>} : vector<2x256xbf16>, vector<256x128xbf16>, vector<2x128xf32> -> vector<2x128xf32>
    %c0_3 = arith.constant 0 : index
    %c0_4 = arith.constant 0 : index
    %3 = vector.load %arg3[%c0_3, %c0_4] : memref<1x128xf32, #tpu.memory_space<vmem>>, vector<1x128xf32>
    %4 = vector.broadcast %3 : vector<1x128xf32> to vector<2x128xf32>
    %5 = arith.addf %2, %4 : vector<2x128xf32>
    %cst_5 = arith.constant 0.000000e+00 : f32
    %6 = vector.broadcast %cst_5 : f32 to vector<2x128xf32>
    %7 = arith.maximumf %5, %6 : vector<2x128xf32>
    %8 = arith.truncf %7 : vector<2x128xf32> to vector<2x128xbf16>
    %c0_6 = arith.constant 0 : index
    %c0_7 = arith.constant 0 : index
    %9 = vector.load %arg4[%c0_6, %c0_7] : memref<2x128xbf16, #tpu.memory_space<vmem>>, vector<2x128xbf16>
    tpu.vector_store %arg4[%c0_6, %c0_7], %8 {strides = array<i32>} : memref<2x128xbf16, #tpu.memory_space<vmem>>, vector<2x128xbf16>,
    return
  }
  func.func @transform_0(%arg0: i32) -> (i32, i32) {
    %c0_i32 = arith.constant 0 : i32
    %c0_i32_0 = arith.constant 0 : i32
    return %arg0, %c0_i32 : i32, i32
  }
  func.func @transform_1(%arg0: i32) -> (i32, i32) {
    %c0_i32 = arith.constant 0 : i32
    %c0_i32_0 = arith.constant 0 : i32
    %c0_i32_1 = arith.constant 0 : i32
    return %c0_i32, %c0_i32_0 : i32, i32
  }
  func.func @transform_2(%arg0: i32) -> (i32, i32) {
    %c0_i32 = arith.constant 0 : i32
    %c0_i32_0 = arith.constant 0 : i32
    %c0_i32_1 = arith.constant 0 : i32
    return %c0_i32, %c0_i32_0 : i32, i32
  }
  func.func @transform_3(%arg0: i32) -> (i32, i32) {
    %c0_i32 = arith.constant 0 : i32
    %c0_i32_0 = arith.constant 0 : i32
    return %arg0, %c0_i32 : i32, i32
  }
}

module attributes {stable_mosaic.version = 11 : i64} {
  func.func @_c2_c3_res_kernel(%arg0: i32, %arg1: memref<2x1152xbf16, #tpu.memory_space<vmem>>, %arg2: memref<1152x128xbf16, #tpu.memory_space<vmem>>, %arg3: memref<1x128xf32, #tpu.memory_space<vmem>>, %arg4: memref<128x256xbf16, #tpu.memory_space<vmem>>, %arg5: memref<1x256xf32, #tpu.memory_space<vmem>>, %arg6: memref<2x256xbf16, #tpu.memory_space<vmem>>, %arg7: memref<2x256xbf16, #tpu.memory_space<vmem>>) attributes {dimension_semantics = [#tpu.dimension_semantics<parallel>], iteration_bounds = array<i64: 1>, scalar_prefetch = 0 : i64, scratch_operands = 0 : i64, tpu.core_type = #tpu.core_type<tc>, window_params = [{transform_indices = @transform_0, window_bounds = array<i64: 2, 1152>}, {pipeline_mode = #tpu.pipeline_mode<synchronous>, transform_indices = @transform_1, window_bounds = array<i64: 1152, 128>}, {pipeline_mode = #tpu.pipeline_mode<synchronous>, transform_indices = @transform_2, window_bounds = array<i64: 1, 128>}, {pipeline_mode = #tpu.pipeline_mode<synchronous>, transform_indices = @transform_3, window_bounds = array<i64: 128, 256>}, {pipeline_mode = #tpu.pipeline_mode<synchronous>, transform_indices = @transform_4, window_bounds = array<i64: 1, 256>}, {transform_indices = @transform_5, window_bounds = array<i64: 2, 256>}, {transform_indices = @transform_6, window_bounds = array<i64: 2, 256>}]} {
    %c0 = arith.constant 0 : index
    %c0_0 = arith.constant 0 : index
    %0 = vector.load %arg1[%c0, %c0_0] : memref<2x1152xbf16, #tpu.memory_space<vmem>>, vector<2x1152xbf16>
    %c0_1 = arith.constant 0 : index
    %c0_2 = arith.constant 0 : index
    %1 = vector.load %arg2[%c0_1, %c0_2] : memref<1152x128xbf16, #tpu.memory_space<vmem>>, vector<1152x128xbf16>
    %cst = arith.constant dense<0.000000e+00> : vector<2x128xf32>
    %2 = tpu.matmul %0, %1, %cst {dimension_numbers = #tpu.dot_dimension_numbers<[1], [0], [0], [1], [0, 0, 1, 1], [], []>} : vector<2x1152xbf16>, vector<1152x128xbf16>, vector<2x128xf32> -> vector<2x128xf32>
    %c0_3 = arith.constant 0 : index
    %c0_4 = arith.constant 0 : index
    %3 = vector.load %arg3[%c0_3, %c0_4] : memref<1x128xf32, #tpu.memory_space<vmem>>, vector<1x128xf32>
    %4 = vector.broadcast %3 : vector<1x128xf32> to vector<2x128xf32>
    %5 = arith.addf %2, %4 : vector<2x128xf32>
    %cst_5 = arith.constant 0.000000e+00 : f32
    %6 = vector.broadcast %cst_5 : f32 to vector<2x128xf32>
    %7 = arith.maximumf %5, %6 : vector<2x128xf32>
    %8 = arith.truncf %7 : vector<2x128xf32> to vector<2x128xbf16>
    %c0_6 = arith.constant 0 : index
    %c0_7 = arith.constant 0 : index
    %9 = vector.load %arg4[%c0_6, %c0_7] : memref<128x256xbf16, #tpu.memory_space<vmem>>, vector<128x256xbf16>
    %cst_8 = arith.constant dense<0.000000e+00> : vector<2x256xf32>
    %10 = tpu.matmul %8, %9, %cst_8 {dimension_numbers = #tpu.dot_dimension_numbers<[1], [0], [0], [1], [0, 0, 1, 1], [], []>} : vector<2x128xbf16>, vector<128x256xbf16>, vector<2x256xf32> -> vector<2x256xf32>
    %c0_9 = arith.constant 0 : index
    %c0_10 = arith.constant 0 : index
    %11 = vector.load %arg5[%c0_9, %c0_10] : memref<1x256xf32, #tpu.memory_space<vmem>>, vector<1x256xf32>
    %12 = vector.broadcast %11 : vector<1x256xf32> to vector<2x256xf32>
    %13 = arith.addf %10, %12 : vector<2x256xf32>
    %c0_11 = arith.constant 0 : index
    %c0_12 = arith.constant 0 : index
    %14 = vector.load %arg6[%c0_11, %c0_12] : memref<2x256xbf16, #tpu.memory_space<vmem>>, vector<2x256xbf16>
    %15 = arith.extf %14 : vector<2x256xbf16> to vector<2x256xf32>
    %16 = arith.addf %13, %15 : vector<2x256xf32>
    %cst_13 = arith.constant 0.000000e+00 : f32
    %17 = vector.broadcast %cst_13 : f32 to vector<2x256xf32>
    %18 = arith.maximumf %16, %17 : vector<2x256xf32>
    %19 = arith.truncf %18 : vector<2x256xf32> to vector<2x256xbf16>
    %c0_14 = arith.constant 0 : index
    %c0_15 = arith.constant 0 : index
    %20 = vector.load %arg7[%c0_14, %c0_15] : memref<2x256xbf16, #tpu.memory_space<vmem>>, vector<2x256xbf16>
    tpu.vector_store %arg7[%c0_14, %c0_15], %19 {strides = array<i32>} : memref<2x256xbf16, #tpu.memory_space<vmem>>, vector<2x256xbf16>,
    return
  }
  func.func @transform_0(%arg0: i32) -> (i32, i32) {
    %c0_i32 = arith.constant 0 : i32
    %c0_i32_0 = arith.constant 0 : i32
    return %arg0, %c0_i32 : i32, i32
  }
  func.func @transform_1(%arg0: i32) -> (i32, i32) {
    %c0_i32 = arith.constant 0 : i32
    %c0_i32_0 = arith.constant 0 : i32
    %c0_i32_1 = arith.constant 0 : i32
    return %c0_i32, %c0_i32_0 : i32, i32
  }
  func.func @transform_2(%arg0: i32) -> (i32, i32) {
    %c0_i32 = arith.constant 0 : i32
    %c0_i32_0 = arith.constant 0 : i32
    %c0_i32_1 = arith.constant 0 : i32
    return %c0_i32, %c0_i32_0 : i32, i32
  }
  func.func @transform_3(%arg0: i32) -> (i32, i32) {
    %c0_i32 = arith.constant 0 : i32
    %c0_i32_0 = arith.constant 0 : i32
    %c0_i32_1 = arith.constant 0 : i32
    return %c0_i32, %c0_i32_0 : i32, i32
  }
  func.func @transform_4(%arg0: i32) -> (i32, i32) {
    %c0_i32 = arith.constant 0 : i32
    %c0_i32_0 = arith.constant 0 : i32
    %c0_i32_1 = arith.constant 0 : i32
    return %c0_i32, %c0_i32_0 : i32, i32
  }
  func.func @transform_5(%arg0: i32) -> (i32, i32) {
    %c0_i32 = arith.constant 0 : i32
    %c0_i32_0 = arith.constant 0 : i32
    return %arg0, %c0_i32 : i32, i32
  }
  func.func @transform_6(%arg0: i32) -> (i32, i32) {
    %c0_i32 = arith.constant 0 : i32
    %c0_i32_0 = arith.constant 0 : i32
    return %arg0, %c0_i32 : i32, i32
  }
}

module attributes {stable_mosaic.version = 11 : i64} {
  func.func @_head_kernel(%arg0: memref<2x1x256xbf16, #tpu.memory_space<vmem>>, %arg1: memref<256x128xbf16, #tpu.memory_space<vmem>>, %arg2: memref<1x128xf32, #tpu.memory_space<vmem>>, %arg3: memref<2x1xi32, #tpu.memory_space<vmem>>, %arg4: memref<2x128xbf16, #tpu.memory_space<vmem>>, %arg5: memref<1x1xf32, #tpu.memory_space<vmem>>) attributes {dimension_semantics = [], scalar_prefetch = 0 : i64, scratch_operands = 0 : i64, tpu.core_type = #tpu.core_type<tc>} {
    %c0 = arith.constant 0 : index
    %c0_0 = arith.constant 0 : index
    %c0_1 = arith.constant 0 : index
    %0 = vector.load %arg0[%c0, %c0_0, %c0_1] : memref<2x1x256xbf16, #tpu.memory_space<vmem>>, vector<2x1x256xbf16>
    %1 = arith.extf %0 : vector<2x1x256xbf16> to vector<2x1x256xf32>
    %cst = arith.constant dense<0.000000e+00> : vector<2x256xf32>
    %2 = vector.multi_reduction <add>, %1, %cst [1] : vector<2x1x256xf32> to vector<2x256xf32>
    %cst_2 = arith.constant 1.000000e+00 : f32
    %3 = vector.broadcast %cst_2 : f32 to vector<2x256xf32>
    %4 = arith.divf %2, %3 : vector<2x256xf32>
    %5 = arith.truncf %4 : vector<2x256xf32> to vector<2x256xbf16>
    %c0_3 = arith.constant 0 : index
    %c0_4 = arith.constant 0 : index
    %6 = vector.load %arg1[%c0_3, %c0_4] : memref<256x128xbf16, #tpu.memory_space<vmem>>, vector<256x128xbf16>
    %cst_5 = arith.constant dense<0.000000e+00> : vector<2x128xf32>
    %7 = tpu.matmul %5, %6, %cst_5 {dimension_numbers = #tpu.dot_dimension_numbers<[1], [0], [0], [1], [0, 0, 1, 1], [], []>} : vector<2x256xbf16>, vector<256x128xbf16>, vector<2x128xf32> -> vector<2x128xf32>
    %c0_6 = arith.constant 0 : index
    %c0_7 = arith.constant 0 : index
    %8 = vector.load %arg2[%c0_6, %c0_7] : memref<1x128xf32, #tpu.memory_space<vmem>>, vector<1x128xf32>
    %9 = vector.broadcast %8 : vector<1x128xf32> to vector<2x128xf32>
    %10 = arith.addf %7, %9 : vector<2x128xf32>
    %11 = arith.truncf %10 : vector<2x128xf32> to vector<2x128xbf16>
    %c0_8 = arith.constant 0 : index
    %c0_9 = arith.constant 0 : index
    %12 = vector.load %arg4[%c0_8, %c0_9] : memref<2x128xbf16, #tpu.memory_space<vmem>>, vector<2x128xbf16>
    tpu.vector_store %arg4[%c0_8, %c0_9], %11 {strides = array<i32>} : memref<2x128xbf16, #tpu.memory_space<vmem>>, vector<2x128xbf16>,
    %13 = tpu.iota {dimensions = array<i32: 1>} : vector<2x128xi32>
    %c10_i32 = arith.constant 10 : i32
    %14 = vector.broadcast %c10_i32 : i32 to vector<2x128xi32>
    %15 = arith.cmpi slt, %13, %14 : vector<2x128xi32>
    %cst_10 = arith.constant -1.000000e+30 : f32
    %16 = vector.broadcast %cst_10 : f32 to vector<2x128xf32>
    %17 = arith.select %15, %10, %16 : vector<2x128xi1>, vector<2x128xf32>
    %cst_11 = arith.constant dense<0xFF800000> : vector<2xf32>
    %18 = vector.multi_reduction <maximumf>, %17, %cst_11 [1] : vector<2x128xf32> to vector<2xf32>
    %19 = vector.shape_cast %18 : vector<2xf32> to vector<2x1xf32>
    %20 = vector.broadcast %19 : vector<2x1xf32> to vector<2x128xf32>
    %21 = arith.subf %17, %20 : vector<2x128xf32>
    %22 = math.exp %21 : vector<2x128xf32>
    %cst_12 = arith.constant dense<0.000000e+00> : vector<2xf32>
    %23 = vector.multi_reduction <add>, %22, %cst_12 [1] : vector<2x128xf32> to vector<2xf32>
    %24 = vector.shape_cast %23 : vector<2xf32> to vector<2x1xf32>
    %25 = math.log %24 : vector<2x1xf32>
    %26 = arith.addf %19, %25 : vector<2x1xf32>
    %c0_13 = arith.constant 0 : index
    %c0_14 = arith.constant 0 : index
    %27 = vector.load %arg3[%c0_13, %c0_14] : memref<2x1xi32, #tpu.memory_space<vmem>>, vector<2x1xi32>
    %28 = vector.broadcast %27 : vector<2x1xi32> to vector<2x128xi32>
    %29 = arith.cmpi eq, %13, %28 : vector<2x128xi32>
    %cst_15 = arith.constant 0.000000e+00 : f32
    %30 = vector.broadcast %cst_15 : f32 to vector<2x128xf32>
    %31 = arith.select %29, %10, %30 : vector<2x128xi1>, vector<2x128xf32>
    %cst_16 = arith.constant dense<0.000000e+00> : vector<2xf32>
    %32 = vector.multi_reduction <add>, %31, %cst_16 [1] : vector<2x128xf32> to vector<2xf32>
    %33 = vector.shape_cast %32 : vector<2xf32> to vector<2x1xf32>
    %34 = arith.subf %26, %33 : vector<2x1xf32>
    %cst_17 = arith.constant dense<0.000000e+00> : vector<1xf32>
    %35 = vector.multi_reduction <add>, %34, %cst_17 [0] : vector<2x1xf32> to vector<1xf32>
    %36 = vector.shape_cast %35 : vector<1xf32> to vector<1x1xf32>
    %cst_18 = arith.constant 2.000000e+00 : f32
    %37 = vector.broadcast %cst_18 : f32 to vector<1x1xf32>
    %38 = arith.divf %36, %37 : vector<1x1xf32>
    %c0_19 = arith.constant 0 : index
    %c0_20 = arith.constant 0 : index
    %39 = vector.load %arg5[%c0_19, %c0_20] : memref<1x1xf32, #tpu.memory_space<vmem>>, vector<1x1xf32>
    tpu.vector_store %arg5[%c0_19, %c0_20], %38 {strides = array<i32>} : memref<1x1xf32, #tpu.memory_space<vmem>>, vector<1x1xf32>,
    return
  }
}

</mosaic_0001>

<bundles_post_ra>
// kernel: _lambda_.37
= control target key start
LH: loop header
LB: loop body
LE: loop exit
PB: predicated region body
PF: predicated region fallthrough
CT: control target
= control target key end

     0   :  { %s939_s12 = smov 0   ;;  %s1057_s0 = inlined_call_operand.vmem [shape: bf16[512,256], index: 0, kind: input, shape index: {}]   ;;  %s1058_s1 = inlined_call_operand.vmem [shape: bf16[256,128], index: 1, kind: input, shape index: {}]   ;;  %s1059_s2 = inlined_call_operand.vmem [shape: f32[1,128], index: 2, kind: input, shape index: {}]   ;;  %s1060_s3 = inlined_call_operand.vmem [shape: bf16[512,128], index: 3, kind: output, shape index: {}]  }
   0x1 LB: > { %s658_s13 = sadd.s32 4294967295, %s917_s12   ;;  %p662_p0 = scmp.ge.s32.totalorder %s917_s12, 1  ;;  %s917_s12 = sphi %s939_s12, %s13_s12  }
   0x2   : > { %p139_p1 = scmp.lt.s32.totalorder %s917_s12, 5 }
   0x4   : > { %p140_p2 = pnand %p662_p0, %p139_p1 }
   0x5   : > { %s663_s16 = sshll.u32 (!%p140_p2), %s658_s13, 4 }
   0x6   : > { %143 = sbr.rel (%p140_p2) target bundleno = 276 (0x114), region = 32  ;;  %p165_p3 = scmp.lt.s32.totalorder (!%p140_p2), %s663_s16, 63 }
   0xb   : > { %v871_v0 = vld [vmem:[%s1058_s1 + $0x78] sm:$0xff]   ;;  %v873_v2 = vld [vmem:[%s1058_s1 + $0x70] sm:$0xff]   ;;  %v875_v4 = vld [vmem:[%s1058_s1 + $0x68] sm:$0xff]   ;;  %s1062_s16 = smov (!%p165_p3, %s663_s16), 63 }
   0xc   : > { %v872_v1 = vld [vmem:[%s1058_s1 + $0x38] sm:$0xff]   ;;  %783 = vmatprep.subr.bf16.mxu0 %v871_v0  ;;  %847 = vmatprep.subr.bf16.mxu1 %v871_v0  ;;  %v874_v3 = vld [vmem:[%s1058_s1 + $0x30] sm:$0xff]   ;;  %v876_v5 = vld [vmem:[%s1058_s1 + $0x28] sm:$0xff]   ;;  %s719_s4 = sshll.u32 %s1062_s16, 3  ;;  %s667_s28 = sshll.u32 %s1062_s16, 2 }
   0xd   : > { %784 = vmatpush3.bf16.msra.mxu0 %v872_v1  ;;  %855 = vmatpush3.bf16.msra.mxu1 %v872_v1  ;;  %v877_v6 = vld [vmem:[%s1058_s1 + $0x60] sm:$0xff]   ;;  %v879_v8 = vld [vmem:[%s1058_s1 + $0x58] sm:$0xff]   ;;  %s980_s9 = scalar_lea.vmem %s1057_s0, %s719_s4  ;;  %v881_v10 = vld [vmem:[%s1058_s1 + $0x50] sm:$0xff]   ;;  %s1032_s4 = scalar_lea.vmem %s1060_s3, %s667_s28 }
   0xe   : > { %785 = vmatprep.subr.bf16.mxu0 %v873_v2  ;;  %848 = vmatprep.subr.bf16.mxu1 %v873_v2  ;;  %v878_v7 = vld [vmem:[%s1058_s1 + $0x20] sm:$0xff]   ;;  %v880_v9 = vld [vmem:[%s1058_s1 + $0x18] sm:$0xff]   ;;  %v882_v13 = vld [vmem:[%s1058_s1 + $0x10] sm:$0xff]  }
   0xf   : > { %v889_v11 = vld [vmem:[%s980_s9 + $0x4] ss:$8 sps:$4 sm:$0xff]   ;;  %v887_v18 = vld [vmem:[%s980_s9] ss:$8 sps:$4 sm:$0xff]   ;;  %v893_v20 = vld [vmem:[%s980_s9 + $0x14] ss:$8 sps:$4 sm:$0xff]  }
  0x10   : > { %v892_v12 = vld [vmem:[%s980_s9 + $0x44] ss:$8 sps:$4 sm:$0xff]   ;;  %441 = vmatprep.mubr.bf16.mxu0 %v889_v11  ;;  %v890_v19 = vld [vmem:[%s980_s9 + $0x40] ss:$8 sps:$4 sm:$0xff]   ;;  %v895_v21 = vld [vmem:[%s980_s9 + $0x54] ss:$8 sps:$4 sm:$0xff]  }
  0x11   : > { %786 = vmatpush3.bf16.msra.mxu0 %v874_v3  ;;  %856 = vmatpush3.bf16.msra.mxu1 %v874_v3  ;;  %v883_v14 = vld [vmem:[%s1058_s1 + $0x48] sm:$0xff]   ;;  %v885_v16 = vld [vmem:[%s1058_s1 + $0x40] sm:$0xff]   ;;  %v897_v22 = vld [vmem:[%s980_s9 + $0x10] ss:$8 sps:$4 sm:$0xff]  }
  0x12   : > { %787 = vmatprep.subr.bf16.mxu0 %v875_v4  ;;  %849 = vmatprep.subr.bf16.mxu1 %v875_v4  ;;  %v884_v15 = vld [vmem:[%s1058_s1 + $0x8] sm:$0xff]   ;;  %v886_v17 = vld [vmem:[%s1058_s1] sm:$0xff]   ;;  %v898_v23 = vld [vmem:[%s980_s9 + $0x50] ss:$8 sps:$4 sm:$0xff]  }
  0x13   : > { %473 = vmatprep.mubr.bf16.mxu1 %v892_v12  ;;  %v899_v24 = vld [vmem:[%s980_s9 + $0x24] ss:$8 sps:$4 sm:$0xff]   ;;  %v903_v26 = vld [vmem:[%s980_s9 + $0x20] ss:$8 sps:$4 sm:$0xff]   ;;  %v905_v28 = vld [vmem:[%s980_s9 + $0x34] ss:$8 sps:$4 sm:$0xff]  }
  0x14   : > { %v901_v25 = vld [vmem:[%s980_s9 + $0x64] ss:$8 sps:$4 sm:$0xff]   ;;  %v904_v27 = vld [vmem:[%s980_s9 + $0x60] ss:$8 sps:$4 sm:$0xff]   ;;  %v907_v29 = vld [vmem:[%s980_s9 + $0x74] ss:$8 sps:$4 sm:$0xff]  }
  0x15   : > { %788 = vmatpush3.bf16.msra.mxu0 %v876_v5  ;;  %857 = vmatpush3.bf16.msra.mxu1 %v876_v5  ;;  %v909_v30 = vld [vmem:[%s980_s9 + $0x30] ss:$8 sps:$4 sm:$0xff]   ;;  %v1022_v36 = vld [vmem:[%s1059_s2] ss:$0 sm:$0xff] }
  0x16   : > { %789 = vmatprep.subr.bf16.mxu0 %v877_v6  ;;  %850 = vmatprep.subr.bf16.mxu1 %v877_v6  ;;  %v910_v31 = vld [vmem:[%s980_s9 + $0x70] ss:$8 sps:$4 sm:$0xff]  }
  0x19   : > { %790 = vmatpush3.bf16.msra.mxu0 %v878_v7  ;;  %858 = vmatpush3.bf16.msra.mxu1 %v878_v7 }
  0x1a   : > { %791 = vmatprep.subr.bf16.mxu0 %v879_v8  ;;  %851 = vmatprep.subr.bf16.mxu1 %v879_v8 }
  0x1d   : > { %792 = vmatpush3.bf16.msra.mxu0 %v880_v9  ;;  %859 = vmatpush3.bf16.msra.mxu1 %v880_v9 }
  0x1e   : > { %793 = vmatprep.subr.bf16.mxu0 %v881_v10  ;;  %852 = vmatprep.subr.bf16.mxu1 %v881_v10 }
  0x21   : > { %794 = vmatpush3.bf16.msra.mxu0 %v882_v13  ;;  %860 = vmatpush3.bf16.msra.mxu1 %v882_v13 }
  0x22   : > { %795 = vmatprep.subr.bf16.mxu0 %v883_v14  ;;  %853 = vmatprep.subr.bf16.mxu1 %v883_v14 }
  0x25   : > { %796 = vmatpush3.bf16.msra.mxu0 %v884_v15  ;;  %861 = vmatpush3.bf16.msra.mxu1 %v884_v15 }
  0x26   : > { %797 = vmatprep.subr.bf16.mxu0 %v885_v16  ;;  %854 = vmatprep.subr.bf16.mxu1 %v885_v16 }
  0x29   : > { %798 = vmatpush3.bf16.msra.mxu0 %v886_v17  ;;  %862 = vmatpush3.bf16.msra.mxu1 %v886_v17 }
  0x2c   : > { %442 = vmatmul.mubr.bf16.vlgmr.msra.gmra.mxu0 %v887_v18  ;;  %474 = vmatmul.mubr.bf16.vlgmr.msra.gmra.mxu1 %v890_v19 }
  0x2d   : > { %449 = vmatprep.mubr.bf16.mxu0 %v893_v20  ;;  %481 = vmatprep.mubr.bf16.mxu1 %v895_v21 }
  0x34   : > { %450 = vmatmul.mubr.bf16.gmra.mxu0 %v897_v22  ;;  %482 = vmatmul.mubr.bf16.gmra.mxu1 %v898_v23 }
  0x35   : > { %457 = vmatprep.mubr.bf16.mxu0 %v899_v24  ;;  %489 = vmatprep.mubr.bf16.mxu1 %v901_v25 }
  0x3c   : > { %458 = vmatmul.mubr.bf16.gmra.mxu0 %v903_v26  ;;  %490 = vmatmul.mubr.bf16.gmra.mxu1 %v904_v27 }
  0x3d   : > { %465 = vmatprep.mubr.bf16.mxu0 %v905_v28  ;;  %497 = vmatprep.mubr.bf16.mxu1 %v907_v29 }
  0x44   : > { %466 = vmatmul.mubr.bf16.gmra.mxu0 %v909_v30  ;;  %498 = vmatmul.mubr.bf16.gmra.mxu1 %v910_v31 }
  0xec   : > { %v799_v32 = vpop.f32.mrf.mxu0  ;;  %v823_v33 = vpop.f32.mrf.mxu1 }
  0xee   : > { %v800_v34 = vpop.f32.mrf.mxu0  ;;  %v824_v35 = vpop.f32.mrf.mxu1 }
  0xef   : > { %v801_v37 = vadd.f32 %v800_v34, %v799_v32  ;;  %v825_v38 = vadd.f32 %v824_v35, %v823_v33 }
  0xf0   : > { %v802_v39 = vpop.f32.mrf.mxu0  ;;  %v826_v40 = vpop.f32.mrf.mxu1 }
  0xf1   : > { %v444_v41 = vadd.f32 %v801_v37, %v1022_v36  ;;  %v476_v42 = vadd.f32 %v825_v38, %v1022_v36 }
  0xf2   : > { %v803_v43 = vpop.f32.mrf.mxu0  ;;  %v827_v44 = vpop.f32.mrf.mxu1 }
  0xf3   : > { %v804_v45 = vadd.f32 %v803_v43, %v802_v39  ;;  %v828_v46 = vadd.f32 %v827_v44, %v826_v40  ;;  %v506_v51 = vmax.f32 %v444_v41, 0.0  ;;  %v514_v52 = vmax.f32 %v476_v42, 0.0 }
  0xf4   : > { %v805_v47 = vpop.f32.mrf.mxu0  ;;  %v829_v48 = vpop.f32.mrf.mxu1 }
  0xf5   : > { %v447_v49 = vadd.f32 %v804_v45, %v1022_v36  ;;  %v479_v50 = vadd.f32 %v828_v46, %v1022_v36 }
  0xf6   : > { %v806_v53 = vpop.f32.mrf.mxu0  ;;  %v830_v54 = vpop.f32.mrf.mxu1 }
  0xf7   : > { %v507_v55 = vmax.f32 %v447_v49, 0.0  ;;  %v515_v56 = vmax.f32 %v479_v50, 0.0  ;;  %v807_v57 = vadd.f32 %v806_v53, %v805_v47  ;;  %v831_v58 = vadd.f32 %v830_v54, %v829_v48 }
  0xf8   : > { %v808_v59 = vpop.f32.mrf.mxu0  ;;  %v832_v60 = vpop.f32.mrf.mxu1 }
  0xf9   : > { %v739_v61 = vpack.c.bf16 %v507_v55, %v506_v51  ;;  %v759_v62 = vpack.c.bf16 %v515_v56, %v514_v52  ;;  %v452_v63 = vadd.f32 %v807_v57, %v1022_v36  ;;  %v484_v0 = vadd.f32 %v831_v58, %v1022_v36 }
  0xfa   : > { %v809_v1 = vpop.f32.mrf.mxu0  ;;  %v833_v2 = vpop.f32.mrf.mxu1 }
  0xfb   : > { %740 = vst [vmem:[%s1032_s4] sm:$0xff] %v739_v61   ;;  %779 = vst [vmem:[%s1032_s4 + $0x20] sm:$0xff] %v759_v62   ;;  %v810_v3 = vadd.f32 %v809_v1, %v808_v59  ;;  %v834_v4 = vadd.f32 %v833_v2, %v832_v60  ;;  %v508_v9 = vmax.f32 %v452_v63, 0.0  ;;  %v516_v10 = vmax.f32 %v484_v0, 0.0 }
  0xfc   : > { %v811_v5 = vpop.f32.mrf.mxu0  ;;  %v835_v6 = vpop.f32.mrf.mxu1 }
  0xfd   : > { %v455_v7 = vadd.f32 %v810_v3, %v1022_v36  ;;  %v487_v8 = vadd.f32 %v834_v4, %v1022_v36 }
  0xfe   : > { %v812_v11 = vpop.f32.mrf.mxu0  ;;  %v836_v12 = vpop.f32.mrf.mxu1 }
  0xff   : > { %v509_v13 = vmax.f32 %v455_v7, 0.0  ;;  %v517_v14 = vmax.f32 %v487_v8, 0.0  ;;  %v813_v15 = vadd.f32 %v812_v11, %v811_v5  ;;  %v837_v16 = vadd.f32 %v836_v12, %v835_v6 }
 0x100   : > { %v814_v17 = vpop.f32.mrf.mxu0  ;;  %v838_v18 = vpop.f32.mrf.mxu1 }
 0x101   : > { %v744_v19 = vpack.c.bf16 %v509_v13, %v508_v9  ;;  %v764_v20 = vpack.c.bf16 %v517_v14, %v516_v10  ;;  %v460_v21 = vadd.f32 %v813_v15, %v1022_v36  ;;  %v492_v22 = vadd.f32 %v837_v16, %v1022_v36 }
 0x102   : > { %v815_v23 = vpop.f32.mrf.mxu0  ;;  %v839_v24 = vpop.f32.mrf.mxu1 }
 0x103   : > { %776 = vst [vmem:[%s1032_s4 + $0x8] sm:$0xff] %v744_v19   ;;  %780 = vst [vmem:[%s1032_s4 + $0x28] sm:$0xff] %v764_v20   ;;  %v816_v25 = vadd.f32 %v815_v23, %v814_v17  ;;  %v840_v26 = vadd.f32 %v839_v24, %v838_v18  ;;  %v510_v31 = vmax.f32 %v460_v21, 0.0  ;;  %v518_v32 = vmax.f32 %v492_v22, 0.0 }
 0x104   : > { %v817_v27 = vpop.f32.mrf.mxu0  ;;  %v841_v28 = vpop.f32.mrf.mxu1 }
 0x105   : > { %v463_v29 = vadd.f32 %v816_v25, %v1022_v36  ;;  %v495_v30 = vadd.f32 %v840_v26, %v1022_v36 }
 0x106   : > { %v818_v33 = vpop.f32.mrf.mxu0  ;;  %v842_v34 = vpop.f32.mrf.mxu1 }
 0x107   : > { %v511_v35 = vmax.f32 %v463_v29, 0.0  ;;  %v519_v37 = vmax.f32 %v495_v30, 0.0  ;;  %v819_v38 = vadd.f32 %v818_v33, %v817_v27  ;;  %v843_v39 = vadd.f32 %v842_v34, %v841_v28 }
 0x108   : > { %v820_v40 = vpop.f32.mrf.mxu0  ;;  %v844_v41 = vpop.f32.mrf.mxu1 }
 0x109   : > { %v749_v42 = vpack.c.bf16 %v511_v35, %v510_v31  ;;  %v769_v43 = vpack.c.bf16 %v519_v37, %v518_v32  ;;  %v468_v46 = vadd.f32 %v819_v38, %v1022_v36  ;;  %v500_v47 = vadd.f32 %v843_v39, %v1022_v36 }
 0x10a   : > { %v821_v44 = vpop.f32.mrf.mxu0  ;;  %v845_v45 = vpop.f32.mrf.mxu1 }
 0x10b   : > { %777 = vst [vmem:[%s1032_s4 + $0x10] sm:$0xff] %v749_v42   ;;  %781 = vst [vmem:[%s1032_s4 + $0x30] sm:$0xff] %v769_v43   ;;  %v822_v48 = vadd.f32 %v821_v44, %v820_v40  ;;  %v846_v49 = vadd.f32 %v845_v45, %v844_v41  ;;  %v512_v52 = vmax.f32 %v468_v46, 0.0  ;;  %v520_v53 = vmax.f32 %v500_v47, 0.0 }
 0x10d   : > { %v471_v50 = vadd.f32 %v822_v48, %v1022_v36  ;;  %v503_v51 = vadd.f32 %v846_v49, %v1022_v36 }
 0x10f   : > { %v513_v54 = vmax.f32 %v471_v50, 0.0  ;;  %v521_v55 = vmax.f32 %v503_v51, 0.0 }
 0x111   : > { %v754_v56 = vpack.c.bf16 %v513_v54, %v512_v52  ;;  %v774_v57 = vpack.c.bf16 %v521_v55, %v520_v53 }
 0x113   : > { %778 = vst [vmem:[%s1032_s4 + $0x18] sm:$0xff] %v754_v56   ;;  %782 = vst [vmem:[%s1032_s4 + $0x38] sm:$0xff] %v774_v57  }
 0x114 PF: > { %s13_s12 = sadd.s32 1, %s917_s12  }
 0x115   : > { %p10_p4 = scmp.ge.s32.totalorder %s13_s12, 6  }
 0x117   :  { %12 = sbr.rel (!%p10_p4) target bundleno = 1 (0x1), region = 62 }

// kernel: _lambda_.39
= control target key start
LH: loop header
LB: loop body
LE: loop exit
PB: predicated region body
PF: predicated region fallthrough
CT: control target
= control target key end

     0   :  { %s1108_s1 = inlined_call_operand.vmem [shape: bf16[128,128], index: 1, kind: input, shape index: {}]   ;;  %s1109_s3 = inlined_call_operand.vmem [shape: bf16[128,128], index: 3, kind: input, shape index: {}]   ;;  %s1110_s0 = inlined_call_operand.vmem [shape: bf16[128,128], index: 0, kind: input, shape index: {}]   ;;  %s1111_s2 = inlined_call_operand.vmem [shape: f32[1,128], index: 2, kind: input, shape index: {}, may-alias: {2,4}]   ;;  %s1112_s4 = inlined_call_operand.vmem [shape: f32[1,128], index: 4, kind: input, shape index: {}, may-alias: {2,4}]   ;;  %s1113_s6 = inlined_call_operand.vmem [shape: bf16[128,128], index: 6, kind: output, shape index: {1}]   ;;  %s1114_s5 = inlined_call_operand.vmem [shape: bf16[128,128], index: 5, kind: output, shape index: {0}]  }
   0x1   :  { %v887_v0 = vld [vmem:[%s1108_s1 + $0x38] sm:$0xff]   ;;  %v889_v2 = vld [vmem:[%s1108_s1 + $0x30] sm:$0xff]   ;;  %v891_v4 = vld [vmem:[%s1108_s1 + $0x28] sm:$0xff]  }
   0x2   :  { %v888_v1 = vld [vmem:[%s1109_s3 + $0x38] sm:$0xff]   ;;  %823 = vmatprep.subr.bf16.mxu0 %v887_v0  ;;  %v890_v3 = vld [vmem:[%s1109_s3 + $0x30] sm:$0xff]   ;;  %v892_v5 = vld [vmem:[%s1109_s3 + $0x28] sm:$0xff]  }
   0x3   :  { %855 = vmatprep.subr.bf16.mxu1 %v888_v1  ;;  %824 = vmatpush3.bf16.msra.mxu0 %v887_v0  ;;  %v893_v6 = vld [vmem:[%s1108_s1 + $0x20] sm:$0xff]   ;;  %v895_v8 = vld [vmem:[%s1108_s1 + $0x18] sm:$0xff]   ;;  %v897_v10 = vld [vmem:[%s1108_s1 + $0x10] sm:$0xff]  }
   0x4   :  { %856 = vmatpush3.bf16.msra.mxu1 %v888_v1  ;;  %825 = vmatprep.subr.bf16.mxu0 %v889_v2  ;;  %v894_v7 = vld [vmem:[%s1109_s3 + $0x20] sm:$0xff]   ;;  %v896_v9 = vld [vmem:[%s1109_s3 + $0x18] sm:$0xff]   ;;  %v898_v12 = vld [vmem:[%s1109_s3 + $0x10] sm:$0xff]  }
   0x5   :  { %857 = vmatprep.subr.bf16.mxu1 %v890_v3  ;;  %v903_v11 = vld [vmem:[%s1110_s0] sm:$0xff]   ;;  %v899_v13 = vld [vmem:[%s1108_s1 + $0x8] sm:$0xff]   ;;  %v905_v18 = vld [vmem:[%s1110_s0 + $0x10] sm:$0xff]  }
   0x6   :  { %839 = vmatprep.mubr.bf16.mxu0 %v903_v11  ;;  %871 = vmatprep.mubr.bf16.mxu1 %v903_v11  ;;  %v900_v14 = vld [vmem:[%s1109_s3 + $0x8] sm:$0xff]   ;;  %v901_v15 = vld [vmem:[%s1108_s1] sm:$0xff]   ;;  %v906_v19 = vld [vmem:[%s1110_s0 + $0x18] sm:$0xff]  }
   0x7   :  { %826 = vmatpush3.bf16.msra.mxu0 %v889_v2  ;;  %v902_v16 = vld [vmem:[%s1109_s3] sm:$0xff]   ;;  %v904_v17 = vld [vmem:[%s1110_s0 + $0x8] sm:$0xff]   ;;  %v909_v22 = vld [vmem:[%s1110_s0 + $0x30] sm:$0xff]  }
   0x8   :  { %858 = vmatpush3.bf16.msra.mxu1 %v890_v3  ;;  %827 = vmatprep.subr.bf16.mxu0 %v891_v4  ;;  %v907_v20 = vld [vmem:[%s1110_s0 + $0x20] sm:$0xff]   ;;  %v908_v21 = vld [vmem:[%s1110_s0 + $0x28] sm:$0xff]   ;;  %v910_v23 = vld [vmem:[%s1110_s0 + $0x38] sm:$0xff]  }
   0x9   :  { %859 = vmatprep.subr.bf16.mxu1 %v892_v5  ;;  %v1021_v25 = vld [vmem:[%s1111_s2] ss:$0 sm:$0xff] }
   0xa   :  { %v1027_v29 = vld [vmem:[%s1112_s4] ss:$0 sm:$0xff] }
   0xb   :  { %828 = vmatpush3.bf16.msra.mxu0 %v891_v4 }
   0xc   :  { %860 = vmatpush3.bf16.msra.mxu1 %v892_v5  ;;  %829 = vmatprep.subr.bf16.mxu0 %v893_v6 }
   0xd   :  { %861 = vmatprep.subr.bf16.mxu1 %v894_v7 }
   0xf   :  { %830 = vmatpush3.bf16.msra.mxu0 %v893_v6 }
  0x10   :  { %862 = vmatpush3.bf16.msra.mxu1 %v894_v7  ;;  %831 = vmatprep.subr.bf16.mxu0 %v895_v8 }
  0x11   :  { %863 = vmatprep.subr.bf16.mxu1 %v896_v9 }
  0x13   :  { %832 = vmatpush3.bf16.msra.mxu0 %v895_v8 }
  0x14   :  { %864 = vmatpush3.bf16.msra.mxu1 %v896_v9  ;;  %833 = vmatprep.subr.bf16.mxu0 %v897_v10 }
  0x15   :  { %865 = vmatprep.subr.bf16.mxu1 %v898_v12 }
  0x17   :  { %834 = vmatpush3.bf16.msra.mxu0 %v897_v10 }
  0x18   :  { %866 = vmatpush3.bf16.msra.mxu1 %v898_v12  ;;  %835 = vmatprep.subr.bf16.mxu0 %v899_v13 }
  0x19   :  { %867 = vmatprep.subr.bf16.mxu1 %v900_v14 }
  0x1b   :  { %836 = vmatpush3.bf16.msra.mxu0 %v899_v13 }
  0x1c   :  { %868 = vmatpush3.bf16.msra.mxu1 %v900_v14  ;;  %837 = vmatprep.subr.bf16.mxu0 %v901_v15 }
  0x1d   :  { %869 = vmatprep.subr.bf16.mxu1 %v902_v16 }
  0x1f   :  { %838 = vmatpush3.bf16.msra.mxu0 %v901_v15 }
  0x20   :  { %870 = vmatpush3.bf16.msra.mxu1 %v902_v16 }
  0x22   :  { %840 = vmatmul.mubr.bf16.vlgmr.msra.gmra.mxu0 %v904_v17 }
  0x23   :  { %872 = vmatmul.mubr.bf16.vlgmr.msra.gmra.mxu1 %v904_v17  ;;  %843 = vmatprep.mubr.bf16.mxu0 %v905_v18 }
  0x24   :  { %875 = vmatprep.mubr.bf16.mxu1 %v905_v18 }
  0x2a   :  { %844 = vmatmul.mubr.bf16.gmra.mxu0 %v906_v19 }
  0x2b   :  { %876 = vmatmul.mubr.bf16.gmra.mxu1 %v906_v19  ;;  %847 = vmatprep.mubr.bf16.mxu0 %v907_v20 }
  0x2c   :  { %879 = vmatprep.mubr.bf16.mxu1 %v907_v20 }
  0x32   :  { %848 = vmatmul.mubr.bf16.gmra.mxu0 %v908_v21 }
  0x33   :  { %880 = vmatmul.mubr.bf16.gmra.mxu1 %v908_v21  ;;  %851 = vmatprep.mubr.bf16.mxu0 %v909_v22 }
  0x34   :  { %883 = vmatprep.mubr.bf16.mxu1 %v909_v22 }
  0x3a   :  { %852 = vmatmul.mubr.bf16.gmra.mxu0 %v910_v23 }
  0x3b   :  { %884 = vmatmul.mubr.bf16.gmra.mxu1 %v910_v23 }
  0xe2   :  { %v841_v24 = vpop.f32.mrf.mxu0 }
  0xe3   :  { %v873_v26 = vpop.f32.mrf.mxu1  ;;  %v201_v28 = vadd.f32 %v841_v24, %v1021_v25 }
  0xe4   :  { %v192_v27 = vpop.f32.mrf.mxu0  ;;  %v465_v35 = vadd.f32 %v873_v26, %v1027_v29 }
  0xe5   :  { %v456_v30 = vpop.f32.mrf.mxu1  ;;  %v193_v32 = vadd.f32 %v1021_v25, %v192_v27  ;;  %v257_v38 = vmax.f32 %v201_v28, 0.0 }
  0xe6   :  { %v842_v31 = vpop.f32.mrf.mxu0  ;;  %v457_v42 = vadd.f32 %v1027_v29, %v456_v30 }
  0xe7   :  { %v204_v33 = vadd.f32 %v842_v31, %v1021_v25  ;;  %v874_v34 = vpop.f32.mrf.mxu1  ;;  %v255_v46 = vmax.f32 %v193_v32, 0.0 }
  0xe8   :  { %v468_v36 = vadd.f32 %v874_v34, %v1027_v29  ;;  %v195_v37 = vpop.f32.mrf.mxu0 }
  0xe9   :  { %v258_v39 = vmax.f32 %v204_v33, 0.0  ;;  %v196_v40 = vadd.f32 %v1021_v25, %v195_v37  ;;  %v459_v41 = vpop.f32.mrf.mxu1 }
  0xea   :  { %v745_v43 = vpack.c.bf16 %v468_v36, %v465_v35  ;;  %v460_v44 = vadd.f32 %v1027_v29, %v459_v41  ;;  %v845_v45 = vpop.f32.mrf.mxu0 }
  0xeb   :  { %v705_v47 = vpack.c.bf16 %v258_v39, %v257_v38  ;;  %v256_v48 = vmax.f32 %v196_v40, 0.0  ;;  %v877_v49 = vpop.f32.mrf.mxu1  ;;  %v217_v53 = vadd.f32 %v845_v45, %v1021_v25 }
  0xec   :  { %784 = vst [vmem:[%s1113_s6 + $0x8] sm:$0xff] %v745_v43   ;;  %v740_v50 = vpack.c.bf16 %v460_v44, %v457_v42  ;;  %v208_v51 = vpop.f32.mrf.mxu0  ;;  %v481_v59 = vadd.f32 %v877_v49, %v1027_v29 }
  0xed   :  { %777 = vst [vmem:[%s1114_s5 + $0x8] sm:$0xff] %v705_v47   ;;  %v700_v52 = vpack.c.bf16 %v256_v48, %v255_v46  ;;  %v472_v54 = vpop.f32.mrf.mxu1  ;;  %v209_v56 = vadd.f32 %v1021_v25, %v208_v51  ;;  %v261_v62 = vmax.f32 %v217_v53, 0.0 }
  0xee   :  { %741 = vst [vmem:[%s1113_s6] sm:$0xff] %v740_v50   ;;  %v846_v55 = vpop.f32.mrf.mxu0  ;;  %v473_v2 = vadd.f32 %v1027_v29, %v472_v54 }
  0xef   :  { %701 = vst [vmem:[%s1114_s5] sm:$0xff] %v700_v52   ;;  %v220_v57 = vadd.f32 %v846_v55, %v1021_v25  ;;  %v878_v58 = vpop.f32.mrf.mxu1  ;;  %v259_v6 = vmax.f32 %v209_v56, 0.0 }
  0xf0   :  { %v484_v60 = vadd.f32 %v878_v58, %v1027_v29  ;;  %v211_v61 = vpop.f32.mrf.mxu0 }
  0xf1   :  { %v262_v63 = vmax.f32 %v220_v57, 0.0  ;;  %v212_v0 = vadd.f32 %v1021_v25, %v211_v61  ;;  %v475_v1 = vpop.f32.mrf.mxu1 }
  0xf2   :  { %v755_v3 = vpack.c.bf16 %v484_v60, %v481_v59  ;;  %v476_v4 = vadd.f32 %v1027_v29, %v475_v1  ;;  %v849_v5 = vpop.f32.mrf.mxu0 }
  0xf3   :  { %v715_v7 = vpack.c.bf16 %v262_v63, %v261_v62  ;;  %v260_v8 = vmax.f32 %v212_v0, 0.0  ;;  %v881_v9 = vpop.f32.mrf.mxu1  ;;  %v233_v13 = vadd.f32 %v849_v5, %v1021_v25 }
  0xf4   :  { %786 = vst [vmem:[%s1113_s6 + $0x18] sm:$0xff] %v755_v3   ;;  %v750_v10 = vpack.c.bf16 %v476_v4, %v473_v2  ;;  %v224_v11 = vpop.f32.mrf.mxu0  ;;  %v497_v19 = vadd.f32 %v881_v9, %v1027_v29 }
  0xf5   :  { %779 = vst [vmem:[%s1114_s5 + $0x18] sm:$0xff] %v715_v7   ;;  %v710_v12 = vpack.c.bf16 %v260_v8, %v259_v6  ;;  %v488_v14 = vpop.f32.mrf.mxu1  ;;  %v225_v16 = vadd.f32 %v1021_v25, %v224_v11  ;;  %v265_v22 = vmax.f32 %v233_v13, 0.0 }
  0xf6   :  { %785 = vst [vmem:[%s1113_s6 + $0x10] sm:$0xff] %v750_v10   ;;  %v850_v15 = vpop.f32.mrf.mxu0  ;;  %v489_v27 = vadd.f32 %v1027_v29, %v488_v14 }
  0xf7   :  { %778 = vst [vmem:[%s1114_s5 + $0x10] sm:$0xff] %v710_v12   ;;  %v236_v17 = vadd.f32 %v850_v15, %v1021_v25  ;;  %v882_v18 = vpop.f32.mrf.mxu1  ;;  %v263_v32 = vmax.f32 %v225_v16, 0.0 }
  0xf8   :  { %v500_v20 = vadd.f32 %v882_v18, %v1027_v29  ;;  %v227_v21 = vpop.f32.mrf.mxu0 }
  0xf9   :  { %v266_v23 = vmax.f32 %v236_v17, 0.0  ;;  %v228_v24 = vadd.f32 %v1021_v25, %v227_v21  ;;  %v491_v26 = vpop.f32.mrf.mxu1 }
  0xfa   :  { %v765_v28 = vpack.c.bf16 %v500_v20, %v497_v19  ;;  %v492_v30 = vadd.f32 %v1027_v29, %v491_v26  ;;  %v853_v31 = vpop.f32.mrf.mxu0 }
  0xfb   :  { %v725_v33 = vpack.c.bf16 %v266_v23, %v265_v22  ;;  %v264_v34 = vmax.f32 %v228_v24, 0.0  ;;  %v885_v35 = vpop.f32.mrf.mxu1  ;;  %v249_v39 = vadd.f32 %v853_v31, %v1021_v25 }
  0xfc   :  { %788 = vst [vmem:[%s1113_s6 + $0x28] sm:$0xff] %v765_v28   ;;  %v760_v36 = vpack.c.bf16 %v492_v30, %v489_v27  ;;  %v240_v37 = vpop.f32.mrf.mxu0  ;;  %v513_v45 = vadd.f32 %v885_v35, %v1027_v29 }
  0xfd   :  { %781 = vst [vmem:[%s1114_s5 + $0x28] sm:$0xff] %v725_v33   ;;  %v720_v38 = vpack.c.bf16 %v264_v34, %v263_v32  ;;  %v504_v40 = vpop.f32.mrf.mxu1  ;;  %v241_v42 = vadd.f32 %v1021_v25, %v240_v37  ;;  %v269_v48 = vmax.f32 %v249_v39, 0.0 }
  0xfe   :  { %787 = vst [vmem:[%s1113_s6 + $0x20] sm:$0xff] %v760_v36   ;;  %v854_v41 = vpop.f32.mrf.mxu0  ;;  %v505_v52 = vadd.f32 %v1027_v29, %v504_v40 }
  0xff   :  { %780 = vst [vmem:[%s1114_s5 + $0x20] sm:$0xff] %v720_v38   ;;  %v252_v43 = vadd.f32 %v854_v41, %v1021_v25  ;;  %v886_v44 = vpop.f32.mrf.mxu1  ;;  %v267_v55 = vmax.f32 %v241_v42, 0.0 }
 0x100   :  { %v516_v46 = vadd.f32 %v886_v44, %v1027_v29  ;;  %v243_v47 = vpop.f32.mrf.mxu0 }
 0x101   :  { %v270_v49 = vmax.f32 %v252_v43, 0.0  ;;  %v244_v50 = vadd.f32 %v1021_v25, %v243_v47  ;;  %v507_v51 = vpop.f32.mrf.mxu1 }
 0x102   :  { %v775_v53 = vpack.c.bf16 %v516_v46, %v513_v45  ;;  %v508_v54 = vadd.f32 %v1027_v29, %v507_v51 }
 0x103   :  { %v735_v56 = vpack.c.bf16 %v270_v49, %v269_v48  ;;  %v268_v57 = vmax.f32 %v244_v50, 0.0 }
 0x104   :  { %790 = vst [vmem:[%s1113_s6 + $0x38] sm:$0xff] %v775_v53   ;;  %v770_v58 = vpack.c.bf16 %v508_v54, %v505_v52 }
 0x105   :  { %783 = vst [vmem:[%s1114_s5 + $0x38] sm:$0xff] %v735_v56   ;;  %v730_v59 = vpack.c.bf16 %v268_v57, %v267_v55 }
 0x106   :  { %789 = vst [vmem:[%s1113_s6 + $0x30] sm:$0xff] %v770_v58  }
 0x107   :  { %782 = vst [vmem:[%s1114_s5 + $0x30] sm:$0xff] %v730_v59  }

// kernel: _lambda_.38
= control target key start
LH: loop header
LB: loop body
LE: loop exit
PB: predicated region body
PF: predicated region fallthrough
CT: control target
= control target key end

     0   :  { %vm520_vm0 = vcmask 1040384   ;;  %vm2185_vm1 = vcmask 1041409   ;;  %vm2187_vm2 = vcmask 1042434   ;;  %vm2189_vm3 = vcmask 1043459   ;;  %s5950_s0 = inlined_call_operand.vmem [shape: bf16[128,9,128], index: 0, kind: input, shape index: {}]   ;;  %s5951_s1 = inlined_call_operand.vmem [shape: bf16[128,128], index: 1, kind: output, shape index: {}]  }
   0x1   :  { %v2625_v0 = vld [vmem:[%s5950_s0] ss:$8 sps:$4 sm:$0xff]   ;;  %v2630_v1 = vld [vmem:[%s5950_s0 + $0x4] sm:$0x1]  ;;  %v2635_v2 = vld [vmem:[%s5950_s0 + $0xc] sm:$0x1] }
   0x2   :  { %v2640_v3 = vld [vmem:[%s5950_s0 + $0x10] ss:$8 sps:$4 sm:$0xff]   ;;  %v2645_v4 = vld [vmem:[%s5950_s0 + $0x14] sm:$0x1]  ;;  %v2650_v5 = vld [vmem:[%s5950_s0 + $0x1c] sm:$0x1] }
   0x3   :  { %v2659_v10 = vld [vmem:[%s5950_s0 + $0x20] ss:$8 sps:$4 sm:$0xff]   ;;  %v2664_v11 = vld [vmem:[%s5950_s0 + $0x24] sm:$0x1]  ;;  %v2669_v12 = vld [vmem:[%s5950_s0 + $0x2c] sm:$0x1] }
   0x4   :  { %v2678_v17 = vld [vmem:[%s5950_s0 + $0x30] ss:$8 sps:$4 sm:$0xff]   ;;  %v2683_v18 = vld [vmem:[%s5950_s0 + $0x34] sm:$0x1]  ;;  %v2688_v19 = vld [vmem:[%s5950_s0 + $0x3c] sm:$0x1] }
   0x5   :  { %v2697_v24 = vld [vmem:[%s5950_s0 + $0x40] ss:$8 sps:$4 sm:$0xff]   ;;  %v2702_v25 = vld [vmem:[%s5950_s0 + $0x44] sm:$0x1]  ;;  %v2707_v26 = vld [vmem:[%s5950_s0 + $0x4c] sm:$0x1] }
   0x6   :  { %v2716_v31 = vld [vmem:[%s5950_s0 + $0x50] ss:$8 sps:$4 sm:$0xff]   ;;  %v2721_v32 = vld [vmem:[%s5950_s0 + $0x54] sm:$0x1]  ;;  %v2726_v33 = vld [vmem:[%s5950_s0 + $0x5c] sm:$0x1] }
   0x7   :  { %v2735_v38 = vld [vmem:[%s5950_s0 + $0x60] ss:$8 sps:$4 sm:$0xff]   ;;  %v2740_v39 = vld [vmem:[%s5950_s0 + $0x64] sm:$0x1]  ;;  %v2745_v40 = vld [vmem:[%s5950_s0 + $0x6c] sm:$0x1] }
   0x8   :  { %v2754_v45 = vld [vmem:[%s5950_s0 + $0x70] ss:$8 sps:$4 sm:$0xff]   ;;  %v2759_v46 = vld [vmem:[%s5950_s0 + $0x74] sm:$0x1]  ;;  %v2764_v47 = vld [vmem:[%s5950_s0 + $0x7c] sm:$0x1] }
   0x9   :  { %v2773_v52 = vld [vmem:[%s5950_s0 + $0x80] ss:$8 sps:$4 sm:$0xff]   ;;  %v2778_v53 = vld [vmem:[%s5950_s0 + $0x84] sm:$0x1]  ;;  %v2783_v54 = vld [vmem:[%s5950_s0 + $0x8c] sm:$0x1] }
   0xa   :  { %v2792_v59 = vld [vmem:[%s5950_s0 + $0x90] ss:$8 sps:$4 sm:$0xff]   ;;  %v2797_v60 = vld [vmem:[%s5950_s0 + $0x94] sm:$0x1]  ;;  %v2802_v61 = vld [vmem:[%s5950_s0 + $0x9c] sm:$0x1] }
   0xb   :  { %v2811_v50 = vld [vmem:[%s5950_s0 + $0xa0] ss:$8 sps:$4 sm:$0xff]   ;;  %v2816_v48 = vld [vmem:[%s5950_s0 + $0xa4] sm:$0x1]  ;;  %v2821_v62 = vld [vmem:[%s5950_s0 + $0xac] sm:$0x1] }
   0xc   :  { %v2830_v56 = vld [vmem:[%s5950_s0 + $0xb0] ss:$8 sps:$4 sm:$0xff]   ;;  %v2835_v51 = vld [vmem:[%s5950_s0 + $0xb4] sm:$0x1]  ;;  %v2840_v63 = vld [vmem:[%s5950_s0 + $0xbc] sm:$0x1] }
   0xd   :  { %v2849_v43 = vld [vmem:[%s5950_s0 + $0xc0] ss:$8 sps:$4 sm:$0xff]   ;;  %v2854_v41 = vld [vmem:[%s5950_s0 + $0xc4] sm:$0x1]  ;;  %v2859_v57 = vld [vmem:[%s5950_s0 + $0xcc] sm:$0x1] }
   0xe   :  { %6252 = vst [vmem:[#allocation2_spill] sm:$0xff] %v2849_v43  ;;  %v2868_v34 = vld [vmem:[%s5950_s0 + $0xd0] ss:$8 sps:$4 sm:$0xff]   ;;  %v2873_v44 = vld [vmem:[%s5950_s0 + $0xd4] sm:$0x1]  ;;  %vm2191_vm4 = vcmask 1044484  }
   0xf   :  { %6253 = vst [vmem:[#allocation3_spill] sm:$0xff] %v2868_v34  ;;  %v2878_v55 = vld [vmem:[%s5950_s0 + $0xdc] sm:$0x1]  ;;  %v2887_v37 = vld [vmem:[%s5950_s0 + $0xe0] ss:$8 sps:$4 sm:$0xff]   ;;  %vm2193_vm5 = vcmask 1045509  }
  0x10   :  { %6254 = vst [vmem:[#allocation4_spill] sm:$0xff] %v2887_v37  ;;  %v2892_v35 = vld [vmem:[%s5950_s0 + $0xe4] sm:$0x1]  ;;  %v2897_v58 = vld [vmem:[%s5950_s0 + $0xec] sm:$0x1]  ;;  %vm2195_vm6 = vcmask 1046534  }
  0x11   :  { %6255 = vst [vmem:[#allocation5_spill] sm:$0xff] %v2892_v35  ;;  %6256 = vst [vmem:[#allocation6_spill] sm:$0xff] %v2897_v58  ;;  %v2906_v27 = vld [vmem:[%s5950_s0 + $0xf0] ss:$8 sps:$4 sm:$0xff]   ;;  %v2911_v22 = vld [vmem:[%s5950_s0 + $0xf4] sm:$0x1] }
  0x12   :  { %6257 = vst [vmem:[#allocation7_spill] sm:$0xff] %v2906_v27  ;;  %6258 = vst [vmem:[#allocation8_spill] sm:$0xff] %v2911_v22  ;;  %v2916_v49 = vld [vmem:[%s5950_s0 + $0xfc] sm:$0x1]  ;;  %v2925_v30 = vld [vmem:[%s5950_s0 + $0x100] ss:$8 sps:$4 sm:$0xff]  }
  0x13   :  { %6259 = vst [vmem:[#allocation9_spill] sm:$0xff] %v2916_v49  ;;  %6260 = vst [vmem:[#allocation10_spill] sm:$0xff] %v2925_v30  ;;  %v2930_v28 = vld [vmem:[%s5950_s0 + $0x104] sm:$0x1]  ;;  %v2935_v36 = vld [vmem:[%s5950_s0 + $0x10c] sm:$0x1] }
  0x14   :  { %6261 = vst [vmem:[#allocation11_spill] sm:$0xff] %v2930_v28  ;;  %6262 = vst [vmem:[#allocation12_spill] sm:$0xff] %v2935_v36  ;;  %v2944_v21 = vld [vmem:[%s5950_s0 + $0x110] ss:$8 sps:$4 sm:$0xff]   ;;  %v2949_v15 = vld [vmem:[%s5950_s0 + $0x114] sm:$0x1]  ;;  %v6404_v36 = vunpack.c.l.bf16 %v2630_v1 }
  0x15   :  { %6263 = vst [vmem:[#allocation13_spill] sm:$0xff] %v2944_v21  ;;  %6264 = vst [vmem:[#allocation14_spill] sm:$0xff] %v2949_v15  ;;  %v2954_v42 = vld [vmem:[%s5950_s0 + $0x11c] sm:$0x1]  ;;  %v2963_v8 = vld [vmem:[%s5950_s0 + $0x120] ss:$8 sps:$4 sm:$0xff]   ;;  %v6409_v15 = vunpack.c.h.bf16 %v2625_v0 }
  0x16   :  { %6265 = vst [vmem:[#allocation15_spill] sm:$0xff] %v2954_v42  ;;  %6266 = vst [vmem:[#allocation16_spill] sm:$0xff] %v2963_v8  ;;  %v2968_v6 = vld [vmem:[%s5950_s0 + $0x124] sm:$0x1]  ;;  %v2973_v29 = vld [vmem:[%s5950_s0 + $0x12c] sm:$0x1]  ;;  %v6408_v42 = vunpack.c.l.bf16 %v2625_v0  ;;  %v6415_v0 = vunpack.c.l.bf16 %v2688_v19 }
  0x17   :  { %6267 = vst [vmem:[#allocation17_spill] sm:$0xff] %v2968_v6  ;;  %6268 = vst [vmem:[#allocation18_spill] sm:$0xff] %v2973_v29  ;;  %v2982_v14 = vld [vmem:[%s5950_s0 + $0x130] ss:$8 sps:$4 sm:$0xff]   ;;  %v2987_v9 = vld [vmem:[%s5950_s0 + $0x134] sm:$0x1] }
  0x18   :  { %6269 = vst [vmem:[#allocation19_spill] sm:$0xff] %v2982_v14  ;;  %6270 = vst [vmem:[#allocation20_spill] sm:$0xff] %v2987_v9  ;;  %v2992_v20 = vld [vmem:[%s5950_s0 + $0x13c] sm:$0x1]  ;;  %v3001_v21 = vld [vmem:[%s5950_s0 + $0x140] ss:$8 sps:$4 sm:$0xff]  }
  0x19   :  { %6271 = vst [vmem:[#allocation21_spill] sm:$0xff] %v2992_v20  ;;  %6272 = vst [vmem:[#allocation22_spill] sm:$0xff] %v3001_v21  ;;  %v3006_v30 = vld [vmem:[%s5950_s0 + $0x144] sm:$0x1]  ;;  %v3011_v23 = vld [vmem:[%s5950_s0 + $0x14c] sm:$0x1] }
  0x1a   :  { %6273 = vst [vmem:[#allocation23_spill] sm:$0xff] %v3006_v30  ;;  %6274 = vst [vmem:[#allocation24_spill] sm:$0xff] %v3011_v23  ;;  %v3020_v29 = vld [vmem:[%s5950_s0 + $0x150] ss:$8 sps:$4 sm:$0xff]   ;;  %v3025_v6 = vld [vmem:[%s5950_s0 + $0x154] sm:$0x1] }
  0x1b   :  { %6275 = vst [vmem:[#allocation25_spill] sm:$0xff] %v3020_v29  ;;  %6276 = vst [vmem:[#allocation26_spill] sm:$0xff] %v3025_v6  ;;  %v3030_v13 = vld [vmem:[%s5950_s0 + $0x15c] sm:$0x1]  ;;  %v3039_v20 = vld [vmem:[%s5950_s0 + $0x160] ss:$8 sps:$4 sm:$0xff]  }
  0x1c   :  { %6277 = vst [vmem:[#allocation27_spill] sm:$0xff] %v3030_v13  ;;  %6278 = vst [vmem:[#allocation28_spill] sm:$0xff] %v3039_v20  ;;  %v3044_v9 = vld [vmem:[%s5950_s0 + $0x164] sm:$0x1]  ;;  %v3049_v16 = vld [vmem:[%s5950_s0 + $0x16c] sm:$0x1] }
  0x1d   :  { %6279 = vst [vmem:[#allocation29_spill] sm:$0xff] %v3044_v9  ;;  %6280 = vst [vmem:[#allocation30_spill] sm:$0xff] %v3049_v16  ;;  %v3058_v23 = vld [vmem:[%s5950_s0 + $0x170] ss:$8 sps:$4 sm:$0xff]   ;;  %v3063_v30 = vld [vmem:[%s5950_s0 + $0x174] sm:$0x1] }
  0x1e   :  { %6281 = vst [vmem:[#allocation31_spill] sm:$0xff] %v3058_v23  ;;  %6282 = vst [vmem:[#allocation32_spill] sm:$0xff] %v3063_v30  ;;  %v3068_v7 = vld [vmem:[%s5950_s0 + $0x17c] sm:$0x1]  ;;  %v3077_v13 = vld [vmem:[%s5950_s0 + $0x180] ss:$8 sps:$4 sm:$0xff]  }
  0x1f   :  { %6283 = vst [vmem:[#allocation33_spill] sm:$0xff] %v3068_v7  ;;  %6284 = vst [vmem:[#allocation34_spill] sm:$0xff] %v3077_v13  ;;  %v3082_v6 = vld [vmem:[%s5950_s0 + $0x184] sm:$0x1]  ;;  %v3087_v8 = vld [vmem:[%s5950_s0 + $0x18c] sm:$0x1] }
  0x20   :  { %6285 = vst [vmem:[#allocation35_spill] sm:$0xff] %v3082_v6  ;;  %6286 = vst [vmem:[#allocation36_spill] sm:$0xff] %v3087_v8  ;;  %v3096_v16 = vld [vmem:[%s5950_s0 + $0x190] ss:$8 sps:$4 sm:$0xff]   ;;  %v3101_v9 = vld [vmem:[%s5950_s0 + $0x194] sm:$0x1] }
  0x21   :  { %6287 = vst [vmem:[#allocation37_spill] sm:$0xff] %v3096_v16  ;;  %6288 = vst [vmem:[#allocation38_spill] sm:$0xff] %v3101_v9  ;;  %v3106_v14 = vld [vmem:[%s5950_s0 + $0x19c] sm:$0x1]  ;;  %v3115_v7 = vld [vmem:[%s5950_s0 + $0x1a0] ss:$8 sps:$4 sm:$0xff]  }
  0x22   :  { %6289 = vst [vmem:[#allocation39_spill] sm:$0xff] %v3106_v14  ;;  %6290 = vst [vmem:[#allocation40_spill] sm:$0xff] %v3115_v7  ;;  %v3120_v30 = vld [vmem:[%s5950_s0 + $0x1a4] sm:$0x1]  ;;  %v3125_v21 = vld [vmem:[%s5950_s0 + $0x1ac] sm:$0x1] }
  0x23   :  { %6291 = vst [vmem:[#allocation41_spill] sm:$0xff] %v3120_v30  ;;  %6292 = vst [vmem:[#allocation42_spill] sm:$0xff] %v3125_v21  ;;  %v3134_v8 = vld [vmem:[%s5950_s0 + $0x1b0] ss:$8 sps:$4 sm:$0xff]   ;;  %v3139_v6 = vld [vmem:[%s5950_s0 + $0x1b4] sm:$0x1] }
  0x24   :  { %6293 = vst [vmem:[#allocation43_spill] sm:$0xff] %v3134_v8  ;;  %6294 = vst [vmem:[#allocation44_spill] sm:$0xff] %v3139_v6  ;;  %v3144_v29 = vld [vmem:[%s5950_s0 + $0x1bc] sm:$0x1]  ;;  %v3153_v14 = vld [vmem:[%s5950_s0 + $0x1c0] ss:$8 sps:$4 sm:$0xff]  }
  0x25   :  { %6295 = vst [vmem:[#allocation45_spill] sm:$0xff] %v3144_v29  ;;  %6296 = vst [vmem:[#allocation46_spill] sm:$0xff] %v3153_v14  ;;  %v3158_v9 = vld [vmem:[%s5950_s0 + $0x1c4] sm:$0x1]  ;;  %v3163_v20 = vld [vmem:[%s5950_s0 + $0x1cc] sm:$0x1] }
  0x26   :  { %6297 = vst [vmem:[#allocation47_spill] sm:$0xff] %v3158_v9  ;;  %6298 = vst [vmem:[#allocation48_spill] sm:$0xff] %v3163_v20  ;;  %v3172_v21 = vld [vmem:[%s5950_s0 + $0x1d0] ss:$8 sps:$4 sm:$0xff]   ;;  %v3177_v30 = vld [vmem:[%s5950_s0 + $0x1d4] sm:$0x1] }
  0x27   :  { %6299 = vst [vmem:[#allocation49_spill] sm:$0xff] %v3172_v21  ;;  %6300 = vst [vmem:[#allocation50_spill] sm:$0xff] %v3177_v30  ;;  %v3182_v23 = vld [vmem:[%s5950_s0 + $0x1dc] sm:$0x1]  ;;  %v3191_v29 = vld [vmem:[%s5950_s0 + $0x1e0] ss:$8 sps:$4 sm:$0xff]  }
  0x28   :  { %6301 = vst [vmem:[#allocation51_spill] sm:$0xff] %v3182_v23  ;;  %6302 = vst [vmem:[#allocation52_spill] sm:$0xff] %v3191_v29  ;;  %v3196_v6 = vld [vmem:[%s5950_s0 + $0x1e4] sm:$0x1]  ;;  %v3201_v13 = vld [vmem:[%s5950_s0 + $0x1ec] sm:$0x1] }
  0x29   :  { %6303 = vst [vmem:[#allocation53_spill] sm:$0xff] %v3196_v6  ;;  %6304 = vst [vmem:[#allocation54_spill] sm:$0xff] %v3201_v13  ;;  %v3210_v20 = vld [vmem:[%s5950_s0 + $0x1f0] ss:$8 sps:$4 sm:$0xff]   ;;  %v3215_v9 = vld [vmem:[%s5950_s0 + $0x1f4] sm:$0x1] }
  0x2a   :  { %6305 = vst [vmem:[#allocation55_spill] sm:$0xff] %v3210_v20  ;;  %6306 = vst [vmem:[#allocation56_spill] sm:$0xff] %v3215_v9  ;;  %v3220_v16 = vld [vmem:[%s5950_s0 + $0x1fc] sm:$0x1]  ;;  %v3229_v23 = vld [vmem:[%s5950_s0 + $0x200] ss:$8 sps:$4 sm:$0xff]  }
  0x2b   :  { %6307 = vst [vmem:[#allocation57_spill] sm:$0xff] %v3220_v16  ;;  %6308 = vst [vmem:[#allocation58_spill] sm:$0xff] %v3229_v23  ;;  %v3234_v30 = vld [vmem:[%s5950_s0 + $0x204] sm:$0x1]  ;;  %v3239_v7 = vld [vmem:[%s5950_s0 + $0x20c] sm:$0x1] }
  0x2c   :  { %6309 = vst [vmem:[#allocation59_spill] sm:$0xff] %v3234_v30  ;;  %6310 = vst [vmem:[#allocation60_spill] sm:$0xff] %v3239_v7  ;;  %v3248_v13 = vld [vmem:[%s5950_s0 + $0x210] ss:$8 sps:$4 sm:$0xff]   ;;  %v3253_v6 = vld [vmem:[%s5950_s0 + $0x214] sm:$0x1] }
  0x2d   :  { %6311 = vst [vmem:[#allocation61_spill] sm:$0xff] %v3248_v13  ;;  %6312 = vst [vmem:[#allocation62_spill] sm:$0xff] %v3253_v6  ;;  %v3258_v8 = vld [vmem:[%s5950_s0 + $0x21c] sm:$0x1]  ;;  %v3267_v16 = vld [vmem:[%s5950_s0 + $0x220] ss:$8 sps:$4 sm:$0xff]  }
  0x2e   :  { %6313 = vst [vmem:[#allocation63_spill] sm:$0xff] %v3258_v8  ;;  %6314 = vst [vmem:[#allocation64_spill] sm:$0xff] %v3267_v16  ;;  %v3272_v9 = vld [vmem:[%s5950_s0 + $0x224] sm:$0x1]  ;;  %v3277_v14 = vld [vmem:[%s5950_s0 + $0x22c] sm:$0x1] }
  0x2f   :  { %6315 = vst [vmem:[#allocation65_spill] sm:$0xff] %v3272_v9  ;;  %6316 = vst [vmem:[#allocation66_spill] sm:$0xff] %v3277_v14  ;;  %v3286_v7 = vld [vmem:[%s5950_s0 + $0x230] ss:$8 sps:$4 sm:$0xff]   ;;  %v3291_v30 = vld [vmem:[%s5950_s0 + $0x234] sm:$0x1] }
  0x30   :  { %6317 = vst [vmem:[#allocation67_spill] sm:$0xff] %v3286_v7  ;;  %6318 = vst [vmem:[#allocation68_spill] sm:$0xff] %v3291_v30  ;;  %v3296_v21 = vld [vmem:[%s5950_s0 + $0x23c] sm:$0x1]  ;;  %v3305_v8 = vld [vmem:[%s5950_s0 + $0x240] ss:$8 sps:$4 sm:$0xff]  }
  0x31   :  { %6319 = vst [vmem:[#allocation69_spill] sm:$0xff] %v3296_v21  ;;  %6320 = vst [vmem:[#allocation70_spill] sm:$0xff] %v3305_v8  ;;  %v3310_v6 = vld [vmem:[%s5950_s0 + $0x244] sm:$0x1]  ;;  %v3315_v29 = vld [vmem:[%s5950_s0 + $0x24c] sm:$0x1] }
  0x32   :  { %6321 = vst [vmem:[#allocation71_spill] sm:$0xff] %v3310_v6  ;;  %6322 = vst [vmem:[#allocation72_spill] sm:$0xff] %v3315_v29  ;;  %v3324_v14 = vld [vmem:[%s5950_s0 + $0x250] ss:$8 sps:$4 sm:$0xff]   ;;  %v3329_v9 = vld [vmem:[%s5950_s0 + $0x254] sm:$0x1] }
  0x33   :  { %6323 = vst [vmem:[#allocation73_spill] sm:$0xff] %v3324_v14  ;;  %6324 = vst [vmem:[#allocation74_spill] sm:$0xff] %v3329_v9  ;;  %v3334_v20 = vld [vmem:[%s5950_s0 + $0x25c] sm:$0x1]  ;;  %v3343_v21 = vld [vmem:[%s5950_s0 + $0x260] ss:$8 sps:$4 sm:$0xff]  }
  0x34   :  { %6325 = vst [vmem:[#allocation75_spill] sm:$0xff] %v3334_v20  ;;  %6326 = vst [vmem:[#allocation76_spill] sm:$0xff] %v3343_v21  ;;  %v3348_v30 = vld [vmem:[%s5950_s0 + $0x264] sm:$0x1]  ;;  %v3353_v23 = vld [vmem:[%s5950_s0 + $0x26c] sm:$0x1] }
  0x35   :  { %6327 = vst [vmem:[#allocation77_spill] sm:$0xff] %v3348_v30  ;;  %6328 = vst [vmem:[#allocation78_spill] sm:$0xff] %v3353_v23  ;;  %v3362_v29 = vld [vmem:[%s5950_s0 + $0x270] ss:$8 sps:$4 sm:$0xff]   ;;  %v3367_v6 = vld [vmem:[%s5950_s0 + $0x274] sm:$0x1] }
  0x36   :  { %6329 = vst [vmem:[#allocation79_spill] sm:$0xff] %v3362_v29  ;;  %6330 = vst [vmem:[#allocation80_spill] sm:$0xff] %v3367_v6  ;;  %v3372_v13 = vld [vmem:[%s5950_s0 + $0x27c] sm:$0x1]  ;;  %v3381_v20 = vld [vmem:[%s5950_s0 + $0x280] ss:$8 sps:$4 sm:$0xff]  }
  0x37   :  { %6331 = vst [vmem:[#allocation81_spill] sm:$0xff] %v3372_v13  ;;  %6332 = vst [vmem:[#allocation82_spill] sm:$0xff] %v3381_v20  ;;  %v3386_v9 = vld [vmem:[%s5950_s0 + $0x284] sm:$0x1]  ;;  %v3391_v16 = vld [vmem:[%s5950_s0 + $0x28c] sm:$0x1] }
  0x38   :  { %6333 = vst [vmem:[#allocation83_spill] sm:$0xff] %v3386_v9  ;;  %6334 = vst [vmem:[#allocation84_spill] sm:$0xff] %v3391_v16  ;;  %v3400_v23 = vld [vmem:[%s5950_s0 + $0x290] ss:$8 sps:$4 sm:$0xff]   ;;  %v3405_v30 = vld [vmem:[%s5950_s0 + $0x294] sm:$0x1] }
  0x39   :  { %6335 = vst [vmem:[#allocation85_spill] sm:$0xff] %v3400_v23  ;;  %6336 = vst [vmem:[#allocation86_spill] sm:$0xff] %v3405_v30  ;;  %v3410_v7 = vld [vmem:[%s5950_s0 + $0x29c] sm:$0x1]  ;;  %v3419_v13 = vld [vmem:[%s5950_s0 + $0x2a0] ss:$8 sps:$4 sm:$0xff]  }
  0x3a   :  { %6337 = vst [vmem:[#allocation87_spill] sm:$0xff] %v3410_v7  ;;  %6338 = vst [vmem:[#allocation88_spill] sm:$0xff] %v3419_v13  ;;  %v3424_v6 = vld [vmem:[%s5950_s0 + $0x2a4] sm:$0x1]  ;;  %v3429_v8 = vld [vmem:[%s5950_s0 + $0x2ac] sm:$0x1] }
  0x3b   :  { %6339 = vst [vmem:[#allocation89_spill] sm:$0xff] %v3424_v6  ;;  %6340 = vst [vmem:[#allocation90_spill] sm:$0xff] %v3429_v8  ;;  %v3438_v16 = vld [vmem:[%s5950_s0 + $0x2b0] ss:$8 sps:$4 sm:$0xff]   ;;  %v3443_v9 = vld [vmem:[%s5950_s0 + $0x2b4] sm:$0x1] }
  0x3c   :  { %6341 = vst [vmem:[#allocation91_spill] sm:$0xff] %v3438_v16  ;;  %6342 = vst [vmem:[#allocation92_spill] sm:$0xff] %v3443_v9  ;;  %v3448_v14 = vld [vmem:[%s5950_s0 + $0x2bc] sm:$0x1]  ;;  %v3457_v7 = vld [vmem:[%s5950_s0 + $0x2c0] ss:$8 sps:$4 sm:$0xff]  }
  0x3d   :  { %6343 = vst [vmem:[#allocation93_spill] sm:$0xff] %v3448_v14  ;;  %6344 = vst [vmem:[#allocation94_spill] sm:$0xff] %v3457_v7  ;;  %v3462_v30 = vld [vmem:[%s5950_s0 + $0x2c4] sm:$0x1]  ;;  %v3467_v21 = vld [vmem:[%s5950_s0 + $0x2cc] sm:$0x1] }
  0x3e   :  { %6345 = vst [vmem:[#allocation95_spill] sm:$0xff] %v3462_v30  ;;  %6346 = vst [vmem:[#allocation96_spill] sm:$0xff] %v3467_v21  ;;  %v3476_v8 = vld [vmem:[%s5950_s0 + $0x2d0] ss:$8 sps:$4 sm:$0xff]   ;;  %v3481_v6 = vld [vmem:[%s5950_s0 + $0x2d4] sm:$0x1] }
  0x3f   :  { %6347 = vst [vmem:[#allocation97_spill] sm:$0xff] %v3476_v8  ;;  %6348 = vst [vmem:[#allocation98_spill] sm:$0xff] %v3481_v6  ;;  %v3486_v29 = vld [vmem:[%s5950_s0 + $0x2dc] sm:$0x1]  ;;  %v3495_v14 = vld [vmem:[%s5950_s0 + $0x2e0] ss:$8 sps:$4 sm:$0xff]  }
  0x40   :  { %6349 = vst [vmem:[#allocation99_spill] sm:$0xff] %v3486_v29  ;;  %6350 = vst [vmem:[#allocation100_spill] sm:$0xff] %v3495_v14  ;;  %v3500_v9 = vld [vmem:[%s5950_s0 + $0x2e4] sm:$0x1]  ;;  %v3505_v20 = vld [vmem:[%s5950_s0 + $0x2ec] sm:$0x1] }
  0x41   :  { %6351 = vst [vmem:[#allocation101_spill] sm:$0xff] %v3500_v9  ;;  %6352 = vst [vmem:[#allocation102_spill] sm:$0xff] %v3505_v20  ;;  %v3514_v21 = vld [vmem:[%s5950_s0 + $0x2f0] ss:$8 sps:$4 sm:$0xff]   ;;  %v3519_v30 = vld [vmem:[%s5950_s0 + $0x2f4] sm:$0x1] }
  0x42   :  { %6353 = vst [vmem:[#allocation103_spill] sm:$0xff] %v3514_v21  ;;  %6354 = vst [vmem:[#allocation104_spill] sm:$0xff] %v3519_v30  ;;  %v3524_v23 = vld [vmem:[%s5950_s0 + $0x2fc] sm:$0x1]  ;;  %v3533_v29 = vld [vmem:[%s5950_s0 + $0x300] ss:$8 sps:$4 sm:$0xff]  }
  0x43   :  { %6355 = vst [vmem:[#allocation105_spill] sm:$0xff] %v3524_v23  ;;  %6356 = vst [vmem:[#allocation106_spill] sm:$0xff] %v3533_v29  ;;  %v3538_v6 = vld [vmem:[%s5950_s0 + $0x304] sm:$0x1]  ;;  %v3543_v13 = vld [vmem:[%s5950_s0 + $0x30c] sm:$0x1] }
  0x44   :  { %6357 = vst [vmem:[#allocation107_spill] sm:$0xff] %v3538_v6  ;;  %6358 = vst [vmem:[#allocation108_spill] sm:$0xff] %v3543_v13  ;;  %v3552_v20 = vld [vmem:[%s5950_s0 + $0x310] ss:$8 sps:$4 sm:$0xff]   ;;  %v3557_v9 = vld [vmem:[%s5950_s0 + $0x314] sm:$0x1] }
  0x45   :  { %6359 = vst [vmem:[#allocation109_spill] sm:$0xff] %v3552_v20  ;;  %6360 = vst [vmem:[#allocation110_spill] sm:$0xff] %v3557_v9  ;;  %v3562_v16 = vld [vmem:[%s5950_s0 + $0x31c] sm:$0x1]  ;;  %v3571_v23 = vld [vmem:[%s5950_s0 + $0x320] ss:$8 sps:$4 sm:$0xff]  }
  0x46   :  { %6361 = vst [vmem:[#allocation111_spill] sm:$0xff] %v3562_v16  ;;  %6362 = vst [vmem:[#allocation112_spill] sm:$0xff] %v3571_v23  ;;  %v3576_v30 = vld [vmem:[%s5950_s0 + $0x324] sm:$0x1]  ;;  %v3581_v7 = vld [vmem:[%s5950_s0 + $0x32c] sm:$0x1] }
  0x47   :  { %6363 = vst [vmem:[#allocation113_spill] sm:$0xff] %v3576_v30  ;;  %6364 = vst [vmem:[#allocation114_spill] sm:$0xff] %v3581_v7  ;;  %v3590_v13 = vld [vmem:[%s5950_s0 + $0x330] ss:$8 sps:$4 sm:$0xff]   ;;  %v3595_v6 = vld [vmem:[%s5950_s0 + $0x334] sm:$0x1] }
  0x48   :  { %6365 = vst [vmem:[#allocation115_spill] sm:$0xff] %v3590_v13  ;;  %6366 = vst [vmem:[#allocation116_spill] sm:$0xff] %v3595_v6  ;;  %v3600_v8 = vld [vmem:[%s5950_s0 + $0x33c] sm:$0x1]  ;;  %v3609_v16 = vld [vmem:[%s5950_s0 + $0x340] ss:$8 sps:$4 sm:$0xff]  }
  0x49   :  { %6367 = vst [vmem:[#allocation117_spill] sm:$0xff] %v3600_v8  ;;  %6368 = vst [vmem:[#allocation118_spill] sm:$0xff] %v3609_v16  ;;  %v3614_v9 = vld [vmem:[%s5950_s0 + $0x344] sm:$0x1]  ;;  %v3619_v14 = vld [vmem:[%s5950_s0 + $0x34c] sm:$0x1] }
  0x4a   :  { %6369 = vst [vmem:[#allocation119_spill] sm:$0xff] %v3614_v9  ;;  %6370 = vst [vmem:[#allocation120_spill] sm:$0xff] %v3619_v14  ;;  %v3628_v7 = vld [vmem:[%s5950_s0 + $0x350] ss:$8 sps:$4 sm:$0xff]   ;;  %v3633_v30 = vld [vmem:[%s5950_s0 + $0x354] sm:$0x1] }
  0x4b   :  { %6371 = vst [vmem:[#allocation121_spill] sm:$0xff] %v3628_v7  ;;  %6372 = vst [vmem:[#allocation122_spill] sm:$0xff] %v3633_v30  ;;  %v3638_v21 = vld [vmem:[%s5950_s0 + $0x35c] sm:$0x1]  ;;  %v3647_v8 = vld [vmem:[%s5950_s0 + $0x360] ss:$8 sps:$4 sm:$0xff]  }
  0x4c   :  { %6373 = vst [vmem:[#allocation123_spill] sm:$0xff] %v3638_v21  ;;  %6374 = vst [vmem:[#allocation124_spill] sm:$0xff] %v3647_v8  ;;  %v3652_v6 = vld [vmem:[%s5950_s0 + $0x364] sm:$0x1]  ;;  %v3657_v29 = vld [vmem:[%s5950_s0 + $0x36c] sm:$0x1] }
  0x4d   :  { %6375 = vst [vmem:[#allocation125_spill] sm:$0xff] %v3652_v6  ;;  %6376 = vst [vmem:[#allocation126_spill] sm:$0xff] %v3657_v29  ;;  %v3666_v14 = vld [vmem:[%s5950_s0 + $0x370] ss:$8 sps:$4 sm:$0xff]   ;;  %v3671_v9 = vld [vmem:[%s5950_s0 + $0x374] sm:$0x1] }
  0x4e   :  { %6377 = vst [vmem:[#allocation127_spill] sm:$0xff] %v3666_v14  ;;  %6378 = vst [vmem:[#allocation128_spill] sm:$0xff] %v3671_v9  ;;  %v3676_v20 = vld [vmem:[%s5950_s0 + $0x37c] sm:$0x1]  ;;  %v3685_v21 = vld [vmem:[%s5950_s0 + $0x380] ss:$8 sps:$4 sm:$0xff]  }
  0x4f   :  { %6379 = vst [vmem:[#allocation129_spill] sm:$0xff] %v3676_v20  ;;  %6380 = vst [vmem:[#allocation130_spill] sm:$0xff] %v3685_v21  ;;  %v3690_v30 = vld [vmem:[%s5950_s0 + $0x384] sm:$0x1]  ;;  %v3695_v13 = vld [vmem:[%s5950_s0 + $0x38c] sm:$0x1] }
  0x50   :  { %6381 = vst [vmem:[#allocation131_spill] sm:$0xff] %v3690_v30  ;;  %6382 = vst [vmem:[#allocation132_spill] sm:$0xff] %v3695_v13  ;;  %v3704_v29 = vld [vmem:[%s5950_s0 + $0x390] ss:$8 sps:$4 sm:$0xff]   ;;  %v3709_v6 = vld [vmem:[%s5950_s0 + $0x394] sm:$0x1] }
  0x51   :  { %6383 = vst [vmem:[#allocation133_spill] sm:$0xff] %v3704_v29  ;;  %6384 = vst [vmem:[#allocation134_spill] sm:$0xff] %v3709_v6  ;;  %v3714_v16 = vld [vmem:[%s5950_s0 + $0x39c] sm:$0x1]  ;;  %v3723_v20 = vld [vmem:[%s5950_s0 + $0x3a0] ss:$8 sps:$4 sm:$0xff]  }
  0x52   :  { %6385 = vst [vmem:[#allocation135_spill] sm:$0xff] %v3714_v16  ;;  %6386 = vst [vmem:[#allocation136_spill] sm:$0xff] %v3723_v20  ;;  %v3728_v9 = vld [vmem:[%s5950_s0 + $0x3a4] sm:$0x1]  ;;  %v3733_v23 = vld [vmem:[%s5950_s0 + $0x3ac] sm:$0x1]  ;;  %v6405_v20 = vunpack.c.l.bf16 %v2635_v2  ;;  %v6411_v2 = vunpack.c.h.bf16 %v2640_v3 }
  0x53   :  { %6387 = vst [vmem:[#allocation137_spill] sm:$0xff] %v3728_v9  ;;  %6388 = vst [vmem:[#allocation138_spill] sm:$0xff] %v3733_v23  ;;  %v3742_v13 = vld [vmem:[%s5950_s0 + $0x3b0] ss:$8 sps:$4 sm:$0xff]   ;;  %v3747_v30 = vld [vmem:[%s5950_s0 + $0x3b4] sm:$0x1] }
  0x54   :  { %6389 = vst [vmem:[#allocation139_spill] sm:$0xff] %v3742_v13  ;;  %6390 = vst [vmem:[#allocation140_spill] sm:$0xff] %v3747_v30  ;;  %v3752_v7 = vld [vmem:[%s5950_s0 + $0x3bc] sm:$0x1]  ;;  %v3761_v16 = vld [vmem:[%s5950_s0 + $0x3c0] ss:$8 sps:$4 sm:$0xff]  }
  0x55   :  { %6391 = vst [vmem:[#allocation141_spill] sm:$0xff] %v3752_v7  ;;  %6392 = vst [vmem:[#allocation142_spill] sm:$0xff] %v3761_v16  ;;  %v3766_v6 = vld [vmem:[%s5950_s0 + $0x3c4] sm:$0x1]  ;;  %v3771_v8 = vld [vmem:[%s5950_s0 + $0x3cc] sm:$0x1]  ;;  %v6406_v16 = vunpack.c.l.bf16 %v2645_v4  ;;  %v6412_v4 = vunpack.c.l.bf16 %v2664_v11  ;;  %v6416_v11 = vunpack.c.l.bf16 %v2659_v10 }
  0x56   :  { %6393 = vst [vmem:[#allocation143_spill] sm:$0xff] %v3766_v6  ;;  %6394 = vst [vmem:[#allocation144_spill] sm:$0xff] %v3771_v8  ;;  %v3780_v23 = vld [vmem:[%s5950_s0 + $0x3d0] ss:$8 sps:$4 sm:$0xff]   ;;  %v3785_v9 = vld [vmem:[%s5950_s0 + $0x3d4] sm:$0x1] }
  0x57   :  { %6395 = vst [vmem:[#allocation145_spill] sm:$0xff] %v3780_v23  ;;  %6396 = vst [vmem:[#allocation146_spill] sm:$0xff] %v3785_v9  ;;  %v3790_v14 = vld [vmem:[%s5950_s0 + $0x3dc] sm:$0x1]  ;;  %v3799_v7 = vld [vmem:[%s5950_s0 + $0x3e0] ss:$8 sps:$4 sm:$0xff]  }
  0x58   :  { %6397 = vst [vmem:[#allocation147_spill] sm:$0xff] %v3790_v14  ;;  %6398 = vst [vmem:[#allocation148_spill] sm:$0xff] %v3799_v7  ;;  %v3804_v30 = vld [vmem:[%s5950_s0 + $0x3e4] sm:$0x1]  ;;  %v3809_v21 = vld [vmem:[%s5950_s0 + $0x3ec] sm:$0x1]  ;;  %v6407_v14 = vunpack.c.l.bf16 %v2650_v5  ;;  %v6413_v5 = vunpack.c.l.bf16 %v2669_v12 }
  0x59   :  { %6399 = vst [vmem:[#allocation149_spill] sm:$0xff] %v3804_v30  ;;  %6400 = vst [vmem:[#allocation150_spill] sm:$0xff] %v3809_v21  ;;  %v3818_v8 = vld [vmem:[%s5950_s0 + $0x3f0] ss:$8 sps:$4 sm:$0xff]   ;;  %v3823_v6 = vld [vmem:[%s5950_s0 + $0x3f4] sm:$0x1] }
  0x5a   :  { %6401 = vst [vmem:[#allocation151_spill] sm:$0xff] %v3818_v8  ;;  %6402 = vst [vmem:[#allocation152_spill] sm:$0xff] %v3823_v6  ;;  %v3828_v29 = vld [vmem:[%s5950_s0 + $0x3fc] sm:$0x1]  ;;  %v521_v28 = vsel %vm520_vm0, %v6404_v36, -inf  ;;  %v529_v13 = vsel %vm520_vm0, %v6405_v20, -inf  ;;  %v6410_v36 = vunpack.c.l.bf16 %v2640_v3 }
  0x5b   :  { %6403 = vst [vmem:[#allocation153_spill] sm:$0xff] %v3828_v29  ;;  %v537_v23 = vsel %vm520_vm0, %v6406_v16, -inf  ;;  %v545_v9 = vsel %vm520_vm0, %v6407_v14, -inf  ;;  %v522_v8 = vmax.f32 %v6408_v42, %v521_v28  ;;  %v530_v1 = vmax.f32 %v6409_v15, %v529_v13 }
  0x5c   :  { %v538_v7 = vmax.f32 %v6410_v36, %v537_v23  ;;  %v546_v20 = vmax.f32 %v6411_v2, %v545_v9  ;;  %v553_v16 = vsel %vm520_vm0, %v6412_v4, -inf  ;;  %v561_v14 = vsel %vm520_vm0, %v6413_v5, -inf }
  0x5d   :  { %v6414_v29 = vunpack.c.l.bf16 %v2683_v18  ;;  %v577_v13 = vsel %vm520_vm0, %v6415_v0, -inf  ;;  %v523_v15 = vrot.slane %v522_v8, 4  ;;  %v531_v23 = vrot.slane %v530_v1, 4 }
  0x5e   :  { %v539_v3 = vrot.slane %v538_v7, 4  ;;  %v547_v9 = vrot.slane %v546_v20, 4  ;;  %v554_v42 = vmax.f32 %v6416_v11, %v553_v16  ;;  %v6417_v36 = vunpack.c.h.bf16 %v2659_v10 }
  0x5f   :  { %v569_v28 = vsel %vm520_vm0, %v6414_v29, -inf  ;;  %v6418_v2 = vunpack.c.l.bf16 %v2678_v17  ;;  %v6419_v18 = vunpack.c.h.bf16 %v2678_v17  ;;  %v524_v5 = vmax.f32 %v522_v8, %v523_v15 }
  0x60   :  { %v562_v12 = vmax.f32 %v6417_v36, %v561_v14  ;;  %v532_v19 = vmax.f32 %v530_v1, %v531_v23  ;;  %v540_v6 = vmax.f32 %v538_v7, %v539_v3  ;;  %v548_v0 = vmax.f32 %v546_v20, %v547_v9 }
  0x61   :  { %v570_v4 = vmax.f32 %v6418_v2, %v569_v28  ;;  %v578_v29 = vmax.f32 %v6419_v18, %v577_v13  ;;  %v555_v21 = vrot.slane %v554_v42, 4  ;;  %v525_v49 = vrot.slane %v524_v5, 2 }
  0x62   :  { %v563_v30 = vrot.slane %v562_v12, 4  ;;  %v533_v22 = vrot.slane %v532_v19, 2  ;;  %v541_v16 = vrot.slane %v540_v6, 2  ;;  %v549_v11 = vrot.slane %v548_v0, 2 }
  0x63   :  { %v571_v27 = vrot.slane %v570_v4, 4  ;;  %v579_v37 = vrot.slane %v578_v29, 4  ;;  %v556_v10 = vmax.f32 %v554_v42, %v555_v21  ;;  %v526_v28 = vmax.f32 %v524_v5, %v525_v49 }
  0x64   :  { %v564_v14 = vmax.f32 %v562_v12, %v563_v30  ;;  %v534_v2 = vmax.f32 %v532_v19, %v533_v22  ;;  %v542_v17 = vmax.f32 %v540_v6, %v541_v16  ;;  %v550_v13 = vmax.f32 %v548_v0, %v549_v11 }
  0x65   :  { %v572_v36 = vmax.f32 %v570_v4, %v571_v27  ;;  %v580_v58 = vmax.f32 %v578_v29, %v579_v37  ;;  %v557_v8 = vrot.slane %v556_v10, 2  ;;  %v527_v15 = vrot.slane %v526_v28, 1 }
  0x66   :  { %v565_v1 = vrot.slane %v564_v14, 2  ;;  %v535_v23 = vrot.slane %v534_v2, 1  ;;  %v543_v3 = vrot.slane %v542_v17, 1  ;;  %v551_v9 = vrot.slane %v550_v13, 1 }
  0x67   :  { %v573_v7 = vrot.slane %v572_v36, 2  ;;  %v581_v20 = vrot.slane %v580_v58, 2  ;;  %v558_v18 = vmax.f32 %v556_v10, %v557_v8  ;;  %v3878_v21 = vmax.f32 %v526_v28, %v527_v15 }
  0x68   :  { %v566_v35 = vmax.f32 %v564_v14, %v565_v1  ;;  %v3880_v27 = vmax.f32 %v534_v2, %v535_v23  ;;  %v3882_v30 = vmax.f32 %v542_v17, %v543_v3  ;;  %v3884_v6 = vmax.f32 %v550_v13, %v551_v9 }
  0x69   :  { %v574_v34 = vmax.f32 %v572_v36, %v573_v7  ;;  %v582_v43 = vmax.f32 %v580_v58, %v581_v20  ;;  %v559_v22 = vrot.slane %v558_v18, 1  ;;  %v6420_v12 = vunpack.c.l.bf16 %v2702_v25 }
  0x6a   :  { %v567_v37 = vrot.slane %v566_v35, 1  ;;  %v6421_v29 = vunpack.c.l.bf16 %v2707_v26  ;;  %v6422_v5 = vunpack.c.l.bf16 %v2721_v32  ;;  %v6423_v0 = vunpack.c.l.bf16 %v2726_v33 }
  0x6b   :  { %v575_v49 = vrot.slane %v574_v34, 1  ;;  %v583_v42 = vrot.slane %v582_v43, 1  ;;  %v585_v4 = vsel %vm520_vm0, %v6420_v12, -inf  ;;  %v3898_v11 = vmax.f32 %v558_v18, %v559_v22 }
  0x6c   :  { %v593_v58 = vsel %vm520_vm0, %v6421_v29, -inf  ;;  %v601_v19 = vsel %vm520_vm0, %v6422_v5, -inf  ;;  %v609_v16 = vsel %vm520_vm0, %v6423_v0, -inf  ;;  %v3900_v10 = vmax.f32 %v566_v35, %v567_v37 }
  0x6d   :  { %v3902_v14 = vmax.f32 %v574_v34, %v575_v49  ;;  %v3904_v25 = vmax.f32 %v582_v43, %v583_v42  ;;  %v6424_v26 = vunpack.c.l.bf16 %v2697_v24  ;;  %v6425_v28 = vunpack.c.h.bf16 %v2697_v24 }
  0x6e   :  { %v6426_v2 = vunpack.c.l.bf16 %v2716_v31  ;;  %v6427_v33 = vunpack.c.h.bf16 %v2716_v31  ;;  %v6428_v8 = vunpack.c.l.bf16 %v2740_v39  ;;  %v6429_v34 = vunpack.c.l.bf16 %v2745_v40 }
  0x6f   :  { %v586_v36 = vmax.f32 %v6424_v26, %v585_v4  ;;  %v594_v32 = vmax.f32 %v6425_v28, %v593_v58  ;;  %v6430_v1 = vunpack.c.l.bf16 %v2759_v46  ;;  %v6431_v24 = vunpack.c.l.bf16 %v2764_v47 }
  0x70   :  { %v602_v17 = vmax.f32 %v6426_v2, %v601_v19  ;;  %v610_v13 = vmax.f32 %v6427_v33, %v609_v16  ;;  %v617_v35 = vsel %vm520_vm0, %v6428_v8, -inf  ;;  %v625_v43 = vsel %vm520_vm0, %v6429_v34, -inf }
  0x71   :  { %v633_v7 = vsel %vm520_vm0, %v6430_v1, -inf  ;;  %v641_v20 = vsel %vm520_vm0, %v6431_v24, -inf  ;;  %v587_v15 = vrot.slane %v586_v36, 4  ;;  %v595_v23 = vrot.slane %v594_v32, 4 }
  0x72   :  { %v603_v31 = vrot.slane %v602_v17, 4  ;;  %v611_v3 = vrot.slane %v610_v13, 4  ;;  %v6432_v39 = vunpack.c.l.bf16 %v2735_v38  ;;  %v6433_v18 = vunpack.c.h.bf16 %v2735_v38 }
  0x73   :  { %v6434_v22 = vunpack.c.l.bf16 %v2754_v45  ;;  %v6435_v46 = vunpack.c.h.bf16 %v2754_v45  ;;  %v588_v42 = vmax.f32 %v586_v36, %v587_v15  ;;  %v596_v47 = vmax.f32 %v594_v32, %v595_v23 }
  0x74   :  { %v618_v9 = vmax.f32 %v6432_v39, %v617_v35  ;;  %v626_v40 = vmax.f32 %v6433_v18, %v625_v43  ;;  %v604_v12 = vmax.f32 %v602_v17, %v603_v31  ;;  %v612_v4 = vmax.f32 %v610_v13, %v611_v3 }
  0x75   :  { %v634_v37 = vmax.f32 %v6434_v22, %v633_v7  ;;  %v642_v49 = vmax.f32 %v6435_v46, %v641_v20  ;;  %v589_v0 = vrot.slane %v588_v42, 2  ;;  %v597_v16 = vrot.slane %v596_v47, 2 }
  0x76   :  { %v619_v29 = vrot.slane %v618_v9, 4  ;;  %v627_v58 = vrot.slane %v626_v40, 4  ;;  %v605_v26 = vrot.slane %v604_v12, 2  ;;  %v613_v28 = vrot.slane %v612_v4, 2 }
  0x77   :  { %v635_v5 = vrot.slane %v634_v37, 4  ;;  %v643_v19 = vrot.slane %v642_v49, 4  ;;  %v590_v35 = vmax.f32 %v588_v42, %v589_v0  ;;  %v598_v34 = vmax.f32 %v596_v47, %v597_v16 }
  0x78   :  { %v620_v38 = vmax.f32 %v618_v9, %v619_v29  ;;  %v628_v2 = vmax.f32 %v626_v40, %v627_v58  ;;  %v606_v45 = vmax.f32 %v604_v12, %v605_v26  ;;  %v614_v43 = vmax.f32 %v612_v4, %v613_v28 }
  0x79   :  { %v636_v33 = vmax.f32 %v634_v37, %v635_v5  ;;  %v644_v8 = vmax.f32 %v642_v49, %v643_v19  ;;  %v591_v1 = vrot.slane %v590_v35, 1  ;;  %v599_v7 = vrot.slane %v598_v34, 1 }
  0x7a   :  { %v621_v36 = vrot.slane %v620_v38, 2  ;;  %v629_v32 = vrot.slane %v628_v2, 2  ;;  %v607_v24 = vrot.slane %v606_v45, 1  ;;  %v615_v20 = vrot.slane %v614_v43, 1 }
  0x7b   :  { %v637_v17 = vrot.slane %v636_v33, 2  ;;  %v645_v13 = vrot.slane %v644_v8, 2  ;;  %v3934_v39 = vmax.f32 %v590_v35, %v591_v1  ;;  %v3936_v9 = vmax.f32 %v598_v34, %v599_v7 }
  0x7c   :  { %v622_v15 = vmax.f32 %v620_v38, %v621_v36  ;;  %v630_v23 = vmax.f32 %v628_v2, %v629_v32  ;;  %v3938_v18 = vmax.f32 %v606_v45, %v607_v24  ;;  %v3940_v40 = vmax.f32 %v614_v43, %v615_v20 }
  0x7d   :  { %v638_v31 = vmax.f32 %v636_v33, %v637_v17  ;;  %v646_v3 = vmax.f32 %v644_v8, %v645_v13  ;;  %v6436_v42 = vunpack.c.l.bf16 %v2778_v53  ;;  %v6437_v12 = vunpack.c.l.bf16 %v2783_v54 }
  0x7e   :  { %v623_v22 = vrot.slane %v622_v15, 1  ;;  %v631_v37 = vrot.slane %v630_v23, 1  ;;  %v6438_v29 = vunpack.c.l.bf16 %v2797_v60  ;;  %v6439_v5 = vunpack.c.l.bf16 %v2802_v61 }
  0x7f   :  { %v639_v46 = vrot.slane %v638_v31, 1  ;;  %v647_v49 = vrot.slane %v646_v3, 1  ;;  %v649_v47 = vsel %vm520_vm0, %v6436_v42, -inf  ;;  %v657_v4 = vsel %vm520_vm0, %v6437_v12, -inf }
  0x80   :  { %v665_v58 = vsel %vm520_vm0, %v6438_v29, -inf  ;;  %v673_v19 = vsel %vm520_vm0, %v6439_v5, -inf  ;;  %v3954_v0 = vmax.f32 %v622_v15, %v623_v22  ;;  %v3956_v16 = vmax.f32 %v630_v23, %v631_v37 }
  0x81   :  { %v3958_v26 = vmax.f32 %v638_v31, %v639_v46  ;;  %v3960_v53 = vmax.f32 %v646_v3, %v647_v49  ;;  %v6440_v54 = vunpack.c.l.bf16 %v2773_v52  ;;  %v6441_v38 = vunpack.c.h.bf16 %v2773_v52 }
  0x82   :  { %v6442_v2 = vunpack.c.l.bf16 %v2792_v59  ;;  %v6443_v61 = vunpack.c.h.bf16 %v2792_v59  ;;  %v6444_v35 = vunpack.c.l.bf16 %v2816_v48  ;;  %v6445_v45 = vunpack.c.l.bf16 %v2821_v62 }
  0x83   :  { %v650_v28 = vmax.f32 %v6440_v54, %v649_v47  ;;  %v658_v60 = vmax.f32 %v6441_v38, %v657_v4  ;;  %v6446_v36 = vunpack.c.l.bf16 %v2835_v51  ;;  %v6447_v52 = vunpack.c.l.bf16 %v2840_v63 }
  0x84   :  { %v666_v33 = vmax.f32 %v6442_v2, %v665_v58  ;;  %v674_v8 = vmax.f32 %v6443_v61, %v673_v19  ;;  %v681_v34 = vsel %vm520_vm0, %v6444_v35, -inf  ;;  %v689_v43 = vsel %vm520_vm0, %v6445_v45, -inf }
  0x85   :  { %v697_v32 = vsel %vm520_vm0, %v6446_v36, -inf  ;;  %v705_v17 = vsel %vm520_vm0, %v6447_v52, -inf  ;;  %v651_v13 = vrot.slane %v650_v28, 4  ;;  %v659_v1 = vrot.slane %v658_v60, 4 }
  0x86   :  { %v667_v59 = vrot.slane %v666_v33, 4  ;;  %v675_v7 = vrot.slane %v674_v8, 4  ;;  %v6448_v48 = vunpack.c.l.bf16 %v2811_v50  ;;  %v6449_v20 = vunpack.c.h.bf16 %v2811_v50 }
  0x87   :  { %v6450_v15 = vunpack.c.l.bf16 %v2830_v56  ;;  %v6451_v51 = vunpack.c.h.bf16 %v2830_v56  ;;  %v652_v3 = vmax.f32 %v650_v28, %v651_v13  ;;  %v660_v63 = vmax.f32 %v658_v60, %v659_v1 }
  0x88   :  { %v682_v24 = vmax.f32 %v6448_v48, %v681_v34  ;;  %v690_v62 = vmax.f32 %v6449_v20, %v689_v43  ;;  %v668_v22 = vmax.f32 %v666_v33, %v667_v59  ;;  %v676_v37 = vmax.f32 %v674_v8, %v675_v7 }
  0x89   :  { %v698_v23 = vmax.f32 %v6450_v15, %v697_v32  ;;  %v706_v31 = vmax.f32 %v6451_v51, %v705_v17  ;;  %v653_v12 = vrot.slane %v652_v3, 2  ;;  %v661_v4 = vrot.slane %v660_v63, 2 }
  0x8a   :  { %v683_v46 = vrot.slane %v682_v24, 4  ;;  %v691_v49 = vrot.slane %v690_v62, 4  ;;  %v669_v29 = vrot.slane %v668_v22, 2  ;;  %v677_v58 = vrot.slane %v676_v37, 2 }
  0x8b   :  { %v699_v42 = vrot.slane %v698_v23, 4  ;;  %v707_v47 = vrot.slane %v706_v31, 4  ;;  %v654_v38 = vmax.f32 %v652_v3, %v653_v12  ;;  %v662_v2 = vmax.f32 %v660_v63, %v661_v4 }
  0x8c   :  { %v684_v50 = vmax.f32 %v682_v24, %v683_v46  ;;  %v692_v5 = vmax.f32 %v690_v62, %v691_v49  ;;  %v670_v56 = vmax.f32 %v668_v22, %v669_v29  ;;  %v678_v61 = vmax.f32 %v676_v37, %v677_v58  ;;  %v6459_v29 = vld [vmem:[#allocation3_spill] sm:$0xff] }
  0x8d   :  { %v700_v19 = vmax.f32 %v698_v23, %v699_v42  ;;  %v708_v54 = vmax.f32 %v706_v31, %v707_v47  ;;  %v655_v35 = vrot.slane %v654_v38, 1  ;;  %v663_v34 = vrot.slane %v662_v2, 1  ;;  %v6456_v47 = vld [vmem:[#allocation2_spill] sm:$0xff] }
  0x8e   :  { %v685_v28 = vrot.slane %v684_v50, 2  ;;  %v693_v60 = vrot.slane %v692_v5, 2  ;;  %v671_v45 = vrot.slane %v670_v56, 1  ;;  %v679_v43 = vrot.slane %v678_v61, 1 }
  0x8f   :  { %v701_v33 = vrot.slane %v700_v19, 2  ;;  %v709_v8 = vrot.slane %v708_v54, 2  ;;  %v3990_v13 = vmax.f32 %v654_v38, %v655_v35  ;;  %v3992_v1 = vmax.f32 %v662_v2, %v663_v34  ;;  %v6464_v2 = vld [vmem:[#allocation6_spill] sm:$0xff] }
  0x90   :  { %v686_v36 = vmax.f32 %v684_v50, %v685_v28  ;;  %v694_v32 = vmax.f32 %v692_v5, %v693_v60  ;;  %v3994_v59 = vmax.f32 %v670_v56, %v671_v45  ;;  %v3996_v7 = vmax.f32 %v678_v61, %v679_v43  ;;  %v6466_v28 = vld [vmem:[#allocation8_spill] sm:$0xff] }
  0x91   :  { %v702_v52 = vmax.f32 %v700_v19, %v701_v33  ;;  %v710_v17 = vmax.f32 %v708_v54, %v709_v8  ;;  %v6452_v15 = vunpack.c.l.bf16 %v2854_v41  ;;  %v6453_v51 = vunpack.c.l.bf16 %v2859_v57  ;;  %v6462_v19 = vld [vmem:[#allocation5_spill] sm:$0xff] }
  0x92   :  { %v687_v48 = vrot.slane %v686_v36, 1  ;;  %v695_v24 = vrot.slane %v694_v32, 1  ;;  %v6454_v3 = vunpack.c.l.bf16 %v2873_v44  ;;  %v6455_v22 = vunpack.c.l.bf16 %v2878_v55  ;;  %v6468_v8 = vld [vmem:[#allocation9_spill] sm:$0xff] }
  0x93   :  { %v703_v20 = vrot.slane %v702_v52, 1  ;;  %v711_v62 = vrot.slane %v710_v17, 1  ;;  %v713_v23 = vsel %vm520_vm0, %v6452_v15, -inf  ;;  %v721_v31 = vsel %vm520_vm0, %v6453_v51, -inf }
  0x94   :  { %v729_v63 = vsel %vm520_vm0, %v6454_v3, -inf  ;;  %v737_v37 = vsel %vm520_vm0, %v6455_v22, -inf  ;;  %v4010_v46 = vmax.f32 %v686_v36, %v687_v48  ;;  %v4012_v49 = vmax.f32 %v694_v32, %v695_v24 }
  0x95   :  { %v4014_v42 = vmax.f32 %v702_v52, %v703_v20  ;;  %v4016_v41 = vmax.f32 %v710_v17, %v711_v62  ;;  %v6457_v57 = vunpack.c.l.bf16 %v6456_v47  ;;  %v6458_v4 = vunpack.c.h.bf16 %v6456_v47  ;;  %v6470_v52 = vld [vmem:[#allocation4_spill] sm:$0xff]  ;;  %v6473_v62 = vld [vmem:[#allocation7_spill] sm:$0xff] }
  0x96   :  { %v6460_v58 = vunpack.c.l.bf16 %v6459_v29  ;;  %v6461_v55 = vunpack.c.h.bf16 %v6459_v29  ;;  %v6463_v54 = vunpack.c.l.bf16 %v6462_v19  ;;  %v6465_v56 = vunpack.c.l.bf16 %v6464_v2 }
  0x97   :  { %v714_v12 = vmax.f32 %v6457_v57, %v713_v23  ;;  %v722_v44 = vmax.f32 %v6458_v4, %v721_v31  ;;  %v6467_v60 = vunpack.c.l.bf16 %v6466_v28  ;;  %v6469_v35 = vunpack.c.l.bf16 %v6468_v8 }
  0x98   :  { %v730_v50 = vmax.f32 %v6460_v58, %v729_v63  ;;  %v738_v5 = vmax.f32 %v6461_v55, %v737_v37  ;;  %v745_v38 = vsel %vm520_vm0, %v6463_v54, -inf  ;;  %v753_v61 = vsel %vm520_vm0, %v6465_v56, -inf }
  0x99   :  { %v761_v33 = vsel %vm520_vm0, %v6467_v60, -inf  ;;  %v769_v34 = vsel %vm520_vm0, %v6469_v35, -inf  ;;  %v715_v45 = vrot.slane %v714_v12, 4  ;;  %v723_v43 = vrot.slane %v722_v44, 4 }
  0x9a   :  { %v731_v36 = vrot.slane %v730_v50, 4  ;;  %v739_v32 = vrot.slane %v738_v5, 4  ;;  %v6471_v17 = vunpack.c.l.bf16 %v6470_v52  ;;  %v6472_v24 = vunpack.c.h.bf16 %v6470_v52 }
  0x9b   :  { %v6474_v15 = vunpack.c.l.bf16 %v6473_v62  ;;  %v6475_v51 = vunpack.c.h.bf16 %v6473_v62  ;;  %v716_v3 = vmax.f32 %v714_v12, %v715_v45  ;;  %v724_v63 = vmax.f32 %v722_v44, %v723_v43 }
  0x9c   :  { %v746_v48 = vmax.f32 %v6471_v17, %v745_v38  ;;  %v754_v20 = vmax.f32 %v6472_v24, %v753_v61  ;;  %v732_v22 = vmax.f32 %v730_v50, %v731_v36  ;;  %v740_v37 = vmax.f32 %v738_v5, %v739_v32 }
  0x9d   :  { %v762_v23 = vmax.f32 %v6474_v15, %v761_v33  ;;  %v770_v31 = vmax.f32 %v6475_v51, %v769_v34  ;;  %v717_v58 = vrot.slane %v716_v3, 2  ;;  %v725_v55 = vrot.slane %v724_v63, 2 }
  0x9e   :  { %v747_v47 = vrot.slane %v746_v48, 4  ;;  %v755_v57 = vrot.slane %v754_v20, 4  ;;  %v733_v19 = vrot.slane %v732_v22, 2  ;;  %v741_v54 = vrot.slane %v740_v37, 2 }
  0x9f   :  { %v763_v4 = vrot.slane %v762_v23, 4  ;;  %v771_v29 = vrot.slane %v770_v31, 4  ;;  %v718_v28 = vmax.f32 %v716_v3, %v717_v58  ;;  %v726_v60 = vmax.f32 %v724_v63, %v725_v55  ;;  %v6476_v3 = vld [vmem:[#allocation11_spill] sm:$0xff] }
  0xa0   :  { %v748_v38 = vmax.f32 %v746_v48, %v747_v47  ;;  %v756_v2 = vmax.f32 %v754_v20, %v755_v57  ;;  %v734_v33 = vmax.f32 %v732_v22, %v733_v19  ;;  %v742_v8 = vmax.f32 %v740_v37, %v741_v54  ;;  %v6478_v37 = vld [vmem:[#allocation12_spill] sm:$0xff]  ;;  %v6482_v55 = vld [vmem:[#allocation15_spill] sm:$0xff] }
  0xa1   :  { %v764_v56 = vmax.f32 %v762_v23, %v763_v4  ;;  %v772_v61 = vmax.f32 %v770_v31, %v771_v29  ;;  %v719_v35 = vrot.slane %v718_v28, 1  ;;  %v727_v34 = vrot.slane %v726_v60, 1  ;;  %v6480_v4 = vld [vmem:[#allocation14_spill] sm:$0xff] }
  0xa2   :  { %v749_v12 = vrot.slane %v748_v38, 2  ;;  %v757_v44 = vrot.slane %v756_v2, 2  ;;  %v735_v45 = vrot.slane %v734_v33, 1  ;;  %v743_v43 = vrot.slane %v742_v8, 1 }
  0xa3   :  { %v765_v50 = vrot.slane %v764_v56, 2  ;;  %v773_v5 = vrot.slane %v772_v61, 2  ;;  %v4046_v48 = vmax.f32 %v718_v28, %v719_v35  ;;  %v4048_v24 = vmax.f32 %v726_v60, %v727_v34  ;;  %v6488_v28 = vld [vmem:[#allocation10_spill] sm:$0xff] }
  0xa4   :  { %v750_v36 = vmax.f32 %v748_v38, %v749_v12  ;;  %v758_v32 = vmax.f32 %v756_v2, %v757_v44  ;;  %v4050_v20 = vmax.f32 %v734_v33, %v735_v45  ;;  %v4052_v62 = vmax.f32 %v742_v8, %v743_v43  ;;  %v6491_v44 = vld [vmem:[#allocation13_spill] sm:$0xff] }
  0xa5   :  { %v766_v52 = vmax.f32 %v764_v56, %v765_v50  ;;  %v774_v17 = vmax.f32 %v772_v61, %v773_v5  ;;  %v6477_v63 = vunpack.c.l.bf16 %v6476_v3  ;;  %v6479_v47 = vunpack.c.l.bf16 %v6478_v37  ;;  %v6494_v45 = vld [vmem:[#allocation17_spill] sm:$0xff] }
  0xa6   :  { %v751_v15 = vrot.slane %v750_v36, 1  ;;  %v759_v23 = vrot.slane %v758_v32, 1  ;;  %v6481_v29 = vunpack.c.l.bf16 %v6480_v4  ;;  %v6483_v19 = vunpack.c.l.bf16 %v6482_v55  ;;  %v6502_v4 = vld [vmem:[#allocation16_spill] sm:$0xff] }
  0xa7   :  { %v767_v51 = vrot.slane %v766_v52, 1  ;;  %v775_v31 = vrot.slane %v774_v17, 1  ;;  %v777_v22 = vsel %vm520_vm0, %v6477_v63, -inf  ;;  %v785_v57 = vsel %vm520_vm0, %v6479_v47, -inf }
  0xa8   :  { %v793_v58 = vsel %vm520_vm0, %v6481_v29, -inf  ;;  %v801_v54 = vsel %vm520_vm0, %v6483_v19, -inf  ;;  %v4066_v38 = vmax.f32 %v750_v36, %v751_v15  ;;  %v4068_v2 = vmax.f32 %v758_v32, %v759_v23  ;;  %v6496_v32 = vld [vmem:[#allocation18_spill] sm:$0xff]  ;;  %v6498_v15 = vld [vmem:[#allocation20_spill] sm:$0xff] }
  0xa9   :  { %v4070_v56 = vmax.f32 %v766_v52, %v767_v51  ;;  %v4072_v61 = vmax.f32 %v774_v17, %v775_v31  ;;  %v6489_v60 = vunpack.c.l.bf16 %v6488_v28  ;;  %v6490_v8 = vunpack.c.h.bf16 %v6488_v28  ;;  %v6500_v31 = vld [vmem:[#allocation21_spill] sm:$0xff] }
  0xaa   :  { %6484 = vst [vmem:[#allocation2_spill] sm:$0xff] %v4066_v38  ;;  %6485 = vst [vmem:[#allocation3_spill] sm:$0xff] %v4068_v2  ;;  %v6492_v50 = vunpack.c.l.bf16 %v6491_v44  ;;  %v6493_v35 = vunpack.c.h.bf16 %v6491_v44  ;;  %v6495_v43 = vunpack.c.l.bf16 %v6494_v45  ;;  %v6497_v52 = vunpack.c.l.bf16 %v6496_v32 }
  0xab   :  { %6486 = vst [vmem:[#allocation5_spill] sm:$0xff] %v4070_v56  ;;  %6487 = vst [vmem:[#allocation6_spill] sm:$0xff] %v4072_v61  ;;  %v778_v33 = vmax.f32 %v6489_v60, %v777_v22  ;;  %v786_v12 = vmax.f32 %v6490_v8, %v785_v57  ;;  %v6499_v23 = vunpack.c.l.bf16 %v6498_v15  ;;  %v6501_v3 = vunpack.c.l.bf16 %v6500_v31 }
  0xac   :  { %v794_v5 = vmax.f32 %v6492_v50, %v793_v58  ;;  %v802_v34 = vmax.f32 %v6493_v35, %v801_v54  ;;  %v809_v36 = vsel %vm520_vm0, %v6495_v43, -inf  ;;  %v817_v17 = vsel %vm520_vm0, %v6497_v52, -inf  ;;  %v6505_v54 = vld [vmem:[#allocation19_spill] sm:$0xff] }
  0xad   :  { %v825_v51 = vsel %vm520_vm0, %v6499_v23, -inf  ;;  %v833_v63 = vsel %vm520_vm0, %v6501_v3, -inf  ;;  %v779_v22 = vrot.slane %v778_v33, 4  ;;  %v787_v37 = vrot.slane %v786_v12, 4 }
  0xae   :  { %v795_v47 = vrot.slane %v794_v5, 4  ;;  %v803_v57 = vrot.slane %v802_v34, 4  ;;  %v6503_v29 = vunpack.c.l.bf16 %v6502_v4  ;;  %v6504_v55 = vunpack.c.h.bf16 %v6502_v4 }
  0xaf   :  { %v6506_v28 = vunpack.c.l.bf16 %v6505_v54  ;;  %v6507_v8 = vunpack.c.h.bf16 %v6505_v54  ;;  %v780_v50 = vmax.f32 %v778_v33, %v779_v22  ;;  %v788_v35 = vmax.f32 %v786_v12, %v787_v37 }
  0xb0   :  { %v810_v58 = vmax.f32 %v6503_v29, %v809_v36  ;;  %v818_v19 = vmax.f32 %v6504_v55, %v817_v17  ;;  %v796_v45 = vmax.f32 %v794_v5, %v795_v47  ;;  %v804_v43 = vmax.f32 %v802_v34, %v803_v57 }
  0xb1   :  { %v826_v60 = vmax.f32 %v6506_v28, %v825_v51  ;;  %v834_v44 = vmax.f32 %v6507_v8, %v833_v63  ;;  %v781_v31 = vrot.slane %v780_v50, 2  ;;  %v789_v3 = vrot.slane %v788_v35, 2 }
  0xb2   :  { %v811_v32 = vrot.slane %v810_v58, 4  ;;  %v819_v52 = vrot.slane %v818_v19, 4  ;;  %v797_v36 = vrot.slane %v796_v45, 2  ;;  %v805_v29 = vrot.slane %v804_v43, 2 }
  0xb3   :  { %v827_v15 = vrot.slane %v826_v60, 4  ;;  %v835_v23 = vrot.slane %v834_v44, 4  ;;  %v782_v51 = vmax.f32 %v780_v50, %v781_v31  ;;  %v790_v28 = vmax.f32 %v788_v35, %v789_v3  ;;  %v6516_v3 = vld [vmem:[#allocation26_spill] sm:$0xff] }
  0xb4   :  { %v812_v4 = vmax.f32 %v810_v58, %v811_v32  ;;  %v820_v17 = vmax.f32 %v818_v19, %v819_v52  ;;  %v798_v54 = vmax.f32 %v796_v45, %v797_v36  ;;  %v806_v63 = vmax.f32 %v804_v43, %v805_v29  ;;  %v6512_v32 = vld [vmem:[#allocation23_spill] sm:$0xff] }
  0xb5   :  { %v828_v55 = vmax.f32 %v826_v60, %v827_v15  ;;  %v836_v61 = vmax.f32 %v834_v44, %v835_v23  ;;  %v783_v22 = vrot.slane %v782_v51, 1  ;;  %v791_v37 = vrot.slane %v790_v28, 1  ;;  %v6514_v23 = vld [vmem:[#allocation24_spill] sm:$0xff] }
  0xb6   :  { %v813_v33 = vrot.slane %v812_v4, 2  ;;  %v821_v12 = vrot.slane %v820_v17, 2  ;;  %v799_v47 = vrot.slane %v798_v54, 1  ;;  %v807_v57 = vrot.slane %v806_v63, 1 }
  0xb7   :  { %v829_v5 = vrot.slane %v828_v55, 2  ;;  %v837_v34 = vrot.slane %v836_v61, 2  ;;  %v4102_v58 = vmax.f32 %v782_v51, %v783_v22  ;;  %v4104_v19 = vmax.f32 %v790_v28, %v791_v37  ;;  %v6527_v37 = vld [vmem:[#allocation25_spill] sm:$0xff] }
  0xb8   :  { %v814_v8 = vmax.f32 %v812_v4, %v813_v33  ;;  %v822_v56 = vmax.f32 %v820_v17, %v821_v12  ;;  %v4106_v60 = vmax.f32 %v798_v54, %v799_v47  ;;  %v4108_v44 = vmax.f32 %v806_v63, %v807_v57  ;;  %v6518_v4 = vld [vmem:[#allocation27_spill] sm:$0xff]  ;;  %v6524_v33 = vld [vmem:[#allocation22_spill] sm:$0xff] }
  0xb9   :  { %v830_v2 = vmax.f32 %v828_v55, %v829_v5  ;;  %v838_v38 = vmax.f32 %v836_v61, %v837_v34  ;;  %6508 = vst [vmem:[#allocation8_spill] sm:$0xff] %v4102_v58  ;;  %6509 = vst [vmem:[#allocation9_spill] sm:$0xff] %v4104_v19  ;;  %v6513_v52 = vunpack.c.l.bf16 %v6512_v32  ;;  %v6515_v31 = vunpack.c.l.bf16 %v6514_v23  ;;  %v6536_v23 = vld [vmem:[#allocation33_spill] sm:$0xff] }
  0xba   :  { %6510 = vst [vmem:[#allocation4_spill] sm:$0xff] %v4106_v60  ;;  %6511 = vst [vmem:[#allocation7_spill] sm:$0xff] %v4108_v44  ;;  %v815_v50 = vrot.slane %v814_v8, 1  ;;  %v823_v35 = vrot.slane %v822_v56, 1  ;;  %v6517_v36 = vunpack.c.l.bf16 %v6516_v3  ;;  %v6519_v17 = vunpack.c.l.bf16 %v6518_v4 }
  0xbb   :  { %v831_v45 = vrot.slane %v830_v2, 1  ;;  %v839_v43 = vrot.slane %v838_v38, 1  ;;  %v841_v15 = vsel %vm520_vm0, %v6513_v52, -inf  ;;  %v849_v61 = vsel %vm520_vm0, %v6515_v31, -inf }
  0xbc   :  { %v857_v29 = vsel %vm520_vm0, %v6517_v36, -inf  ;;  %v865_v55 = vsel %vm520_vm0, %v6519_v17, -inf  ;;  %v4122_v51 = vmax.f32 %v814_v8, %v815_v50  ;;  %v4124_v28 = vmax.f32 %v822_v56, %v823_v35  ;;  %v6530_v8 = vld [vmem:[#allocation29_spill] sm:$0xff]  ;;  %v6538_v17 = vld [vmem:[#allocation28_spill] sm:$0xff] }
  0xbd   :  { %v4126_v54 = vmax.f32 %v830_v2, %v831_v45  ;;  %v4128_v63 = vmax.f32 %v838_v38, %v839_v43  ;;  %v6525_v12 = vunpack.c.l.bf16 %v6524_v33  ;;  %v6526_v34 = vunpack.c.h.bf16 %v6524_v33  ;;  %v6532_v2 = vld [vmem:[#allocation30_spill] sm:$0xff]  ;;  %v6534_v45 = vld [vmem:[#allocation32_spill] sm:$0xff] }
  0xbe   :  { %6520 = vst [vmem:[#allocation11_spill] sm:$0xff] %v4122_v51  ;;  %6521 = vst [vmem:[#allocation12_spill] sm:$0xff] %v4124_v28  ;;  %v6528_v47 = vunpack.c.l.bf16 %v6527_v37  ;;  %v6529_v32 = vunpack.c.h.bf16 %v6527_v37  ;;  %v6531_v50 = vunpack.c.l.bf16 %v6530_v8  ;;  %v6533_v35 = vunpack.c.l.bf16 %v6532_v2  ;;  %v6541_v37 = vld [vmem:[#allocation31_spill] sm:$0xff] }
  0xbf   :  { %6522 = vst [vmem:[#allocation14_spill] sm:$0xff] %v4126_v54  ;;  %6523 = vst [vmem:[#allocation15_spill] sm:$0xff] %v4128_v63  ;;  %v842_v5 = vmax.f32 %v6525_v12, %v841_v15  ;;  %v850_v22 = vmax.f32 %v6526_v34, %v849_v61  ;;  %v6535_v43 = vunpack.c.l.bf16 %v6534_v45  ;;  %v6537_v31 = vunpack.c.l.bf16 %v6536_v23 }
  0xc0   :  { %v858_v57 = vmax.f32 %v6528_v47, %v857_v29  ;;  %v866_v52 = vmax.f32 %v6529_v32, %v865_v55  ;;  %v873_v56 = vsel %vm520_vm0, %v6531_v50, -inf  ;;  %v881_v38 = vsel %vm520_vm0, %v6533_v35, -inf }
  0xc1   :  { %v889_v15 = vsel %vm520_vm0, %v6535_v43, -inf  ;;  %v897_v61 = vsel %vm520_vm0, %v6537_v31, -inf  ;;  %v843_v3 = vrot.slane %v842_v5, 4  ;;  %v851_v36 = vrot.slane %v850_v22, 4 }
  0xc2   :  { %v859_v29 = vrot.slane %v858_v57, 4  ;;  %v867_v4 = vrot.slane %v866_v52, 4  ;;  %v6539_v55 = vunpack.c.l.bf16 %v6538_v17  ;;  %v6540_v12 = vunpack.c.h.bf16 %v6538_v17 }
  0xc3   :  { %v6542_v47 = vunpack.c.l.bf16 %v6541_v37  ;;  %v6543_v8 = vunpack.c.h.bf16 %v6541_v37  ;;  %v844_v2 = vmax.f32 %v842_v5, %v843_v3  ;;  %v852_v35 = vmax.f32 %v850_v22, %v851_v36 }
  0xc4   :  { %v874_v33 = vmax.f32 %v6539_v55, %v873_v56  ;;  %v882_v34 = vmax.f32 %v6540_v12, %v881_v38  ;;  %v860_v45 = vmax.f32 %v858_v57, %v859_v29  ;;  %v868_v43 = vmax.f32 %v866_v52, %v867_v4 }
  0xc5   :  { %v890_v32 = vmax.f32 %v6542_v47, %v889_v15  ;;  %v898_v50 = vmax.f32 %v6543_v8, %v897_v61  ;;  %v845_v28 = vrot.slane %v844_v2, 2  ;;  %v853_v51 = vrot.slane %v852_v35, 2 }
  0xc6   :  { %v875_v23 = vrot.slane %v874_v33, 4  ;;  %v883_v31 = vrot.slane %v882_v34, 4  ;;  %v861_v56 = vrot.slane %v860_v45, 2  ;;  %v869_v55 = vrot.slane %v868_v43, 2 }
  0xc7   :  { %v891_v63 = vrot.slane %v890_v32, 4  ;;  %v899_v54 = vrot.slane %v898_v50, 4  ;;  %v846_v15 = vmax.f32 %v844_v2, %v845_v28  ;;  %v854_v47 = vmax.f32 %v852_v35, %v853_v51  ;;  %v6548_v2 = vld [vmem:[#allocation35_spill] sm:$0xff] }
  0xc8   :  { %v876_v17 = vmax.f32 %v874_v33, %v875_v23  ;;  %v884_v38 = vmax.f32 %v882_v34, %v883_v31  ;;  %v862_v37 = vmax.f32 %v860_v45, %v861_v56  ;;  %v870_v61 = vmax.f32 %v868_v43, %v869_v55  ;;  %v6550_v43 = vld [vmem:[#allocation36_spill] sm:$0xff]  ;;  %v6552_v31 = vld [vmem:[#allocation38_spill] sm:$0xff] }
  0xc9   :  { %v892_v12 = vmax.f32 %v890_v32, %v891_v63  ;;  %v900_v44 = vmax.f32 %v898_v50, %v899_v54  ;;  %v847_v3 = vrot.slane %v846_v15, 1  ;;  %v855_v36 = vrot.slane %v854_v47, 1 }
  0xca   :  { %v877_v5 = vrot.slane %v876_v17, 2  ;;  %v885_v22 = vrot.slane %v884_v38, 2  ;;  %v863_v29 = vrot.slane %v862_v37, 1  ;;  %v871_v4 = vrot.slane %v870_v61, 1 }
  0xcb   :  { %v893_v57 = vrot.slane %v892_v12, 2  ;;  %v901_v52 = vrot.slane %v900_v44, 2  ;;  %v4158_v33 = vmax.f32 %v846_v15, %v847_v3  ;;  %v4160_v63 = vmax.f32 %v854_v47, %v855_v36  ;;  %v6563_v36 = vld [vmem:[#allocation37_spill] sm:$0xff] }
  0xcc   :  { %v878_v8 = vmax.f32 %v876_v17, %v877_v5  ;;  %v886_v60 = vmax.f32 %v884_v38, %v885_v22  ;;  %v4162_v28 = vmax.f32 %v862_v37, %v863_v29  ;;  %v4164_v51 = vmax.f32 %v870_v61, %v871_v4  ;;  %v6554_v17 = vld [vmem:[#allocation39_spill] sm:$0xff]  ;;  %v6560_v5 = vld [vmem:[#allocation34_spill] sm:$0xff] }
  0xcd   :  { %v894_v19 = vmax.f32 %v892_v12, %v893_v57  ;;  %v902_v58 = vmax.f32 %v900_v44, %v901_v52  ;;  %6544 = vst [vmem:[#allocation10_spill] sm:$0xff] %v4158_v33  ;;  %6545 = vst [vmem:[#allocation13_spill] sm:$0xff] %v4160_v63  ;;  %v6549_v35 = vunpack.c.l.bf16 %v6548_v2  ;;  %v6551_v23 = vunpack.c.l.bf16 %v6550_v43  ;;  %v6572_v43 = vld [vmem:[#allocation45_spill] sm:$0xff] }
  0xce   :  { %6546 = vst [vmem:[#allocation17_spill] sm:$0xff] %v4162_v28  ;;  %6547 = vst [vmem:[#allocation18_spill] sm:$0xff] %v4164_v51  ;;  %v879_v54 = vrot.slane %v878_v8, 1  ;;  %v887_v34 = vrot.slane %v886_v60, 1  ;;  %v6553_v56 = vunpack.c.l.bf16 %v6552_v31  ;;  %v6555_v38 = vunpack.c.l.bf16 %v6554_v17 }
  0xcf   :  { %v895_v32 = vrot.slane %v894_v19, 1  ;;  %v903_v50 = vrot.slane %v902_v58, 1  ;;  %v905_v45 = vsel %vm520_vm0, %v6549_v35, -inf  ;;  %v913_v44 = vsel %vm520_vm0, %v6551_v23, -inf }
  0xd0   :  { %v921_v55 = vsel %vm520_vm0, %v6553_v56, -inf  ;;  %v929_v12 = vsel %vm520_vm0, %v6555_v38, -inf  ;;  %v4178_v15 = vmax.f32 %v878_v8, %v879_v54  ;;  %v4180_v47 = vmax.f32 %v886_v60, %v887_v34  ;;  %v6566_v8 = vld [vmem:[#allocation41_spill] sm:$0xff]  ;;  %v6574_v38 = vld [vmem:[#allocation40_spill] sm:$0xff] }
  0xd1   :  { %v4182_v37 = vmax.f32 %v894_v19, %v895_v32  ;;  %v4184_v61 = vmax.f32 %v902_v58, %v903_v50  ;;  %v6561_v22 = vunpack.c.l.bf16 %v6560_v5  ;;  %v6562_v52 = vunpack.c.h.bf16 %v6560_v5  ;;  %v6568_v19 = vld [vmem:[#allocation42_spill] sm:$0xff]  ;;  %v6570_v32 = vld [vmem:[#allocation44_spill] sm:$0xff] }
  0xd2   :  { %6556 = vst [vmem:[#allocation20_spill] sm:$0xff] %v4178_v15  ;;  %6557 = vst [vmem:[#allocation21_spill] sm:$0xff] %v4180_v47  ;;  %v6564_v29 = vunpack.c.l.bf16 %v6563_v36  ;;  %v6565_v2 = vunpack.c.h.bf16 %v6563_v36  ;;  %v6567_v54 = vunpack.c.l.bf16 %v6566_v8  ;;  %v6569_v34 = vunpack.c.l.bf16 %v6568_v19  ;;  %v6577_v36 = vld [vmem:[#allocation43_spill] sm:$0xff] }
  0xd3   :  { %6558 = vst [vmem:[#allocation16_spill] sm:$0xff] %v4182_v37  ;;  %6559 = vst [vmem:[#allocation19_spill] sm:$0xff] %v4184_v61  ;;  %v906_v57 = vmax.f32 %v6561_v22, %v905_v45  ;;  %v914_v3 = vmax.f32 %v6562_v52, %v913_v44  ;;  %v6571_v50 = vunpack.c.l.bf16 %v6570_v32  ;;  %v6573_v23 = vunpack.c.l.bf16 %v6572_v43 }
  0xd4   :  { %v922_v4 = vmax.f32 %v6564_v29, %v921_v55  ;;  %v930_v35 = vmax.f32 %v6565_v2, %v929_v12  ;;  %v937_v60 = vsel %vm520_vm0, %v6567_v54, -inf  ;;  %v945_v58 = vsel %vm520_vm0, %v6569_v34, -inf }
  0xd5   :  { %v953_v45 = vsel %vm520_vm0, %v6571_v50, -inf  ;;  %v961_v44 = vsel %vm520_vm0, %v6573_v23, -inf  ;;  %v907_v31 = vrot.slane %v906_v57, 4  ;;  %v915_v56 = vrot.slane %v914_v3, 4 }
  0xd6   :  { %v923_v55 = vrot.slane %v922_v4, 4  ;;  %v931_v17 = vrot.slane %v930_v35, 4  ;;  %v6575_v12 = vunpack.c.l.bf16 %v6574_v38  ;;  %v6576_v22 = vunpack.c.h.bf16 %v6574_v38 }
  0xd7   :  { %v6578_v29 = vunpack.c.l.bf16 %v6577_v36  ;;  %v6579_v8 = vunpack.c.h.bf16 %v6577_v36  ;;  %v908_v19 = vmax.f32 %v906_v57, %v907_v31  ;;  %v916_v34 = vmax.f32 %v914_v3, %v915_v56 }
  0xd8   :  { %v938_v5 = vmax.f32 %v6575_v12, %v937_v60  ;;  %v946_v52 = vmax.f32 %v6576_v22, %v945_v58  ;;  %v924_v32 = vmax.f32 %v922_v4, %v923_v55  ;;  %v932_v50 = vmax.f32 %v930_v35, %v931_v17 }
  0xd9   :  { %v954_v2 = vmax.f32 %v6578_v29, %v953_v45  ;;  %v962_v54 = vmax.f32 %v6579_v8, %v961_v44  ;;  %v909_v47 = vrot.slane %v908_v19, 2  ;;  %v917_v15 = vrot.slane %v916_v34, 2 }
  0xda   :  { %v939_v43 = vrot.slane %v938_v5, 4  ;;  %v947_v23 = vrot.slane %v946_v52, 4  ;;  %v925_v60 = vrot.slane %v924_v32, 2  ;;  %v933_v12 = vrot.slane %v932_v50, 2 }
  0xdb   :  { %v955_v61 = vrot.slane %v954_v2, 4  ;;  %v963_v37 = vrot.slane %v962_v54, 4  ;;  %v910_v45 = vmax.f32 %v908_v19, %v909_v47  ;;  %v918_v29 = vmax.f32 %v916_v34, %v917_v15  ;;  %v6584_v19 = vld [vmem:[#allocation47_spill] sm:$0xff] }
  0xdc   :  { %v940_v38 = vmax.f32 %v938_v5, %v939_v43  ;;  %v948_v58 = vmax.f32 %v946_v52, %v947_v23  ;;  %v926_v36 = vmax.f32 %v924_v32, %v925_v60  ;;  %v934_v44 = vmax.f32 %v932_v50, %v933_v12  ;;  %v6586_v50 = vld [vmem:[#allocation48_spill] sm:$0xff]  ;;  %v6588_v23 = vld [vmem:[#allocation50_spill] sm:$0xff] }
  0xdd   :  { %v956_v22 = vmax.f32 %v954_v2, %v955_v61  ;;  %v964_v51 = vmax.f32 %v962_v54, %v963_v37  ;;  %v911_v31 = vrot.slane %v910_v45, 1  ;;  %v919_v56 = vrot.slane %v918_v29, 1 }
  0xde   :  { %v941_v57 = vrot.slane %v940_v38, 2  ;;  %v949_v3 = vrot.slane %v948_v58, 2  ;;  %v927_v55 = vrot.slane %v926_v36, 1  ;;  %v935_v17 = vrot.slane %v934_v44, 1 }
  0xdf   :  { %v957_v4 = vrot.slane %v956_v22, 2  ;;  %v965_v35 = vrot.slane %v964_v51, 2  ;;  %v4214_v5 = vmax.f32 %v910_v45, %v911_v31  ;;  %v4216_v61 = vmax.f32 %v918_v29, %v919_v56  ;;  %v6599_v56 = vld [vmem:[#allocation49_spill] sm:$0xff] }
  0xe0   :  { %v942_v8 = vmax.f32 %v940_v38, %v941_v57  ;;  %v950_v28 = vmax.f32 %v948_v58, %v949_v3  ;;  %v4218_v47 = vmax.f32 %v926_v36, %v927_v55  ;;  %v4220_v15 = vmax.f32 %v934_v44, %v935_v17  ;;  %v6590_v38 = vld [vmem:[#allocation51_spill] sm:$0xff]  ;;  %v6596_v57 = vld [vmem:[#allocation46_spill] sm:$0xff] }
  0xe1   :  { %v958_v63 = vmax.f32 %v956_v22, %v957_v4  ;;  %v966_v33 = vmax.f32 %v964_v51, %v965_v35  ;;  %6580 = vst [vmem:[#allocation23_spill] sm:$0xff] %v4214_v5  ;;  %6581 = vst [vmem:[#allocation24_spill] sm:$0xff] %v4216_v61  ;;  %v6585_v34 = vunpack.c.l.bf16 %v6584_v19  ;;  %v6587_v43 = vunpack.c.l.bf16 %v6586_v50  ;;  %v6608_v50 = vld [vmem:[#allocation57_spill] sm:$0xff] }
  0xe2   :  { %6582 = vst [vmem:[#allocation26_spill] sm:$0xff] %v4218_v47  ;;  %6583 = vst [vmem:[#allocation27_spill] sm:$0xff] %v4220_v15  ;;  %v943_v37 = vrot.slane %v942_v8, 1  ;;  %v951_v52 = vrot.slane %v950_v28, 1  ;;  %v6589_v60 = vunpack.c.l.bf16 %v6588_v23  ;;  %v6591_v58 = vunpack.c.l.bf16 %v6590_v38 }
  0xe3   :  { %v959_v2 = vrot.slane %v958_v63, 1  ;;  %v967_v54 = vrot.slane %v966_v33, 1  ;;  %v969_v32 = vsel %vm520_vm0, %v6585_v34, -inf  ;;  %v977_v51 = vsel %vm520_vm0, %v6587_v43, -inf }
  0xe4   :  { %v985_v12 = vsel %vm520_vm0, %v6589_v60, -inf  ;;  %v993_v22 = vsel %vm520_vm0, %v6591_v58, -inf  ;;  %v4234_v45 = vmax.f32 %v942_v8, %v943_v37  ;;  %v4236_v29 = vmax.f32 %v950_v28, %v951_v52  ;;  %v6602_v8 = vld [vmem:[#allocation53_spill] sm:$0xff]  ;;  %v6610_v58 = vld [vmem:[#allocation52_spill] sm:$0xff] }
  0xe5   :  { %v4238_v36 = vmax.f32 %v958_v63, %v959_v2  ;;  %v4240_v44 = vmax.f32 %v966_v33, %v967_v54  ;;  %v6597_v3 = vunpack.c.l.bf16 %v6596_v57  ;;  %v6598_v35 = vunpack.c.h.bf16 %v6596_v57  ;;  %v6604_v63 = vld [vmem:[#allocation54_spill] sm:$0xff]  ;;  %v6606_v2 = vld [vmem:[#allocation56_spill] sm:$0xff] }
  0xe6   :  { %6592 = vst [vmem:[#allocation22_spill] sm:$0xff] %v4234_v45  ;;  %6593 = vst [vmem:[#allocation25_spill] sm:$0xff] %v4236_v29  ;;  %v6600_v55 = vunpack.c.l.bf16 %v6599_v56  ;;  %v6601_v19 = vunpack.c.h.bf16 %v6599_v56  ;;  %v6603_v37 = vunpack.c.l.bf16 %v6602_v8  ;;  %v6605_v52 = vunpack.c.l.bf16 %v6604_v63  ;;  %v6613_v56 = vld [vmem:[#allocation55_spill] sm:$0xff] }
  0xe7   :  { %6594 = vst [vmem:[#allocation29_spill] sm:$0xff] %v4238_v36  ;;  %6595 = vst [vmem:[#allocation30_spill] sm:$0xff] %v4240_v44  ;;  %v970_v4 = vmax.f32 %v6597_v3, %v969_v32  ;;  %v978_v31 = vmax.f32 %v6598_v35, %v977_v51  ;;  %v6607_v54 = vunpack.c.l.bf16 %v6606_v2  ;;  %v6609_v43 = vunpack.c.l.bf16 %v6608_v50 }
  0xe8   :  { %v986_v17 = vmax.f32 %v6600_v55, %v985_v12  ;;  %v994_v34 = vmax.f32 %v6601_v19, %v993_v22  ;;  %v1001_v28 = vsel %vm520_vm0, %v6603_v37, -inf  ;;  %v1009_v33 = vsel %vm520_vm0, %v6605_v52, -inf }
  0xe9   :  { %v1017_v32 = vsel %vm520_vm0, %v6607_v54, -inf  ;;  %v1025_v51 = vsel %vm520_vm0, %v6609_v43, -inf  ;;  %v971_v23 = vrot.slane %v970_v4, 4  ;;  %v979_v60 = vrot.slane %v978_v31, 4 }
  0xea   :  { %v987_v12 = vrot.slane %v986_v17, 4  ;;  %v995_v38 = vrot.slane %v994_v34, 4  ;;  %v6611_v22 = vunpack.c.l.bf16 %v6610_v58  ;;  %v6612_v3 = vunpack.c.h.bf16 %v6610_v58 }
  0xeb   :  { %v6614_v55 = vunpack.c.l.bf16 %v6613_v56  ;;  %v6615_v8 = vunpack.c.h.bf16 %v6613_v56  ;;  %v972_v63 = vmax.f32 %v970_v4, %v971_v23  ;;  %v980_v52 = vmax.f32 %v978_v31, %v979_v60 }
  0xec   :  { %v1002_v57 = vmax.f32 %v6611_v22, %v1001_v28  ;;  %v1010_v35 = vmax.f32 %v6612_v3, %v1009_v33  ;;  %v988_v2 = vmax.f32 %v986_v17, %v987_v12  ;;  %v996_v54 = vmax.f32 %v994_v34, %v995_v38 }
  0xed   :  { %v1018_v19 = vmax.f32 %v6614_v55, %v1017_v32  ;;  %v1026_v37 = vmax.f32 %v6615_v8, %v1025_v51  ;;  %v973_v29 = vrot.slane %v972_v63, 2  ;;  %v981_v45 = vrot.slane %v980_v52, 2 }
  0xee   :  { %v1003_v50 = vrot.slane %v1002_v57, 4  ;;  %v1011_v43 = vrot.slane %v1010_v35, 4  ;;  %v989_v28 = vrot.slane %v988_v2, 2  ;;  %v997_v22 = vrot.slane %v996_v54, 2 }
  0xef   :  { %v1019_v44 = vrot.slane %v1018_v19, 4  ;;  %v1027_v36 = vrot.slane %v1026_v37, 4  ;;  %v974_v32 = vmax.f32 %v972_v63, %v973_v29  ;;  %v982_v55 = vmax.f32 %v980_v52, %v981_v45  ;;  %v6620_v63 = vld [vmem:[#allocation59_spill] sm:$0xff] }
  0xf0   :  { %v1004_v58 = vmax.f32 %v1002_v57, %v1003_v50  ;;  %v1012_v33 = vmax.f32 %v1010_v35, %v1011_v43  ;;  %v990_v56 = vmax.f32 %v988_v2, %v989_v28  ;;  %v998_v51 = vmax.f32 %v996_v54, %v997_v22  ;;  %v6622_v54 = vld [vmem:[#allocation60_spill] sm:$0xff]  ;;  %v6624_v43 = vld [vmem:[#allocation62_spill] sm:$0xff] }
  0xf1   :  { %v1020_v3 = vmax.f32 %v1018_v19, %v1019_v44  ;;  %v1028_v15 = vmax.f32 %v1026_v37, %v1027_v36  ;;  %v975_v23 = vrot.slane %v974_v32, 1  ;;  %v983_v60 = vrot.slane %v982_v55, 1 }
  0xf2   :  { %v1005_v4 = vrot.slane %v1004_v58, 2  ;;  %v1013_v31 = vrot.slane %v1012_v33, 2  ;;  %v991_v12 = vrot.slane %v990_v56, 1  ;;  %v999_v38 = vrot.slane %v998_v51, 1 }
  0xf3   :  { %v1021_v17 = vrot.slane %v1020_v3, 2  ;;  %v1029_v34 = vrot.slane %v1028_v15, 2  ;;  %v4270_v57 = vmax.f32 %v974_v32, %v975_v23  ;;  %v4272_v44 = vmax.f32 %v982_v55, %v983_v60  ;;  %v6635_v60 = vld [vmem:[#allocation61_spill] sm:$0xff] }
  0xf4   :  { %v1006_v8 = vmax.f32 %v1004_v58, %v1005_v4  ;;  %v1014_v47 = vmax.f32 %v1012_v33, %v1013_v31  ;;  %v4274_v29 = vmax.f32 %v990_v56, %v991_v12  ;;  %v4276_v45 = vmax.f32 %v998_v51, %v999_v38  ;;  %v6626_v58 = vld [vmem:[#allocation63_spill] sm:$0xff]  ;;  %v6632_v4 = vld [vmem:[#allocation58_spill] sm:$0xff] }
  0xf5   :  { %v1022_v61 = vmax.f32 %v1020_v3, %v1021_v17  ;;  %v1030_v5 = vmax.f32 %v1028_v15, %v1029_v34  ;;  %6616 = vst [vmem:[#allocation32_spill] sm:$0xff] %v4270_v57  ;;  %6617 = vst [vmem:[#allocation33_spill] sm:$0xff] %v4272_v44  ;;  %v6621_v52 = vunpack.c.l.bf16 %v6620_v63  ;;  %v6623_v50 = vunpack.c.l.bf16 %v6622_v54  ;;  %v6644_v54 = vld [vmem:[#allocation69_spill] sm:$0xff] }
  0xf6   :  { %6618 = vst [vmem:[#allocation28_spill] sm:$0xff] %v4274_v29  ;;  %6619 = vst [vmem:[#allocation31_spill] sm:$0xff] %v4276_v45  ;;  %v1007_v36 = vrot.slane %v1006_v8, 1  ;;  %v1015_v35 = vrot.slane %v1014_v47, 1  ;;  %v6625_v28 = vunpack.c.l.bf16 %v6624_v43  ;;  %v6627_v33 = vunpack.c.l.bf16 %v6626_v58 }
  0xf7   :  { %v1023_v19 = vrot.slane %v1022_v61, 1  ;;  %v1031_v37 = vrot.slane %v1030_v5, 1  ;;  %v1033_v2 = vsel %vm520_vm0, %v6621_v52, -inf  ;;  %v1041_v15 = vsel %vm520_vm0, %v6623_v50, -inf }
  0xf8   :  { %v1049_v22 = vsel %vm520_vm0, %v6625_v28, -inf  ;;  %v1057_v3 = vsel %vm520_vm0, %v6627_v33, -inf  ;;  %v4290_v32 = vmax.f32 %v1006_v8, %v1007_v36  ;;  %v4292_v55 = vmax.f32 %v1014_v47, %v1015_v35  ;;  %v6638_v8 = vld [vmem:[#allocation65_spill] sm:$0xff]  ;;  %v6646_v33 = vld [vmem:[#allocation64_spill] sm:$0xff] }
  0xf9   :  { %v4294_v56 = vmax.f32 %v1022_v61, %v1023_v19  ;;  %v4296_v51 = vmax.f32 %v1030_v5, %v1031_v37  ;;  %v6633_v31 = vunpack.c.l.bf16 %v6632_v4  ;;  %v6634_v34 = vunpack.c.h.bf16 %v6632_v4  ;;  %v6640_v61 = vld [vmem:[#allocation66_spill] sm:$0xff]  ;;  %v6642_v19 = vld [vmem:[#allocation68_spill] sm:$0xff] }
  0xfa   :  { %6628 = vst [vmem:[#allocation35_spill] sm:$0xff] %v4290_v32  ;;  %6629 = vst [vmem:[#allocation36_spill] sm:$0xff] %v4292_v55  ;;  %v6636_v12 = vunpack.c.l.bf16 %v6635_v60  ;;  %v6637_v63 = vunpack.c.h.bf16 %v6635_v60  ;;  %v6639_v36 = vunpack.c.l.bf16 %v6638_v8  ;;  %v6641_v35 = vunpack.c.l.bf16 %v6640_v61  ;;  %v6649_v60 = vld [vmem:[#allocation67_spill] sm:$0xff] }
  0xfb   :  { %6630 = vst [vmem:[#allocation38_spill] sm:$0xff] %v4294_v56  ;;  %6631 = vst [vmem:[#allocation39_spill] sm:$0xff] %v4296_v51  ;;  %v1034_v17 = vmax.f32 %v6633_v31, %v1033_v2  ;;  %v1042_v23 = vmax.f32 %v6634_v34, %v1041_v15  ;;  %v6643_v37 = vunpack.c.l.bf16 %v6642_v19  ;;  %v6645_v50 = vunpack.c.l.bf16 %v6644_v54 }
  0xfc   :  { %v1050_v38 = vmax.f32 %v6636_v12, %v1049_v22  ;;  %v1058_v52 = vmax.f32 %v6637_v63, %v1057_v3  ;;  %v1065_v47 = vsel %vm520_vm0, %v6639_v36, -inf  ;;  %v1073_v5 = vsel %vm520_vm0, %v6641_v35, -inf }
  0xfd   :  { %v1081_v2 = vsel %vm520_vm0, %v6643_v37, -inf  ;;  %v1089_v15 = vsel %vm520_vm0, %v6645_v50, -inf  ;;  %v1035_v43 = vrot.slane %v1034_v17, 4  ;;  %v1043_v28 = vrot.slane %v1042_v23, 4 }
  0xfe   :  { %v1051_v22 = vrot.slane %v1050_v38, 4  ;;  %v1059_v58 = vrot.slane %v1058_v52, 4  ;;  %v6647_v3 = vunpack.c.l.bf16 %v6646_v33  ;;  %v6648_v31 = vunpack.c.h.bf16 %v6646_v33 }
  0xff   :  { %v6650_v12 = vunpack.c.l.bf16 %v6649_v60  ;;  %v6651_v8 = vunpack.c.h.bf16 %v6649_v60  ;;  %v1036_v61 = vmax.f32 %v1034_v17, %v1035_v43  ;;  %v1044_v35 = vmax.f32 %v1042_v23, %v1043_v28 }
 0x100   :  { %v1066_v4 = vmax.f32 %v6647_v3, %v1065_v47  ;;  %v1074_v34 = vmax.f32 %v6648_v31, %v1073_v5  ;;  %v1052_v19 = vmax.f32 %v1050_v38, %v1051_v22  ;;  %v1060_v37 = vmax.f32 %v1058_v52, %v1059_v58 }
 0x101   :  { %v1082_v63 = vmax.f32 %v6650_v12, %v1081_v2  ;;  %v1090_v36 = vmax.f32 %v6651_v8, %v1089_v15  ;;  %v1037_v55 = vrot.slane %v1036_v61, 2  ;;  %v1045_v32 = vrot.slane %v1044_v35, 2 }
 0x102   :  { %v1067_v54 = vrot.slane %v1066_v4, 4  ;;  %v1075_v50 = vrot.slane %v1074_v34, 4  ;;  %v1053_v47 = vrot.slane %v1052_v19, 2  ;;  %v1061_v3 = vrot.slane %v1060_v37, 2 }
 0x103   :  { %v1083_v51 = vrot.slane %v1082_v63, 4  ;;  %v1091_v56 = vrot.slane %v1090_v36, 4  ;;  %v1038_v2 = vmax.f32 %v1036_v61, %v1037_v55  ;;  %v1046_v12 = vmax.f32 %v1044_v35, %v1045_v32  ;;  %v6656_v61 = vld [vmem:[#allocation71_spill] sm:$0xff] }
 0x104   :  { %v1068_v33 = vmax.f32 %v1066_v4, %v1067_v54  ;;  %v1076_v5 = vmax.f32 %v1074_v34, %v1075_v50  ;;  %v1054_v60 = vmax.f32 %v1052_v19, %v1053_v47  ;;  %v1062_v15 = vmax.f32 %v1060_v37, %v1061_v3  ;;  %v6658_v37 = vld [vmem:[#allocation72_spill] sm:$0xff]  ;;  %v6660_v50 = vld [vmem:[#allocation74_spill] sm:$0xff] }
 0x105   :  { %v1084_v31 = vmax.f32 %v1082_v63, %v1083_v51  ;;  %v1092_v45 = vmax.f32 %v1090_v36, %v1091_v56  ;;  %v1039_v43 = vrot.slane %v1038_v2, 1  ;;  %v1047_v28 = vrot.slane %v1046_v12, 1 }
 0x106   :  { %v1069_v17 = vrot.slane %v1068_v33, 2  ;;  %v1077_v23 = vrot.slane %v1076_v5, 2  ;;  %v1055_v22 = vrot.slane %v1054_v60, 1  ;;  %v1063_v58 = vrot.slane %v1062_v15, 1 }
 0x107   :  { %v1085_v38 = vrot.slane %v1084_v31, 2  ;;  %v1093_v52 = vrot.slane %v1092_v45, 2  ;;  %v4326_v4 = vmax.f32 %v1038_v2, %v1039_v43  ;;  %v4328_v51 = vmax.f32 %v1046_v12, %v1047_v28  ;;  %v6671_v28 = vld [vmem:[#allocation73_spill] sm:$0xff] }
 0x108   :  { %v1070_v8 = vmax.f32 %v1068_v33, %v1069_v17  ;;  %v1078_v29 = vmax.f32 %v1076_v5, %v1077_v23  ;;  %v4330_v55 = vmax.f32 %v1054_v60, %v1055_v22  ;;  %v4332_v32 = vmax.f32 %v1062_v15, %v1063_v58  ;;  %v6662_v33 = vld [vmem:[#allocation75_spill] sm:$0xff]  ;;  %v6668_v17 = vld [vmem:[#allocation70_spill] sm:$0xff] }
 0x109   :  { %v1086_v44 = vmax.f32 %v1084_v31, %v1085_v38  ;;  %v1094_v57 = vmax.f32 %v1092_v45, %v1093_v52  ;;  %6652 = vst [vmem:[#allocation34_spill] sm:$0xff] %v4326_v4  ;;  %6653 = vst [vmem:[#allocation37_spill] sm:$0xff] %v4328_v51  ;;  %v6657_v35 = vunpack.c.l.bf16 %v6656_v61  ;;  %v6659_v54 = vunpack.c.l.bf16 %v6658_v37  ;;  %v6680_v37 = vld [vmem:[#allocation81_spill] sm:$0xff] }
 0x10a   :  { %6654 = vst [vmem:[#allocation41_spill] sm:$0xff] %v4330_v55  ;;  %6655 = vst [vmem:[#allocation42_spill] sm:$0xff] %v4332_v32  ;;  %v1071_v56 = vrot.slane %v1070_v8, 1  ;;  %v1079_v34 = vrot.slane %v1078_v29, 1  ;;  %v6661_v47 = vunpack.c.l.bf16 %v6660_v50  ;;  %v6663_v5 = vunpack.c.l.bf16 %v6662_v33 }
 0x10b   :  { %v1087_v63 = vrot.slane %v1086_v44, 1  ;;  %v1095_v36 = vrot.slane %v1094_v57, 1  ;;  %v1097_v19 = vsel %vm520_vm0, %v6657_v35, -inf  ;;  %v1105_v45 = vsel %vm520_vm0, %v6659_v54, -inf }
 0x10c   :  { %v1113_v3 = vsel %vm520_vm0, %v6661_v47, -inf  ;;  %v1121_v31 = vsel %vm520_vm0, %v6663_v5, -inf  ;;  %v4346_v2 = vmax.f32 %v1070_v8, %v1071_v56  ;;  %v4348_v12 = vmax.f32 %v1078_v29, %v1079_v34  ;;  %v6674_v8 = vld [vmem:[#allocation77_spill] sm:$0xff]  ;;  %v6682_v5 = vld [vmem:[#allocation76_spill] sm:$0xff] }
 0x10d   :  { %v4350_v60 = vmax.f32 %v1086_v44, %v1087_v63  ;;  %v4352_v15 = vmax.f32 %v1094_v57, %v1095_v36  ;;  %v6669_v23 = vunpack.c.l.bf16 %v6668_v17  ;;  %v6670_v52 = vunpack.c.h.bf16 %v6668_v17  ;;  %v6676_v44 = vld [vmem:[#allocation78_spill] sm:$0xff]  ;;  %v6678_v63 = vld [vmem:[#allocation80_spill] sm:$0xff] }
 0x10e   :  { %6664 = vst [vmem:[#allocation44_spill] sm:$0xff] %v4346_v2  ;;  %6665 = vst [vmem:[#allocation45_spill] sm:$0xff] %v4348_v12  ;;  %v6672_v22 = vunpack.c.l.bf16 %v6671_v28  ;;  %v6673_v61 = vunpack.c.h.bf16 %v6671_v28  ;;  %v6675_v56 = vunpack.c.l.bf16 %v6674_v8  ;;  %v6677_v34 = vunpack.c.l.bf16 %v6676_v44  ;;  %v6685_v28 = vld [vmem:[#allocation79_spill] sm:$0xff] }
 0x10f   :  { %6666 = vst [vmem:[#allocation40_spill] sm:$0xff] %v4350_v60  ;;  %6667 = vst [vmem:[#allocation43_spill] sm:$0xff] %v4352_v15  ;;  %v1098_v38 = vmax.f32 %v6669_v23, %v1097_v19  ;;  %v1106_v43 = vmax.f32 %v6670_v52, %v1105_v45  ;;  %v6679_v36 = vunpack.c.l.bf16 %v6678_v63  ;;  %v6681_v54 = vunpack.c.l.bf16 %v6680_v37 }
 0x110   :  { %v1114_v58 = vmax.f32 %v6672_v22, %v1113_v3  ;;  %v1122_v35 = vmax.f32 %v6673_v61, %v1121_v31  ;;  %v1129_v29 = vsel %vm520_vm0, %v6675_v56, -inf  ;;  %v1137_v57 = vsel %vm520_vm0, %v6677_v34, -inf }
 0x111   :  { %v1145_v19 = vsel %vm520_vm0, %v6679_v36, -inf  ;;  %v1153_v45 = vsel %vm520_vm0, %v6681_v54, -inf  ;;  %v1099_v50 = vrot.slane %v1098_v38, 4  ;;  %v1107_v47 = vrot.slane %v1106_v43, 4 }
 0x112   :  { %v1115_v3 = vrot.slane %v1114_v58, 4  ;;  %v1123_v33 = vrot.slane %v1122_v35, 4  ;;  %v6683_v31 = vunpack.c.l.bf16 %v6682_v5  ;;  %v6684_v23 = vunpack.c.h.bf16 %v6682_v5 }
 0x113   :  { %v6686_v22 = vunpack.c.l.bf16 %v6685_v28  ;;  %v6687_v8 = vunpack.c.h.bf16 %v6685_v28  ;;  %v1100_v44 = vmax.f32 %v1098_v38, %v1099_v50  ;;  %v1108_v34 = vmax.f32 %v1106_v43, %v1107_v47 }
 0x114   :  { %v1130_v17 = vmax.f32 %v6683_v31, %v1129_v29  ;;  %v1138_v52 = vmax.f32 %v6684_v23, %v1137_v57  ;;  %v1116_v63 = vmax.f32 %v1114_v58, %v1115_v3  ;;  %v1124_v36 = vmax.f32 %v1122_v35, %v1123_v33 }
 0x115   :  { %v1146_v61 = vmax.f32 %v6686_v22, %v1145_v19  ;;  %v1154_v56 = vmax.f32 %v6687_v8, %v1153_v45  ;;  %v1101_v12 = vrot.slane %v1100_v44, 2  ;;  %v1109_v2 = vrot.slane %v1108_v34, 2 }
 0x116   :  { %v1131_v37 = vrot.slane %v1130_v17, 4  ;;  %v1139_v54 = vrot.slane %v1138_v52, 4  ;;  %v1117_v29 = vrot.slane %v1116_v63, 2  ;;  %v1125_v31 = vrot.slane %v1124_v36, 2 }
 0x117   :  { %v1147_v15 = vrot.slane %v1146_v61, 4  ;;  %v1155_v60 = vrot.slane %v1154_v56, 4  ;;  %v1102_v19 = vmax.f32 %v1100_v44, %v1101_v12  ;;  %v1110_v22 = vmax.f32 %v1108_v34, %v1109_v2  ;;  %v6692_v44 = vld [vmem:[#allocation83_spill] sm:$0xff] }
 0x118   :  { %v1132_v5 = vmax.f32 %v1130_v17, %v1131_v37  ;;  %v1140_v57 = vmax.f32 %v1138_v52, %v1139_v54  ;;  %v1118_v28 = vmax.f32 %v1116_v63, %v1117_v29  ;;  %v1126_v45 = vmax.f32 %v1124_v36, %v1125_v31  ;;  %v6694_v36 = vld [vmem:[#allocation84_spill] sm:$0xff]  ;;  %v6696_v54 = vld [vmem:[#allocation86_spill] sm:$0xff] }
 0x119   :  { %v1148_v23 = vmax.f32 %v1146_v61, %v1147_v15  ;;  %v1156_v32 = vmax.f32 %v1154_v56, %v1155_v60  ;;  %v1103_v50 = vrot.slane %v1102_v19, 1  ;;  %v1111_v47 = vrot.slane %v1110_v22, 1 }
 0x11a   :  { %v1133_v38 = vrot.slane %v1132_v5, 2  ;;  %v1141_v43 = vrot.slane %v1140_v57, 2  ;;  %v1119_v3 = vrot.slane %v1118_v28, 1  ;;  %v1127_v33 = vrot.slane %v1126_v45, 1 }
 0x11b   :  { %v1149_v58 = vrot.slane %v1148_v23, 2  ;;  %v1157_v35 = vrot.slane %v1156_v32, 2  ;;  %v4382_v17 = vmax.f32 %v1102_v19, %v1103_v50  ;;  %v4384_v15 = vmax.f32 %v1110_v22, %v1111_v47  ;;  %v6707_v47 = vld [vmem:[#allocation85_spill] sm:$0xff] }
 0x11c   :  { %v1134_v8 = vmax.f32 %v1132_v5, %v1133_v38  ;;  %v1142_v55 = vmax.f32 %v1140_v57, %v1141_v43  ;;  %v4386_v12 = vmax.f32 %v1118_v28, %v1119_v3  ;;  %v4388_v2 = vmax.f32 %v1126_v45, %v1127_v33  ;;  %v6698_v5 = vld [vmem:[#allocation87_spill] sm:$0xff]  ;;  %v6704_v38 = vld [vmem:[#allocation82_spill] sm:$0xff] }
 0x11d   :  { %v1150_v51 = vmax.f32 %v1148_v23, %v1149_v58  ;;  %v1158_v4 = vmax.f32 %v1156_v32, %v1157_v35  ;;  %6688 = vst [vmem:[#allocation47_spill] sm:$0xff] %v4382_v17  ;;  %6689 = vst [vmem:[#allocation48_spill] sm:$0xff] %v4384_v15  ;;  %v6693_v34 = vunpack.c.l.bf16 %v6692_v44  ;;  %v6695_v37 = vunpack.c.l.bf16 %v6694_v36  ;;  %v6716_v36 = vld [vmem:[#allocation93_spill] sm:$0xff] }
 0x11e   :  { %6690 = vst [vmem:[#allocation50_spill] sm:$0xff] %v4386_v12  ;;  %6691 = vst [vmem:[#allocation51_spill] sm:$0xff] %v4388_v2  ;;  %v1135_v60 = vrot.slane %v1134_v8, 1  ;;  %v1143_v52 = vrot.slane %v1142_v55, 1  ;;  %v6697_v29 = vunpack.c.l.bf16 %v6696_v54  ;;  %v6699_v57 = vunpack.c.l.bf16 %v6698_v5 }
 0x11f   :  { %v1151_v61 = vrot.slane %v1150_v51, 1  ;;  %v1159_v56 = vrot.slane %v1158_v4, 1  ;;  %v1161_v63 = vsel %vm520_vm0, %v6693_v34, -inf  ;;  %v1169_v32 = vsel %vm520_vm0, %v6695_v37, -inf }
 0x120   :  { %v1177_v31 = vsel %vm520_vm0, %v6697_v29, -inf  ;;  %v1185_v23 = vsel %vm520_vm0, %v6699_v57, -inf  ;;  %v4402_v19 = vmax.f32 %v1134_v8, %v1135_v60  ;;  %v4404_v22 = vmax.f32 %v1142_v55, %v1143_v52  ;;  %v6710_v8 = vld [vmem:[#allocation89_spill] sm:$0xff]  ;;  %v6718_v57 = vld [vmem:[#allocation88_spill] sm:$0xff] }
 0x121   :  { %v4406_v28 = vmax.f32 %v1150_v51, %v1151_v61  ;;  %v4408_v45 = vmax.f32 %v1158_v4, %v1159_v56  ;;  %v6705_v43 = vunpack.c.l.bf16 %v6704_v38  ;;  %v6706_v35 = vunpack.c.h.bf16 %v6704_v38  ;;  %v6712_v51 = vld [vmem:[#allocation90_spill] sm:$0xff]  ;;  %v6714_v61 = vld [vmem:[#allocation92_spill] sm:$0xff] }
 0x122   :  { %6700 = vst [vmem:[#allocation46_spill] sm:$0xff] %v4402_v19  ;;  %6701 = vst [vmem:[#allocation49_spill] sm:$0xff] %v4404_v22  ;;  %v6708_v3 = vunpack.c.l.bf16 %v6707_v47  ;;  %v6709_v44 = vunpack.c.h.bf16 %v6707_v47  ;;  %v6711_v60 = vunpack.c.l.bf16 %v6710_v8  ;;  %v6713_v52 = vunpack.c.l.bf16 %v6712_v51  ;;  %v6721_v47 = vld [vmem:[#allocation91_spill] sm:$0xff] }
 0x123   :  { %6702 = vst [vmem:[#allocation53_spill] sm:$0xff] %v4406_v28  ;;  %6703 = vst [vmem:[#allocation54_spill] sm:$0xff] %v4408_v45  ;;  %v1162_v58 = vmax.f32 %v6705_v43, %v1161_v63  ;;  %v1170_v50 = vmax.f32 %v6706_v35, %v1169_v32  ;;  %v6715_v56 = vunpack.c.l.bf16 %v6714_v61  ;;  %v6717_v37 = vunpack.c.l.bf16 %v6716_v36 }
 0x124   :  { %v1178_v33 = vmax.f32 %v6708_v3, %v1177_v31  ;;  %v1186_v34 = vmax.f32 %v6709_v44, %v1185_v23  ;;  %v1193_v55 = vsel %vm520_vm0, %v6711_v60, -inf  ;;  %v1201_v4 = vsel %vm520_vm0, %v6713_v52, -inf }
 0x125   :  { %v1209_v63 = vsel %vm520_vm0, %v6715_v56, -inf  ;;  %v1217_v32 = vsel %vm520_vm0, %v6717_v37, -inf  ;;  %v1163_v54 = vrot.slane %v1162_v58, 4  ;;  %v1171_v29 = vrot.slane %v1170_v50, 4 }
 0x126   :  { %v1179_v31 = vrot.slane %v1178_v33, 4  ;;  %v1187_v5 = vrot.slane %v1186_v34, 4  ;;  %v6719_v23 = vunpack.c.l.bf16 %v6718_v57  ;;  %v6720_v43 = vunpack.c.h.bf16 %v6718_v57 }
 0x127   :  { %v6722_v3 = vunpack.c.l.bf16 %v6721_v47  ;;  %v6723_v8 = vunpack.c.h.bf16 %v6721_v47  ;;  %v1164_v51 = vmax.f32 %v1162_v58, %v1163_v54  ;;  %v1172_v52 = vmax.f32 %v1170_v50, %v1171_v29 }
 0x128   :  { %v1194_v38 = vmax.f32 %v6719_v23, %v1193_v55  ;;  %v1202_v35 = vmax.f32 %v6720_v43, %v1201_v4  ;;  %v1180_v61 = vmax.f32 %v1178_v33, %v1179_v31  ;;  %v1188_v56 = vmax.f32 %v1186_v34, %v1187_v5 }
 0x129   :  { %v1210_v44 = vmax.f32 %v6722_v3, %v1209_v63  ;;  %v1218_v60 = vmax.f32 %v6723_v8, %v1217_v32  ;;  %v1165_v22 = vrot.slane %v1164_v51, 2  ;;  %v1173_v19 = vrot.slane %v1172_v52, 2 }
 0x12a   :  { %v1195_v36 = vrot.slane %v1194_v38, 4  ;;  %v1203_v37 = vrot.slane %v1202_v35, 4  ;;  %v1181_v55 = vrot.slane %v1180_v61, 2  ;;  %v1189_v23 = vrot.slane %v1188_v56, 2 }
 0x12b   :  { %v1211_v45 = vrot.slane %v1210_v44, 4  ;;  %v1219_v28 = vrot.slane %v1218_v60, 4  ;;  %v1166_v63 = vmax.f32 %v1164_v51, %v1165_v22  ;;  %v1174_v3 = vmax.f32 %v1172_v52, %v1173_v19  ;;  %v6728_v51 = vld [vmem:[#allocation95_spill] sm:$0xff] }
 0x12c   :  { %v1196_v57 = vmax.f32 %v1194_v38, %v1195_v36  ;;  %v1204_v4 = vmax.f32 %v1202_v35, %v1203_v37  ;;  %v1182_v47 = vmax.f32 %v1180_v61, %v1181_v55  ;;  %v1190_v32 = vmax.f32 %v1188_v56, %v1189_v23  ;;  %v6730_v56 = vld [vmem:[#allocation96_spill] sm:$0xff]  ;;  %v6732_v37 = vld [vmem:[#allocation98_spill] sm:$0xff] }
 0x12d   :  { %v1212_v43 = vmax.f32 %v1210_v44, %v1211_v45  ;;  %v1220_v2 = vmax.f32 %v1218_v60, %v1219_v28  ;;  %v1167_v54 = vrot.slane %v1166_v63, 1  ;;  %v1175_v29 = vrot.slane %v1174_v3, 1 }
 0x12e   :  { %v1197_v58 = vrot.slane %v1196_v57, 2  ;;  %v1205_v50 = vrot.slane %v1204_v4, 2  ;;  %v1183_v31 = vrot.slane %v1182_v47, 1  ;;  %v1191_v5 = vrot.slane %v1190_v32, 1 }
 0x12f   :  { %v1213_v33 = vrot.slane %v1212_v43, 2  ;;  %v1221_v34 = vrot.slane %v1220_v2, 2  ;;  %v4438_v38 = vmax.f32 %v1166_v63, %v1167_v54  ;;  %v4440_v45 = vmax.f32 %v1174_v3, %v1175_v29  ;;  %v6743_v29 = vld [vmem:[#allocation97_spill] sm:$0xff] }
 0x130   :  { %v1198_v8 = vmax.f32 %v1196_v57, %v1197_v58  ;;  %v1206_v12 = vmax.f32 %v1204_v4, %v1205_v50  ;;  %v4442_v22 = vmax.f32 %v1182_v47, %v1183_v31  ;;  %v4444_v19 = vmax.f32 %v1190_v32, %v1191_v5  ;;  %v6734_v57 = vld [vmem:[#allocation99_spill] sm:$0xff]  ;;  %v6740_v58 = vld [vmem:[#allocation94_spill] sm:$0xff] }
 0x131   :  { %v1214_v15 = vmax.f32 %v1212_v43, %v1213_v33  ;;  %v1222_v17 = vmax.f32 %v1220_v2, %v1221_v34  ;;  %6724 = vst [vmem:[#allocation56_spill] sm:$0xff] %v4438_v38  ;;  %6725 = vst [vmem:[#allocation57_spill] sm:$0xff] %v4440_v45  ;;  %v6729_v52 = vunpack.c.l.bf16 %v6728_v51  ;;  %v6731_v36 = vunpack.c.l.bf16 %v6730_v56  ;;  %v6752_v56 = vld [vmem:[#allocation105_spill] sm:$0xff] }
 0x132   :  { %6726 = vst [vmem:[#allocation52_spill] sm:$0xff] %v4442_v22  ;;  %6727 = vst [vmem:[#allocation55_spill] sm:$0xff] %v4444_v19  ;;  %v1199_v28 = vrot.slane %v1198_v8, 1  ;;  %v1207_v35 = vrot.slane %v1206_v12, 1  ;;  %v6733_v55 = vunpack.c.l.bf16 %v6732_v37  ;;  %v6735_v4 = vunpack.c.l.bf16 %v6734_v57 }
 0x133   :  { %v1215_v44 = vrot.slane %v1214_v15, 1  ;;  %v1223_v60 = vrot.slane %v1222_v17, 1  ;;  %v1225_v61 = vsel %vm520_vm0, %v6729_v52, -inf  ;;  %v1233_v2 = vsel %vm520_vm0, %v6731_v36, -inf }
 0x134   :  { %v1241_v23 = vsel %vm520_vm0, %v6733_v55, -inf  ;;  %v1249_v43 = vsel %vm520_vm0, %v6735_v4, -inf  ;;  %v4458_v63 = vmax.f32 %v1198_v8, %v1199_v28  ;;  %v4460_v3 = vmax.f32 %v1206_v12, %v1207_v35  ;;  %v6746_v8 = vld [vmem:[#allocation101_spill] sm:$0xff]  ;;  %v6754_v4 = vld [vmem:[#allocation100_spill] sm:$0xff] }
 0x135   :  { %v4462_v47 = vmax.f32 %v1214_v15, %v1215_v44  ;;  %v4464_v32 = vmax.f32 %v1222_v17, %v1223_v60  ;;  %v6741_v50 = vunpack.c.l.bf16 %v6740_v58  ;;  %v6742_v34 = vunpack.c.h.bf16 %v6740_v58  ;;  %v6748_v15 = vld [vmem:[#allocation102_spill] sm:$0xff]  ;;  %v6750_v44 = vld [vmem:[#allocation104_spill] sm:$0xff] }
 0x136   :  { %6736 = vst [vmem:[#allocation59_spill] sm:$0xff] %v4458_v63  ;;  %6737 = vst [vmem:[#allocation60_spill] sm:$0xff] %v4460_v3  ;;  %v6744_v31 = vunpack.c.l.bf16 %v6743_v29  ;;  %v6745_v51 = vunpack.c.h.bf16 %v6743_v29  ;;  %v6747_v28 = vunpack.c.l.bf16 %v6746_v8  ;;  %v6749_v35 = vunpack.c.l.bf16 %v6748_v15  ;;  %v6757_v29 = vld [vmem:[#allocation103_spill] sm:$0xff] }
 0x137   :  { %6738 = vst [vmem:[#allocation62_spill] sm:$0xff] %v4462_v47  ;;  %6739 = vst [vmem:[#allocation63_spill] sm:$0xff] %v4464_v32  ;;  %v1226_v33 = vmax.f32 %v6741_v50, %v1225_v61  ;;  %v1234_v54 = vmax.f32 %v6742_v34, %v1233_v2  ;;  %v6751_v60 = vunpack.c.l.bf16 %v6750_v44  ;;  %v6753_v36 = vunpack.c.l.bf16 %v6752_v56 }
 0x138   :  { %v1242_v5 = vmax.f32 %v6744_v31, %v1241_v23  ;;  %v1250_v52 = vmax.f32 %v6745_v51, %v1249_v43  ;;  %v1257_v12 = vsel %vm520_vm0, %v6747_v28, -inf  ;;  %v1265_v17 = vsel %vm520_vm0, %v6749_v35, -inf }
 0x139   :  { %v1273_v61 = vsel %vm520_vm0, %v6751_v60, -inf  ;;  %v1281_v2 = vsel %vm520_vm0, %v6753_v36, -inf  ;;  %v1227_v37 = vrot.slane %v1226_v33, 4  ;;  %v1235_v55 = vrot.slane %v1234_v54, 4 }
 0x13a   :  { %v1243_v23 = vrot.slane %v1242_v5, 4  ;;  %v1251_v57 = vrot.slane %v1250_v52, 4  ;;  %v6755_v43 = vunpack.c.l.bf16 %v6754_v4  ;;  %v6756_v50 = vunpack.c.h.bf16 %v6754_v4 }
 0x13b   :  { %v6758_v31 = vunpack.c.l.bf16 %v6757_v29  ;;  %v6759_v8 = vunpack.c.h.bf16 %v6757_v29  ;;  %v1228_v15 = vmax.f32 %v1226_v33, %v1227_v37  ;;  %v1236_v35 = vmax.f32 %v1234_v54, %v1235_v55 }
 0x13c   :  { %v1258_v58 = vmax.f32 %v6755_v43, %v1257_v12  ;;  %v1266_v34 = vmax.f32 %v6756_v50, %v1265_v17  ;;  %v1244_v44 = vmax.f32 %v1242_v5, %v1243_v23  ;;  %v1252_v60 = vmax.f32 %v1250_v52, %v1251_v57 }
 0x13d   :  { %v1274_v51 = vmax.f32 %v6758_v31, %v1273_v61  ;;  %v1282_v28 = vmax.f32 %v6759_v8, %v1281_v2  ;;  %v1229_v3 = vrot.slane %v1228_v15, 2  ;;  %v1237_v63 = vrot.slane %v1236_v35, 2 }
 0x13e   :  { %v1259_v56 = vrot.slane %v1258_v58, 4  ;;  %v1267_v36 = vrot.slane %v1266_v34, 4  ;;  %v1245_v12 = vrot.slane %v1244_v44, 2  ;;  %v1253_v43 = vrot.slane %v1252_v60, 2 }
 0x13f   :  { %v1275_v32 = vrot.slane %v1274_v51, 4  ;;  %v1283_v47 = vrot.slane %v1282_v28, 4  ;;  %v1230_v61 = vmax.f32 %v1228_v15, %v1229_v3  ;;  %v1238_v31 = vmax.f32 %v1236_v35, %v1237_v63  ;;  %v6764_v15 = vld [vmem:[#allocation107_spill] sm:$0xff] }
 0x140   :  { %v1260_v4 = vmax.f32 %v1258_v58, %v1259_v56  ;;  %v1268_v17 = vmax.f32 %v1266_v34, %v1267_v36  ;;  %v1246_v29 = vmax.f32 %v1244_v44, %v1245_v12  ;;  %v1254_v2 = vmax.f32 %v1252_v60, %v1253_v43  ;;  %v6766_v60 = vld [vmem:[#allocation108_spill] sm:$0xff]  ;;  %v6768_v36 = vld [vmem:[#allocation110_spill] sm:$0xff] }
 0x141   :  { %v1276_v50 = vmax.f32 %v1274_v51, %v1275_v32  ;;  %v1284_v19 = vmax.f32 %v1282_v28, %v1283_v47  ;;  %v1231_v37 = vrot.slane %v1230_v61, 1  ;;  %v1239_v55 = vrot.slane %v1238_v31, 1 }
 0x142   :  { %v1261_v33 = vrot.slane %v1260_v4, 2  ;;  %v1269_v54 = vrot.slane %v1268_v17, 2  ;;  %v1247_v23 = vrot.slane %v1246_v29, 1  ;;  %v1255_v57 = vrot.slane %v1254_v2, 1 }
 0x143   :  { %v1277_v5 = vrot.slane %v1276_v50, 2  ;;  %v1285_v52 = vrot.slane %v1284_v19, 2  ;;  %v4494_v58 = vmax.f32 %v1230_v61, %v1231_v37  ;;  %v4496_v32 = vmax.f32 %v1238_v31, %v1239_v55  ;;  %v6779_v55 = vld [vmem:[#allocation109_spill] sm:$0xff] }
 0x144   :  { %v1262_v8 = vmax.f32 %v1260_v4, %v1261_v33  ;;  %v1270_v22 = vmax.f32 %v1268_v17, %v1269_v54  ;;  %v4498_v3 = vmax.f32 %v1246_v29, %v1247_v23  ;;  %v4500_v63 = vmax.f32 %v1254_v2, %v1255_v57  ;;  %v6770_v4 = vld [vmem:[#allocation111_spill] sm:$0xff]  ;;  %v6776_v33 = vld [vmem:[#allocation106_spill] sm:$0xff] }
 0x145   :  { %v1278_v45 = vmax.f32 %v1276_v50, %v1277_v5  ;;  %v1286_v38 = vmax.f32 %v1284_v19, %v1285_v52  ;;  %6760 = vst [vmem:[#allocation58_spill] sm:$0xff] %v4494_v58  ;;  %6761 = vst [vmem:[#allocation61_spill] sm:$0xff] %v4496_v32  ;;  %v6765_v35 = vunpack.c.l.bf16 %v6764_v15  ;;  %v6767_v56 = vunpack.c.l.bf16 %v6766_v60  ;;  %v6788_v60 = vld [vmem:[#allocation117_spill] sm:$0xff] }
 0x146   :  { %6762 = vst [vmem:[#allocation65_spill] sm:$0xff] %v4498_v3  ;;  %6763 = vst [vmem:[#allocation66_spill] sm:$0xff] %v4500_v63  ;;  %v1263_v47 = vrot.slane %v1262_v8, 1  ;;  %v1271_v34 = vrot.slane %v1270_v22, 1  ;;  %v6769_v12 = vunpack.c.l.bf16 %v6768_v36  ;;  %v6771_v17 = vunpack.c.l.bf16 %v6770_v4 }
 0x147   :  { %v1279_v51 = vrot.slane %v1278_v45, 1  ;;  %v1287_v28 = vrot.slane %v1286_v38, 1  ;;  %v1289_v44 = vsel %vm520_vm0, %v6765_v35, -inf  ;;  %v1297_v19 = vsel %vm520_vm0, %v6767_v56, -inf }
 0x148   :  { %v1305_v43 = vsel %vm520_vm0, %v6769_v12, -inf  ;;  %v1313_v50 = vsel %vm520_vm0, %v6771_v17, -inf  ;;  %v4514_v61 = vmax.f32 %v1262_v8, %v1263_v47  ;;  %v4516_v31 = vmax.f32 %v1270_v22, %v1271_v34  ;;  %v6782_v8 = vld [vmem:[#allocation113_spill] sm:$0xff]  ;;  %v6790_v17 = vld [vmem:[#allocation112_spill] sm:$0xff] }
 0x149   :  { %v4518_v29 = vmax.f32 %v1278_v45, %v1279_v51  ;;  %v4520_v2 = vmax.f32 %v1286_v38, %v1287_v28  ;;  %v6777_v54 = vunpack.c.l.bf16 %v6776_v33  ;;  %v6778_v52 = vunpack.c.h.bf16 %v6776_v33  ;;  %v6784_v45 = vld [vmem:[#allocation114_spill] sm:$0xff]  ;;  %v6786_v51 = vld [vmem:[#allocation116_spill] sm:$0xff] }
 0x14a   :  { %6772 = vst [vmem:[#allocation68_spill] sm:$0xff] %v4514_v61  ;;  %6773 = vst [vmem:[#allocation69_spill] sm:$0xff] %v4516_v31  ;;  %v6780_v23 = vunpack.c.l.bf16 %v6779_v55  ;;  %v6781_v15 = vunpack.c.h.bf16 %v6779_v55  ;;  %v6783_v47 = vunpack.c.l.bf16 %v6782_v8  ;;  %v6785_v34 = vunpack.c.l.bf16 %v6784_v45  ;;  %v6793_v55 = vld [vmem:[#allocation115_spill] sm:$0xff] }
 0x14b   :  { %6774 = vst [vmem:[#allocation64_spill] sm:$0xff] %v4518_v29  ;;  %6775 = vst [vmem:[#allocation67_spill] sm:$0xff] %v4520_v2  ;;  %v1290_v5 = vmax.f32 %v6777_v54, %v1289_v44  ;;  %v1298_v37 = vmax.f32 %v6778_v52, %v1297_v19  ;;  %v6787_v28 = vunpack.c.l.bf16 %v6786_v51  ;;  %v6789_v56 = vunpack.c.l.bf16 %v6788_v60 }
 0x14c   :  { %v1306_v57 = vmax.f32 %v6780_v23, %v1305_v43  ;;  %v1314_v35 = vmax.f32 %v6781_v15, %v1313_v50  ;;  %v1321_v22 = vsel %vm520_vm0, %v6783_v47, -inf  ;;  %v1329_v38 = vsel %vm520_vm0, %v6785_v34, -inf }
 0x14d   :  { %v1337_v44 = vsel %vm520_vm0, %v6787_v28, -inf  ;;  %v1345_v19 = vsel %vm520_vm0, %v6789_v56, -inf  ;;  %v1291_v36 = vrot.slane %v1290_v5, 4  ;;  %v1299_v12 = vrot.slane %v1298_v37, 4 }
 0x14e   :  { %v1307_v43 = vrot.slane %v1306_v57, 4  ;;  %v1315_v4 = vrot.slane %v1314_v35, 4  ;;  %v6791_v50 = vunpack.c.l.bf16 %v6790_v17  ;;  %v6792_v54 = vunpack.c.h.bf16 %v6790_v17 }
 0x14f   :  { %v6794_v23 = vunpack.c.l.bf16 %v6793_v55  ;;  %v6795_v8 = vunpack.c.h.bf16 %v6793_v55  ;;  %v1292_v45 = vmax.f32 %v1290_v5, %v1291_v36  ;;  %v1300_v34 = vmax.f32 %v1298_v37, %v1299_v12 }
 0x150   :  { %v1322_v33 = vmax.f32 %v6791_v50, %v1321_v22  ;;  %v1330_v52 = vmax.f32 %v6792_v54, %v1329_v38  ;;  %v1308_v51 = vmax.f32 %v1306_v57, %v1307_v43  ;;  %v1316_v28 = vmax.f32 %v1314_v35, %v1315_v4 }
 0x151   :  { %v1338_v15 = vmax.f32 %v6794_v23, %v1337_v44  ;;  %v1346_v47 = vmax.f32 %v6795_v8, %v1345_v19  ;;  %v1293_v31 = vrot.slane %v1292_v45, 2  ;;  %v1301_v61 = vrot.slane %v1300_v34, 2 }
 0x152   :  { %v1323_v60 = vrot.slane %v1322_v33, 4  ;;  %v1331_v56 = vrot.slane %v1330_v52, 4  ;;  %v1309_v22 = vrot.slane %v1308_v51, 2  ;;  %v1317_v50 = vrot.slane %v1316_v28, 2 }
 0x153   :  { %v1339_v2 = vrot.slane %v1338_v15, 4  ;;  %v1347_v29 = vrot.slane %v1346_v47, 4  ;;  %v1294_v44 = vmax.f32 %v1292_v45, %v1293_v31  ;;  %v1302_v23 = vmax.f32 %v1300_v34, %v1301_v61  ;;  %v6800_v45 = vld [vmem:[#allocation119_spill] sm:$0xff] }
 0x154   :  { %v1324_v17 = vmax.f32 %v1322_v33, %v1323_v60  ;;  %v1332_v38 = vmax.f32 %v1330_v52, %v1331_v56  ;;  %v1310_v55 = vmax.f32 %v1308_v51, %v1309_v22  ;;  %v1318_v19 = vmax.f32 %v1316_v28, %v1317_v50  ;;  %v6802_v28 = vld [vmem:[#allocation120_spill] sm:$0xff]  ;;  %v6804_v56 = vld [vmem:[#allocation122_spill] sm:$0xff] }
 0x155   :  { %v1340_v54 = vmax.f32 %v1338_v15, %v1339_v2  ;;  %v1348_v63 = vmax.f32 %v1346_v47, %v1347_v29  ;;  %v1295_v36 = vrot.slane %v1294_v44, 1  ;;  %v1303_v12 = vrot.slane %v1302_v23, 1 }
 0x156   :  { %v1325_v5 = vrot.slane %v1324_v17, 2  ;;  %v1333_v37 = vrot.slane %v1332_v38, 2  ;;  %v1311_v43 = vrot.slane %v1310_v55, 1  ;;  %v1319_v4 = vrot.slane %v1318_v19, 1 }
 0x157   :  { %v1341_v57 = vrot.slane %v1340_v54, 2  ;;  %v1349_v35 = vrot.slane %v1348_v63, 2  ;;  %v4550_v33 = vmax.f32 %v1294_v44, %v1295_v36  ;;  %v4552_v2 = vmax.f32 %v1302_v23, %v1303_v12  ;;  %v6815_v12 = vld [vmem:[#allocation121_spill] sm:$0xff] }
 0x158   :  { %v1326_v8 = vmax.f32 %v1324_v17, %v1325_v5  ;;  %v1334_v3 = vmax.f32 %v1332_v38, %v1333_v37  ;;  %v4554_v31 = vmax.f32 %v1310_v55, %v1311_v43  ;;  %v4556_v61 = vmax.f32 %v1318_v19, %v1319_v4  ;;  %v6806_v17 = vld [vmem:[#allocation123_spill] sm:$0xff]  ;;  %v6812_v5 = vld [vmem:[#allocation118_spill] sm:$0xff] }
 0x159   :  { %v1342_v32 = vmax.f32 %v1340_v54, %v1341_v57  ;;  %v1350_v58 = vmax.f32 %v1348_v63, %v1349_v35  ;;  %6796 = vst [vmem:[#allocation71_spill] sm:$0xff] %v4550_v33  ;;  %6797 = vst [vmem:[#allocation72_spill] sm:$0xff] %v4552_v2  ;;  %v6801_v34 = vunpack.c.l.bf16 %v6800_v45  ;;  %v6803_v60 = vunpack.c.l.bf16 %v6802_v28  ;;  %v6824_v28 = vld [vmem:[#allocation129_spill] sm:$0xff] }
 0x15a   :  { %6798 = vst [vmem:[#allocation74_spill] sm:$0xff] %v4554_v31  ;;  %6799 = vst [vmem:[#allocation75_spill] sm:$0xff] %v4556_v61  ;;  %v1327_v29 = vrot.slane %v1326_v8, 1  ;;  %v1335_v52 = vrot.slane %v1334_v3, 1  ;;  %v6805_v22 = vunpack.c.l.bf16 %v6804_v56  ;;  %v6807_v38 = vunpack.c.l.bf16 %v6806_v17 }
 0x15b   :  { %v1343_v15 = vrot.slane %v1342_v32, 1  ;;  %v1351_v47 = vrot.slane %v1350_v58, 1  ;;  %v1353_v51 = vsel %vm520_vm0, %v6801_v34, -inf  ;;  %v1361_v63 = vsel %vm520_vm0, %v6803_v60, -inf }
 0x15c   :  { %v1369_v50 = vsel %vm520_vm0, %v6805_v22, -inf  ;;  %v1377_v54 = vsel %vm520_vm0, %v6807_v38, -inf  ;;  %v4570_v44 = vmax.f32 %v1326_v8, %v1327_v29  ;;  %v4572_v23 = vmax.f32 %v1334_v3, %v1335_v52  ;;  %v6818_v8 = vld [vmem:[#allocation125_spill] sm:$0xff]  ;;  %v6826_v38 = vld [vmem:[#allocation124_spill] sm:$0xff] }
 0x15d   :  { %v4574_v55 = vmax.f32 %v1342_v32, %v1343_v15  ;;  %v4576_v19 = vmax.f32 %v1350_v58, %v1351_v47  ;;  %v6813_v37 = vunpack.c.l.bf16 %v6812_v5  ;;  %v6814_v35 = vunpack.c.h.bf16 %v6812_v5  ;;  %v6820_v32 = vld [vmem:[#allocation126_spill] sm:$0xff]  ;;  %v6822_v15 = vld [vmem:[#allocation128_spill] sm:$0xff] }
 0x15e   :  { %6808 = vst [vmem:[#allocation70_spill] sm:$0xff] %v4570_v44  ;;  %6809 = vst [vmem:[#allocation73_spill] sm:$0xff] %v4572_v23  ;;  %v6816_v43 = vunpack.c.l.bf16 %v6815_v12  ;;  %v6817_v45 = vunpack.c.h.bf16 %v6815_v12  ;;  %v6819_v29 = vunpack.c.l.bf16 %v6818_v8  ;;  %v6821_v52 = vunpack.c.l.bf16 %v6820_v32  ;;  %v6829_v12 = vld [vmem:[#allocation127_spill] sm:$0xff] }
 0x15f   :  { %6810 = vst [vmem:[#allocation77_spill] sm:$0xff] %v4574_v55  ;;  %6811 = vst [vmem:[#allocation78_spill] sm:$0xff] %v4576_v19  ;;  %v1354_v57 = vmax.f32 %v6813_v37, %v1353_v51  ;;  %v1362_v36 = vmax.f32 %v6814_v35, %v1361_v63  ;;  %v6823_v47 = vunpack.c.l.bf16 %v6822_v15  ;;  %v6825_v60 = vunpack.c.l.bf16 %v6824_v28 }
 0x160   :  { %v1370_v4 = vmax.f32 %v6816_v43, %v1369_v50  ;;  %v1378_v34 = vmax.f32 %v6817_v45, %v1377_v54  ;;  %v1385_v3 = vsel %vm520_vm0, %v6819_v29, -inf  ;;  %v1393_v58 = vsel %vm520_vm0, %v6821_v52, -inf }
 0x161   :  { %v1401_v51 = vsel %vm520_vm0, %v6823_v47, -inf  ;;  %v1409_v63 = vsel %vm520_vm0, %v6825_v60, -inf  ;;  %v1355_v56 = vrot.slane %v1354_v57, 4  ;;  %v1363_v22 = vrot.slane %v1362_v36, 4 }
 0x162   :  { %v1371_v50 = vrot.slane %v1370_v4, 4  ;;  %v1379_v17 = vrot.slane %v1378_v34, 4  ;;  %v6827_v54 = vunpack.c.l.bf16 %v6826_v38  ;;  %v6828_v37 = vunpack.c.h.bf16 %v6826_v38 }
 0x163   :  { %v6830_v43 = vunpack.c.l.bf16 %v6829_v12  ;;  %v6831_v8 = vunpack.c.h.bf16 %v6829_v12  ;;  %v1356_v32 = vmax.f32 %v1354_v57, %v1355_v56  ;;  %v1364_v52 = vmax.f32 %v1362_v36, %v1363_v22 }
 0x164   :  { %v1386_v5 = vmax.f32 %v6827_v54, %v1385_v3  ;;  %v1394_v35 = vmax.f32 %v6828_v37, %v1393_v58  ;;  %v1372_v15 = vmax.f32 %v1370_v4, %v1371_v50  ;;  %v1380_v47 = vmax.f32 %v1378_v34, %v1379_v17 }
 0x165   :  { %v1402_v45 = vmax.f32 %v6830_v43, %v1401_v51  ;;  %v1410_v29 = vmax.f32 %v6831_v8, %v1409_v63  ;;  %v1357_v23 = vrot.slane %v1356_v32, 2  ;;  %v1365_v44 = vrot.slane %v1364_v52, 2 }
 0x166   :  { %v1387_v28 = vrot.slane %v1386_v5, 4  ;;  %v1395_v60 = vrot.slane %v1394_v35, 4  ;;  %v1373_v3 = vrot.slane %v1372_v15, 2  ;;  %v1381_v54 = vrot.slane %v1380_v47, 2 }
 0x167   :  { %v1403_v19 = vrot.slane %v1402_v45, 4  ;;  %v1411_v55 = vrot.slane %v1410_v29, 4  ;;  %v1358_v51 = vmax.f32 %v1356_v32, %v1357_v23  ;;  %v1366_v43 = vmax.f32 %v1364_v52, %v1365_v44  ;;  %v6836_v32 = vld [vmem:[#allocation131_spill] sm:$0xff] }
 0x168   :  { %v1388_v38 = vmax.f32 %v1386_v5, %v1387_v28  ;;  %v1396_v58 = vmax.f32 %v1394_v35, %v1395_v60  ;;  %v1374_v12 = vmax.f32 %v1372_v15, %v1373_v3  ;;  %v1382_v63 = vmax.f32 %v1380_v47, %v1381_v54  ;;  %v6838_v47 = vld [vmem:[#allocation132_spill] sm:$0xff]  ;;  %v6840_v60 = vld [vmem:[#allocation134_spill] sm:$0xff] }
 0x169   :  { %v1404_v37 = vmax.f32 %v1402_v45, %v1403_v19  ;;  %v1412_v61 = vmax.f32 %v1410_v29, %v1411_v55  ;;  %v1359_v56 = vrot.slane %v1358_v51, 1  ;;  %v1367_v22 = vrot.slane %v1366_v43, 1 }
 0x16a   :  { %v1389_v57 = vrot.slane %v1388_v38, 2  ;;  %v1397_v36 = vrot.slane %v1396_v58, 2  ;;  %v1375_v50 = vrot.slane %v1374_v12, 1  ;;  %v1383_v17 = vrot.slane %v1382_v63, 1 }
 0x16b   :  { %v1405_v4 = vrot.slane %v1404_v37, 2  ;;  %v1413_v34 = vrot.slane %v1412_v61, 2  ;;  %v4606_v5 = vmax.f32 %v1358_v51, %v1359_v56  ;;  %v4608_v19 = vmax.f32 %v1366_v43, %v1367_v22  ;;  %v6851_v22 = vld [vmem:[#allocation133_spill] sm:$0xff] }
 0x16c   :  { %v1390_v8 = vmax.f32 %v1388_v38, %v1389_v57  ;;  %v1398_v31 = vmax.f32 %v1396_v58, %v1397_v36  ;;  %v4610_v23 = vmax.f32 %v1374_v12, %v1375_v50  ;;  %v4612_v44 = vmax.f32 %v1382_v63, %v1383_v17  ;;  %v6842_v38 = vld [vmem:[#allocation135_spill] sm:$0xff]  ;;  %v6848_v57 = vld [vmem:[#allocation130_spill] sm:$0xff] }
 0x16d   :  { %v1406_v2 = vmax.f32 %v1404_v37, %v1405_v4  ;;  %v1414_v33 = vmax.f32 %v1412_v61, %v1413_v34  ;;  %6832 = vst [vmem:[#allocation80_spill] sm:$0xff] %v4606_v5  ;;  %6833 = vst [vmem:[#allocation81_spill] sm:$0xff] %v4608_v19  ;;  %v6837_v52 = vunpack.c.l.bf16 %v6836_v32  ;;  %v6839_v28 = vunpack.c.l.bf16 %v6838_v47  ;;  %v6860_v47 = vld [vmem:[#allocation141_spill] sm:$0xff] }
 0x16e   :  { %6834 = vst [vmem:[#allocation76_spill] sm:$0xff] %v4610_v23  ;;  %6835 = vst [vmem:[#allocation79_spill] sm:$0xff] %v4612_v44  ;;  %v1391_v55 = vrot.slane %v1390_v8, 1  ;;  %v1399_v35 = vrot.slane %v1398_v31, 1  ;;  %v6841_v3 = vunpack.c.l.bf16 %v6840_v60  ;;  %v6843_v58 = vunpack.c.l.bf16 %v6842_v38 }
 0x16f   :  { %v1407_v45 = vrot.slane %v1406_v2, 1  ;;  %v1415_v29 = vrot.slane %v1414_v33, 1  ;;  %v1417_v15 = vsel %vm520_vm0, %v6837_v52, -inf  ;;  %v1425_v61 = vsel %vm520_vm0, %v6839_v28, -inf }
 0x170   :  { %v1433_v54 = vsel %vm520_vm0, %v6841_v3, -inf  ;;  %v1441_v37 = vsel %vm520_vm0, %v6843_v58, -inf  ;;  %v4626_v51 = vmax.f32 %v1390_v8, %v1391_v55  ;;  %v4628_v43 = vmax.f32 %v1398_v31, %v1399_v35  ;;  %v6854_v8 = vld [vmem:[#allocation137_spill] sm:$0xff]  ;;  %v6862_v58 = vld [vmem:[#allocation136_spill] sm:$0xff] }
 0x171   :  { %v4630_v12 = vmax.f32 %v1406_v2, %v1407_v45  ;;  %v4632_v63 = vmax.f32 %v1414_v33, %v1415_v29  ;;  %v6849_v36 = vunpack.c.l.bf16 %v6848_v57  ;;  %v6850_v34 = vunpack.c.h.bf16 %v6848_v57  ;;  %v6856_v2 = vld [vmem:[#allocation138_spill] sm:$0xff]  ;;  %v6858_v45 = vld [vmem:[#allocation140_spill] sm:$0xff] }
 0x172   :  { %6844 = vst [vmem:[#allocation83_spill] sm:$0xff] %v4626_v51  ;;  %6845 = vst [vmem:[#allocation84_spill] sm:$0xff] %v4628_v43  ;;  %v6852_v50 = vunpack.c.l.bf16 %v6851_v22  ;;  %v6853_v32 = vunpack.c.h.bf16 %v6851_v22  ;;  %v6855_v55 = vunpack.c.l.bf16 %v6854_v8  ;;  %v6857_v35 = vunpack.c.l.bf16 %v6856_v2  ;;  %v6865_v22 = vld [vmem:[#allocation139_spill] sm:$0xff] }
 0x173   :  { %6846 = vst [vmem:[#allocation86_spill] sm:$0xff] %v4630_v12  ;;  %6847 = vst [vmem:[#allocation87_spill] sm:$0xff] %v4632_v63  ;;  %v1418_v4 = vmax.f32 %v6849_v36, %v1417_v15  ;;  %v1426_v56 = vmax.f32 %v6850_v34, %v1425_v61  ;;  %v6859_v29 = vunpack.c.l.bf16 %v6858_v45  ;;  %v6861_v28 = vunpack.c.l.bf16 %v6860_v47 }
 0x174   :  { %v1434_v17 = vmax.f32 %v6852_v50, %v1433_v54  ;;  %v1442_v52 = vmax.f32 %v6853_v32, %v1441_v37  ;;  %v1449_v31 = vsel %vm520_vm0, %v6855_v55, -inf  ;;  %v1457_v33 = vsel %vm520_vm0, %v6857_v35, -inf }
 0x175   :  { %v1465_v15 = vsel %vm520_vm0, %v6859_v29, -inf  ;;  %v1473_v61 = vsel %vm520_vm0, %v6861_v28, -inf  ;;  %v1419_v60 = vrot.slane %v1418_v4, 4  ;;  %v1427_v3 = vrot.slane %v1426_v56, 4 }
 0x176   :  { %v1435_v54 = vrot.slane %v1434_v17, 4  ;;  %v1443_v38 = vrot.slane %v1442_v52, 4  ;;  %v6863_v37 = vunpack.c.l.bf16 %v6862_v58  ;;  %v6864_v36 = vunpack.c.h.bf16 %v6862_v58 }
 0x177   :  { %v6866_v50 = vunpack.c.l.bf16 %v6865_v22  ;;  %v6867_v8 = vunpack.c.h.bf16 %v6865_v22  ;;  %v1420_v2 = vmax.f32 %v1418_v4, %v1419_v60  ;;  %v1428_v35 = vmax.f32 %v1426_v56, %v1427_v3 }
 0x178   :  { %v1450_v57 = vmax.f32 %v6863_v37, %v1449_v31  ;;  %v1458_v34 = vmax.f32 %v6864_v36, %v1457_v33  ;;  %v1436_v45 = vmax.f32 %v1434_v17, %v1435_v54  ;;  %v1444_v29 = vmax.f32 %v1442_v52, %v1443_v38 }
 0x179   :  { %v1466_v32 = vmax.f32 %v6866_v50, %v1465_v15  ;;  %v1474_v55 = vmax.f32 %v6867_v8, %v1473_v61  ;;  %v1421_v43 = vrot.slane %v1420_v2, 2  ;;  %v1429_v51 = vrot.slane %v1428_v35, 2 }
 0x17a   :  { %v1451_v47 = vrot.slane %v1450_v57, 4  ;;  %v1459_v28 = vrot.slane %v1458_v34, 4  ;;  %v1437_v31 = vrot.slane %v1436_v45, 2  ;;  %v1445_v37 = vrot.slane %v1444_v29, 2 }
 0x17b   :  { %v1467_v63 = vrot.slane %v1466_v32, 4  ;;  %v1475_v12 = vrot.slane %v1474_v55, 4  ;;  %v1422_v15 = vmax.f32 %v1420_v2, %v1421_v43  ;;  %v1430_v50 = vmax.f32 %v1428_v35, %v1429_v51  ;;  %v6872_v2 = vld [vmem:[#allocation143_spill] sm:$0xff] }
 0x17c   :  { %v1452_v58 = vmax.f32 %v1450_v57, %v1451_v47  ;;  %v1460_v33 = vmax.f32 %v1458_v34, %v1459_v28  ;;  %v1438_v22 = vmax.f32 %v1436_v45, %v1437_v31  ;;  %v1446_v61 = vmax.f32 %v1444_v29, %v1445_v37  ;;  %v6874_v29 = vld [vmem:[#allocation144_spill] sm:$0xff]  ;;  %v6876_v28 = vld [vmem:[#allocation146_spill] sm:$0xff] }
 0x17d   :  { %v1468_v36 = vmax.f32 %v1466_v32, %v1467_v63  ;;  %v1476_v44 = vmax.f32 %v1474_v55, %v1475_v12  ;;  %v1423_v60 = vrot.slane %v1422_v15, 1  ;;  %v1431_v3 = vrot.slane %v1430_v50, 1 }
 0x17e   :  { %v1453_v4 = vrot.slane %v1452_v58, 2  ;;  %v1461_v56 = vrot.slane %v1460_v33, 2  ;;  %v1439_v54 = vrot.slane %v1438_v22, 1  ;;  %v1447_v38 = vrot.slane %v1446_v61, 1 }
 0x17f   :  { %v1469_v17 = vrot.slane %v1468_v36, 2  ;;  %v1477_v52 = vrot.slane %v1476_v44, 2  ;;  %v4662_v57 = vmax.f32 %v1422_v15, %v1423_v60  ;;  %v4664_v63 = vmax.f32 %v1430_v50, %v1431_v3  ;;  %v6887_v3 = vld [vmem:[#allocation145_spill] sm:$0xff] }
 0x180   :  { %v1454_v8 = vmax.f32 %v1452_v58, %v1453_v4  ;;  %v1462_v23 = vmax.f32 %v1460_v33, %v1461_v56  ;;  %v4666_v43 = vmax.f32 %v1438_v22, %v1439_v54  ;;  %v4668_v51 = vmax.f32 %v1446_v61, %v1447_v38  ;;  %v6878_v58 = vld [vmem:[#allocation147_spill] sm:$0xff]  ;;  %v6884_v4 = vld [vmem:[#allocation142_spill] sm:$0xff] }
 0x181   :  { %v1470_v19 = vmax.f32 %v1468_v36, %v1469_v17  ;;  %v1478_v5 = vmax.f32 %v1476_v44, %v1477_v52  ;;  %6868 = vst [vmem:[#allocation82_spill] sm:$0xff] %v4662_v57  ;;  %6869 = vst [vmem:[#allocation85_spill] sm:$0xff] %v4664_v63  ;;  %v6873_v35 = vunpack.c.l.bf16 %v6872_v2  ;;  %v6875_v47 = vunpack.c.l.bf16 %v6874_v29  ;;  %v6896_v29 = vld [vmem:[#allocation153_spill] sm:$0xff] }
 0x182   :  { %6870 = vst [vmem:[#allocation89_spill] sm:$0xff] %v4666_v43  ;;  %6871 = vst [vmem:[#allocation90_spill] sm:$0xff] %v4668_v51  ;;  %v1455_v12 = vrot.slane %v1454_v8, 1  ;;  %v1463_v34 = vrot.slane %v1462_v23, 1  ;;  %v6877_v31 = vunpack.c.l.bf16 %v6876_v28  ;;  %v6879_v33 = vunpack.c.l.bf16 %v6878_v58 }
 0x183   :  { %v1471_v32 = vrot.slane %v1470_v19, 1  ;;  %v1479_v55 = vrot.slane %v1478_v5, 1  ;;  %v1481_v45 = vsel %vm520_vm0, %v6873_v35, -inf  ;;  %v1489_v44 = vsel %vm520_vm0, %v6875_v47, -inf }
 0x184   :  { %v1497_v37 = vsel %vm520_vm0, %v6877_v31, -inf  ;;  %v1505_v36 = vsel %vm520_vm0, %v6879_v33, -inf  ;;  %v4682_v15 = vmax.f32 %v1454_v8, %v1455_v12  ;;  %v4684_v50 = vmax.f32 %v1462_v23, %v1463_v34  ;;  %v6890_v8 = vld [vmem:[#allocation149_spill] sm:$0xff]  ;;  %v6898_v33 = vld [vmem:[#allocation148_spill] sm:$0xff] }
 0x185   :  { %v4686_v22 = vmax.f32 %v1470_v19, %v1471_v32  ;;  %v4688_v61 = vmax.f32 %v1478_v5, %v1479_v55  ;;  %v6885_v56 = vunpack.c.l.bf16 %v6884_v4  ;;  %v6886_v52 = vunpack.c.h.bf16 %v6884_v4  ;;  %v6892_v19 = vld [vmem:[#allocation150_spill] sm:$0xff]  ;;  %v6894_v32 = vld [vmem:[#allocation152_spill] sm:$0xff] }
 0x186   :  { %6880 = vst [vmem:[#allocation92_spill] sm:$0xff] %v4682_v15  ;;  %6881 = vst [vmem:[#allocation93_spill] sm:$0xff] %v4684_v50  ;;  %v6888_v54 = vunpack.c.l.bf16 %v6887_v3  ;;  %v6889_v2 = vunpack.c.h.bf16 %v6887_v3  ;;  %v6891_v12 = vunpack.c.l.bf16 %v6890_v8  ;;  %v6893_v34 = vunpack.c.l.bf16 %v6892_v19  ;;  %v6901_v3 = vld [vmem:[#allocation151_spill] sm:$0xff] }
 0x187   :  { %6882 = vst [vmem:[#allocation88_spill] sm:$0xff] %v4686_v22  ;;  %6883 = vst [vmem:[#allocation91_spill] sm:$0xff] %v4688_v61  ;;  %v1482_v17 = vmax.f32 %v6885_v56, %v1481_v45  ;;  %v1490_v60 = vmax.f32 %v6886_v52, %v1489_v44  ;;  %v6895_v55 = vunpack.c.l.bf16 %v6894_v32  ;;  %v6897_v47 = vunpack.c.l.bf16 %v6896_v29 }
 0x188   :  { %v1498_v38 = vmax.f32 %v6888_v54, %v1497_v37  ;;  %v1506_v35 = vmax.f32 %v6889_v2, %v1505_v36  ;;  %v1513_v23 = vsel %vm520_vm0, %v6891_v12, -inf  ;;  %v1521_v5 = vsel %vm520_vm0, %v6893_v34, -inf }
 0x189   :  { %v1529_v45 = vsel %vm520_vm0, %v6895_v55, -inf  ;;  %v1537_v44 = vsel %vm520_vm0, %v6897_v47, -inf  ;;  %v1483_v28 = vrot.slane %v1482_v17, 4  ;;  %v1491_v31 = vrot.slane %v1490_v60, 4 }
 0x18a   :  { %v1499_v37 = vrot.slane %v1498_v38, 4  ;;  %v1507_v58 = vrot.slane %v1506_v35, 4  ;;  %v6899_v36 = vunpack.c.l.bf16 %v6898_v33  ;;  %v6900_v56 = vunpack.c.h.bf16 %v6898_v33 }
 0x18b   :  { %v6902_v54 = vunpack.c.l.bf16 %v6901_v3  ;;  %v6903_v8 = vunpack.c.h.bf16 %v6901_v3  ;;  %v1484_v19 = vmax.f32 %v1482_v17, %v1483_v28  ;;  %v1492_v34 = vmax.f32 %v1490_v60, %v1491_v31 }
 0x18c   :  { %v1514_v4 = vmax.f32 %v6899_v36, %v1513_v23  ;;  %v1522_v52 = vmax.f32 %v6900_v56, %v1521_v5  ;;  %v1500_v32 = vmax.f32 %v1498_v38, %v1499_v37  ;;  %v1508_v55 = vmax.f32 %v1506_v35, %v1507_v58 }
 0x18d   :  { %v1530_v2 = vmax.f32 %v6902_v54, %v1529_v45  ;;  %v1538_v12 = vmax.f32 %v6903_v8, %v1537_v44  ;;  %v1485_v50 = vrot.slane %v1484_v19, 2  ;;  %v1493_v15 = vrot.slane %v1492_v34, 2 }
 0x18e   :  { %v1515_v29 = vrot.slane %v1514_v4, 4  ;;  %v1523_v47 = vrot.slane %v1522_v52, 4  ;;  %v1501_v23 = vrot.slane %v1500_v32, 2  ;;  %v1509_v36 = vrot.slane %v1508_v55, 2 }
 0x18f   :  { %v1531_v61 = vrot.slane %v1530_v2, 4  ;;  %v1539_v22 = vrot.slane %v1538_v12, 4  ;;  %v1486_v45 = vmax.f32 %v1484_v19, %v1485_v50  ;;  %v1494_v54 = vmax.f32 %v1492_v34, %v1493_v15  ;;  %v6990_v19 = vld [vmem:[#allocation82_spill] sm:$0xff]  ;;  %v6997_v34 = vld [vmem:[#allocation91_spill] sm:$0xff] }
 0x190   :  { %v1516_v33 = vmax.f32 %v1514_v4, %v1515_v29  ;;  %v1524_v5 = vmax.f32 %v1522_v52, %v1523_v47  ;;  %v1502_v3 = vmax.f32 %v1500_v32, %v1501_v23  ;;  %v1510_v44 = vmax.f32 %v1508_v55, %v1509_v36  ;;  %v6994_v36 = vld [vmem:[#allocation92_spill] sm:$0xff]  ;;  %v6995_v32 = vld [vmem:[#allocation93_spill] sm:$0xff] }
 0x191   :  { %v1532_v56 = vmax.f32 %v1530_v2, %v1531_v61  ;;  %v1540_v51 = vmax.f32 %v1538_v12, %v1539_v22  ;;  %v1487_v28 = vrot.slane %v1486_v45, 1  ;;  %v1495_v31 = vrot.slane %v1494_v54, 1 }
 0x192   :  { %v1517_v17 = vrot.slane %v1516_v33, 2  ;;  %v1525_v60 = vrot.slane %v1524_v5, 2  ;;  %v1503_v37 = vrot.slane %v1502_v3, 1  ;;  %v1511_v58 = vrot.slane %v1510_v44, 1 }
 0x193   :  { %v1533_v38 = vrot.slane %v1532_v56, 2  ;;  %v1541_v35 = vrot.slane %v1540_v51, 2  ;;  %v4718_v4 = vmax.f32 %v1486_v45, %v1487_v28  ;;  %v4720_v61 = vmax.f32 %v1494_v54, %v1495_v31  ;;  %v6906_v31 = vld [vmem:[#allocation2_spill] sm:$0xff]  ;;  %v6907_v28 = vld [vmem:[#allocation3_spill] sm:$0xff]  ;;  %v6915_v45 = vld [vmem:[#allocation12_spill] sm:$0xff] }
 0x194   :  { %v1518_v8 = vmax.f32 %v1516_v33, %v1517_v17  ;;  %v1526_v43 = vmax.f32 %v1524_v5, %v1525_v60  ;;  %v4722_v50 = vmax.f32 %v1502_v3, %v1503_v37  ;;  %v4724_v15 = vmax.f32 %v1510_v44, %v1511_v58  ;;  %v6910_v60 = vld [vmem:[#allocation8_spill] sm:$0xff]  ;;  %v6911_v17 = vld [vmem:[#allocation9_spill] sm:$0xff]  ;;  %v6913_v3 = vld [vmem:[#allocation7_spill] sm:$0xff] }
 0x195   :  { %v1534_v63 = vmax.f32 %v1532_v56, %v1533_v38  ;;  %v1542_v57 = vmax.f32 %v1540_v51, %v1541_v35  ;;  %6904 = vst [vmem:[#allocation95_spill] sm:$0xff] %v4720_v61  ;;  %v6908_v35 = vld [vmem:[#allocation5_spill] sm:$0xff]  ;;  %v6909_v38 = vld [vmem:[#allocation6_spill] sm:$0xff]  ;;  %v6912_v44 = vld [vmem:[#allocation4_spill] sm:$0xff]  ;;  %v7001_v37 = vpack.c.bf16 %v3884_v6, %v3884_v6  ;;  %v7005_v6 = vpack.c.bf16 %v3904_v25, %v3904_v25 }
 0x196   :  { %v1519_v22 = vrot.slane %v1518_v8, 1  ;;  %v1527_v52 = vrot.slane %v1526_v43, 1  ;;  %v6914_v54 = vld [vmem:[#allocation11_spill] sm:$0xff]  ;;  %v6991_v56 = vld [vmem:[#allocation85_spill] sm:$0xff]  ;;  %v6993_v33 = vld [vmem:[#allocation90_spill] sm:$0xff]  ;;  %v7009_v25 = vpack.c.bf16 %v3940_v40, %v3940_v40  ;;  %v7013_v40 = vpack.c.bf16 %v3960_v53, %v3960_v53 }
 0x197   :  { %v1535_v2 = vrot.slane %v1534_v63, 1  ;;  %v1543_v12 = vrot.slane %v1542_v57, 1  ;;  %v6992_v5 = vld [vmem:[#allocation89_spill] sm:$0xff]  ;;  %v6996_v51 = vld [vmem:[#allocation88_spill] sm:$0xff]  ;;  %v7017_v53 = vpack.c.bf16 %v3996_v7, %v3996_v7  ;;  %v7021_v7 = vpack.c.bf16 %v4016_v41, %v4016_v41 }
 0x198   :  { %v4734_v55 = vmax.f32 %v1518_v8, %v1519_v22  ;;  %v4736_v29 = vmax.f32 %v1526_v43, %v1527_v52  ;;  %v6918_v43 = vld [vmem:[#allocation10_spill] sm:$0xff]  ;;  %v6998_v8 = vpack.c.bf16 %v3878_v21, %v3878_v21  ;;  %v6999_v52 = vpack.c.bf16 %v3880_v27, %v3880_v27  ;;  %v7044_v58 = vld [vmem:[#allocation13_spill] sm:$0xff] }
 0x199   :  { %v4738_v47 = vmax.f32 %v1534_v63, %v1535_v2  ;;  %v4740_v23 = vmax.f32 %v1542_v57, %v1543_v12  ;;  %v6916_v57 = vld [vmem:[#allocation14_spill] sm:$0xff]  ;;  %v6917_v63 = vld [vmem:[#allocation15_spill] sm:$0xff]  ;;  %v7000_v2 = vpack.c.bf16 %v3882_v30, %v3882_v30  ;;  %v7002_v21 = vpack.c.bf16 %v3898_v11, %v3898_v11 }
 0x19a   :  { %v4993_v61 = vunpack.c.l.b16 %v6998_v8  ;;  %v4998_v22 = vunpack.c.l.b16 %v6999_v52  ;;  %v7003_v27 = vpack.c.bf16 %v3900_v10, %v3900_v10  ;;  %v7004_v30 = vpack.c.bf16 %v3902_v14, %v3902_v14 }
 0x19b   :  { %6905 = vst [vmem:[#allocation96_spill] sm:$0xff] %v4738_v47  ;;  %v5003_v12 = vunpack.c.l.b16 %v7000_v2  ;;  %v5008_v47 = vunpack.c.l.b16 %v7001_v37  ;;  %v5013_v8 = vunpack.c.l.b16 %v7002_v21  ;;  %v5028_v37 = vunpack.c.l.b16 %v7005_v6 }
 0x19c   :  { %v5018_v52 = vunpack.c.l.b16 %v7003_v27  ;;  %v5023_v2 = vunpack.c.l.b16 %v7004_v30  ;;  %v7006_v11 = vpack.c.bf16 %v3934_v39, %v3934_v39  ;;  %v7007_v10 = vpack.c.bf16 %v3936_v9, %v3936_v9 }
 0x19d   :  { %v7008_v14 = vpack.c.bf16 %v3938_v18, %v3938_v18  ;;  %v5048_v6 = vunpack.c.l.b16 %v7009_v25  ;;  %v7010_v39 = vpack.c.bf16 %v3954_v0, %v3954_v0  ;;  %v7011_v9 = vpack.c.bf16 %v3956_v16, %v3956_v16 }
 0x19e   :  { %v5033_v21 = vunpack.c.l.b16 %v7006_v11  ;;  %v5038_v27 = vunpack.c.l.b16 %v7007_v10  ;;  %v7012_v18 = vpack.c.bf16 %v3958_v26, %v3958_v26  ;;  %v5068_v25 = vunpack.c.l.b16 %v7013_v40 }
 0x19f   :  { %v5043_v30 = vunpack.c.l.b16 %v7008_v14  ;;  %v5053_v11 = vunpack.c.l.b16 %v7010_v39  ;;  %v5058_v10 = vunpack.c.l.b16 %v7011_v9  ;;  %v7014_v0 = vpack.c.bf16 %v3990_v13, %v3990_v13 }
 0x1a0   :  { %v5063_v14 = vunpack.c.l.b16 %v7012_v18  ;;  %v7015_v16 = vpack.c.bf16 %v3992_v1, %v3992_v1  ;;  %v7016_v26 = vpack.c.bf16 %v3994_v59, %v3994_v59  ;;  %v5088_v40 = vunpack.c.l.b16 %v7017_v53 }
 0x1a1   :  { %v5073_v39 = vunpack.c.l.b16 %v7014_v0  ;;  %v7018_v13 = vpack.c.bf16 %v4010_v46, %v4010_v46  ;;  %v7019_v1 = vpack.c.bf16 %v4012_v49, %v4012_v49  ;;  %v7020_v59 = vpack.c.bf16 %v4014_v42, %v4014_v42 }
 0x1a2   :  { %v5078_v9 = vunpack.c.l.b16 %v7015_v16  ;;  %v5083_v18 = vunpack.c.l.b16 %v7016_v26  ;;  %v5108_v53 = vunpack.c.l.b16 %v7021_v7  ;;  %v7022_v46 = vpack.c.bf16 %v4046_v48, %v4046_v48 }
 0x1a3   :  { %v5093_v0 = vunpack.c.l.b16 %v7018_v13  ;;  %v5098_v16 = vunpack.c.l.b16 %v7019_v1  ;;  %v5103_v26 = vunpack.c.l.b16 %v7020_v59  ;;  %v7023_v49 = vpack.c.bf16 %v4048_v24, %v4048_v24 }
 0x1a4   :  { %v5113_v13 = vunpack.c.l.b16 %v7022_v46  ;;  %v7024_v42 = vpack.c.bf16 %v4050_v20, %v4050_v20  ;;  %v7025_v41 = vpack.c.bf16 %v4052_v62, %v4052_v62  ;;  %v7026_v48 = vpack.c.bf16 %v6906_v31, %v6906_v31 }
 0x1a5   :  { %v5118_v1 = vunpack.c.l.b16 %v7023_v49  ;;  %v7027_v24 = vpack.c.bf16 %v6907_v28, %v6907_v28  ;;  %v7028_v20 = vpack.c.bf16 %v6908_v35, %v6908_v35  ;;  %v7029_v62 = vpack.c.bf16 %v6909_v38, %v6909_v38 }
 0x1a6   :  { %v5123_v59 = vunpack.c.l.b16 %v7024_v42  ;;  %v5128_v7 = vunpack.c.l.b16 %v7025_v41  ;;  %v5133_v46 = vunpack.c.l.b16 %v7026_v48  ;;  %v7030_v31 = vpack.c.bf16 %v6910_v60, %v6910_v60 }
 0x1a7   :  { %v5138_v49 = vunpack.c.l.b16 %v7027_v24  ;;  %v5143_v42 = vunpack.c.l.b16 %v7028_v20  ;;  %v5148_v41 = vunpack.c.l.b16 %v7029_v62  ;;  %v7031_v28 = vpack.c.bf16 %v6911_v17, %v6911_v17 }
 0x1a8   :  { %v5153_v48 = vunpack.c.l.b16 %v7030_v31  ;;  %v7032_v35 = vpack.c.bf16 %v6912_v44, %v6912_v44  ;;  %v7033_v38 = vpack.c.bf16 %v6913_v3, %v6913_v3  ;;  %v7035_v60 = vpack.c.bf16 %v6914_v54, %v6914_v54 }
 0x1a9   :  { %v5158_v24 = vunpack.c.l.b16 %v7031_v28  ;;  %v7037_v17 = vpack.c.bf16 %v6915_v45, %v6915_v45  ;;  %v7039_v44 = vpack.c.bf16 %v6916_v57, %v6916_v57  ;;  %v7041_v3 = vpack.c.bf16 %v6917_v63, %v6917_v63 }
 0x1aa   :  { %v5163_v20 = vunpack.c.l.b16 %v7032_v35  ;;  %v5168_v62 = vunpack.c.l.b16 %v7033_v38  ;;  %v5173_v31 = vunpack.c.l.b16 %v7035_v60  ;;  %v7043_v54 = vpack.c.bf16 %v6918_v43, %v6918_v43 }
 0x1ab   :  { %v5178_v28 = vunpack.c.l.b16 %v7037_v17  ;;  %v5183_v35 = vunpack.c.l.b16 %v7039_v44  ;;  %v5188_v38 = vunpack.c.l.b16 %v7041_v3  ;;  %v7045_v45 = vpack.c.bf16 %v7044_v58, %v7044_v58 }
 0x1ac   :  { %7034 = vst [vmem:[#allocation98_spill] sm:$0xff] %v5168_v62  ;;  %7036 = vst [vmem:[#allocation99_spill] sm:$0xff] %v5173_v31  ;;  %v5193_v60 = vunpack.c.l.b16 %v7043_v54  ;;  %v7055_v31 = vld [vmem:[#allocation21_spill] sm:$0xff]  ;;  %v7058_v62 = vld [vmem:[#allocation16_spill] sm:$0xff]  ;;  %vm2197_vm7 = vcmask 1047559  }
 0x1ad   :  { %7038 = vst [vmem:[#allocation94_spill] sm:$0xff] %v5178_v28  ;;  %7040 = vst [vmem:[#allocation97_spill] sm:$0xff] %v5183_v35  ;;  %v5198_v17 = vunpack.c.l.b16 %v7045_v45  ;;  %v7046_v28 = vld [vmem:[#allocation17_spill] sm:$0xff]  ;;  %v7049_v35 = vld [vmem:[#allocation18_spill] sm:$0xff]  ;;  %v7056_v58 = vpack.c.bf16 %v7055_v31, %v7055_v31 }
 0x1ae   :  { %7042 = vst [vmem:[#allocation101_spill] sm:$0xff] %v5188_v38  ;;  %v7047_v57 = vpack.c.bf16 %v7046_v28, %v7046_v28  ;;  %v7050_v63 = vpack.c.bf16 %v7049_v35, %v7049_v35  ;;  %v7052_v38 = vld [vmem:[#allocation20_spill] sm:$0xff]  ;;  %v7059_v28 = vpack.c.bf16 %v7058_v62, %v7058_v62 }
 0x1af   :  { %v7053_v43 = vpack.c.bf16 %v7052_v38, %v7052_v38  ;;  %v5218_v45 = vunpack.c.l.b16 %v7056_v58 }
 0x1b0   :  { %v5203_v44 = vunpack.c.l.b16 %v7047_v57  ;;  %v5208_v3 = vunpack.c.l.b16 %v7050_v63  ;;  %v5223_v57 = vunpack.c.l.b16 %v7059_v28 }
 0x1b1   :  { %v5213_v54 = vunpack.c.l.b16 %v7053_v43  ;;  %7057 = vst [vmem:[#allocation100_spill] sm:$0xff] %v5218_v45  ;;  %v7070_v45 = vld [vmem:[#allocation26_spill] sm:$0xff] }
 0x1b2   :  { %7048 = vst [vmem:[#allocation102_spill] sm:$0xff] %v5203_v44  ;;  %7051 = vst [vmem:[#allocation104_spill] sm:$0xff] %v5208_v3  ;;  %v7061_v44 = vld [vmem:[#allocation19_spill] sm:$0xff]  ;;  %v7071_v62 = vpack.c.bf16 %v7070_v45, %v7070_v45 }
 0x1b3   :  { %7054 = vst [vmem:[#allocation105_spill] sm:$0xff] %v5213_v54  ;;  %7060 = vst [vmem:[#allocation103_spill] sm:$0xff] %v5223_v57  ;;  %v7062_v35 = vpack.c.bf16 %v7061_v44, %v7061_v44  ;;  %v7064_v3 = vld [vmem:[#allocation23_spill] sm:$0xff]  ;;  %v7067_v54 = vld [vmem:[#allocation24_spill] sm:$0xff] }
 0x1b4   :  { %v7065_v38 = vpack.c.bf16 %v7064_v3, %v7064_v3  ;;  %v7068_v31 = vpack.c.bf16 %v7067_v54, %v7067_v54  ;;  %v5243_v28 = vunpack.c.l.b16 %v7071_v62  ;;  %v7073_v57 = vld [vmem:[#allocation27_spill] sm:$0xff] }
 0x1b5   :  { %v5228_v63 = vunpack.c.l.b16 %v7062_v35  ;;  %v7074_v44 = vpack.c.bf16 %v7073_v57, %v7073_v57 }
 0x1b6   :  { %v5233_v43 = vunpack.c.l.b16 %v7065_v38  ;;  %v5238_v58 = vunpack.c.l.b16 %v7068_v31  ;;  %7072 = vst [vmem:[#allocation111_spill] sm:$0xff] %v5243_v28  ;;  %v7085_v28 = vld [vmem:[#allocation30_spill] sm:$0xff] }
 0x1b7   :  { %7063 = vst [vmem:[#allocation107_spill] sm:$0xff] %v5228_v63  ;;  %v5248_v35 = vunpack.c.l.b16 %v7074_v44  ;;  %v7076_v63 = vld [vmem:[#allocation22_spill] sm:$0xff]  ;;  %v7086_v57 = vpack.c.bf16 %v7085_v28, %v7085_v28 }
 0x1b8   :  { %7066 = vst [vmem:[#allocation108_spill] sm:$0xff] %v5233_v43  ;;  %7069 = vst [vmem:[#allocation110_spill] sm:$0xff] %v5238_v58  ;;  %v7077_v3 = vpack.c.bf16 %v7076_v63, %v7076_v63  ;;  %v7079_v43 = vld [vmem:[#allocation25_spill] sm:$0xff] }
 0x1b9   :  { %7075 = vst [vmem:[#allocation106_spill] sm:$0xff] %v5248_v35  ;;  %v7080_v54 = vpack.c.bf16 %v7079_v43, %v7079_v43  ;;  %v7082_v58 = vld [vmem:[#allocation29_spill] sm:$0xff]  ;;  %v5268_v44 = vunpack.c.l.b16 %v7086_v57  ;;  %v7088_v35 = vld [vmem:[#allocation32_spill] sm:$0xff] }
 0x1ba   :  { %v5253_v38 = vunpack.c.l.b16 %v7077_v3  ;;  %v7083_v45 = vpack.c.bf16 %v7082_v58, %v7082_v58  ;;  %v7089_v63 = vpack.c.bf16 %v7088_v35, %v7088_v35 }
 0x1bb   :  { %v5258_v31 = vunpack.c.l.b16 %v7080_v54  ;;  %7087 = vst [vmem:[#allocation116_spill] sm:$0xff] %v5268_v44  ;;  %v7100_v44 = vld [vmem:[#allocation35_spill] sm:$0xff] }
 0x1bc   :  { %7078 = vst [vmem:[#allocation109_spill] sm:$0xff] %v5253_v38  ;;  %v5263_v62 = vunpack.c.l.b16 %v7083_v45  ;;  %v5273_v3 = vunpack.c.l.b16 %v7089_v63  ;;  %v7091_v38 = vld [vmem:[#allocation33_spill] sm:$0xff]  ;;  %v7101_v35 = vpack.c.bf16 %v7100_v44, %v7100_v44 }
 0x1bd   :  { %7081 = vst [vmem:[#allocation113_spill] sm:$0xff] %v5258_v31  ;;  %v7092_v43 = vpack.c.bf16 %v7091_v38, %v7091_v38  ;;  %v7094_v31 = vld [vmem:[#allocation28_spill] sm:$0xff] }
 0x1be   :  { %7084 = vst [vmem:[#allocation114_spill] sm:$0xff] %v5263_v62  ;;  %7090 = vst [vmem:[#allocation117_spill] sm:$0xff] %v5273_v3  ;;  %v7095_v58 = vpack.c.bf16 %v7094_v31, %v7094_v31  ;;  %v7097_v62 = vld [vmem:[#allocation31_spill] sm:$0xff]  ;;  %v5293_v63 = vunpack.c.l.b16 %v7101_v35  ;;  %v7103_v3 = vld [vmem:[#allocation36_spill] sm:$0xff] }
 0x1bf   :  { %v5278_v54 = vunpack.c.l.b16 %v7092_v43  ;;  %v7098_v28 = vpack.c.bf16 %v7097_v62, %v7097_v62  ;;  %v7104_v38 = vpack.c.bf16 %v7103_v3, %v7103_v3 }
 0x1c0   :  { %v5283_v45 = vunpack.c.l.b16 %v7095_v58  ;;  %7102 = vst [vmem:[#allocation120_spill] sm:$0xff] %v5293_v63  ;;  %v7115_v63 = vld [vmem:[#allocation37_spill] sm:$0xff] }
 0x1c1   :  { %7093 = vst [vmem:[#allocation112_spill] sm:$0xff] %v5278_v54  ;;  %v5288_v57 = vunpack.c.l.b16 %v7098_v28  ;;  %v5298_v43 = vunpack.c.l.b16 %v7104_v38  ;;  %v7106_v54 = vld [vmem:[#allocation38_spill] sm:$0xff]  ;;  %v7116_v3 = vpack.c.bf16 %v7115_v63, %v7115_v63 }
 0x1c2   :  { %7096 = vst [vmem:[#allocation115_spill] sm:$0xff] %v5283_v45  ;;  %v7107_v31 = vpack.c.bf16 %v7106_v54, %v7106_v54  ;;  %v7109_v45 = vld [vmem:[#allocation39_spill] sm:$0xff] }
 0x1c3   :  { %7099 = vst [vmem:[#allocation119_spill] sm:$0xff] %v5288_v57  ;;  %7105 = vst [vmem:[#allocation122_spill] sm:$0xff] %v5298_v43  ;;  %v7110_v62 = vpack.c.bf16 %v7109_v45, %v7109_v45  ;;  %v7112_v57 = vld [vmem:[#allocation34_spill] sm:$0xff]  ;;  %v5318_v38 = vunpack.c.l.b16 %v7116_v3  ;;  %v7118_v43 = vld [vmem:[#allocation41_spill] sm:$0xff] }
 0x1c4   :  { %v5303_v58 = vunpack.c.l.b16 %v7107_v31  ;;  %v7113_v44 = vpack.c.bf16 %v7112_v57, %v7112_v57  ;;  %v7119_v54 = vpack.c.bf16 %v7118_v43, %v7118_v43 }
 0x1c5   :  { %v5308_v28 = vunpack.c.l.b16 %v7110_v62  ;;  %7117 = vst [vmem:[#allocation125_spill] sm:$0xff] %v5318_v38  ;;  %v7130_v38 = vld [vmem:[#allocation40_spill] sm:$0xff] }
 0x1c6   :  { %7108 = vst [vmem:[#allocation123_spill] sm:$0xff] %v5303_v58  ;;  %v5313_v35 = vunpack.c.l.b16 %v7113_v44  ;;  %v5323_v31 = vunpack.c.l.b16 %v7119_v54  ;;  %v7121_v58 = vld [vmem:[#allocation42_spill] sm:$0xff]  ;;  %v7131_v43 = vpack.c.bf16 %v7130_v38, %v7130_v38 }
 0x1c7   :  { %7111 = vst [vmem:[#allocation118_spill] sm:$0xff] %v5308_v28  ;;  %v7122_v45 = vpack.c.bf16 %v7121_v58, %v7121_v58  ;;  %v7124_v28 = vld [vmem:[#allocation44_spill] sm:$0xff] }
 0x1c8   :  { %7114 = vst [vmem:[#allocation121_spill] sm:$0xff] %v5313_v35  ;;  %7120 = vst [vmem:[#allocation126_spill] sm:$0xff] %v5323_v31  ;;  %v7125_v57 = vpack.c.bf16 %v7124_v28, %v7124_v28  ;;  %v7127_v35 = vld [vmem:[#allocation45_spill] sm:$0xff]  ;;  %v5343_v54 = vunpack.c.l.b16 %v7131_v43  ;;  %v7133_v31 = vld [vmem:[#allocation43_spill] sm:$0xff] }
 0x1c9   :  { %v5328_v62 = vunpack.c.l.b16 %v7122_v45  ;;  %v7128_v63 = vpack.c.bf16 %v7127_v35, %v7127_v35  ;;  %v7134_v58 = vpack.c.bf16 %v7133_v31, %v7133_v31 }
 0x1ca   :  { %v5333_v44 = vunpack.c.l.b16 %v7125_v57  ;;  %7132 = vst [vmem:[#allocation127_spill] sm:$0xff] %v5343_v54  ;;  %v7145_v54 = vld [vmem:[#allocation51_spill] sm:$0xff] }
 0x1cb   :  { %7123 = vst [vmem:[#allocation128_spill] sm:$0xff] %v5328_v62  ;;  %v5338_v3 = vunpack.c.l.b16 %v7128_v63  ;;  %v5348_v45 = vunpack.c.l.b16 %v7134_v58  ;;  %v7136_v62 = vld [vmem:[#allocation47_spill] sm:$0xff]  ;;  %v7146_v31 = vpack.c.bf16 %v7145_v54, %v7145_v54 }
 0x1cc   :  { %7126 = vst [vmem:[#allocation129_spill] sm:$0xff] %v5333_v44  ;;  %v7137_v28 = vpack.c.bf16 %v7136_v62, %v7136_v62  ;;  %v7139_v44 = vld [vmem:[#allocation48_spill] sm:$0xff] }
 0x1cd   :  { %7129 = vst [vmem:[#allocation124_spill] sm:$0xff] %v5338_v3  ;;  %7135 = vst [vmem:[#allocation131_spill] sm:$0xff] %v5348_v45  ;;  %v7140_v35 = vpack.c.bf16 %v7139_v44, %v7139_v44  ;;  %v7142_v3 = vld [vmem:[#allocation50_spill] sm:$0xff]  ;;  %v5368_v58 = vunpack.c.l.b16 %v7146_v31 }
 0x1ce   :  { %v5353_v57 = vunpack.c.l.b16 %v7137_v28  ;;  %v7143_v38 = vpack.c.bf16 %v7142_v3, %v7142_v3  ;;  %v7148_v45 = vld [vmem:[#allocation46_spill] sm:$0xff] }
 0x1cf   :  { %v5358_v63 = vunpack.c.l.b16 %v7140_v35  ;;  %7147 = vst [vmem:[#allocation130_spill] sm:$0xff] %v5368_v58  ;;  %v7149_v62 = vpack.c.bf16 %v7148_v45, %v7148_v45  ;;  %v7160_v58 = vld [vmem:[#allocation56_spill] sm:$0xff] }
 0x1d0   :  { %7138 = vst [vmem:[#allocation132_spill] sm:$0xff] %v5353_v57  ;;  %v5363_v43 = vunpack.c.l.b16 %v7143_v38  ;;  %v7151_v57 = vld [vmem:[#allocation49_spill] sm:$0xff]  ;;  %v7161_v45 = vpack.c.bf16 %v7160_v58, %v7160_v58 }
 0x1d1   :  { %7141 = vst [vmem:[#allocation134_spill] sm:$0xff] %v5358_v63  ;;  %v5373_v28 = vunpack.c.l.b16 %v7149_v62  ;;  %v7152_v44 = vpack.c.bf16 %v7151_v57, %v7151_v57  ;;  %v7154_v63 = vld [vmem:[#allocation53_spill] sm:$0xff] }
 0x1d2   :  { %7144 = vst [vmem:[#allocation135_spill] sm:$0xff] %v5363_v43  ;;  %v7155_v3 = vpack.c.bf16 %v7154_v63, %v7154_v63  ;;  %v7157_v43 = vld [vmem:[#allocation54_spill] sm:$0xff]  ;;  %v5393_v62 = vunpack.c.l.b16 %v7161_v45 }
 0x1d3   :  { %7150 = vst [vmem:[#allocation133_spill] sm:$0xff] %v5373_v28  ;;  %v5378_v35 = vunpack.c.l.b16 %v7152_v44  ;;  %v7158_v54 = vpack.c.bf16 %v7157_v43, %v7157_v43  ;;  %v7163_v28 = vld [vmem:[#allocation57_spill] sm:$0xff] }
 0x1d4   :  { %v5383_v38 = vunpack.c.l.b16 %v7155_v3  ;;  %7162 = vst [vmem:[#allocation141_spill] sm:$0xff] %v5393_v62  ;;  %v7164_v57 = vpack.c.bf16 %v7163_v28, %v7163_v28  ;;  %v7175_v62 = vld [vmem:[#allocation60_spill] sm:$0xff] }
 0x1d5   :  { %7153 = vst [vmem:[#allocation137_spill] sm:$0xff] %v5378_v35  ;;  %v5388_v31 = vunpack.c.l.b16 %v7158_v54  ;;  %v7166_v35 = vld [vmem:[#allocation52_spill] sm:$0xff]  ;;  %v7176_v28 = vpack.c.bf16 %v7175_v62, %v7175_v62 }
 0x1d6   :  { %7156 = vst [vmem:[#allocation138_spill] sm:$0xff] %v5383_v38  ;;  %v5398_v44 = vunpack.c.l.b16 %v7164_v57  ;;  %v7167_v63 = vpack.c.bf16 %v7166_v35, %v7166_v35  ;;  %v7169_v38 = vld [vmem:[#allocation55_spill] sm:$0xff] }
 0x1d7   :  { %7159 = vst [vmem:[#allocation140_spill] sm:$0xff] %v5388_v31  ;;  %v7170_v43 = vpack.c.bf16 %v7169_v38, %v7169_v38  ;;  %v7172_v31 = vld [vmem:[#allocation59_spill] sm:$0xff]  ;;  %v5418_v57 = vunpack.c.l.b16 %v7176_v28 }
 0x1d8   :  { %7165 = vst [vmem:[#allocation136_spill] sm:$0xff] %v5398_v44  ;;  %v5403_v3 = vunpack.c.l.b16 %v7167_v63  ;;  %v7173_v58 = vpack.c.bf16 %v7172_v31, %v7172_v31  ;;  %v7178_v44 = vld [vmem:[#allocation62_spill] sm:$0xff] }
 0x1d9   :  { %v5408_v54 = vunpack.c.l.b16 %v7170_v43  ;;  %7177 = vst [vmem:[#allocation146_spill] sm:$0xff] %v5418_v57  ;;  %v7179_v35 = vpack.c.bf16 %v7178_v44, %v7178_v44  ;;  %v7190_v57 = vld [vmem:[#allocation65_spill] sm:$0xff] }
 0x1da   :  { %7168 = vst [vmem:[#allocation139_spill] sm:$0xff] %v5403_v3  ;;  %v5413_v45 = vunpack.c.l.b16 %v7173_v58  ;;  %v7181_v3 = vld [vmem:[#allocation63_spill] sm:$0xff]  ;;  %v7191_v44 = vpack.c.bf16 %v7190_v57, %v7190_v57 }
 0x1db   :  { %7171 = vst [vmem:[#allocation143_spill] sm:$0xff] %v5408_v54  ;;  %v5423_v63 = vunpack.c.l.b16 %v7179_v35  ;;  %v7182_v38 = vpack.c.bf16 %v7181_v3, %v7181_v3  ;;  %v7184_v54 = vld [vmem:[#allocation58_spill] sm:$0xff] }
 0x1dc   :  { %7174 = vst [vmem:[#allocation144_spill] sm:$0xff] %v5413_v45  ;;  %v7185_v31 = vpack.c.bf16 %v7184_v54, %v7184_v54  ;;  %v7187_v45 = vld [vmem:[#allocation61_spill] sm:$0xff]  ;;  %v5443_v35 = vunpack.c.l.b16 %v7191_v44 }
 0x1dd   :  { %7180 = vst [vmem:[#allocation147_spill] sm:$0xff] %v5423_v63  ;;  %v5428_v43 = vunpack.c.l.b16 %v7182_v38  ;;  %v7188_v62 = vpack.c.bf16 %v7187_v45, %v7187_v45  ;;  %v7193_v63 = vld [vmem:[#allocation66_spill] sm:$0xff] }
 0x1de   :  { %v5433_v58 = vunpack.c.l.b16 %v7185_v31  ;;  %7192 = vst [vmem:[#allocation150_spill] sm:$0xff] %v5443_v35  ;;  %v7194_v3 = vpack.c.bf16 %v7193_v63, %v7193_v63  ;;  %v7205_v35 = vld [vmem:[#allocation67_spill] sm:$0xff] }
 0x1df   :  { %7183 = vst [vmem:[#allocation142_spill] sm:$0xff] %v5428_v43  ;;  %v5438_v28 = vunpack.c.l.b16 %v7188_v62  ;;  %v7196_v43 = vld [vmem:[#allocation68_spill] sm:$0xff]  ;;  %v7206_v63 = vpack.c.bf16 %v7205_v35, %v7205_v35 }
 0x1e0   :  { %7186 = vst [vmem:[#allocation145_spill] sm:$0xff] %v5433_v58  ;;  %v5448_v38 = vunpack.c.l.b16 %v7194_v3  ;;  %v7197_v54 = vpack.c.bf16 %v7196_v43, %v7196_v43  ;;  %v7199_v58 = vld [vmem:[#allocation69_spill] sm:$0xff] }
 0x1e1   :  { %7189 = vst [vmem:[#allocation149_spill] sm:$0xff] %v5438_v28  ;;  %v7200_v45 = vpack.c.bf16 %v7199_v58, %v7199_v58  ;;  %v7202_v28 = vld [vmem:[#allocation64_spill] sm:$0xff]  ;;  %v5468_v3 = vunpack.c.l.b16 %v7206_v63 }
 0x1e2   :  { %7195 = vst [vmem:[#allocation152_spill] sm:$0xff] %v5448_v38  ;;  %v5453_v31 = vunpack.c.l.b16 %v7197_v54  ;;  %v7203_v57 = vpack.c.bf16 %v7202_v28, %v7202_v28  ;;  %v7208_v38 = vld [vmem:[#allocation71_spill] sm:$0xff] }
 0x1e3   :  { %v5458_v62 = vunpack.c.l.b16 %v7200_v45  ;;  %7207 = vst [vmem:[#allocation2_spill] sm:$0xff] %v5468_v3  ;;  %v7209_v43 = vpack.c.bf16 %v7208_v38, %v7208_v38  ;;  %v7220_v3 = vld [vmem:[#allocation70_spill] sm:$0xff] }
 0x1e4   :  { %7198 = vst [vmem:[#allocation153_spill] sm:$0xff] %v5453_v31  ;;  %v5463_v44 = vunpack.c.l.b16 %v7203_v57  ;;  %v7211_v31 = vld [vmem:[#allocation72_spill] sm:$0xff]  ;;  %v7221_v38 = vpack.c.bf16 %v7220_v3, %v7220_v3 }
 0x1e5   :  { %7201 = vst [vmem:[#allocation148_spill] sm:$0xff] %v5458_v62  ;;  %v5473_v54 = vunpack.c.l.b16 %v7209_v43  ;;  %v7212_v58 = vpack.c.bf16 %v7211_v31, %v7211_v31  ;;  %v7214_v62 = vld [vmem:[#allocation74_spill] sm:$0xff] }
 0x1e6   :  { %7204 = vst [vmem:[#allocation151_spill] sm:$0xff] %v5463_v44  ;;  %v7215_v28 = vpack.c.bf16 %v7214_v62, %v7214_v62  ;;  %v7217_v44 = vld [vmem:[#allocation75_spill] sm:$0xff]  ;;  %v5493_v43 = vunpack.c.l.b16 %v7221_v38 }
 0x1e7   :  { %7210 = vst [vmem:[#allocation3_spill] sm:$0xff] %v5473_v54  ;;  %v5478_v45 = vunpack.c.l.b16 %v7212_v58  ;;  %v7218_v35 = vpack.c.bf16 %v7217_v44, %v7217_v44  ;;  %v7223_v54 = vld [vmem:[#allocation73_spill] sm:$0xff] }
 0x1e8   :  { %v5483_v57 = vunpack.c.l.b16 %v7215_v28  ;;  %7222 = vst [vmem:[#allocation9_spill] sm:$0xff] %v5493_v43  ;;  %v7224_v31 = vpack.c.bf16 %v7223_v54, %v7223_v54  ;;  %v7235_v43 = vld [vmem:[#allocation81_spill] sm:$0xff] }
 0x1e9   :  { %7213 = vst [vmem:[#allocation5_spill] sm:$0xff] %v5478_v45  ;;  %v5488_v63 = vunpack.c.l.b16 %v7218_v35  ;;  %v7226_v45 = vld [vmem:[#allocation77_spill] sm:$0xff]  ;;  %v7236_v54 = vpack.c.bf16 %v7235_v43, %v7235_v43 }
 0x1ea   :  { %7216 = vst [vmem:[#allocation6_spill] sm:$0xff] %v5483_v57  ;;  %v5498_v58 = vunpack.c.l.b16 %v7224_v31  ;;  %v7227_v62 = vpack.c.bf16 %v7226_v45, %v7226_v45  ;;  %v7229_v57 = vld [vmem:[#allocation78_spill] sm:$0xff] }
 0x1eb   :  { %7219 = vst [vmem:[#allocation8_spill] sm:$0xff] %v5488_v63  ;;  %v7230_v44 = vpack.c.bf16 %v7229_v57, %v7229_v57  ;;  %v7232_v63 = vld [vmem:[#allocation80_spill] sm:$0xff]  ;;  %v5518_v31 = vunpack.c.l.b16 %v7236_v54 }
 0x1ec   :  { %7225 = vst [vmem:[#allocation4_spill] sm:$0xff] %v5498_v58  ;;  %v5503_v28 = vunpack.c.l.b16 %v7227_v62  ;;  %v7233_v3 = vpack.c.bf16 %v7232_v63, %v7232_v63  ;;  %v7238_v58 = vld [vmem:[#allocation76_spill] sm:$0xff] }
 0x1ed   :  { %v5508_v35 = vunpack.c.l.b16 %v7230_v44  ;;  %7237 = vst [vmem:[#allocation14_spill] sm:$0xff] %v5518_v31  ;;  %v7239_v45 = vpack.c.bf16 %v7238_v58, %v7238_v58  ;;  %v7247_v31 = vld [vmem:[#allocation86_spill] sm:$0xff] }
 0x1ee   :  { %7228 = vst [vmem:[#allocation7_spill] sm:$0xff] %v5503_v28  ;;  %v5513_v38 = vunpack.c.l.b16 %v7233_v3  ;;  %v7241_v28 = vld [vmem:[#allocation79_spill] sm:$0xff]  ;;  %v7248_v58 = vpack.c.bf16 %v7247_v31, %v7247_v31  ;;  %v7254_v31 = vpack.c.bf16 %v6992_v5, %v6992_v5  ;;  %v7258_v5 = vpack.c.bf16 %v6996_v51, %v6996_v51 }
 0x1ef   :  { %7231 = vst [vmem:[#allocation11_spill] sm:$0xff] %v5508_v35  ;;  %v5523_v62 = vunpack.c.l.b16 %v7239_v45  ;;  %v7242_v57 = vpack.c.bf16 %v7241_v28, %v7241_v28  ;;  %v7243_v35 = vld [vmem:[#allocation83_spill] sm:$0xff]  ;;  %v7264_v51 = vpack.c.bf16 %v4722_v50, %v4722_v50 }
 0x1f0   :  { %7234 = vst [vmem:[#allocation12_spill] sm:$0xff] %v5513_v38  ;;  %v7244_v63 = vpack.c.bf16 %v7243_v35, %v7243_v35  ;;  %v7245_v38 = vld [vmem:[#allocation84_spill] sm:$0xff]  ;;  %v5543_v45 = vunpack.c.l.b16 %v7248_v58  ;;  %v7252_v35 = vpack.c.bf16 %v6990_v19, %v6990_v19  ;;  %v5563_v58 = vunpack.c.l.b16 %v7254_v31 }
 0x1f1   :  { %7240 = vst [vmem:[#allocation15_spill] sm:$0xff] %v5523_v62  ;;  %v5528_v44 = vunpack.c.l.b16 %v7242_v57  ;;  %v7246_v43 = vpack.c.bf16 %v7245_v38, %v7245_v38  ;;  %v7249_v62 = vld [vmem:[#allocation87_spill] sm:$0xff]  ;;  %v7253_v38 = vpack.c.bf16 %v6991_v56, %v6991_v56  ;;  %v7256_v19 = vpack.c.bf16 %v6994_v36, %v6994_v36 }
 0x1f2   :  { %v5533_v3 = vunpack.c.l.b16 %v7244_v63  ;;  %v7250_v28 = vpack.c.bf16 %v7249_v62, %v7249_v62  ;;  %v5553_v63 = vunpack.c.l.b16 %v7252_v35  ;;  %v7255_v62 = vpack.c.bf16 %v6993_v33, %v6993_v33 }
 0x1f3   :  { %v5538_v54 = vunpack.c.l.b16 %v7246_v43  ;;  %v5558_v43 = vunpack.c.l.b16 %v7253_v38  ;;  %v5573_v35 = vunpack.c.l.b16 %v7256_v19  ;;  %v7257_v56 = vpack.c.bf16 %v6995_v32, %v6995_v32 }
 0x1f4   :  { %v5548_v57 = vunpack.c.l.b16 %v7250_v28  ;;  %v5568_v28 = vunpack.c.l.b16 %v7255_v62  ;;  %v5583_v31 = vunpack.c.l.b16 %v7258_v5  ;;  %v7259_v33 = vpack.c.bf16 %v6997_v34, %v6997_v34 }
 0x1f5   :  { %v5578_v38 = vunpack.c.l.b16 %v7257_v56  ;;  %v7261_v36 = vpack.c.bf16 %v4718_v4, %v4718_v4  ;;  %v5603_v5 = vunpack.c.l.b16 %v7264_v51  ;;  %v7265_v34 = vpack.c.bf16 %v4724_v15, %v4724_v15 }
 0x1f6   :  { %7251 = vst [vmem:[#allocation10_spill] sm:$0xff] %v5548_v57  ;;  %v5588_v62 = vunpack.c.l.b16 %v7259_v33  ;;  %v7262_v57 = vld [vmem:[#allocation95_spill] sm:$0xff]  ;;  %v7266_v4 = vpack.c.bf16 %v4734_v55, %v4734_v55  ;;  %v7270_v15 = vpack.c.bf16 %v4740_v23, %v4740_v23  ;;  %v2186_v55 = vsel %vm2185_vm1, %v4998_v22, %v4993_v61 }
 0x1f7   :  { %v5593_v19 = vunpack.c.l.b16 %v7261_v36  ;;  %v7263_v32 = vpack.c.bf16 %v7262_v57, %v7262_v57  ;;  %v5608_v33 = vunpack.c.l.b16 %v7265_v34  ;;  %v7267_v57 = vpack.c.bf16 %v4736_v29, %v4736_v29 }
 0x1f8   :  { %7260 = vst [vmem:[#allocation82_spill] sm:$0xff] %v5588_v62  ;;  %v5613_v36 = vunpack.c.l.b16 %v7266_v4  ;;  %v7268_v62 = vld [vmem:[#allocation96_spill] sm:$0xff]  ;;  %v5628_v34 = vunpack.c.l.b16 %v7270_v15  ;;  %v2188_v29 = vsel %vm2187_vm2, %v5003_v12, %v2186_v55  ;;  %v2199_v23 = vsel %vm2185_vm1, %v5038_v27, %v5033_v21  ;;  %v7276_v15 = vld [vmem:[#allocation102_spill] sm:$0xff]  ;;  %v7278_v55 = vld [vmem:[#allocation115_spill] sm:$0xff] }
 0x1f9   :  { %v5598_v56 = vunpack.c.l.b16 %v7263_v32  ;;  %v5618_v32 = vunpack.c.l.b16 %v7267_v57  ;;  %v7269_v50 = vpack.c.bf16 %v7268_v62, %v7268_v62  ;;  %v2206_v62 = vsel %vm2185_vm1, %v5078_v9, %v5073_v39  ;;  %v7275_v57 = vld [vmem:[#allocation98_spill] sm:$0xff] }
 0x1fa   :  { %v2213_v4 = vsel %vm2185_vm1, %v5118_v1, %v5113_v13  ;;  %v2190_v61 = vsel %vm2189_vm3, %v5008_v47, %v2188_v29  ;;  %v2200_v22 = vsel %vm2187_vm2, %v5043_v30, %v2199_v23  ;;  %v2207_v12 = vsel %vm2187_vm2, %v5083_v18, %v2206_v62  ;;  %v7280_v23 = vld [vmem:[#allocation104_spill] sm:$0xff] }
 0x1fb   :  { %v5623_v51 = vunpack.c.l.b16 %v7269_v50  ;;  %v2214_v21 = vsel %vm2187_vm2, %v5123_v59, %v2213_v4  ;;  %v2192_v27 = vsel %vm2191_vm4, %v5013_v8, %v2190_v61  ;;  %v2201_v39 = vsel %vm2189_vm3, %v5048_v6, %v2200_v22  ;;  %v7281_v4 = vld [vmem:[#allocation106_spill] sm:$0xff]  ;;  %v7282_v22 = vld [vmem:[#allocation119_spill] sm:$0xff] }
 0x1fc   :  { %v2208_v9 = vsel %vm2189_vm3, %v5088_v40, %v2207_v12  ;;  %v2215_v47 = vsel %vm2189_vm3, %v5128_v7, %v2214_v21  ;;  %v2194_v30 = vsel %vm2193_vm5, %v5018_v52, %v2192_v27  ;;  %v2202_v18 = vsel %vm2191_vm4, %v5053_v11, %v2201_v39  ;;  %v7271_v7 = vld [vmem:[#allocation108_spill] sm:$0xff]  ;;  %v7283_v21 = vld [vmem:[#allocation94_spill] sm:$0xff]  ;;  %v7284_v39 = vld [vmem:[#allocation105_spill] sm:$0xff] }
 0x1fd   :  { %v2209_v13 = vsel %vm2191_vm4, %v5093_v0, %v2208_v9  ;;  %v2216_v8 = vsel %vm2191_vm4, %v5133_v46, %v2215_v47  ;;  %v2196_v6 = vsel %vm2195_vm6, %v5023_v2, %v2194_v30  ;;  %v2203_v40 = vsel %vm2193_vm5, %v5058_v10, %v2202_v18  ;;  %v7272_v46 = vld [vmem:[#allocation110_spill] sm:$0xff]  ;;  %v7285_v47 = vld [vmem:[#allocation109_spill] sm:$0xff]  ;;  %v7286_v18 = vld [vmem:[#allocation120_spill] sm:$0xff] }
 0x1fe   :  { %v2210_v1 = vsel %vm2193_vm5, %v5098_v16, %v2209_v13  ;;  %v2217_v52 = vsel %vm2193_vm5, %v5138_v49, %v2216_v8  ;;  %v5678_v11 = vsel %vm2197_vm7, %v5028_v37, %v2196_v6  ;;  %v2204_v0 = vsel %vm2195_vm6, %v5063_v14, %v2203_v40  ;;  %v7273_v49 = vld [vmem:[#allocation117_spill] sm:$0xff]  ;;  %v7288_v40 = vld [vmem:[#allocation100_spill] sm:$0xff] }
 0x1ff   :  { %v2211_v59 = vsel %vm2195_vm6, %v5103_v26, %v2210_v1  ;;  %v2218_v2 = vsel %vm2195_vm6, %v5143_v42, %v2217_v52  ;;  %v5688_v10 = vsel %vm2197_vm7, %v5068_v25, %v2204_v0  ;;  %v2220_v14 = vsel %vm2185_vm1, %v5158_v24, %v5153_v48  ;;  %v7274_v42 = vld [vmem:[#allocation112_spill] sm:$0xff]  ;;  %v7277_v24 = vld [vmem:[#allocation111_spill] sm:$0xff]  ;;  %v7287_v8 = vld [vmem:[#allocation97_spill] sm:$0xff] }
 0x200   :  { %v5692_v16 = vsel %vm2197_vm7, %v5108_v53, %v2211_v59  ;;  %v5696_v37 = vsel %vm2197_vm7, %v5148_v41, %v2218_v2  ;;  %v2221_v26 = vsel %vm2187_vm2, %v5163_v20, %v2220_v14  ;;  %v2227_v25 = vsel %vm2185_vm1, %v5198_v17, %v5193_v60  ;;  %v7279_v17 = vld [vmem:[#allocation99_spill] sm:$0xff]  ;;  %v7289_v52 = vld [vmem:[#allocation113_spill] sm:$0xff]  ;;  %v7290_v59 = vld [vmem:[#allocation122_spill] sm:$0xff] }
 0x201   :  { %v2234_v53 = vsel %vm2185_vm1, %v7272_v46, %v7271_v7  ;;  %v2241_v41 = vsel %vm2185_vm1, %v7274_v42, %v7273_v49  ;;  %v2222_v50 = vsel %vm2189_vm3, %v7275_v57, %v2221_v26  ;;  %v2228_v48 = vsel %vm2187_vm2, %v7276_v15, %v2227_v25  ;;  %v7291_v14 = vld [vmem:[#allocation101_spill] sm:$0xff]  ;;  %v7292_v25 = vld [vmem:[#allocation103_spill] sm:$0xff]  ;;  %v7293_v46 = vld [vmem:[#allocation114_spill] sm:$0xff] }
 0x202   :  { %v2235_v20 = vsel %vm2187_vm2, %v7277_v24, %v2234_v53  ;;  %v2242_v60 = vsel %vm2187_vm2, %v7278_v55, %v2241_v41  ;;  %v2223_v29 = vsel %vm2191_vm4, %v7279_v17, %v2222_v50  ;;  %v2229_v62 = vsel %vm2189_vm3, %v7280_v23, %v2228_v48  ;;  %v7294_v49 = vld [vmem:[#allocation123_spill] sm:$0xff]  ;;  %v7296_v50 = vld [vmem:[#allocation116_spill] sm:$0xff]  ;;  %v7297_v48 = vld [vmem:[#allocation118_spill] sm:$0xff] }
 0x203   :  { %v2236_v61 = vsel %vm2189_vm3, %v7281_v4, %v2235_v20  ;;  %v2243_v12 = vsel %vm2189_vm3, %v7282_v22, %v2242_v60  ;;  %v2224_v27 = vsel %vm2193_vm5, %v7283_v21, %v2223_v29  ;;  %v2230_v9 = vsel %vm2191_vm4, %v7284_v39, %v2229_v62  ;;  %v7295_v41 = vld [vmem:[#allocation107_spill] sm:$0xff]  ;;  %v7298_v20 = vld [vmem:[#allocation121_spill] sm:$0xff]  ;;  %v7300_v17 = vld [vmem:[#allocation126_spill] sm:$0xff] }
 0x204   :  { %v2237_v30 = vsel %vm2191_vm4, %v7285_v47, %v2236_v61  ;;  %v2244_v13 = vsel %vm2191_vm4, %v7286_v18, %v2243_v12  ;;  %v2225_v6 = vsel %vm2195_vm6, %v7287_v8, %v2224_v27  ;;  %v2231_v1 = vsel %vm2193_vm5, %v7288_v40, %v2230_v9  ;;  %v7299_v55 = vld [vmem:[#allocation125_spill] sm:$0xff]  ;;  %v7301_v23 = vld [vmem:[#allocation132_spill] sm:$0xff]  ;;  %v7302_v62 = vld [vmem:[#allocation134_spill] sm:$0xff] }
 0x205   :  { %v2238_v0 = vsel %vm2193_vm5, %v7289_v52, %v2237_v30  ;;  %v2245_v2 = vsel %vm2193_vm5, %v7290_v59, %v2244_v13  ;;  %v5746_v26 = vsel %vm2197_vm7, %v7291_v14, %v2225_v6  ;;  %v2232_v7 = vsel %vm2195_vm6, %v7292_v25, %v2231_v1  ;;  %v7303_v61 = vld [vmem:[#allocation141_spill] sm:$0xff]  ;;  %v7304_v22 = vld [vmem:[#allocation136_spill] sm:$0xff]  ;;  %v7308_v30 = vld [vmem:[#allocation135_spill] sm:$0xff] }
 0x206   :  { %v2239_v53 = vsel %vm2195_vm6, %v7293_v46, %v2238_v0  ;;  %v2246_v42 = vsel %vm2195_vm6, %v7294_v49, %v2245_v2  ;;  %v5756_v57 = vsel %vm2197_vm7, %v7295_v41, %v2232_v7  ;;  %v2248_v60 = vsel %vm2185_vm1, %v7299_v55, %v7298_v20  ;;  %v7305_v21 = vld [vmem:[#allocation145_spill] sm:$0xff]  ;;  %v7307_v9 = vld [vmem:[#allocation128_spill] sm:$0xff]  ;;  %v7309_v13 = vld [vmem:[#allocation139_spill] sm:$0xff] }
 0x207   :  { %v5760_v15 = vsel %vm2197_vm7, %v7296_v50, %v2239_v53  ;;  %v5764_v24 = vsel %vm2197_vm7, %v7297_v48, %v2246_v42  ;;  %v2249_v29 = vsel %vm2187_vm2, %v7300_v17, %v2248_v60  ;;  %v2255_v4 = vsel %vm2185_vm1, %v7302_v62, %v7301_v23  ;;  %v7306_v27 = vld [vmem:[#allocation149_spill] sm:$0xff]  ;;  %v7310_v6 = vld [vmem:[#allocation150_spill] sm:$0xff]  ;;  %v7313_v2 = vld [vmem:[#allocation143_spill] sm:$0xff] }
 0x208   :  { %v2262_v12 = vsel %vm2185_vm1, %v7304_v22, %v7303_v61  ;;  %v2269_v39 = vsel %vm2185_vm1, %v7306_v27, %v7305_v21  ;;  %v2250_v47 = vsel %vm2189_vm3, %v7307_v9, %v2249_v29  ;;  %v2256_v18 = vsel %vm2187_vm2, %v7308_v30, %v2255_v4  ;;  %v7311_v1 = vld [vmem:[#allocation129_spill] sm:$0xff]  ;;  %v7312_v0 = vld [vmem:[#allocation130_spill] sm:$0xff]  ;;  %v7314_v25 = vld [vmem:[#allocation152_spill] sm:$0xff] }
 0x209   :  { %v2263_v8 = vsel %vm2187_vm2, %v7309_v13, %v2262_v12  ;;  %v2270_v40 = vsel %vm2187_vm2, %v7310_v6, %v2269_v39  ;;  %v2251_v52 = vsel %vm2191_vm4, %v7311_v1, %v2250_v47  ;;  %v2257_v59 = vsel %vm2189_vm3, %v7312_v0, %v2256_v18  ;;  %v7315_v46 = vld [vmem:[#allocation124_spill] sm:$0xff]  ;;  %v7316_v49 = vld [vmem:[#allocation133_spill] sm:$0xff]  ;;  %v7319_v55 = vld [vmem:[#allocation127_spill] sm:$0xff] }
 0x20a   :  { %v2264_v14 = vsel %vm2189_vm3, %v7313_v2, %v2263_v8  ;;  %v2271_v7 = vsel %vm2189_vm3, %v7314_v25, %v2270_v40  ;;  %v2252_v53 = vsel %vm2193_vm5, %v7315_v46, %v2251_v52  ;;  %v2258_v42 = vsel %vm2191_vm4, %v7316_v49, %v2257_v59  ;;  %v7317_v41 = vld [vmem:[#allocation144_spill] sm:$0xff]  ;;  %v7318_v48 = vld [vmem:[#allocation153_spill] sm:$0xff]  ;;  %v7321_v23 = vld [vmem:[#allocation146_spill] sm:$0xff] }
 0x20b   :  { %v2265_v50 = vsel %vm2191_vm4, %v7317_v41, %v2264_v14  ;;  %v2272_v20 = vsel %vm2191_vm4, %v7318_v48, %v2271_v7  ;;  %v2253_v60 = vsel %vm2195_vm6, %v7319_v55, %v2252_v53  ;;  %v7320_v17 = vld [vmem:[#allocation137_spill] sm:$0xff]  ;;  %v7322_v4 = vld [vmem:[#allocation148_spill] sm:$0xff]  ;;  %v7323_v22 = vld [vmem:[#allocation131_spill] sm:$0xff]  ;;  %v2290_v53 = vsel %vm2185_vm1, %v5558_v43, %v5553_v63 }
 0x20c   :  { %v2259_v29 = vsel %vm2193_vm5, %v7320_v17, %v2258_v42  ;;  %v2266_v62 = vsel %vm2193_vm5, %v7321_v23, %v2265_v50  ;;  %v2273_v61 = vsel %vm2193_vm5, %v7322_v4, %v2272_v20  ;;  %v2254_v12 = vsel %vm2197_vm7, %v7323_v22, %v2253_v60  ;;  %v7324_v21 = vld [vmem:[#allocation138_spill] sm:$0xff]  ;;  %v7325_v39 = vld [vmem:[#allocation147_spill] sm:$0xff]  ;;  %v7327_v18 = vld [vmem:[#allocation140_spill] sm:$0xff] }
 0x20d   :  { %v2260_v27 = vsel %vm2195_vm6, %v7324_v21, %v2259_v29  ;;  %v2267_v9 = vsel %vm2195_vm6, %v7325_v39, %v2266_v62  ;;  %v7326_v47 = vld [vmem:[#allocation151_spill] sm:$0xff]  ;;  %v7328_v8 = vld [vmem:[#allocation142_spill] sm:$0xff]  ;;  %v7331_v0 = vld [vmem:[#allocation5_spill] sm:$0xff]  ;;  %v2297_v49 = vsel %vm2185_vm1, %v5598_v56, %v5593_v19  ;;  %v2291_v20 = vsel %vm2187_vm2, %v5563_v58, %v2290_v53 }
 0x20e   :  { %v2274_v30 = vsel %vm2195_vm6, %v7326_v47, %v2273_v61  ;;  %v2261_v13 = vsel %vm2197_vm7, %v7327_v18, %v2260_v27  ;;  %v2268_v6 = vsel %vm2197_vm7, %v7328_v8, %v2267_v9  ;;  %v7329_v40 = vld [vmem:[#allocation2_spill] sm:$0xff]  ;;  %v7330_v52 = vld [vmem:[#allocation3_spill] sm:$0xff]  ;;  %v7333_v25 = vld [vmem:[#allocation12_spill] sm:$0xff]  ;;  %v2298_v55 = vsel %vm2187_vm2, %v5603_v5, %v2297_v49 }
 0x20f   :  { %v2275_v1 = vsel %vm2197_vm7, %v7329_v40, %v2274_v30  ;;  %v2276_v59 = vsel %vm2185_vm1, %v7331_v0, %v7330_v52  ;;  %v7332_v2 = vld [vmem:[#allocation6_spill] sm:$0xff]  ;;  %v7335_v42 = vld [vmem:[#allocation8_spill] sm:$0xff]  ;;  %v7336_v50 = vld [vmem:[#allocation15_spill] sm:$0xff]  ;;  %v2292_v43 = vsel %vm2189_vm3, %v5568_v28, %v2291_v20  ;;  %v2299_v19 = vsel %vm2189_vm3, %v5608_v33, %v2298_v55 }
 0x210   :  { %v2277_v14 = vsel %vm2187_vm2, %v7332_v2, %v2276_v59  ;;  %v7334_v7 = vld [vmem:[#allocation14_spill] sm:$0xff]  ;;  %v7337_v60 = vld [vmem:[#allocation9_spill] sm:$0xff]  ;;  %v7338_v56 = vld [vmem:[#allocation4_spill] sm:$0xff]  ;;  %v2293_v5 = vsel %vm2191_vm4, %v5573_v35, %v2292_v43  ;;  %v2300_v23 = vsel %vm2191_vm4, %v5613_v36, %v2299_v19  ;;  %v2304_v39 = vpack.c.b16 %v5678_v11, %v5678_v11 }
 0x211   :  { %v2283_v46 = vsel %vm2185_vm1, %v7334_v7, %v7333_v25  ;;  %v2278_v41 = vsel %vm2189_vm3, %v7335_v42, %v2277_v14  ;;  %v7339_v62 = vld [vmem:[#allocation7_spill] sm:$0xff]  ;;  %v2294_v33 = vsel %vm2193_vm5, %v5578_v38, %v2293_v5  ;;  %v2301_v4 = vsel %vm2193_vm5, %v5618_v32, %v2300_v23  ;;  %v7341_v21 = vld [vmem:[#allocation10_spill] sm:$0xff] }
 0x212   :  { %v2284_v48 = vsel %vm2187_vm2, %v7336_v50, %v2283_v46  ;;  %v2279_v17 = vsel %vm2191_vm4, %v7337_v60, %v2278_v41  ;;  %v7340_v61 = vld [vmem:[#allocation11_spill] sm:$0xff]  ;;  %v2295_v36 = vsel %vm2195_vm6, %v5583_v31, %v2294_v33  ;;  %v2302_v22 = vsel %vm2195_vm6, %v5623_v51, %v2301_v4  ;;  %v7342_v27 = vld [vmem:[#allocation82_spill] sm:$0xff]  ;;  %2336 = vst [vmem:[%s5951_s1] sm:$0xf] %v2304_v39 }
 0x213   :  { %v2285_v63 = vsel %vm2189_vm3, %v5528_v44, %v2284_v48  ;;  %v2280_v29 = vsel %vm2193_vm5, %v7338_v56, %v2279_v17  ;;  %v2296_v38 = vsel %vm2197_vm7, %v7342_v27, %v2295_v36  ;;  %v2303_v32 = vsel %vm2197_vm7, %v5628_v34, %v2302_v22 }
 0x214   :  { %v2286_v58 = vsel %vm2191_vm4, %v5533_v3, %v2285_v63  ;;  %v2281_v44 = vsel %vm2195_vm6, %v7339_v62, %v2280_v29  ;;  %v2306_v31 = vpack.c.b16 %v5692_v16, %v5692_v16  ;;  %v2307_v51 = vpack.c.b16 %v5696_v37, %v5696_v37 }
 0x215   :  { %v2287_v28 = vsel %vm2193_vm5, %v5538_v54, %v2286_v58  ;;  %v2282_v3 = vsel %vm2197_vm7, %v7340_v61, %v2281_v44  ;;  %v2308_v9 = vpack.c.b16 %v5746_v26, %v5746_v26  ;;  %v2309_v47 = vpack.c.b16 %v5756_v57, %v5756_v57 }
 0x216   :  { %v2288_v35 = vsel %vm2195_vm6, %v5543_v45, %v2287_v28  ;;  %v2305_v45 = vpack.c.b16 %v5688_v10, %v5688_v10  ;;  %v2310_v34 = vpack.c.b16 %v5760_v15, %v5760_v15  ;;  %v2311_v11 = vpack.c.b16 %v5764_v24, %v5764_v24  ;;  %2338 = vst [vmem:[%s5951_s1 + $0x8] sm:$0xf] %v2306_v31 }
 0x217   :  { %v2289_v54 = vsel %vm2197_vm7, %v7341_v21, %v2288_v35  ;;  %v2312_v30 = vpack.c.b16 %v2254_v12, %v2254_v12  ;;  %v2313_v10 = vpack.c.b16 %v2261_v13, %v2261_v13  ;;  %v2314_v16 = vpack.c.b16 %v2268_v6, %v2268_v6  ;;  %2339 = vst [vmem:[%s5951_s1 + $0xc] sm:$0xf] %v2307_v51 }
 0x218   :  { %v2315_v37 = vpack.c.b16 %v2275_v1, %v2275_v1  ;;  %v2316_v18 = vpack.c.b16 %v2282_v3, %v2282_v3  ;;  %2337 = vst [vmem:[%s5951_s1 + $0x4] sm:$0xf] %v2305_v45  ;;  %2340 = vst [vmem:[%s5951_s1 + $0x10] sm:$0xf] %v2308_v9  ;;  %v2317_v26 = vpack.c.b16 %v2289_v54, %v2289_v54 }
 0x219   :  { %v2318_v57 = vpack.c.b16 %v2296_v38, %v2296_v38  ;;  %v2319_v15 = vpack.c.b16 %v2303_v32, %v2303_v32  ;;  %2341 = vst [vmem:[%s5951_s1 + $0x14] sm:$0xf] %v2309_v47  ;;  %2342 = vst [vmem:[%s5951_s1 + $0x18] sm:$0xf] %v2310_v34 }
 0x21a   :  { %2343 = vst [vmem:[%s5951_s1 + $0x1c] sm:$0xf] %v2311_v11  ;;  %2344 = vst [vmem:[%s5951_s1 + $0x20] sm:$0xf] %v2312_v30 }
 0x21b   :  { %2345 = vst [vmem:[%s5951_s1 + $0x24] sm:$0xf] %v2313_v10  ;;  %2346 = vst [vmem:[%s5951_s1 + $0x28] sm:$0xf] %v2314_v16 }
 0x21c   :  { %2347 = vst [vmem:[%s5951_s1 + $0x2c] sm:$0xf] %v2315_v37  ;;  %2348 = vst [vmem:[%s5951_s1 + $0x30] sm:$0xf] %v2316_v18 }
 0x21d   :  { %2349 = vst [vmem:[%s5951_s1 + $0x34] sm:$0xf] %v2317_v26  ;;  %2350 = vst [vmem:[%s5951_s1 + $0x38] sm:$0xf] %v2318_v57 }
 0x21e   :  { %2351 = vst [vmem:[%s5951_s1 + $0x3c] sm:$0xf] %v2319_v15 }

// kernel: _lambda_.41
= control target key start
LH: loop header
LB: loop body
LE: loop exit
PB: predicated region body
PF: predicated region fallthrough
CT: control target
= control target key end

     0   :  { %s618_s1 = inlined_call_operand.vmem [shape: bf16[128,128], index: 1, kind: input, shape index: {}]   ;;  %s619_s0 = inlined_call_operand.vmem [shape: bf16[128,128], index: 0, kind: input, shape index: {}]   ;;  %s620_s2 = inlined_call_operand.vmem [shape: f32[1,128], index: 2, kind: input, shape index: {}]   ;;  %s621_s3 = inlined_call_operand.vmem [shape: bf16[128,128], index: 3, kind: output, shape index: {}]  }
   0x1   :  { %v507_v0 = vld [vmem:[%s618_s1 + $0x38] sm:$0xff]   ;;  %v508_v1 = vld [vmem:[%s618_s1 + $0x30] sm:$0xff]   ;;  %v509_v2 = vld [vmem:[%s618_s1 + $0x28] sm:$0xff]  }
   0x2   :  { %459 = vmatprep.subr.bf16.mxu0 %v507_v0  ;;  %491 = vmatprep.subr.bf16.mxu1 %v507_v0  ;;  %v510_v3 = vld [vmem:[%s618_s1 + $0x20] sm:$0xff]   ;;  %v511_v6 = vld [vmem:[%s618_s1 + $0x18] sm:$0xff]   ;;  %v512_v7 = vld [vmem:[%s618_s1 + $0x10] sm:$0xff]  }
   0x3   :  { %460 = vmatpush3.bf16.msra.mxu0 %v507_v0  ;;  %499 = vmatpush3.bf16.msra.mxu1 %v507_v0  ;;  %v515_v4 = vld [vmem:[%s619_s0] sm:$0xff]   ;;  %v513_v8 = vld [vmem:[%s618_s1 + $0x8] sm:$0xff]   ;;  %v519_v12 = vld [vmem:[%s619_s0 + $0x10] sm:$0xff]  }
   0x4   :  { %461 = vmatprep.subr.bf16.mxu0 %v508_v1  ;;  %492 = vmatprep.subr.bf16.mxu1 %v508_v1  ;;  %v516_v5 = vld [vmem:[%s619_s0 + $0x20] sm:$0xff]   ;;  %v517_v10 = vld [vmem:[%s619_s0 + $0x8] sm:$0xff]   ;;  %v520_v13 = vld [vmem:[%s619_s0 + $0x30] sm:$0xff]  }
   0x5   :  { %475 = vmatprep.mubr.bf16.mxu0 %v515_v4  ;;  %483 = vmatprep.mubr.bf16.mxu1 %v516_v5  ;;  %v514_v9 = vld [vmem:[%s618_s1] sm:$0xff]   ;;  %v518_v11 = vld [vmem:[%s619_s0 + $0x28] sm:$0xff]   ;;  %v521_v14 = vld [vmem:[%s619_s0 + $0x18] sm:$0xff]  }
   0x6   :  { %v522_v15 = vld [vmem:[%s619_s0 + $0x38] sm:$0xff]   ;;  %v347_v16 = vld [vmem:[%s620_s2] ss:$0 sm:$0xff] }
   0x7   :  { %462 = vmatpush3.bf16.msra.mxu0 %v508_v1  ;;  %500 = vmatpush3.bf16.msra.mxu1 %v508_v1 }
   0x8   :  { %463 = vmatprep.subr.bf16.mxu0 %v509_v2  ;;  %493 = vmatprep.subr.bf16.mxu1 %v509_v2 }
   0xb   :  { %464 = vmatpush3.bf16.msra.mxu0 %v509_v2  ;;  %501 = vmatpush3.bf16.msra.mxu1 %v509_v2 }
   0xc   :  { %465 = vmatprep.subr.bf16.mxu0 %v510_v3  ;;  %494 = vmatprep.subr.bf16.mxu1 %v510_v3 }
   0xf   :  { %466 = vmatpush3.bf16.msra.mxu0 %v510_v3  ;;  %502 = vmatpush3.bf16.msra.mxu1 %v510_v3 }
  0x10   :  { %467 = vmatprep.subr.bf16.mxu0 %v511_v6  ;;  %495 = vmatprep.subr.bf16.mxu1 %v511_v6 }
  0x13   :  { %468 = vmatpush3.bf16.msra.mxu0 %v511_v6  ;;  %503 = vmatpush3.bf16.msra.mxu1 %v511_v6 }
  0x14   :  { %469 = vmatprep.subr.bf16.mxu0 %v512_v7  ;;  %496 = vmatprep.subr.bf16.mxu1 %v512_v7 }
  0x17   :  { %470 = vmatpush3.bf16.msra.mxu0 %v512_v7  ;;  %504 = vmatpush3.bf16.msra.mxu1 %v512_v7 }
  0x18   :  { %471 = vmatprep.subr.bf16.mxu0 %v513_v8  ;;  %497 = vmatprep.subr.bf16.mxu1 %v513_v8 }
  0x1b   :  { %472 = vmatpush3.bf16.msra.mxu0 %v513_v8  ;;  %505 = vmatpush3.bf16.msra.mxu1 %v513_v8 }
  0x1c   :  { %473 = vmatprep.subr.bf16.mxu0 %v514_v9  ;;  %498 = vmatprep.subr.bf16.mxu1 %v514_v9 }
  0x1f   :  { %474 = vmatpush3.bf16.msra.mxu0 %v514_v9  ;;  %506 = vmatpush3.bf16.msra.mxu1 %v514_v9 }
  0x22   :  { %476 = vmatmul.mubr.bf16.vlgmr.msra.gmra.mxu0 %v517_v10  ;;  %484 = vmatmul.mubr.bf16.vlgmr.msra.gmra.mxu1 %v518_v11 }
  0x23   :  { %479 = vmatprep.mubr.bf16.mxu0 %v519_v12  ;;  %487 = vmatprep.mubr.bf16.mxu1 %v520_v13 }
  0x2a   :  { %480 = vmatmul.mubr.bf16.gmra.mxu0 %v521_v14  ;;  %488 = vmatmul.mubr.bf16.gmra.mxu1 %v522_v15 }
  0xe2   :  { %v477_v17 = vpop.f32.mrf.mxu0  ;;  %v485_v18 = vpop.f32.mrf.mxu1 }
  0xe3   :  { %v193_v19 = vadd.f32 %v477_v17, %v347_v16  ;;  %v225_v20 = vadd.f32 %v485_v18, %v347_v16 }
  0xe4   :  { %v184_v21 = vpop.f32.mrf.mxu0  ;;  %v216_v22 = vpop.f32.mrf.mxu1 }
  0xe5   :  { %v185_v23 = vadd.f32 %v347_v16, %v184_v21  ;;  %v217_v24 = vadd.f32 %v347_v16, %v216_v22  ;;  %v249_v29 = vmax.f32 %v193_v19, 0.0  ;;  %v257_v30 = vmax.f32 %v225_v20, 0.0 }
  0xe6   :  { %v478_v25 = vpop.f32.mrf.mxu0  ;;  %v486_v26 = vpop.f32.mrf.mxu1 }
  0xe7   :  { %v196_v27 = vadd.f32 %v478_v25, %v347_v16  ;;  %v228_v28 = vadd.f32 %v486_v26, %v347_v16  ;;  %v247_v37 = vmax.f32 %v185_v23, 0.0  ;;  %v255_v38 = vmax.f32 %v217_v24, 0.0 }
  0xe8   :  { %v187_v31 = vpop.f32.mrf.mxu0  ;;  %v219_v32 = vpop.f32.mrf.mxu1 }
  0xe9   :  { %v250_v33 = vmax.f32 %v196_v27, 0.0  ;;  %v258_v34 = vmax.f32 %v228_v28, 0.0  ;;  %v188_v35 = vadd.f32 %v347_v16, %v187_v31  ;;  %v220_v36 = vadd.f32 %v347_v16, %v219_v32 }
  0xea   :  { %v481_v39 = vpop.f32.mrf.mxu0  ;;  %v489_v40 = vpop.f32.mrf.mxu1 }
  0xeb   :  { %v404_v41 = vpack.c.bf16 %v250_v33, %v249_v29  ;;  %v424_v42 = vpack.c.bf16 %v258_v34, %v257_v30  ;;  %v248_v43 = vmax.f32 %v188_v35, 0.0  ;;  %v256_v44 = vmax.f32 %v220_v36, 0.0 }
  0xec   :  { %v209_v45 = vadd.f32 %v481_v39, %v347_v16  ;;  %v241_v46 = vadd.f32 %v489_v40, %v347_v16  ;;  %v200_v47 = vpop.f32.mrf.mxu0  ;;  %v232_v48 = vpop.f32.mrf.mxu1 }
  0xed   :  { %436 = vst [vmem:[%s621_s3 + $0x8] sm:$0xff] %v404_v41   ;;  %440 = vst [vmem:[%s621_s3 + $0x28] sm:$0xff] %v424_v42   ;;  %v399_v49 = vpack.c.bf16 %v248_v43, %v247_v37  ;;  %v419_v50 = vpack.c.bf16 %v256_v44, %v255_v38  ;;  %v201_v51 = vadd.f32 %v347_v16, %v200_v47 }
  0xee   :  { %v233_v52 = vadd.f32 %v347_v16, %v232_v48  ;;  %v482_v53 = vpop.f32.mrf.mxu0  ;;  %v490_v54 = vpop.f32.mrf.mxu1  ;;  %v253_v57 = vmax.f32 %v209_v45, 0.0  ;;  %v261_v58 = vmax.f32 %v241_v46, 0.0 }
  0xef   :  { %400 = vst [vmem:[%s621_s3] sm:$0xff] %v399_v49   ;;  %439 = vst [vmem:[%s621_s3 + $0x20] sm:$0xff] %v419_v50   ;;  %v212_v55 = vadd.f32 %v482_v53, %v347_v16  ;;  %v244_v56 = vadd.f32 %v490_v54, %v347_v16  ;;  %v251_v1 = vmax.f32 %v201_v51, 0.0 }
  0xf0   :  { %v203_v59 = vpop.f32.mrf.mxu0  ;;  %v235_v60 = vpop.f32.mrf.mxu1  ;;  %v259_v2 = vmax.f32 %v233_v52, 0.0 }
  0xf1   :  { %v254_v61 = vmax.f32 %v212_v55, 0.0  ;;  %v262_v62 = vmax.f32 %v244_v56, 0.0  ;;  %v204_v63 = vadd.f32 %v347_v16, %v203_v59  ;;  %v236_v0 = vadd.f32 %v347_v16, %v235_v60 }
  0xf3   :  { %v414_v3 = vpack.c.bf16 %v254_v61, %v253_v57  ;;  %v434_v4 = vpack.c.bf16 %v262_v62, %v261_v58  ;;  %v252_v5 = vmax.f32 %v204_v63, 0.0  ;;  %v260_v6 = vmax.f32 %v236_v0, 0.0 }
  0xf5   :  { %438 = vst [vmem:[%s621_s3 + $0x18] sm:$0xff] %v414_v3   ;;  %442 = vst [vmem:[%s621_s3 + $0x38] sm:$0xff] %v434_v4   ;;  %v409_v7 = vpack.c.bf16 %v252_v5, %v251_v1  ;;  %v429_v8 = vpack.c.bf16 %v260_v6, %v259_v2 }
  0xf7   :  { %437 = vst [vmem:[%s621_s3 + $0x10] sm:$0xff] %v409_v7   ;;  %441 = vst [vmem:[%s621_s3 + $0x30] sm:$0xff] %v429_v8  }

// kernel: _lambda_.40
= control target key start
LH: loop header
LB: loop body
LE: loop exit
PB: predicated region body
PF: predicated region fallthrough
CT: control target
= control target key end

     0   :  { %s3410_s1 = inlined_call_operand.vmem [shape: bf16[1152,128], index: 1, kind: input, shape index: {}]   ;;  %s3411_s0 = inlined_call_operand.vmem [shape: bf16[128,1152], index: 0, kind: input, shape index: {}]   ;;  %s3412_s3 = inlined_call_operand.vmem [shape: bf16[128,128], index: 3, kind: input, shape index: {}]   ;;  %s3413_s2 = inlined_call_operand.vmem [shape: f32[1,128], index: 2, kind: input, shape index: {}, may-alias: {2,4}]   ;;  %s3414_s4 = inlined_call_operand.vmem [shape: f32[1,128], index: 4, kind: input, shape index: {}, may-alias: {2,4}]   ;;  %s3415_s5 = inlined_call_operand.vmem [shape: bf16[128,128], index: 5, kind: input, shape index: {}]   ;;  %s3416_s6 = inlined_call_operand.vmem [shape: bf16[128,128], index: 6, kind: output, shape index: {}]  }
   0x1   :  { %v2504_v0 = vld [vmem:[%s3410_s1 + $0x78] sm:$0xff]   ;;  %v2508_v4 = vld [vmem:[%s3410_s1 + $0x70] sm:$0xff]   ;;  %v2512_v8 = vld [vmem:[%s3410_s1 + $0x68] sm:$0xff]  }
   0x2   :  { %v2505_v1 = vld [vmem:[%s3410_s1 + $0x38] sm:$0xff]   ;;  %2152 = vmatprep.subr.bf16.mxu0 %v2504_v0  ;;  %v2509_v5 = vld [vmem:[%s3410_s1 + $0x30] sm:$0xff]   ;;  %v2513_v9 = vld [vmem:[%s3410_s1 + $0x28] sm:$0xff]  }
   0x3   :  { %v2506_v2 = vld [vmem:[%s3410_s1 + $0xf8] sm:$0xff]   ;;  %2153 = vmatpush3.bf16.msra.mxu0 %v2505_v1  ;;  %v2510_v6 = vld [vmem:[%s3410_s1 + $0xf0] sm:$0xff]   ;;  %v2514_v10 = vld [vmem:[%s3410_s1 + $0xe8] sm:$0xff]  }
   0x4   :  { %v2507_v3 = vld [vmem:[%s3410_s1 + $0xb8] sm:$0xff]   ;;  %2216 = vmatprep.subr.bf16.mxu1 %v2506_v2  ;;  %2154 = vmatprep.subr.bf16.mxu0 %v2508_v4  ;;  %v2511_v7 = vld [vmem:[%s3410_s1 + $0xb0] sm:$0xff]   ;;  %v2515_v11 = vld [vmem:[%s3410_s1 + $0xa8] sm:$0xff]  }
   0x5   :  { %2217 = vmatpush3.bf16.msra.mxu1 %v2507_v3  ;;  %v2516_v12 = vld [vmem:[%s3410_s1 + $0x60] sm:$0xff]   ;;  %v2520_v16 = vld [vmem:[%s3410_s1 + $0x58] sm:$0xff]   ;;  %v2524_v20 = vld [vmem:[%s3410_s1 + $0x50] sm:$0xff]  }
   0x6   :  { %2218 = vmatprep.subr.bf16.mxu1 %v2510_v6  ;;  %v2517_v13 = vld [vmem:[%s3410_s1 + $0x20] sm:$0xff]   ;;  %v2521_v17 = vld [vmem:[%s3410_s1 + $0x18] sm:$0xff]   ;;  %v2525_v21 = vld [vmem:[%s3410_s1 + $0x10] sm:$0xff]  }
   0x7   :  { %2155 = vmatpush3.bf16.msra.mxu0 %v2509_v5  ;;  %v2518_v14 = vld [vmem:[%s3410_s1 + $0xe0] sm:$0xff]   ;;  %v2522_v18 = vld [vmem:[%s3410_s1 + $0xd8] sm:$0xff]   ;;  %v2526_v22 = vld [vmem:[%s3410_s1 + $0xd0] sm:$0xff]  }
   0x8   :  { %2156 = vmatprep.subr.bf16.mxu0 %v2512_v8  ;;  %v2519_v15 = vld [vmem:[%s3410_s1 + $0xa0] sm:$0xff]   ;;  %v2523_v19 = vld [vmem:[%s3410_s1 + $0x98] sm:$0xff]   ;;  %v2527_v23 = vld [vmem:[%s3410_s1 + $0x90] sm:$0xff]  }
   0x9   :  { %2219 = vmatpush3.bf16.msra.mxu1 %v2511_v7  ;;  %v2528_v24 = vld [vmem:[%s3410_s1 + $0x48] sm:$0xff]   ;;  %v2532_v28 = vld [vmem:[%s3410_s1 + $0x40] sm:$0xff]   ;;  %v2539_v34 = vld [vmem:[%s3410_s1 + $0x178] sm:$0xff]  }
   0xa   :  { %2220 = vmatprep.subr.bf16.mxu1 %v2514_v10  ;;  %v2529_v25 = vld [vmem:[%s3410_s1 + $0x8] sm:$0xff]   ;;  %v2533_v29 = vld [vmem:[%s3410_s1] sm:$0xff]   ;;  %v2543_v37 = vld [vmem:[%s3410_s1 + $0x138] sm:$0xff]  }
   0xb   :  { %2157 = vmatpush3.bf16.msra.mxu0 %v2513_v9  ;;  %v2530_v26 = vld [vmem:[%s3410_s1 + $0xc8] sm:$0xff]   ;;  %v2534_v30 = vld [vmem:[%s3410_s1 + $0xc0] sm:$0xff]   ;;  %v2547_v40 = vld [vmem:[%s3410_s1 + $0x170] sm:$0xff]  }
   0xc   :  { %2158 = vmatprep.subr.bf16.mxu0 %v2516_v12  ;;  %v2531_v27 = vld [vmem:[%s3410_s1 + $0x88] sm:$0xff]   ;;  %v2535_v31 = vld [vmem:[%s3411_s0] ss:$36 sps:$4 sm:$0xff]   ;;  %v2548_v41 = vld [vmem:[%s3411_s0 + $0x54] ss:$36 sps:$4 sm:$0xff]  }
   0xd   :  { %2221 = vmatpush3.bf16.msra.mxu1 %v2515_v11  ;;  %v2537_v32 = vld [vmem:[%s3411_s0 + $0x4] ss:$36 sps:$4 sm:$0xff]   ;;  %v2542_v36 = vld [vmem:[%s3411_s0 + $0xc] ss:$36 sps:$4 sm:$0xff]   ;;  %v2552_v44 = vld [vmem:[%s3411_s0 + $0x94] ss:$36 sps:$4 sm:$0xff]  }
   0xe   :  { %2222 = vmatprep.subr.bf16.mxu1 %v2518_v14  ;;  %v2538_v33 = vld [vmem:[%s3410_s1 + $0x80] sm:$0xff]   ;;  %1087 = vmatprep.mubr.bf16.mxu0 %v2537_v32  ;;  %v2540_v35 = vld [vmem:[%s3411_s0 + $0x8] ss:$36 sps:$4 sm:$0xff]   ;;  %v2550_v42 = vld [vmem:[%s3410_s1 + $0x130] sm:$0xff]  }
   0xf   :  { %2159 = vmatpush3.bf16.msra.mxu0 %v2517_v13  ;;  %1184 = vmatprep.mubr.bf16.mxu1 %v2542_v36  ;;  %v2544_v38 = vld [vmem:[%s3411_s0 + $0x4c] ss:$36 sps:$4 sm:$0xff]   ;;  %v2556_v46 = vld [vmem:[%s3411_s0 + $0x9c] ss:$36 sps:$4 sm:$0xff]   ;;  %v2564_v52 = vld [vmem:[%s3411_s0 + $0xe4] ss:$36 sps:$4 sm:$0xff]  }
  0x10   :  { %2160 = vmatprep.subr.bf16.mxu0 %v2520_v16  ;;  %v2546_v39 = vld [vmem:[%s3411_s0 + $0x48] ss:$36 sps:$4 sm:$0xff]   ;;  %v2551_v43 = vld [vmem:[%s3411_s0 + $0x50] ss:$36 sps:$4 sm:$0xff]   ;;  %v2560_v49 = vld [vmem:[%s3411_s0 + $0xdc] ss:$36 sps:$4 sm:$0xff]  }
  0x11   :  { %2223 = vmatpush3.bf16.msra.mxu1 %v2519_v15  ;;  %v2555_v45 = vld [vmem:[%s3410_s1 + $0x168] sm:$0xff]   ;;  %v2554_v48 = vld [vmem:[%s3411_s0 + $0x90] ss:$36 sps:$4 sm:$0xff]   ;;  %v2563_v50 = vld [vmem:[%s3410_s1 + $0x160] sm:$0xff]  }
  0x12   :  { %2224 = vmatprep.subr.bf16.mxu1 %v2522_v18  ;;  %v2558_v47 = vld [vmem:[%s3410_s1 + $0x128] sm:$0xff]   ;;  %v2559_v51 = vld [vmem:[%s3411_s0 + $0x98] ss:$36 sps:$4 sm:$0xff]   ;;  %v2566_v53 = vld [vmem:[%s3410_s1 + $0x120] sm:$0xff]  }
  0x13   :  { %2161 = vmatpush3.bf16.msra.mxu0 %v2521_v17  ;;  %v2568_v54 = vld [vmem:[%s3410_s1 + $0x1f8] sm:$0xff]   ;;  %v2570_v58 = vld [vmem:[%s3411_s0 + $0x124] ss:$36 sps:$4 sm:$0xff]   ;;  %v2574_v61 = vld [vmem:[%s3411_s0 + $0x12c] ss:$36 sps:$4 sm:$0xff]  }
  0x14   :  { %2162 = vmatprep.subr.bf16.mxu0 %v2524_v20  ;;  %v2569_v55 = vld [vmem:[%s3410_s1 + $0x1b8] sm:$0xff]   ;;  %v2567_v59 = vld [vmem:[%s3411_s0 + $0xe0] ss:$36 sps:$4 sm:$0xff]   ;;  %v2578_v62 = vld [vmem:[%s3410_s1 + $0x1f0] sm:$0xff]  }
  0x15   :  { %2225 = vmatpush3.bf16.msra.mxu1 %v2523_v19  ;;  %v2562_v56 = vld [vmem:[%s3411_s0 + $0xd8] ss:$36 sps:$4 sm:$0xff]   ;;  %v2579_v63 = vld [vmem:[%s3410_s1 + $0x1b0] sm:$0xff]   ;;  %v2572_v1 = vld [vmem:[%s3411_s0 + $0x120] ss:$36 sps:$4 sm:$0xff]  }
  0x16   :  { %2226 = vmatprep.subr.bf16.mxu1 %v2526_v22  ;;  %v2573_v57 = vld [vmem:[%s3410_s1 + $0x158] sm:$0xff]   ;;  %v2583_v0 = vld [vmem:[%s3410_s1 + $0x150] sm:$0xff]   ;;  %v2577_v4 = vld [vmem:[%s3411_s0 + $0x128] ss:$36 sps:$4 sm:$0xff]  }
  0x17   :  { %2163 = vmatpush3.bf16.msra.mxu0 %v2525_v21  ;;  %v2576_v60 = vld [vmem:[%s3410_s1 + $0x118] sm:$0xff]   ;;  %v2580_v2 = vld [vmem:[%s3411_s0 + $0x16c] ss:$36 sps:$4 sm:$0xff]   ;;  %v2590_v7 = vld [vmem:[%s3410_s1 + $0x1e0] sm:$0xff]  }
  0x18   :  { %2164 = vmatprep.subr.bf16.mxu0 %v2528_v24  ;;  %v2586_v3 = vld [vmem:[%s3410_s1 + $0x110] sm:$0xff]   ;;  %v2588_v5 = vld [vmem:[%s3410_s1 + $0x1e8] sm:$0xff]   ;;  %v2593_v9 = vld [vmem:[%s3410_s1 + $0x1a0] sm:$0xff]  }
  0x19   :  { %2227 = vmatpush3.bf16.msra.mxu1 %v2527_v23  ;;  %v2589_v6 = vld [vmem:[%s3410_s1 + $0x1a8] sm:$0xff]   ;;  %v2584_v8 = vld [vmem:[%s3411_s0 + $0x174] ss:$36 sps:$4 sm:$0xff]   ;;  %v2596_v15 = vld [vmem:[%s3411_s0 + $0x1bc] ss:$36 sps:$4 sm:$0xff]  }
  0x1a   :  { %2228 = vmatprep.subr.bf16.mxu1 %v2530_v26  ;;  %v2595_v10 = vld [vmem:[%s3410_s1 + $0x148] sm:$0xff]   ;;  %v2587_v12 = vld [vmem:[%s3411_s0 + $0x170] ss:$36 sps:$4 sm:$0xff]   ;;  %v2600_v16 = vld [vmem:[%s3410_s1 + $0x1d8] sm:$0xff]  }
  0x1b   :  { %2165 = vmatpush3.bf16.msra.mxu0 %v2529_v25  ;;  %v2582_v11 = vld [vmem:[%s3411_s0 + $0x168] ss:$36 sps:$4 sm:$0xff]   ;;  %v2591_v13 = vld [vmem:[%s3411_s0 + $0x1b4] ss:$36 sps:$4 sm:$0xff]   ;;  %v2607_v21 = vld [vmem:[%s3410_s1 + $0x140] sm:$0xff]  }
  0x1c   :  { %2166 = vmatprep.subr.bf16.mxu0 %v2532_v28  ;;  %v2598_v14 = vld [vmem:[%s3410_s1 + $0x108] sm:$0xff]   ;;  %v2601_v17 = vld [vmem:[%s3410_s1 + $0x198] sm:$0xff]   ;;  %v2602_v18 = vld [vmem:[%s3410_s1 + $0x1d0] sm:$0xff]  }
  0x1d   :  { %2229 = vmatpush3.bf16.msra.mxu1 %v2531_v27  ;;  %v2594_v19 = vld [vmem:[%s3411_s0 + $0x1b0] ss:$36 sps:$4 sm:$0xff]   ;;  %v2603_v22 = vld [vmem:[%s3411_s0 + $0x1fc] ss:$36 sps:$4 sm:$0xff]   ;;  %v2608_v25 = vld [vmem:[%s3411_s0 + $0x204] ss:$36 sps:$4 sm:$0xff]  }
  0x1e   :  { %2230 = vmatprep.subr.bf16.mxu1 %v2534_v30  ;;  %v2605_v20 = vld [vmem:[%s3410_s1 + $0x190] sm:$0xff]   ;;  %v2599_v23 = vld [vmem:[%s3411_s0 + $0x1b8] ss:$36 sps:$4 sm:$0xff]   ;;  %v2610_v24 = vld [vmem:[%s3410_s1 + $0x100] sm:$0xff]  }
  0x1f   :  { %2167 = vmatpush3.bf16.msra.mxu0 %v2533_v29  ;;  %v2612_v26 = vld [vmem:[%s3410_s1 + $0x1c8] sm:$0xff]   ;;  %v2614_v28 = vld [vmem:[%s3410_s1 + $0x1c0] sm:$0xff]   ;;  %v2606_v29 = vld [vmem:[%s3411_s0 + $0x1f8] ss:$36 sps:$4 sm:$0xff]  }
  0x20   :  { %2280 = vmatprep.subr.bf16.mxu0 %v2539_v34  ;;  %v2613_v27 = vld [vmem:[%s3410_s1 + $0x188] sm:$0xff]   ;;  %v2618_v30 = vld [vmem:[%s3410_s1 + $0x180] sm:$0xff]   ;;  %v2617_v32 = vld [vmem:[%s3411_s0 + $0x14] ss:$36 sps:$4 sm:$0xff]  }
  0x21   :  { %2231 = vmatpush3.bf16.msra.mxu1 %v2538_v33  ;;  %v2611_v33 = vld [vmem:[%s3411_s0 + $0x200] ss:$36 sps:$4 sm:$0xff]  }
  0x22   :  { %1088 = vmatmul.mubr.bf16.vlgmr.msra.gmra.mxu0 %v2535_v31  ;;  %2344 = vmatprep.subr.bf16.mxu1 %v2568_v54  ;;  %v2619_v31 = vld [vmem:[%s3410_s1 + $0x238] sm:$0xff]  }
  0x23   :  { %2281 = vmatpush3.bf16.msra.mxu0 %v2543_v37  ;;  %1095 = vmatprep.mubr.bf16.mxu0 %v2544_v38  ;;  %v2622_v34 = vld [vmem:[%s3411_s0 + $0x1c] ss:$36 sps:$4 sm:$0xff]   ;;  %v2626_v37 = vld [vmem:[%s3410_s1 + $0x230] sm:$0xff]  }
  0x24   :  { %1185 = vmatmul.mubr.bf16.vlgmr.msra.gmra.mxu1 %v2540_v35  ;;  %2282 = vmatprep.subr.bf16.mxu0 %v2547_v40  ;;  %v2615_v35 = vld [vmem:[%s3411_s0 + $0x10] ss:$36 sps:$4 sm:$0xff]   ;;  %v2623_v36 = vld [vmem:[%s3411_s0 + $0x5c] ss:$36 sps:$4 sm:$0xff]   ;;  %v2633_v40 = vld [vmem:[%s3410_s1 + $0x228] sm:$0xff]  }
  0x25   :  { %1192 = vmatprep.mubr.bf16.mxu1 %v2548_v41  ;;  %2345 = vmatpush3.bf16.msra.mxu1 %v2569_v55  ;;  %v2620_v38 = vld [vmem:[%s3411_s0 + $0x18] ss:$36 sps:$4 sm:$0xff]   ;;  %v2668_v55 = vld [vmem:[%s3410_s1 + $0x200] sm:$0xff]  }
  0x26   :  { %2346 = vmatprep.subr.bf16.mxu1 %v2578_v62  ;;  %v2625_v41 = vld [vmem:[%s3411_s0 + $0x58] ss:$36 sps:$4 sm:$0xff]  }
  0x27   :  { %2283 = vmatpush3.bf16.msra.mxu0 %v2550_v42  ;;  %v2630_v42 = vld [vmem:[%s3411_s0 + $0xa4] ss:$36 sps:$4 sm:$0xff]   ;;  %v2644_v54 = vld [vmem:[%s3411_s0 + $0x134] ss:$36 sps:$4 sm:$0xff]  }
  0x28   :  { %2284 = vmatprep.subr.bf16.mxu0 %v2555_v45  ;;  %v2634_v45 = vld [vmem:[%s3411_s0 + $0xac] ss:$36 sps:$4 sm:$0xff]   ;;  %v2653_v62 = vld [vmem:[%s3411_s0 + $0x178] ss:$36 sps:$4 sm:$0xff]  }
  0x29   :  { %2347 = vmatpush3.bf16.msra.mxu1 %v2579_v63  ;;  %v2658_v63 = vld [vmem:[%s3411_s0 + $0x1c4] ss:$36 sps:$4 sm:$0xff]  }
  0x2a   :  { %1096 = vmatmul.mubr.bf16.gmra.mxu0 %v2546_v39  ;;  %2348 = vmatprep.subr.bf16.mxu1 %v2588_v5  ;;  %v2627_v39 = vld [vmem:[%s3411_s0 + $0x64] ss:$36 sps:$4 sm:$0xff]   ;;  %v2669_v5 = vld [vmem:[%s3411_s0 + $0x214] ss:$36 sps:$4 sm:$0xff]  }
  0x2b   :  { %1103 = vmatprep.mubr.bf16.mxu0 %v2552_v44  ;;  %2285 = vmatpush3.bf16.msra.mxu0 %v2558_v47  ;;  %v2629_v44 = vld [vmem:[%s3411_s0 + $0x60] ss:$36 sps:$4 sm:$0xff]  }
  0x2c   :  { %1193 = vmatmul.mubr.bf16.gmra.mxu1 %v2551_v43  ;;  %2286 = vmatprep.subr.bf16.mxu0 %v2563_v50  ;;  %v2640_v43 = vld [vmem:[%s3410_s1 + $0x220] sm:$0xff]   ;;  %v2636_v50 = vld [vmem:[%s3411_s0 + $0xa8] ss:$36 sps:$4 sm:$0xff]  }
  0x2d   :  { %1200 = vmatprep.mubr.bf16.mxu1 %v2556_v46  ;;  %2349 = vmatpush3.bf16.msra.mxu1 %v2589_v6  ;;  %v2647_v46 = vld [vmem:[%s3410_s1 + $0x218] sm:$0xff]   ;;  %v2632_v47 = vld [vmem:[%s3411_s0 + $0xa0] ss:$36 sps:$4 sm:$0xff]   ;;  %v2667_v6 = vld [vmem:[%s3411_s0 + $0x208] ss:$36 sps:$4 sm:$0xff]  }
  0x2e   :  { %2350 = vmatprep.subr.bf16.mxu1 %v2590_v7  ;;  %v2672_v7 = vld [vmem:[%s3411_s0 + $0x20] ss:$36 sps:$4 sm:$0xff]  }
  0x2f   :  { %2287 = vmatpush3.bf16.msra.mxu0 %v2566_v53  ;;  %v2639_v53 = vld [vmem:[%s3411_s0 + $0xe8] ss:$36 sps:$4 sm:$0xff]  }
  0x30   :  { %2288 = vmatprep.subr.bf16.mxu0 %v2573_v57  ;;  %v2648_v57 = vld [vmem:[%s3411_s0 + $0x13c] ss:$36 sps:$4 sm:$0xff]  }
  0x31   :  { %2351 = vmatpush3.bf16.msra.mxu1 %v2593_v9  ;;  %v2673_v9 = vld [vmem:[%s3411_s0 + $0x68] ss:$36 sps:$4 sm:$0xff]  }
  0x32   :  { %1104 = vmatmul.mubr.bf16.gmra.mxu0 %v2554_v48  ;;  %2352 = vmatprep.subr.bf16.mxu1 %v2600_v16  ;;  %v2637_v48 = vld [vmem:[%s3411_s0 + $0xec] ss:$36 sps:$4 sm:$0xff]   ;;  %v2680_v16 = vld [vmem:[%s3412_s3 + $0x38] sm:$0xff]  }
  0x33   :  { %1111 = vmatprep.mubr.bf16.mxu0 %v2560_v49  ;;  %2289 = vmatpush3.bf16.msra.mxu0 %v2576_v60  ;;  %v2654_v49 = vld [vmem:[%s3410_s1 + $0x210] sm:$0xff]   ;;  %v2650_v60 = vld [vmem:[%s3411_s0 + $0x138] ss:$36 sps:$4 sm:$0xff]  }
  0x34   :  { %1201 = vmatmul.mubr.bf16.gmra.mxu1 %v2559_v51  ;;  %2290 = vmatprep.subr.bf16.mxu0 %v2583_v0  ;;  %v2641_v51 = vld [vmem:[%s3411_s0 + $0xf4] ss:$36 sps:$4 sm:$0xff]   ;;  %v2657_v0 = vld [vmem:[%s3411_s0 + $0x180] ss:$36 sps:$4 sm:$0xff]  }
  0x35   :  { %1208 = vmatprep.mubr.bf16.mxu1 %v2564_v52  ;;  %2353 = vmatpush3.bf16.msra.mxu1 %v2601_v17  ;;  %v2661_v52 = vld [vmem:[%s3410_s1 + $0x208] sm:$0xff]   ;;  %v2681_v17 = vld [vmem:[%s3412_s3 + $0x30] sm:$0xff]  }
  0x36   :  { %2354 = vmatprep.subr.bf16.mxu1 %v2602_v18  ;;  %v2682_v18 = vld [vmem:[%s3412_s3 + $0x28] sm:$0xff]  }
  0x37   :  { %2291 = vmatpush3.bf16.msra.mxu0 %v2586_v3  ;;  %v2665_v3 = vld [vmem:[%s3411_s0 + $0x20c] ss:$36 sps:$4 sm:$0xff]  }
  0x38   :  { %2292 = vmatprep.subr.bf16.mxu0 %v2595_v10  ;;  %v2674_v10 = vld [vmem:[%s3411_s0 + $0xb0] ss:$36 sps:$4 sm:$0xff]  }
  0x39   :  { %2355 = vmatpush3.bf16.msra.mxu1 %v2605_v20  ;;  %v2684_v20 = vld [vmem:[%s3412_s3 + $0x18] sm:$0xff]  }
  0x3a   :  { %1112 = vmatmul.mubr.bf16.gmra.mxu0 %v2562_v56  ;;  %2356 = vmatprep.subr.bf16.mxu1 %v2612_v26  ;;  %v2643_v56 = vld [vmem:[%s3411_s0 + $0xf0] ss:$36 sps:$4 sm:$0xff]  }
  0x3b   :  { %1119 = vmatprep.mubr.bf16.mxu0 %v2570_v58  ;;  %2293 = vmatpush3.bf16.msra.mxu0 %v2598_v14  ;;  %v2646_v58 = vld [vmem:[%s3411_s0 + $0x130] ss:$36 sps:$4 sm:$0xff]  }
  0x3c   :  { %1209 = vmatmul.mubr.bf16.gmra.mxu1 %v2567_v59  ;;  %2294 = vmatprep.subr.bf16.mxu0 %v2607_v21  ;;  %v2651_v59 = vld [vmem:[%s3411_s0 + $0x17c] ss:$36 sps:$4 sm:$0xff]   ;;  %v2678_v14 = vld [vmem:[%s3411_s0 + $0x1d0] ss:$36 sps:$4 sm:$0xff]  }
  0x3d   :  { %1216 = vmatprep.mubr.bf16.mxu1 %v2574_v61  ;;  %2357 = vmatpush3.bf16.msra.mxu1 %v2613_v27  ;;  %v2655_v61 = vld [vmem:[%s3411_s0 + $0x184] ss:$36 sps:$4 sm:$0xff]   ;;  %v2685_v21 = vld [vmem:[%s3412_s3 + $0x10] sm:$0xff]  }
  0x3e   :  { %2358 = vmatprep.subr.bf16.mxu1 %v2614_v28 }
  0x3f   :  { %2295 = vmatpush3.bf16.msra.mxu0 %v2610_v24  ;;  %v3179_v24 = vld [vmem:[%s3413_s2] ss:$0 sm:$0xff] }
  0x40   :  { %2440 = vmatprep.subr.bf16.mxu0 %v2619_v31 }
  0x41   :  { %2359 = vmatpush3.bf16.msra.mxu1 %v2618_v30 }
  0x42   :  { %1120 = vmatmul.mubr.bf16.gmra.mxu0 %v2572_v1  ;;  %v2662_v1 = vld [vmem:[%s3411_s0 + $0x1cc] ss:$36 sps:$4 sm:$0xff]   ;;  %2472 = vmatprep.subr.bf16.mxu1 %v2680_v16 }
  0x43   :  { %1127 = vmatprep.mubr.bf16.mxu0 %v2580_v2  ;;  %v2660_v2 = vld [vmem:[%s3411_s0 + $0x1c0] ss:$36 sps:$4 sm:$0xff]  }
  0x44   :  { %1217 = vmatmul.mubr.bf16.gmra.mxu1 %v2577_v4  ;;  %v2664_v4 = vld [vmem:[%s3411_s0 + $0x1c8] ss:$36 sps:$4 sm:$0xff]  }
  0x45   :  { %1224 = vmatprep.mubr.bf16.mxu1 %v2584_v8  ;;  %v2671_v8 = vld [vmem:[%s3411_s0 + $0x210] ss:$36 sps:$4 sm:$0xff]  }
  0x4a   :  { %1128 = vmatmul.mubr.bf16.gmra.mxu0 %v2582_v11  ;;  %v2675_v11 = vld [vmem:[%s3411_s0 + $0xf8] ss:$36 sps:$4 sm:$0xff]  }
  0x4b   :  { %1135 = vmatprep.mubr.bf16.mxu0 %v2591_v13  ;;  %v2677_v13 = vld [vmem:[%s3411_s0 + $0x188] ss:$36 sps:$4 sm:$0xff]  }
  0x4c   :  { %1225 = vmatmul.mubr.bf16.gmra.mxu1 %v2587_v12  ;;  %v2676_v12 = vld [vmem:[%s3411_s0 + $0x140] ss:$36 sps:$4 sm:$0xff]  }
  0x4d   :  { %1232 = vmatprep.mubr.bf16.mxu1 %v2596_v15  ;;  %v2679_v15 = vld [vmem:[%s3411_s0 + $0x218] ss:$36 sps:$4 sm:$0xff]  }
  0x52   :  { %1136 = vmatmul.mubr.bf16.gmra.mxu0 %v2594_v19  ;;  %v2683_v19 = vld [vmem:[%s3412_s3 + $0x20] sm:$0xff]  }
  0x53   :  { %1143 = vmatprep.mubr.bf16.mxu0 %v2603_v22 }
  0x54   :  { %1233 = vmatmul.mubr.bf16.gmra.mxu1 %v2599_v23  ;;  %v2686_v23 = vld [vmem:[%s3412_s3 + $0x8] sm:$0xff]  }
  0x55   :  { %1240 = vmatprep.mubr.bf16.mxu1 %v2608_v25 }
  0x5a   :  { %1144 = vmatmul.mubr.bf16.gmra.mxu0 %v2606_v29 }
  0x5b   :  { %1281 = vmatprep.mubr.bf16.mxu0 %v2617_v32 }
  0x5c   :  { %1241 = vmatmul.mubr.bf16.gmra.mxu1 %v2611_v33 }
  0x5d   :  { %1378 = vmatprep.mubr.bf16.mxu1 %v2622_v34 }
  0x62   :  { %1282 = vmatmul.mubr.bf16.vlgmr.msra.gmra.mxu0 %v2615_v35 }
  0x63   :  { %2441 = vmatpush3.bf16.msra.mxu0 %v2619_v31  ;;  %1289 = vmatprep.mubr.bf16.mxu0 %v2623_v36 }
  0x64   :  { %2442 = vmatprep.subr.bf16.mxu0 %v2626_v37  ;;  %1379 = vmatmul.mubr.bf16.vlgmr.msra.gmra.mxu1 %v2620_v38 }
  0x65   :  { %1386 = vmatprep.mubr.bf16.mxu1 %v2627_v39  ;;  %2473 = vmatpush3.bf16.msra.mxu1 %v2680_v16  ;;  %v2687_v39 = vld [vmem:[%s3412_s3] sm:$0xff]  }
  0x66   :  { %2474 = vmatprep.subr.bf16.mxu1 %v2681_v17 }
  0x67   :  { %2443 = vmatpush3.bf16.msra.mxu0 %v2626_v37 }
  0x68   :  { %2444 = vmatprep.subr.bf16.mxu0 %v2633_v40 }
  0x69   :  { %2475 = vmatpush3.bf16.msra.mxu1 %v2681_v17 }
  0x6a   :  { %1290 = vmatmul.mubr.bf16.gmra.mxu0 %v2625_v41  ;;  %2476 = vmatprep.subr.bf16.mxu1 %v2682_v18 }
  0x6b   :  { %1297 = vmatprep.mubr.bf16.mxu0 %v2630_v42  ;;  %2445 = vmatpush3.bf16.msra.mxu0 %v2633_v40 }
  0x6c   :  { %2446 = vmatprep.subr.bf16.mxu0 %v2640_v43  ;;  %1387 = vmatmul.mubr.bf16.gmra.mxu1 %v2629_v44 }
  0x6d   :  { %1394 = vmatprep.mubr.bf16.mxu1 %v2634_v45  ;;  %2477 = vmatpush3.bf16.msra.mxu1 %v2682_v18 }
  0x6e   :  { %2478 = vmatprep.subr.bf16.mxu1 %v2683_v19 }
  0x6f   :  { %2447 = vmatpush3.bf16.msra.mxu0 %v2640_v43 }
  0x70   :  { %2448 = vmatprep.subr.bf16.mxu0 %v2647_v46 }
  0x71   :  { %2479 = vmatpush3.bf16.msra.mxu1 %v2683_v19 }
  0x72   :  { %1298 = vmatmul.mubr.bf16.gmra.mxu0 %v2632_v47  ;;  %2480 = vmatprep.subr.bf16.mxu1 %v2684_v20 }
  0x73   :  { %1305 = vmatprep.mubr.bf16.mxu0 %v2637_v48  ;;  %2449 = vmatpush3.bf16.msra.mxu0 %v2647_v46 }
  0x74   :  { %2450 = vmatprep.subr.bf16.mxu0 %v2654_v49  ;;  %1395 = vmatmul.mubr.bf16.gmra.mxu1 %v2636_v50 }
  0x75   :  { %1402 = vmatprep.mubr.bf16.mxu1 %v2641_v51  ;;  %2481 = vmatpush3.bf16.msra.mxu1 %v2684_v20 }
  0x76   :  { %2482 = vmatprep.subr.bf16.mxu1 %v2685_v21 }
  0x77   :  { %2451 = vmatpush3.bf16.msra.mxu0 %v2654_v49 }
  0x78   :  { %2452 = vmatprep.subr.bf16.mxu0 %v2661_v52 }
  0x79   :  { %2483 = vmatpush3.bf16.msra.mxu1 %v2685_v21 }
  0x7a   :  { %1306 = vmatmul.mubr.bf16.gmra.mxu0 %v2639_v53  ;;  %2484 = vmatprep.subr.bf16.mxu1 %v2686_v23 }
  0x7b   :  { %1313 = vmatprep.mubr.bf16.mxu0 %v2644_v54  ;;  %2453 = vmatpush3.bf16.msra.mxu0 %v2661_v52 }
  0x7c   :  { %2454 = vmatprep.subr.bf16.mxu0 %v2668_v55  ;;  %1403 = vmatmul.mubr.bf16.gmra.mxu1 %v2643_v56 }
  0x7d   :  { %1410 = vmatprep.mubr.bf16.mxu1 %v2648_v57  ;;  %2485 = vmatpush3.bf16.msra.mxu1 %v2686_v23 }
  0x7e   :  { %2486 = vmatprep.subr.bf16.mxu1 %v2687_v39 }
  0x7f   :  { %2455 = vmatpush3.bf16.msra.mxu0 %v2668_v55 }
  0x81   :  { %2487 = vmatpush3.bf16.msra.mxu1 %v2687_v39 }
  0x82   :  { %1314 = vmatmul.mubr.bf16.gmra.mxu0 %v2646_v58 }
  0x83   :  { %1321 = vmatprep.mubr.bf16.mxu0 %v2651_v59 }
  0x84   :  { %1411 = vmatmul.mubr.bf16.gmra.mxu1 %v2650_v60 }
  0x85   :  { %1418 = vmatprep.mubr.bf16.mxu1 %v2655_v61 }
  0x8a   :  { %1322 = vmatmul.mubr.bf16.gmra.mxu0 %v2653_v62 }
  0x8b   :  { %1329 = vmatprep.mubr.bf16.mxu0 %v2658_v63 }
  0x8c   :  { %1419 = vmatmul.mubr.bf16.gmra.mxu1 %v2657_v0 }
  0x8d   :  { %1426 = vmatprep.mubr.bf16.mxu1 %v2662_v1 }
  0x92   :  { %1330 = vmatmul.mubr.bf16.gmra.mxu0 %v2660_v2 }
  0x93   :  { %1337 = vmatprep.mubr.bf16.mxu0 %v2665_v3 }
  0x94   :  { %1427 = vmatmul.mubr.bf16.gmra.mxu1 %v2664_v4 }
  0x95   :  { %1434 = vmatprep.mubr.bf16.mxu1 %v2669_v5 }
  0x9a   :  { %1338 = vmatmul.mubr.bf16.gmra.mxu0 %v2667_v6 }
  0x9b   :  { %2456 = vmatprep.mubr.bf16.mxu0 %v2672_v7 }
  0x9c   :  { %1435 = vmatmul.mubr.bf16.gmra.mxu1 %v2671_v8 }
  0xa2   :  { %2457 = vmatmul.mubr.bf16.vlgmr.msra.gmra.mxu0 %v2673_v9 }
  0xa3   :  { %2460 = vmatprep.mubr.bf16.mxu0 %v2674_v10 }
  0xaa   :  { %2461 = vmatmul.mubr.bf16.gmra.mxu0 %v2675_v11 }
  0xab   :  { %2464 = vmatprep.mubr.bf16.mxu0 %v2676_v12 }
  0xb2   :  { %2465 = vmatmul.mubr.bf16.gmra.mxu0 %v2677_v13 }
  0xb3   :  { %2468 = vmatprep.mubr.bf16.mxu0 %v2678_v14 }
  0xba   :  { %2469 = vmatmul.mubr.bf16.gmra.mxu0 %v2679_v15 }
  0xe2   :  { %v2168_v22 = vpop.f32.mrf.mxu0 }
  0xe4   :  { %v2169_v25 = vpop.f32.mrf.mxu0  ;;  %v2232_v27 = vpop.f32.mrf.mxu1 }
  0xe5   :  { %v2170_v26 = vadd.f32 %v2169_v25, %v2168_v22 }
  0xe6   :  { %v2171_v28 = vpop.f32.mrf.mxu0  ;;  %v2233_v30 = vpop.f32.mrf.mxu1 }
  0xe7   :  { %v1090_v29 = vadd.f32 %v2170_v26, %v3179_v24  ;;  %v2234_v31 = vadd.f32 %v2233_v30, %v2232_v27 }
  0xe8   :  { %v2172_v32 = vpop.f32.mrf.mxu0  ;;  %v2235_v34 = vpop.f32.mrf.mxu1 }
  0xe9   :  { %v2173_v33 = vadd.f32 %v2172_v32, %v2171_v28  ;;  %v3182_v35 = vadd.f32 %v2234_v31, %v1090_v29 }
  0xea   :  { %v2174_v36 = vpop.f32.mrf.mxu0  ;;  %v2236_v38 = vpop.f32.mrf.mxu1 }
  0xeb   :  { %v1093_v37 = vadd.f32 %v2173_v33, %v3179_v24  ;;  %v2237_v40 = vadd.f32 %v2236_v38, %v2235_v34 }
  0xec   :  { %v2175_v41 = vpop.f32.mrf.mxu0  ;;  %v2238_v43 = vpop.f32.mrf.mxu1 }
  0xed   :  { %v2176_v42 = vadd.f32 %v2175_v41, %v2174_v36  ;;  %v3188_v44 = vadd.f32 %v2237_v40, %v1093_v37 }
  0xee   :  { %v2177_v45 = vpop.f32.mrf.mxu0  ;;  %v2239_v47 = vpop.f32.mrf.mxu1 }
  0xef   :  { %v1098_v46 = vadd.f32 %v2176_v42, %v3179_v24  ;;  %v2240_v48 = vadd.f32 %v2239_v47, %v2238_v43 }
  0xf0   :  { %v2178_v49 = vpop.f32.mrf.mxu0  ;;  %v2241_v51 = vpop.f32.mrf.mxu1 }
  0xf1   :  { %v2179_v50 = vadd.f32 %v2178_v49, %v2177_v45  ;;  %v3191_v52 = vadd.f32 %v2240_v48, %v1098_v46 }
  0xf2   :  { %v2180_v53 = vpop.f32.mrf.mxu0  ;;  %v2242_v55 = vpop.f32.mrf.mxu1 }
  0xf3   :  { %v1101_v54 = vadd.f32 %v2179_v50, %v3179_v24  ;;  %v2243_v56 = vadd.f32 %v2242_v55, %v2241_v51 }
  0xf4   :  { %v2181_v57 = vpop.f32.mrf.mxu0  ;;  %v2244_v59 = vpop.f32.mrf.mxu1 }
  0xf5   :  { %v2182_v58 = vadd.f32 %v2181_v57, %v2180_v53  ;;  %v3194_v60 = vadd.f32 %v2243_v56, %v1101_v54 }
  0xf6   :  { %v2183_v61 = vpop.f32.mrf.mxu0  ;;  %v2245_v63 = vpop.f32.mrf.mxu1 }
  0xf7   :  { %v1106_v62 = vadd.f32 %v2182_v58, %v3179_v24  ;;  %v2246_v0 = vadd.f32 %v2245_v63, %v2244_v59 }
  0xf8   :  { %v2184_v1 = vpop.f32.mrf.mxu0  ;;  %v2247_v3 = vpop.f32.mrf.mxu1 }
  0xf9   :  { %v2185_v2 = vadd.f32 %v2184_v1, %v2183_v61  ;;  %v3197_v4 = vadd.f32 %v2246_v0, %v1106_v62 }
  0xfa   :  { %v2186_v5 = vpop.f32.mrf.mxu0  ;;  %v2248_v7 = vpop.f32.mrf.mxu1 }
  0xfb   :  { %v1109_v6 = vadd.f32 %v2185_v2, %v3179_v24  ;;  %v2249_v8 = vadd.f32 %v2248_v7, %v2247_v3 }
  0xfc   :  { %v2187_v9 = vpop.f32.mrf.mxu0  ;;  %v2250_v11 = vpop.f32.mrf.mxu1 }
  0xfd   :  { %v2188_v10 = vadd.f32 %v2187_v9, %v2186_v5  ;;  %v3200_v12 = vadd.f32 %v2249_v8, %v1109_v6 }
  0xfe   :  { %v2189_v13 = vpop.f32.mrf.mxu0  ;;  %v2251_v15 = vpop.f32.mrf.mxu1 }
  0xff   :  { %v1114_v14 = vadd.f32 %v2188_v10, %v3179_v24  ;;  %v2252_v16 = vadd.f32 %v2251_v15, %v2250_v11 }
 0x100   :  { %v2190_v17 = vpop.f32.mrf.mxu0  ;;  %v2253_v19 = vpop.f32.mrf.mxu1 }
 0x101   :  { %v2191_v18 = vadd.f32 %v2190_v17, %v2189_v13  ;;  %v3203_v20 = vadd.f32 %v2252_v16, %v1114_v14 }
 0x102   :  { %v2192_v21 = vpop.f32.mrf.mxu0  ;;  %v2254_v23 = vpop.f32.mrf.mxu1 }
 0x103   :  { %v1117_v22 = vadd.f32 %v2191_v18, %v3179_v24  ;;  %v2255_v25 = vadd.f32 %v2254_v23, %v2253_v19 }
 0x104   :  { %v2193_v26 = vpop.f32.mrf.mxu0  ;;  %v2256_v28 = vpop.f32.mrf.mxu1 }
 0x105   :  { %v2194_v27 = vadd.f32 %v2193_v26, %v2192_v21  ;;  %v3206_v29 = vadd.f32 %v2255_v25, %v1117_v22 }
 0x106   :  { %v2195_v30 = vpop.f32.mrf.mxu0  ;;  %v2257_v32 = vpop.f32.mrf.mxu1 }
 0x107   :  { %v1122_v31 = vadd.f32 %v2194_v27, %v3179_v24  ;;  %v2258_v33 = vadd.f32 %v2257_v32, %v2256_v28 }
 0x108   :  { %v2196_v34 = vpop.f32.mrf.mxu0  ;;  %v2259_v37 = vpop.f32.mrf.mxu1 }
 0x109   :  { %v2197_v36 = vadd.f32 %v2196_v34, %v2195_v30  ;;  %v3209_v38 = vadd.f32 %v2258_v33, %v1122_v31 }
 0x10a   :  { %v2198_v39 = vpop.f32.mrf.mxu0  ;;  %v2260_v41 = vpop.f32.mrf.mxu1 }
 0x10b   :  { %3417 = vst [vmem:[#allocation2_spill] sm:$0xff] %v3209_v38  ;;  %v1125_v40 = vadd.f32 %v2197_v36, %v3179_v24  ;;  %v2261_v42 = vadd.f32 %v2260_v41, %v2259_v37 }
 0x10c   :  { %v2199_v43 = vpop.f32.mrf.mxu0  ;;  %v2262_v46 = vpop.f32.mrf.mxu1 }
 0x10d   :  { %v2200_v45 = vadd.f32 %v2199_v43, %v2198_v39  ;;  %v3212_v47 = vadd.f32 %v2261_v42, %v1125_v40 }
 0x10e   :  { %v2201_v48 = vpop.f32.mrf.mxu0  ;;  %v2263_v50 = vpop.f32.mrf.mxu1 }
 0x10f   :  { %3418 = vst [vmem:[#allocation3_spill] sm:$0xff] %v3212_v47  ;;  %v1130_v49 = vadd.f32 %v2200_v45, %v3179_v24  ;;  %v2264_v51 = vadd.f32 %v2263_v50, %v2262_v46 }
 0x110   :  { %v2202_v53 = vpop.f32.mrf.mxu0  ;;  %v2265_v55 = vpop.f32.mrf.mxu1 }
 0x111   :  { %v2203_v54 = vadd.f32 %v2202_v53, %v2201_v48  ;;  %v3215_v56 = vadd.f32 %v2264_v51, %v1130_v49 }
 0x112   :  { %v2204_v57 = vpop.f32.mrf.mxu0  ;;  %v2266_v59 = vpop.f32.mrf.mxu1 }
 0x113   :  { %v1133_v58 = vadd.f32 %v2203_v54, %v3179_v24  ;;  %v2267_v61 = vadd.f32 %v2266_v59, %v2265_v55 }
 0x114   :  { %v2205_v62 = vpop.f32.mrf.mxu0  ;;  %v2268_v0 = vpop.f32.mrf.mxu1 }
 0x115   :  { %v2206_v63 = vadd.f32 %v2205_v62, %v2204_v57  ;;  %v3218_v1 = vadd.f32 %v2267_v61, %v1133_v58 }
 0x116   :  { %v2207_v2 = vpop.f32.mrf.mxu0  ;;  %v2269_v5 = vpop.f32.mrf.mxu1 }
 0x117   :  { %3419 = vst [vmem:[#allocation4_spill] sm:$0xff] %v3218_v1  ;;  %v1138_v3 = vadd.f32 %v2206_v63, %v3179_v24  ;;  %v2270_v6 = vadd.f32 %v2269_v5, %v2268_v0 }
 0x118   :  { %v2208_v7 = vpop.f32.mrf.mxu0  ;;  %v2271_v9 = vpop.f32.mrf.mxu1 }
 0x119   :  { %v2209_v8 = vadd.f32 %v2208_v7, %v2207_v2  ;;  %v3221_v10 = vadd.f32 %v2270_v6, %v1138_v3 }
 0x11a   :  { %v2210_v11 = vpop.f32.mrf.mxu0  ;;  %v2272_v14 = vpop.f32.mrf.mxu1 }
 0x11b   :  { %3420 = vst [vmem:[#allocation5_spill] sm:$0xff] %v3221_v10  ;;  %v1141_v13 = vadd.f32 %v2209_v8, %v3179_v24  ;;  %v2273_v15 = vadd.f32 %v2272_v14, %v2271_v9 }
 0x11c   :  { %v2211_v16 = vpop.f32.mrf.mxu0  ;;  %v2274_v18 = vpop.f32.mrf.mxu1 }
 0x11d   :  { %v2212_v17 = vadd.f32 %v2211_v16, %v2210_v11  ;;  %v3224_v19 = vadd.f32 %v2273_v15, %v1141_v13 }
 0x11e   :  { %v2213_v21 = vpop.f32.mrf.mxu0  ;;  %v2275_v23 = vpop.f32.mrf.mxu1 }
 0x11f   :  { %3421 = vst [vmem:[#allocation6_spill] sm:$0xff] %v3224_v19  ;;  %v1146_v22 = vadd.f32 %v2212_v17, %v3179_v24  ;;  %v2276_v25 = vadd.f32 %v2275_v23, %v2274_v18 }
 0x120   :  { %v2214_v26 = vpop.f32.mrf.mxu0  ;;  %v3229_v28 = vpop.f32.mrf.mxu1 }
 0x121   :  { %v3227_v27 = vadd.f32 %v2214_v26, %v2213_v21  ;;  %3422 = vst [vmem:[#allocation7_spill] sm:$0xff] %v3229_v28  ;;  %v3231_v30 = vadd.f32 %v2276_v25, %v1146_v22 }
 0x122   :  { %v2296_v31 = vpop.f32.mrf.mxu0  ;;  %v3233_v32 = vpop.f32.mrf.mxu1 }
 0x123   :  { %3423 = vst [vmem:[#allocation8_spill] sm:$0xff] %v3231_v30  ;;  %3424 = vst [vmem:[#allocation9_spill] sm:$0xff] %v3233_v32 }
 0x124   :  { %v2297_v33 = vpop.f32.mrf.mxu0  ;;  %v2360_v36 = vpop.f32.mrf.mxu1 }
 0x125   :  { %v2298_v34 = vadd.f32 %v2297_v33, %v2296_v31 }
 0x126   :  { %v2299_v37 = vpop.f32.mrf.mxu0  ;;  %v2361_v40 = vpop.f32.mrf.mxu1 }
 0x127   :  { %v3236_v39 = vadd.f32 %v2298_v34, %v3182_v35 }
 0x128   :  { %v2300_v41 = vpop.f32.mrf.mxu0  ;;  %v2363_v42 = vpop.f32.mrf.mxu1 }
 0x12a   :  { %v2302_v43 = vpop.f32.mrf.mxu0  ;;  %v2364_v45 = vpop.f32.mrf.mxu1 }
 0x12c   :  { %v2303_v46 = vpop.f32.mrf.mxu0  ;;  %v2366_v48 = vpop.f32.mrf.mxu1 }
 0x12d   :  { %v2304_v28 = vadd.f32 %v2303_v46, %v2302_v43  ;;  %v2365_v43 = vadd.f32 %v2364_v45, %v2363_v42 }
 0x12e   :  { %v2305_v49 = vpop.f32.mrf.mxu0  ;;  %v2367_v50 = vpop.f32.mrf.mxu1 }
 0x130   :  { %v2306_v51 = vpop.f32.mrf.mxu0  ;;  %v2369_v53 = vpop.f32.mrf.mxu1 }
 0x132   :  { %v2308_v54 = vpop.f32.mrf.mxu0  ;;  %v2370_v55 = vpop.f32.mrf.mxu1 }
 0x134   :  { %v2309_v57 = vpop.f32.mrf.mxu0  ;;  %v3238_v58 = vpop.f32.mrf.mxu1 }
 0x136   :  { %v2311_v59 = vpop.f32.mrf.mxu0  ;;  %v3240_v61 = vpop.f32.mrf.mxu1 }
 0x138   :  { %v2312_v35 = vpop.f32.mrf.mxu0  ;;  %v3242_v62 = vpop.f32.mrf.mxu1 }
 0x13a   :  { %v2314_v63 = vpop.f32.mrf.mxu0  ;;  %v3244_v0 = vpop.f32.mrf.mxu1 }
 0x13c   :  { %v2315_v2 = vpop.f32.mrf.mxu0  ;;  %v2378_v3 = vpop.f32.mrf.mxu1 }
 0x13e   :  { %v2317_v5 = vpop.f32.mrf.mxu0  ;;  %v2379_v6 = vpop.f32.mrf.mxu1 }
 0x13f   :  { %v2380_v42 = vadd.f32 %v2379_v6, %v2378_v3 }
 0x140   :  { %v2318_v7 = vpop.f32.mrf.mxu0  ;;  %v2381_v8 = vpop.f32.mrf.mxu1 }
 0x142   :  { %v3246_v9 = vpop.f32.mrf.mxu0  ;;  %v2382_v11 = vpop.f32.mrf.mxu1 }
 0x144   :  { %v3248_v13 = vpop.f32.mrf.mxu0  ;;  %v3250_v14 = vpop.f32.mrf.mxu1 }
 0x145   :  { %3425 = vst [vmem:[#allocation10_spill] sm:$0xff] %v3250_v14  ;;  %v2301_v14 = vadd.f32 %v2300_v41, %v2299_v37  ;;  %v2316_v37 = vadd.f32 %v2315_v2, %v2314_v63 }
 0x146   :  { %v3252_v15 = vpop.f32.mrf.mxu0  ;;  %v3254_v16 = vpop.f32.mrf.mxu1 }
 0x147   :  { %3426 = vst [vmem:[#allocation11_spill] sm:$0xff] %v3254_v16  ;;  %v2307_v16 = vadd.f32 %v2306_v51, %v2305_v49  ;;  %v2310_v51 = vadd.f32 %v2309_v57, %v2308_v54 }
 0x148   :  { %v3256_v17 = vpop.f32.mrf.mxu0  ;;  %v3258_v18 = vpop.f32.mrf.mxu1 }
 0x149   :  { %3427 = vst [vmem:[#allocation12_spill] sm:$0xff] %v3258_v18 }
 0x14a   :  { %v2326_v21 = vpop.f32.mrf.mxu0  ;;  %v3260_v22 = vpop.f32.mrf.mxu1 }
 0x14b   :  { %3428 = vst [vmem:[#allocation13_spill] sm:$0xff] %v3260_v22 }
 0x14c   :  { %v2327_v23 = vpop.f32.mrf.mxu0  ;;  %v3262_v25 = vpop.f32.mrf.mxu1 }
 0x14e   :  { %v2329_v26 = vpop.f32.mrf.mxu0  ;;  %v3264_v31 = vpop.f32.mrf.mxu1 }
 0x150   :  { %v2330_v33 = vpop.f32.mrf.mxu0  ;;  %v3266_v34 = vpop.f32.mrf.mxu1 }
 0x151   :  { %3429 = vst [vmem:[#allocation14_spill] sm:$0xff] %v3266_v34 }
 0x152   :  { %v3268_v19 = vpop.f32.mrf.mxu0  ;;  %v3272_v30 = vpop.f32.mrf.mxu1 }
 0x153   :  { %3430 = vst [vmem:[#allocation15_spill] sm:$0xff] %v3268_v19  ;;  %3432 = vst [vmem:[#allocation17_spill] sm:$0xff] %v3272_v30  ;;  %v2368_v30 = vadd.f32 %v2367_v50, %v2366_v48  ;;  %v2313_v48 = vadd.f32 %v2312_v35, %v2311_v59 }
 0x154   :  { %v3270_v10 = vpop.f32.mrf.mxu0  ;;  %v3278_v22 = vpop.f32.mrf.mxu1 }
 0x155   :  { %3431 = vst [vmem:[#allocation16_spill] sm:$0xff] %v3270_v10  ;;  %3435 = vst [vmem:[#allocation20_spill] sm:$0xff] %v3278_v22  ;;  %v1292_v10 = vadd.f32 %v2304_v28, %v3191_v52  ;;  %v2371_v22 = vadd.f32 %v2370_v55, %v2369_v53  ;;  %v1300_v53 = vadd.f32 %v2310_v51, %v3197_v4 }
 0x156   :  { %v3274_v47 = vpop.f32.mrf.mxu0  ;;  %v3284_v34 = vpop.f32.mrf.mxu1  ;;  %v1303_v59 = vadd.f32 %v2313_v48, %v3200_v12  ;;  %v2325_v12 = vadd.f32 %v3256_v17, %v3252_v15  ;;  %v3443_v15 = vld [vmem:[#allocation4_spill] sm:$0xff] }
 0x157   :  { %3433 = vst [vmem:[#allocation18_spill] sm:$0xff] %v3274_v47  ;;  %3438 = vst [vmem:[#allocation23_spill] sm:$0xff] %v3284_v34  ;;  %v2362_v47 = vadd.f32 %v2361_v40, %v2360_v36  ;;  %v1389_v41 = vadd.f32 %v2368_v30, %v1292_v10  ;;  %v2319_v34 = vadd.f32 %v2318_v7, %v2317_v5 }
 0x158   :  { %v3276_v18 = vpop.f32.mrf.mxu0  ;;  %v3293_v46 = vpop.f32.mrf.mxu1  ;;  %v2374_v10 = vadd.f32 %v3240_v61, %v3238_v58  ;;  %v2331_v58 = vadd.f32 %v2330_v33, %v2329_v26  ;;  %v3444_v33 = vld [vmem:[#allocation14_spill] sm:$0xff] }
 0x159   :  { %3434 = vst [vmem:[#allocation19_spill] sm:$0xff] %v3276_v18  ;;  %v1295_v18 = vadd.f32 %v2307_v16, %v3194_v60  ;;  %v1381_v52 = vadd.f32 %v2362_v47, %v3236_v39  ;;  %v1311_v30 = vadd.f32 %v2319_v34, %v3206_v29  ;;  %v2383_v47 = vadd.f32 %v2382_v11, %v2381_v8 }
 0x15a   :  { %v3280_v32 = vpop.f32.mrf.mxu0  ;;  %v3296_v36 = vpop.f32.mrf.mxu1  ;;  %v2322_v29 = vadd.f32 %v3248_v13, %v3246_v9  ;;  %v1397_v6 = vadd.f32 %v2374_v10, %v1300_v53  ;;  %v1149_v13 = vadd.f32 %v3227_v27, %v3179_v24  ;;  %v1327_v17 = vadd.f32 %v2331_v58, %v3443_v15  ;;  %v3449_v27 = vld [vmem:[#allocation12_spill] sm:$0xff] }
 0x15b   :  { %3436 = vst [vmem:[#allocation21_spill] sm:$0xff] %v3280_v32  ;;  %v1287_v32 = vadd.f32 %v2301_v14, %v3188_v44  ;;  %v1392_v28 = vadd.f32 %v2371_v22, %v1295_v18  ;;  %v1308_v44 = vadd.f32 %v2316_v37, %v3203_v20  ;;  %v2377_v20 = vadd.f32 %v3244_v0, %v3242_v62  ;;  %v3440_v18 = vld [vmem:[#allocation2_spill] sm:$0xff]  ;;  %v3446_v37 = vld [vmem:[#allocation7_spill] sm:$0xff] }
 0x15c   :  { %v3282_v1 = vpop.f32.mrf.mxu0  ;;  %v1408_v7 = vadd.f32 %v2383_v47, %v1311_v30  ;;  %v2392_v0 = vadd.f32 %v3264_v31, %v3262_v25  ;;  %v3441_v22 = vld [vmem:[#allocation10_spill] sm:$0xff]  ;;  %v3445_v25 = vld [vmem:[#allocation17_spill] sm:$0xff]  ;;  %v3454_v47 = vld [vmem:[#allocation16_spill] sm:$0xff] }
 0x15d   :  { %3437 = vst [vmem:[#allocation22_spill] sm:$0xff] %v3282_v1  ;;  %v1384_v40 = vadd.f32 %v2365_v43, %v1287_v32  ;;  %v2328_v32 = vadd.f32 %v2327_v23, %v2326_v21  ;;  %v1405_v3 = vadd.f32 %v2380_v42, %v1308_v44  ;;  %v1400_v9 = vadd.f32 %v2377_v20, %v1303_v59  ;;  %v3442_v23 = vld [vmem:[#allocation11_spill] sm:$0xff] }
 0x15e   :  { %v3286_v19 = vpop.f32.mrf.mxu0  ;;  %v1316_v21 = vadd.f32 %v2322_v29, %v3440_v18  ;;  %v2386_v26 = vadd.f32 %v3442_v23, %v3441_v22  ;;  %v2395_v31 = vadd.f32 %v3445_v25, %v3444_v33 }
 0x15f   :  { %3439 = vst [vmem:[#allocation24_spill] sm:$0xff] %v3286_v19  ;;  %v1324_v62 = vadd.f32 %v2328_v32, %v3215_v56 }
 0x160   :  { %v3289_v38 = vpop.f32.mrf.mxu0 }
 0x162   :  { %v2458_v49 = vpop.f32.mrf.mxu0  ;;  %v3451_v42 = vld [vmem:[#allocation21_spill] sm:$0xff] }
 0x163   :  { %v1486_v1 = vadd.f32 %v2458_v49, %v1389_v41  ;;  %v3447_v41 = vld [vmem:[#allocation9_spill] sm:$0xff] }
 0x164   :  { %v1477_v19 = vpop.f32.mrf.mxu0  ;;  %v2279_v51 = vadd.f32 %v3447_v41, %v3446_v37 }
 0x165   :  { %v1478_v45 = vadd.f32 %v1477_v19, %v1381_v52  ;;  %v1542_v39 = vmax.f32 %v1486_v1, 0.0  ;;  %v2402_v19 = vpop.f32.mrf.mxu1  ;;  %v3448_v52 = vld [vmem:[#allocation3_spill] sm:$0xff] }
 0x166   :  { %v2459_v60 = vpop.f32.mrf.mxu0  ;;  %v1319_v24 = vadd.f32 %v2325_v12, %v3448_v52 }
 0x167   :  { %v1489_v50 = vadd.f32 %v2459_v60, %v1392_v28  ;;  %v1540_v63 = vmax.f32 %v1478_v45, 0.0  ;;  %v2403_v8 = vpop.f32.mrf.mxu1  ;;  %v3450_v28 = vld [vmem:[#allocation13_spill] sm:$0xff]  ;;  %v3452_v45 = vld [vmem:[#allocation22_spill] sm:$0xff] }
 0x168   :  { %v1480_v54 = vpop.f32.mrf.mxu0  ;;  %v2389_v48 = vadd.f32 %v3450_v28, %v3449_v27 }
 0x169   :  { %v1543_v55 = vmax.f32 %v1489_v50, 0.0  ;;  %v1481_v57 = vadd.f32 %v1480_v54, %v1384_v40  ;;  %v2405_v60 = vpop.f32.mrf.mxu1  ;;  %v1421_v40 = vadd.f32 %v2392_v0, %v1324_v62  ;;  %v2340_v50 = vadd.f32 %v3452_v45, %v3451_v42  ;;  %v3453_v54 = vld [vmem:[#allocation15_spill] sm:$0xff]  ;;  %v3459_v0 = vld [vmem:[#allocation5_spill] sm:$0xff]  ;;  %v3344_v42 = vld [vmem:[%s3414_s4] ss:$0 sm:$0xff] }
 0x16a   :  { %v2462_v35 = vpop.f32.mrf.mxu0  ;;  %v2138_v45 = vld [vmem:[%s3415_s5 + $0x8] sm:$0xff]  }
 0x16b   :  { %v1557_v4 = vpack.c.bf16 %v1543_v55, %v1542_v39  ;;  %v1541_v2 = vmax.f32 %v1481_v57, 0.0  ;;  %v1502_v5 = vadd.f32 %v2462_v35, %v1405_v3  ;;  %v2334_v39 = vadd.f32 %v3454_v47, %v3453_v54  ;;  %v3455_v55 = vld [vmem:[#allocation24_spill] sm:$0xff]  ;;  %v3457_v3 = vld [vmem:[#allocation19_spill] sm:$0xff]  ;;  %v2406_v58 = vpop.f32.mrf.mxu1 }
 0x16c   :  { %v1493_v61 = vpop.f32.mrf.mxu0  ;;  %v2343_v57 = vadd.f32 %v3289_v38, %v3455_v55  ;;  %v1413_v35 = vadd.f32 %v2386_v26, %v1316_v21  ;;  %v3462_v26 = vld [vmem:[#allocation6_spill] sm:$0xff]  ;;  %v2073_v55 = vunpack.c.h.bf16 %v2138_v45 }
 0x16d   :  { %v1556_v1 = vpack.c.bf16 %v1541_v2, %v1540_v63  ;;  %v1494_v14 = vadd.f32 %v1493_v61, %v1397_v6  ;;  %v1546_v34 = vmax.f32 %v1502_v5, 0.0  ;;  %v1424_v63 = vadd.f32 %v2395_v31, %v1327_v17  ;;  %v3456_v2 = vld [vmem:[#allocation18_spill] sm:$0xff]  ;;  %v3458_v5 = vld [vmem:[#allocation8_spill] sm:$0xff] }
 0x16e   :  { %v2463_v11 = vpop.f32.mrf.mxu0  ;;  %v2337_v29 = vadd.f32 %v3457_v3, %v3456_v2  ;;  %v1340_v6 = vadd.f32 %v2340_v50, %v3458_v5  ;;  %v1332_v38 = vadd.f32 %v2334_v39, %v3459_v0 }
 0x16f   :  { %v1505_v16 = vadd.f32 %v2463_v11, %v1408_v7  ;;  %2488 = vmatprep.mubr.bf16.mxu1 %v1556_v1  ;;  %v1544_v53 = vmax.f32 %v1494_v14, 0.0  ;;  %v1416_v1 = vadd.f32 %v2389_v48, %v1319_v24  ;;  %v2404_v7 = vadd.f32 %v2403_v8, %v2402_v19  ;;  %v3460_v11 = vld [vmem:[#allocation20_spill] sm:$0xff]  ;;  %v3461_v14 = vld [vmem:[#allocation23_spill] sm:$0xff] }
 0x170   :  { %v1496_v56 = vpop.f32.mrf.mxu0  ;;  %2489 = vmatmul.mubr.bf16.vlgmr.msra.gmra.mxu1 %v1557_v4  ;;  %v1246_v4 = vadd.f32 %v2279_v51, %v1149_v13  ;;  %v2407_v13 = vadd.f32 %v2406_v58, %v2405_v60  ;;  %v1335_v15 = vadd.f32 %v2337_v29, %v3462_v26  ;;  %v2401_v19 = vadd.f32 %v3296_v36, %v3293_v46  ;;  %v2139_v29 = vld [vmem:[%s3415_s5 + $0x10] sm:$0xff]  }
 0x171   :  { %v1547_v43 = vmax.f32 %v1505_v16, 0.0  ;;  %v1497_v49 = vadd.f32 %v1496_v56, %v1400_v9  ;;  %v2398_v16 = vadd.f32 %v3461_v14, %v3460_v11  ;;  %v1437_v25 = vadd.f32 %v2404_v7, %v1340_v6 }
 0x172   :  { %v2466_v44 = vpop.f32.mrf.mxu0  ;;  %v1343_v9 = vadd.f32 %v2343_v57, %v1246_v4  ;;  %v1432_v24 = vadd.f32 %v2401_v19, %v1335_v15 }
 0x173   :  { %v1559_v10 = vpack.c.bf16 %v1547_v43, %v1546_v34  ;;  %v1545_v30 = vmax.f32 %v1497_v49, 0.0  ;;  %v1518_v32 = vadd.f32 %v2466_v44, %v1421_v40  ;;  %v1429_v49 = vadd.f32 %v2398_v16, %v1332_v38 }
 0x174   :  { %v1509_v59 = vpop.f32.mrf.mxu0  ;;  %v1440_v37 = vadd.f32 %v2407_v13, %v1343_v9 }
 0x175   :  { %v1558_v20 = vpack.c.bf16 %v1545_v30, %v1544_v53  ;;  %v1510_v12 = vadd.f32 %v1509_v59, %v1413_v35  ;;  %v1550_v21 = vmax.f32 %v1518_v32, 0.0  ;;  %v2067_v53 = vld [vmem:[%s3415_s5] sm:$0xff]   ;;  %v2072_v30 = vunpack.c.l.bf16 %v2138_v45  ;;  %v2140_v35 = vld [vmem:[%s3415_s5 + $0x18] sm:$0xff]  }
 0x176   :  { %v2467_v61 = vpop.f32.mrf.mxu0  ;;  %v2068_v39 = vunpack.c.l.bf16 %v2067_v53  ;;  %v2069_v32 = vunpack.c.h.bf16 %v2067_v53  ;;  %v2081_v0 = vunpack.c.h.bf16 %v2140_v35 }
 0x177   :  { %v1521_v62 = vadd.f32 %v2467_v61, %v1424_v63  ;;  %2492 = vmatprep.mubr.bf16.mxu1 %v1558_v20  ;;  %v1548_v17 = vmax.f32 %v1510_v12, 0.0  ;;  %v2080_v61 = vunpack.c.l.bf16 %v2140_v35 }
 0x178   :  { %v1512_v18 = vpop.f32.mrf.mxu0  ;;  %2493 = vmatmul.mubr.bf16.gmra.mxu1 %v1559_v10 }
 0x179   :  { %v1551_v22 = vmax.f32 %v1521_v62, 0.0  ;;  %v1513_v23 = vadd.f32 %v1512_v18, %v1416_v1  ;;  %v2076_v62 = vunpack.c.l.bf16 %v2139_v29 }
 0x17a   :  { %v2470_v8 = vpop.f32.mrf.mxu0 }
 0x17b   :  { %v1561_v56 = vpack.c.bf16 %v1551_v22, %v1550_v21  ;;  %v1549_v33 = vmax.f32 %v1513_v23, 0.0  ;;  %v1534_v43 = vadd.f32 %v2470_v8, %v1437_v25  ;;  %v2077_v22 = vunpack.c.h.bf16 %v2139_v29  ;;  %v2142_v23 = vld [vmem:[%s3415_s5 + $0x28] sm:$0xff]  }
 0x17c   :  { %v1525_v31 = vpop.f32.mrf.mxu0 }
 0x17d   :  { %v1560_v34 = vpack.c.bf16 %v1549_v33, %v1548_v17  ;;  %v1526_v51 = vadd.f32 %v1525_v31, %v1429_v49  ;;  %v1554_v28 = vmax.f32 %v1534_v43, 0.0  ;;  %v2141_v17 = vld [vmem:[%s3415_s5 + $0x20] sm:$0xff]   ;;  %v2088_v33 = vunpack.c.l.bf16 %v2142_v23 }
 0x17e   :  { %v2471_v41 = vpop.f32.mrf.mxu0 }
 0x17f   :  { %v1537_v52 = vadd.f32 %v2471_v41, %v1440_v37  ;;  %2496 = vmatprep.mubr.bf16.mxu1 %v1560_v34  ;;  %v1552_v36 = vmax.f32 %v1526_v51, 0.0  ;;  %v2084_v37 = vunpack.c.l.bf16 %v2141_v17  ;;  %v2089_v41 = vunpack.c.h.bf16 %v2142_v23 }
 0x180   :  { %v1528_v27 = vpop.f32.mrf.mxu0  ;;  %2497 = vmatmul.mubr.bf16.gmra.mxu1 %v1561_v56 }
 0x181   :  { %v1555_v48 = vmax.f32 %v1537_v52, 0.0  ;;  %v1529_v46 = vadd.f32 %v1528_v27, %v1432_v24 }
 0x183   :  { %v1563_v60 = vpack.c.bf16 %v1555_v48, %v1554_v28  ;;  %v1553_v40 = vmax.f32 %v1529_v46, 0.0 }
 0x185   :  { %v1562_v44 = vpack.c.bf16 %v1553_v40, %v1552_v36  ;;  %v2144_v40 = vld [vmem:[%s3415_s5 + $0x38] sm:$0xff]  }
 0x187   :  { %2500 = vmatprep.mubr.bf16.mxu1 %v1562_v44 }
 0x188   :  { %2501 = vmatmul.mubr.bf16.gmra.mxu1 %v1563_v60  ;;  %v2085_v60 = vunpack.c.h.bf16 %v2141_v17 }
 0x230   :  { %v2490_v50 = vpop.f32.mrf.mxu1 }
 0x231   :  { %v1678_v10 = vadd.f32 %v2490_v50, %v3344_v42 }
 0x232   :  { %v1669_v54 = vpop.f32.mrf.mxu1 }
 0x233   :  { %v1670_v47 = vadd.f32 %v3344_v42, %v1669_v54  ;;  %v1766_v59 = vadd.f32 %v2072_v30, %v1678_v10  ;;  %v2143_v10 = vld [vmem:[%s3415_s5 + $0x30] sm:$0xff]   ;;  %v2096_v54 = vunpack.c.l.bf16 %v2144_v40 }
 0x234   :  { %v2491_v57 = vpop.f32.mrf.mxu1 }
 0x235   :  { %v1681_v20 = vadd.f32 %v2491_v57, %v3344_v42  ;;  %v1764_v4 = vadd.f32 %v2068_v39, %v1670_v47  ;;  %v1782_v1 = vmax.f32 %v1766_v59, 0.0 }
 0x236   :  { %v1672_v63 = vpop.f32.mrf.mxu1 }
 0x237   :  { %v1767_v2 = vadd.f32 %v2073_v55, %v1681_v20  ;;  %v1673_v3 = vadd.f32 %v3344_v42, %v1672_v63  ;;  %v1780_v38 = vmax.f32 %v1764_v4, 0.0  ;;  %v2092_v20 = vunpack.c.l.bf16 %v2143_v10 }
 0x238   :  { %v2494_v58 = vpop.f32.mrf.mxu1 }
 0x239   :  { %v1783_v5 = vmax.f32 %v1767_v2, 0.0  ;;  %v1765_v6 = vadd.f32 %v2069_v32, %v1673_v3  ;;  %v1694_v7 = vadd.f32 %v2494_v58, %v3344_v42  ;;  %v2097_v32 = vunpack.c.h.bf16 %v2144_v40 }
 0x23a   :  { %v1685_v12 = vpop.f32.mrf.mxu1 }
 0x23b   :  { %v2106_v11 = vpack.c.bf16 %v1783_v5, %v1782_v1  ;;  %v1781_v14 = vmax.f32 %v1765_v6, 0.0  ;;  %v1686_v16 = vadd.f32 %v3344_v42, %v1685_v12  ;;  %v1770_v13 = vadd.f32 %v2080_v61, %v1694_v7 }
 0x23c   :  { %v2495_v9 = vpop.f32.mrf.mxu1  ;;  %v2093_v1 = vunpack.c.h.bf16 %v2143_v10 }
 0x23d   :  { %2145 = vst [vmem:[%s3416_s6 + $0x8] sm:$0xff] %v2106_v11   ;;  %v2101_v18 = vpack.c.bf16 %v1781_v14, %v1780_v38  ;;  %v1697_v21 = vadd.f32 %v2495_v9, %v3344_v42  ;;  %v1768_v15 = vadd.f32 %v2076_v62, %v1686_v16  ;;  %v1786_v25 = vmax.f32 %v1770_v13, 0.0 }
 0x23e   :  { %v1688_v26 = vpop.f32.mrf.mxu1 }
 0x23f   :  { %2102 = vst [vmem:[%s3416_s6] sm:$0xff] %v2101_v18   ;;  %v1771_v19 = vadd.f32 %v2081_v0, %v1697_v21  ;;  %v1689_v8 = vadd.f32 %v3344_v42, %v1688_v26  ;;  %v1784_v51 = vmax.f32 %v1768_v15, 0.0 }
 0x240   :  { %v2498_v56 = vpop.f32.mrf.mxu1 }
 0x241   :  { %v1787_v31 = vmax.f32 %v1771_v19, 0.0  ;;  %v1769_v34 = vadd.f32 %v2077_v22, %v1689_v8  ;;  %v1710_v43 = vadd.f32 %v2498_v56, %v3344_v42 }
 0x242   :  { %v1701_v49 = vpop.f32.mrf.mxu1 }
 0x243   :  { %v2116_v52 = vpack.c.bf16 %v1787_v31, %v1786_v25  ;;  %v1785_v24 = vmax.f32 %v1769_v34, 0.0  ;;  %v1702_v27 = vadd.f32 %v3344_v42, %v1701_v49  ;;  %v1774_v46 = vadd.f32 %v2088_v33, %v1710_v43 }
 0x244   :  { %v2499_v28 = vpop.f32.mrf.mxu1 }
 0x245   :  { %2147 = vst [vmem:[%s3416_s6 + $0x18] sm:$0xff] %v2116_v52   ;;  %v2111_v48 = vpack.c.bf16 %v1785_v24, %v1784_v51  ;;  %v1713_v36 = vadd.f32 %v2499_v28, %v3344_v42  ;;  %v1772_v45 = vadd.f32 %v2084_v37, %v1702_v27  ;;  %v1790_v47 = vmax.f32 %v1774_v46, 0.0 }
 0x246   :  { %v1704_v44 = vpop.f32.mrf.mxu1 }
 0x247   :  { %2146 = vst [vmem:[%s3416_s6 + $0x10] sm:$0xff] %v2111_v48   ;;  %v1775_v50 = vadd.f32 %v2089_v41, %v1713_v36  ;;  %v1705_v53 = vadd.f32 %v3344_v42, %v1704_v44  ;;  %v1788_v35 = vmax.f32 %v1772_v45, 0.0 }
 0x248   :  { %v2502_v30 = vpop.f32.mrf.mxu1 }
 0x249   :  { %v1791_v39 = vmax.f32 %v1775_v50, 0.0  ;;  %v1773_v55 = vadd.f32 %v2085_v60, %v1705_v53  ;;  %v1726_v57 = vadd.f32 %v2502_v30, %v3344_v42 }
 0x24a   :  { %v1717_v59 = vpop.f32.mrf.mxu1 }
 0x24b   :  { %v2126_v63 = vpack.c.bf16 %v1791_v39, %v1790_v47  ;;  %v1789_v4 = vmax.f32 %v1773_v55, 0.0  ;;  %v1718_v2 = vadd.f32 %v3344_v42, %v1717_v59  ;;  %v1778_v58 = vadd.f32 %v2096_v54, %v1726_v57 }
 0x24c   :  { %v2503_v3 = vpop.f32.mrf.mxu1 }
 0x24d   :  { %2149 = vst [vmem:[%s3416_s6 + $0x28] sm:$0xff] %v2126_v63   ;;  %v2121_v29 = vpack.c.bf16 %v1789_v4, %v1788_v35  ;;  %v1729_v61 = vadd.f32 %v2503_v3, %v3344_v42  ;;  %v1776_v6 = vadd.f32 %v2092_v20, %v1718_v2  ;;  %v1794_v62 = vmax.f32 %v1778_v58, 0.0 }
 0x24e   :  { %v1720_v5 = vpop.f32.mrf.mxu1 }
 0x24f   :  { %2148 = vst [vmem:[%s3416_s6 + $0x20] sm:$0xff] %v2121_v29   ;;  %v1779_v7 = vadd.f32 %v2097_v32, %v1729_v61  ;;  %v1721_v12 = vadd.f32 %v3344_v42, %v1720_v5  ;;  %v1792_v11 = vmax.f32 %v1776_v6, 0.0 }
 0x251   :  { %v1795_v0 = vmax.f32 %v1779_v7, 0.0  ;;  %v1777_v38 = vadd.f32 %v2093_v1, %v1721_v12 }
 0x253   :  { %v2136_v14 = vpack.c.bf16 %v1795_v0, %v1794_v62  ;;  %v1793_v16 = vmax.f32 %v1777_v38, 0.0 }
 0x255   :  { %2151 = vst [vmem:[%s3416_s6 + $0x38] sm:$0xff] %v2136_v14   ;;  %v2131_v9 = vpack.c.bf16 %v1793_v16, %v1792_v11 }
 0x257   :  { %2150 = vst [vmem:[%s3416_s6 + $0x30] sm:$0xff] %v2131_v9  }

// kernel: _lambda_.47
= control target key start
LH: loop header
LB: loop body
LE: loop exit
PB: predicated region body
PF: predicated region fallthrough
CT: control target
= control target key end

     0   :  { %s308_s1 = inlined_call_operand.vmem [shape: bf16[128,128], index: 1, kind: input, shape index: {}]   ;;  %s309_s0 = inlined_call_operand.vmem [shape: bf16[32,128], index: 0, kind: input, shape index: {}]   ;;  %s310_s2 = inlined_call_operand.vmem [shape: f32[1,128], index: 2, kind: input, shape index: {}]   ;;  %s311_s3 = inlined_call_operand.vmem [shape: bf16[32,128], index: 3, kind: output, shape index: {}]  }
   0x1   :  { %v239_v0 = vld [vmem:[%s308_s1 + $0x38] sm:$0xff]   ;;  %v240_v1 = vld [vmem:[%s308_s1 + $0x30] sm:$0xff]   ;;  %v241_v2 = vld [vmem:[%s308_s1 + $0x28] sm:$0xff]  }
   0x2   :  { %219 = vmatprep.subr.bf16.mxu0 %v239_v0  ;;  %v242_v3 = vld [vmem:[%s308_s1 + $0x20] sm:$0xff]   ;;  %v243_v5 = vld [vmem:[%s308_s1 + $0x18] sm:$0xff]   ;;  %v244_v6 = vld [vmem:[%s308_s1 + $0x10] sm:$0xff]  }
   0x3   :  { %220 = vmatpush3.bf16.msra.mxu0 %v239_v0  ;;  %v247_v4 = vld [vmem:[%s309_s0] sm:$0xff]   ;;  %v245_v7 = vld [vmem:[%s308_s1 + $0x8] sm:$0xff]  }
   0x4   :  { %221 = vmatprep.subr.bf16.mxu0 %v240_v1  ;;  %235 = vmatprep.mubr.bf16.mxu0 %v247_v4  ;;  %v246_v8 = vld [vmem:[%s308_s1] sm:$0xff]   ;;  %v248_v9 = vld [vmem:[%s309_s0 + $0x8] sm:$0xff]  }
   0x5   :  { %v179_v11 = vld [vmem:[%s310_s2] ss:$0 sm:$0xff] }
   0x7   :  { %222 = vmatpush3.bf16.msra.mxu0 %v240_v1 }
   0x8   :  { %223 = vmatprep.subr.bf16.mxu0 %v241_v2 }
   0xb   :  { %224 = vmatpush3.bf16.msra.mxu0 %v241_v2 }
   0xc   :  { %225 = vmatprep.subr.bf16.mxu0 %v242_v3 }
   0xf   :  { %226 = vmatpush3.bf16.msra.mxu0 %v242_v3 }
  0x10   :  { %227 = vmatprep.subr.bf16.mxu0 %v243_v5 }
  0x13   :  { %228 = vmatpush3.bf16.msra.mxu0 %v243_v5 }
  0x14   :  { %229 = vmatprep.subr.bf16.mxu0 %v244_v6 }
  0x17   :  { %230 = vmatpush3.bf16.msra.mxu0 %v244_v6 }
  0x18   :  { %231 = vmatprep.subr.bf16.mxu0 %v245_v7 }
  0x1b   :  { %232 = vmatpush3.bf16.msra.mxu0 %v245_v7 }
  0x1c   :  { %233 = vmatprep.subr.bf16.mxu0 %v246_v8 }
  0x1f   :  { %234 = vmatpush3.bf16.msra.mxu0 %v246_v8 }
  0x22   :  { %236 = vmatmul.mubr.bf16.vlgmr.msra.gmra.mxu0 %v248_v9 }
  0xe2   :  { %v237_v10 = vpop.f32.mrf.mxu0 }
  0xe3   :  { %v145_v13 = vadd.f32 %v237_v10, %v179_v11 }
  0xe4   :  { %v136_v12 = vpop.f32.mrf.mxu0 }
  0xe5   :  { %v137_v15 = vadd.f32 %v179_v11, %v136_v12  ;;  %v153_v18 = vmax.f32 %v145_v13, 0.0 }
  0xe6   :  { %v238_v14 = vpop.f32.mrf.mxu0 }
  0xe7   :  { %v148_v16 = vadd.f32 %v238_v14, %v179_v11  ;;  %v151_v21 = vmax.f32 %v137_v15, 0.0 }
  0xe8   :  { %v139_v17 = vpop.f32.mrf.mxu0 }
  0xe9   :  { %v154_v19 = vmax.f32 %v148_v16, 0.0  ;;  %v140_v20 = vadd.f32 %v179_v11, %v139_v17 }
  0xeb   :  { %v206_v22 = vpack.c.bf16 %v154_v19, %v153_v18  ;;  %v152_v23 = vmax.f32 %v140_v20, 0.0 }
  0xed   :  { %208 = vst [vmem:[%s311_s3 + $0x8] sm:$0xff] %v206_v22   ;;  %v201_v24 = vpack.c.bf16 %v152_v23, %v151_v21 }
  0xef   :  { %202 = vst [vmem:[%s311_s3] sm:$0xff] %v201_v24  }

// kernel: _lambda_.46
= control target key start
LH: loop header
LB: loop body
LE: loop exit
PB: predicated region body
PF: predicated region fallthrough
CT: control target
= control target key end

     0   :  { %s1883_s1 = inlined_call_operand.vmem [shape: bf16[1152,128], index: 1, kind: input, shape index: {}]   ;;  %s1884_s0 = inlined_call_operand.vmem [shape: bf16[32,1152], index: 0, kind: input, shape index: {}]   ;;  %s1885_s3 = inlined_call_operand.vmem [shape: bf16[128,128], index: 3, kind: input, shape index: {}]   ;;  %s1886_s2 = inlined_call_operand.vmem [shape: f32[1,128], index: 2, kind: input, shape index: {}, may-alias: {2,4}]   ;;  %s1887_s4 = inlined_call_operand.vmem [shape: f32[1,128], index: 4, kind: input, shape index: {}, may-alias: {2,4}]   ;;  %s1888_s5 = inlined_call_operand.vmem [shape: bf16[32,128], index: 5, kind: input, shape index: {}]   ;;  %s1889_s6 = inlined_call_operand.vmem [shape: bf16[32,128], index: 6, kind: output, shape index: {}]  }
   0x1   :  { %v1430_v0 = vld [vmem:[%s1883_s1 + $0x78] sm:$0xff]   ;;  %v1434_v4 = vld [vmem:[%s1883_s1 + $0x70] sm:$0xff]   ;;  %v1438_v8 = vld [vmem:[%s1883_s1 + $0x68] sm:$0xff]  }
   0x2   :  { %v1431_v1 = vld [vmem:[%s1883_s1 + $0x38] sm:$0xff]   ;;  %1258 = vmatprep.subr.bf16.mxu0 %v1430_v0  ;;  %v1435_v5 = vld [vmem:[%s1883_s1 + $0x30] sm:$0xff]   ;;  %v1439_v9 = vld [vmem:[%s1883_s1 + $0x28] sm:$0xff]  }
   0x3   :  { %v1432_v2 = vld [vmem:[%s1883_s1 + $0xf8] sm:$0xff]   ;;  %1259 = vmatpush3.bf16.msra.mxu0 %v1431_v1  ;;  %v1436_v6 = vld [vmem:[%s1883_s1 + $0xf0] sm:$0xff]   ;;  %v1440_v10 = vld [vmem:[%s1883_s1 + $0xe8] sm:$0xff]  }
   0x4   :  { %v1433_v3 = vld [vmem:[%s1883_s1 + $0xb8] sm:$0xff]   ;;  %1286 = vmatprep.subr.bf16.mxu1 %v1432_v2  ;;  %1260 = vmatprep.subr.bf16.mxu0 %v1434_v4  ;;  %v1437_v7 = vld [vmem:[%s1883_s1 + $0xb0] sm:$0xff]   ;;  %v1441_v11 = vld [vmem:[%s1883_s1 + $0xa8] sm:$0xff]  }
   0x5   :  { %1287 = vmatpush3.bf16.msra.mxu1 %v1433_v3  ;;  %v1442_v12 = vld [vmem:[%s1883_s1 + $0x60] sm:$0xff]   ;;  %v1446_v16 = vld [vmem:[%s1883_s1 + $0x58] sm:$0xff]   ;;  %v1450_v20 = vld [vmem:[%s1883_s1 + $0x50] sm:$0xff]  }
   0x6   :  { %1288 = vmatprep.subr.bf16.mxu1 %v1436_v6  ;;  %v1443_v13 = vld [vmem:[%s1883_s1 + $0x20] sm:$0xff]   ;;  %v1447_v17 = vld [vmem:[%s1883_s1 + $0x18] sm:$0xff]   ;;  %v1451_v21 = vld [vmem:[%s1883_s1 + $0x10] sm:$0xff]  }
   0x7   :  { %1261 = vmatpush3.bf16.msra.mxu0 %v1435_v5  ;;  %v1444_v14 = vld [vmem:[%s1883_s1 + $0xe0] sm:$0xff]   ;;  %v1448_v18 = vld [vmem:[%s1883_s1 + $0xd8] sm:$0xff]   ;;  %v1452_v22 = vld [vmem:[%s1883_s1 + $0xd0] sm:$0xff]  }
   0x8   :  { %1262 = vmatprep.subr.bf16.mxu0 %v1438_v8  ;;  %v1445_v15 = vld [vmem:[%s1883_s1 + $0xa0] sm:$0xff]   ;;  %v1449_v19 = vld [vmem:[%s1883_s1 + $0x98] sm:$0xff]   ;;  %v1453_v23 = vld [vmem:[%s1883_s1 + $0x90] sm:$0xff]  }
   0x9   :  { %1289 = vmatpush3.bf16.msra.mxu1 %v1437_v7  ;;  %v1454_v24 = vld [vmem:[%s1883_s1 + $0x48] sm:$0xff]   ;;  %v1458_v28 = vld [vmem:[%s1883_s1 + $0x40] sm:$0xff]   ;;  %v1465_v34 = vld [vmem:[%s1883_s1 + $0x178] sm:$0xff]  }
   0xa   :  { %1290 = vmatprep.subr.bf16.mxu1 %v1440_v10  ;;  %v1455_v25 = vld [vmem:[%s1883_s1 + $0x8] sm:$0xff]   ;;  %v1459_v29 = vld [vmem:[%s1883_s1] sm:$0xff]   ;;  %v1469_v37 = vld [vmem:[%s1883_s1 + $0x138] sm:$0xff]  }
   0xb   :  { %1263 = vmatpush3.bf16.msra.mxu0 %v1439_v9  ;;  %v1456_v26 = vld [vmem:[%s1883_s1 + $0xc8] sm:$0xff]   ;;  %v1460_v30 = vld [vmem:[%s1883_s1 + $0xc0] sm:$0xff]   ;;  %v1470_v38 = vld [vmem:[%s1883_s1 + $0x1f8] sm:$0xff]  }
   0xc   :  { %1264 = vmatprep.subr.bf16.mxu0 %v1442_v12  ;;  %v1457_v27 = vld [vmem:[%s1883_s1 + $0x88] sm:$0xff]   ;;  %v1461_v31 = vld [vmem:[%s1884_s0] ss:$36 sps:$4 sm:$0xff]   ;;  %v1471_v39 = vld [vmem:[%s1883_s1 + $0x1b8] sm:$0xff]  }
   0xd   :  { %1291 = vmatpush3.bf16.msra.mxu1 %v1441_v11  ;;  %v1463_v32 = vld [vmem:[%s1884_s0 + $0x4] ss:$36 sps:$4 sm:$0xff]   ;;  %v1468_v36 = vld [vmem:[%s1884_s0 + $0xc] ss:$36 sps:$4 sm:$0xff]   ;;  %v1484_v52 = vld [vmem:[%s1883_s1 + $0x158] sm:$0xff]  }
   0xe   :  { %1292 = vmatprep.subr.bf16.mxu1 %v1444_v14  ;;  %v1464_v33 = vld [vmem:[%s1883_s1 + $0x80] sm:$0xff]   ;;  %751 = vmatprep.mubr.bf16.mxu0 %v1463_v32  ;;  %v1466_v35 = vld [vmem:[%s1884_s0 + $0x8] ss:$36 sps:$4 sm:$0xff]   ;;  %v1472_v40 = vld [vmem:[%s1883_s1 + $0x170] sm:$0xff]  }
   0xf   :  { %1265 = vmatpush3.bf16.msra.mxu0 %v1443_v13  ;;  %800 = vmatprep.mubr.bf16.mxu1 %v1468_v36  ;;  %v1473_v41 = vld [vmem:[%s1883_s1 + $0x130] sm:$0xff]   ;;  %v1476_v44 = vld [vmem:[%s1883_s1 + $0x168] sm:$0xff]   ;;  %v1480_v48 = vld [vmem:[%s1883_s1 + $0x160] sm:$0xff]  }
  0x10   :  { %1266 = vmatprep.subr.bf16.mxu0 %v1446_v16  ;;  %v1474_v42 = vld [vmem:[%s1883_s1 + $0x1f0] sm:$0xff]   ;;  %v1477_v45 = vld [vmem:[%s1883_s1 + $0x128] sm:$0xff]   ;;  %v1481_v49 = vld [vmem:[%s1883_s1 + $0x120] sm:$0xff]  }
  0x11   :  { %1293 = vmatpush3.bf16.msra.mxu1 %v1445_v15  ;;  %v1475_v43 = vld [vmem:[%s1883_s1 + $0x1b0] sm:$0xff]   ;;  %v1478_v46 = vld [vmem:[%s1883_s1 + $0x1e8] sm:$0xff]   ;;  %v1482_v50 = vld [vmem:[%s1883_s1 + $0x1e0] sm:$0xff]  }
  0x12   :  { %1294 = vmatprep.subr.bf16.mxu1 %v1448_v18  ;;  %v1479_v47 = vld [vmem:[%s1883_s1 + $0x1a8] sm:$0xff]   ;;  %v1483_v51 = vld [vmem:[%s1883_s1 + $0x1a0] sm:$0xff]   ;;  %v1485_v53 = vld [vmem:[%s1883_s1 + $0x118] sm:$0xff]  }
  0x13   :  { %1267 = vmatpush3.bf16.msra.mxu0 %v1447_v17  ;;  %v1486_v54 = vld [vmem:[%s1884_s0 + $0x4c] ss:$36 sps:$4 sm:$0xff]   ;;  %v1488_v55 = vld [vmem:[%s1883_s1 + $0x1d8] sm:$0xff]   ;;  %v1502_v4 = vld [vmem:[%s1883_s1 + $0x140] sm:$0xff]  }
  0x14   :  { %1268 = vmatprep.subr.bf16.mxu0 %v1450_v20  ;;  %v1489_v56 = vld [vmem:[%s1884_s0 + $0x48] ss:$36 sps:$4 sm:$0xff]   ;;  %v1490_v57 = vld [vmem:[%s1883_s1 + $0x198] sm:$0xff]   ;;  %v1493_v59 = vld [vmem:[%s1883_s1 + $0x150] sm:$0xff]  }
  0x15   :  { %1295 = vmatpush3.bf16.msra.mxu1 %v1449_v19  ;;  %v1491_v58 = vld [vmem:[%s1884_s0 + $0x54] ss:$36 sps:$4 sm:$0xff]   ;;  %v1498_v0 = vld [vmem:[%s1883_s1 + $0x148] sm:$0xff]   ;;  %v1503_v5 = vld [vmem:[%s1883_s1 + $0x100] sm:$0xff]  }
  0x16   :  { %1296 = vmatprep.subr.bf16.mxu1 %v1452_v22  ;;  %v1494_v60 = vld [vmem:[%s1884_s0 + $0x50] ss:$36 sps:$4 sm:$0xff]   ;;  %v1499_v1 = vld [vmem:[%s1883_s1 + $0x108] sm:$0xff]   ;;  %v1504_v6 = vld [vmem:[%s1883_s1 + $0x1c0] sm:$0xff]  }
  0x17   :  { %1269 = vmatpush3.bf16.msra.mxu0 %v1451_v21  ;;  %v1495_v61 = vld [vmem:[%s1883_s1 + $0x110] sm:$0xff]   ;;  %v1500_v2 = vld [vmem:[%s1883_s1 + $0x1c8] sm:$0xff]   ;;  %v1508_v9 = vld [vmem:[%s1883_s1 + $0x180] sm:$0xff]  }
  0x18   :  { %1270 = vmatprep.subr.bf16.mxu0 %v1454_v24  ;;  %v1496_v62 = vld [vmem:[%s1883_s1 + $0x1d0] sm:$0xff]   ;;  %v1501_v3 = vld [vmem:[%s1883_s1 + $0x188] sm:$0xff]   ;;  %v1509_v10 = vld [vmem:[%s1883_s1 + $0x238] sm:$0xff]  }
  0x19   :  { %1297 = vmatpush3.bf16.msra.mxu1 %v1453_v23  ;;  %v1497_v63 = vld [vmem:[%s1883_s1 + $0x190] sm:$0xff]   ;;  %v1510_v11 = vld [vmem:[%s1884_s0 + $0x18] ss:$36 sps:$4 sm:$0xff]   ;;  %v1517_v16 = vld [vmem:[%s1883_s1 + $0x228] sm:$0xff]  }
  0x1a   :  { %1298 = vmatprep.subr.bf16.mxu1 %v1456_v26  ;;  %v1505_v7 = vld [vmem:[%s1884_s0 + $0x10] ss:$36 sps:$4 sm:$0xff]   ;;  %v1512_v12 = vld [vmem:[%s1884_s0 + $0x1c] ss:$36 sps:$4 sm:$0xff]   ;;  %v1518_v17 = vld [vmem:[%s1884_s0 + $0x64] ss:$36 sps:$4 sm:$0xff]  }
  0x1b   :  { %1271 = vmatpush3.bf16.msra.mxu0 %v1455_v25  ;;  %v1507_v8 = vld [vmem:[%s1884_s0 + $0x14] ss:$36 sps:$4 sm:$0xff]   ;;  %v1514_v14 = vld [vmem:[%s1884_s0 + $0x5c] ss:$36 sps:$4 sm:$0xff]   ;;  %v1524_v23 = vld [vmem:[%s1883_s1 + $0x208] sm:$0xff]  }
  0x1c   :  { %1272 = vmatprep.subr.bf16.mxu0 %v1458_v28  ;;  %v1513_v13 = vld [vmem:[%s1883_s1 + $0x230] sm:$0xff]   ;;  %v1516_v15 = vld [vmem:[%s1884_s0 + $0x58] ss:$36 sps:$4 sm:$0xff]   ;;  %v1520_v18 = vld [vmem:[%s1884_s0 + $0x60] ss:$36 sps:$4 sm:$0xff]  }
  0x1d   :  { %1299 = vmatpush3.bf16.msra.mxu1 %v1457_v27  ;;  %v1521_v19 = vld [vmem:[%s1883_s1 + $0x220] sm:$0xff]   ;;  %v1522_v20 = vld [vmem:[%s1883_s1 + $0x218] sm:$0xff]   ;;  %v1523_v22 = vld [vmem:[%s1883_s1 + $0x210] sm:$0xff]  }
  0x1e   :  { %1300 = vmatprep.subr.bf16.mxu1 %v1460_v30  ;;  %v1526_v21 = vld [vmem:[%s1884_s0 + $0x20] ss:$36 sps:$4 sm:$0xff]   ;;  %v1527_v25 = vld [vmem:[%s1884_s0 + $0x68] ss:$36 sps:$4 sm:$0xff]   ;;  %v1528_v26 = vld [vmem:[%s1885_s3 + $0x38] sm:$0xff]  }
  0x1f   :  { %1273 = vmatpush3.bf16.msra.mxu0 %v1459_v29  ;;  %v1525_v24 = vld [vmem:[%s1883_s1 + $0x200] sm:$0xff]   ;;  %v1529_v27 = vld [vmem:[%s1885_s3 + $0x30] sm:$0xff]   ;;  %v1530_v28 = vld [vmem:[%s1885_s3 + $0x28] sm:$0xff]  }
  0x20   :  { %1314 = vmatprep.subr.bf16.mxu0 %v1465_v34  ;;  %v1531_v29 = vld [vmem:[%s1885_s3 + $0x20] sm:$0xff]   ;;  %v1532_v30 = vld [vmem:[%s1885_s3 + $0x18] sm:$0xff]   ;;  %v1534_v32 = vld [vmem:[%s1885_s3 + $0x8] sm:$0xff]  }
  0x21   :  { %1301 = vmatpush3.bf16.msra.mxu1 %v1464_v33  ;;  %v1535_v33 = vld [vmem:[%s1885_s3] sm:$0xff]  }
  0x22   :  { %752 = vmatmul.mubr.bf16.vlgmr.msra.gmra.mxu0 %v1461_v31  ;;  %1342 = vmatprep.subr.bf16.mxu1 %v1470_v38  ;;  %v1533_v31 = vld [vmem:[%s1885_s3 + $0x10] sm:$0xff]  }
  0x23   :  { %1315 = vmatpush3.bf16.msra.mxu0 %v1469_v37  ;;  %759 = vmatprep.mubr.bf16.mxu0 %v1486_v54 }
  0x24   :  { %801 = vmatmul.mubr.bf16.vlgmr.msra.gmra.mxu1 %v1466_v35  ;;  %1316 = vmatprep.subr.bf16.mxu0 %v1472_v40 }
  0x25   :  { %1343 = vmatpush3.bf16.msra.mxu1 %v1471_v39  ;;  %808 = vmatprep.mubr.bf16.mxu1 %v1491_v58 }
  0x26   :  { %1344 = vmatprep.subr.bf16.mxu1 %v1474_v42 }
  0x27   :  { %1317 = vmatpush3.bf16.msra.mxu0 %v1473_v41 }
  0x28   :  { %1318 = vmatprep.subr.bf16.mxu0 %v1476_v44 }
  0x29   :  { %1345 = vmatpush3.bf16.msra.mxu1 %v1475_v43 }
  0x2a   :  { %1346 = vmatprep.subr.bf16.mxu1 %v1478_v46  ;;  %760 = vmatmul.mubr.bf16.gmra.mxu0 %v1489_v56 }
  0x2b   :  { %1319 = vmatpush3.bf16.msra.mxu0 %v1477_v45  ;;  %849 = vmatprep.mubr.bf16.mxu0 %v1507_v8 }
  0x2c   :  { %1320 = vmatprep.subr.bf16.mxu0 %v1480_v48  ;;  %809 = vmatmul.mubr.bf16.gmra.mxu1 %v1494_v60 }
  0x2d   :  { %1347 = vmatpush3.bf16.msra.mxu1 %v1479_v47  ;;  %898 = vmatprep.mubr.bf16.mxu1 %v1512_v12 }
  0x2e   :  { %1348 = vmatprep.subr.bf16.mxu1 %v1482_v50 }
  0x2f   :  { %1321 = vmatpush3.bf16.msra.mxu0 %v1481_v49 }
  0x30   :  { %1322 = vmatprep.subr.bf16.mxu0 %v1484_v52 }
  0x31   :  { %1349 = vmatpush3.bf16.msra.mxu1 %v1483_v51 }
  0x32   :  { %1350 = vmatprep.subr.bf16.mxu1 %v1488_v55 }
  0x33   :  { %1323 = vmatpush3.bf16.msra.mxu0 %v1485_v53 }
  0x34   :  { %1324 = vmatprep.subr.bf16.mxu0 %v1493_v59 }
  0x35   :  { %1351 = vmatpush3.bf16.msra.mxu1 %v1490_v57 }
  0x36   :  { %1352 = vmatprep.subr.bf16.mxu1 %v1496_v62 }
  0x37   :  { %1325 = vmatpush3.bf16.msra.mxu0 %v1495_v61 }
  0x38   :  { %1326 = vmatprep.subr.bf16.mxu0 %v1498_v0 }
  0x39   :  { %1353 = vmatpush3.bf16.msra.mxu1 %v1497_v63 }
  0x3a   :  { %1354 = vmatprep.subr.bf16.mxu1 %v1500_v2 }
  0x3b   :  { %1327 = vmatpush3.bf16.msra.mxu0 %v1499_v1  ;;  %v1130_v1 = vld [vmem:[%s1886_s2] ss:$0 sm:$0xff] }
  0x3c   :  { %1328 = vmatprep.subr.bf16.mxu0 %v1502_v4 }
  0x3d   :  { %1355 = vmatpush3.bf16.msra.mxu1 %v1501_v3 }
  0x3e   :  { %1356 = vmatprep.subr.bf16.mxu1 %v1504_v6 }
  0x3f   :  { %1329 = vmatpush3.bf16.msra.mxu0 %v1503_v5 }
  0x40   :  { %1390 = vmatprep.subr.bf16.mxu0 %v1509_v10 }
  0x41   :  { %1357 = vmatpush3.bf16.msra.mxu1 %v1508_v9 }
  0x42   :  { %850 = vmatmul.mubr.bf16.vlgmr.msra.gmra.mxu0 %v1505_v7  ;;  %1410 = vmatprep.subr.bf16.mxu1 %v1528_v26 }
  0x43   :  { %1391 = vmatpush3.bf16.msra.mxu0 %v1509_v10  ;;  %857 = vmatprep.mubr.bf16.mxu0 %v1514_v14 }
  0x44   :  { %899 = vmatmul.mubr.bf16.vlgmr.msra.gmra.mxu1 %v1510_v11  ;;  %1392 = vmatprep.subr.bf16.mxu0 %v1513_v13 }
  0x45   :  { %906 = vmatprep.mubr.bf16.mxu1 %v1518_v17  ;;  %1411 = vmatpush3.bf16.msra.mxu1 %v1528_v26 }
  0x46   :  { %1412 = vmatprep.subr.bf16.mxu1 %v1529_v27 }
  0x47   :  { %1393 = vmatpush3.bf16.msra.mxu0 %v1513_v13 }
  0x48   :  { %1394 = vmatprep.subr.bf16.mxu0 %v1517_v16 }
  0x49   :  { %1413 = vmatpush3.bf16.msra.mxu1 %v1529_v27 }
  0x4a   :  { %858 = vmatmul.mubr.bf16.gmra.mxu0 %v1516_v15  ;;  %1414 = vmatprep.subr.bf16.mxu1 %v1530_v28 }
  0x4b   :  { %1395 = vmatpush3.bf16.msra.mxu0 %v1517_v16  ;;  %1406 = vmatprep.mubr.bf16.mxu0 %v1526_v21 }
  0x4c   :  { %907 = vmatmul.mubr.bf16.gmra.mxu1 %v1520_v18  ;;  %1396 = vmatprep.subr.bf16.mxu0 %v1521_v19 }
  0x4d   :  { %1415 = vmatpush3.bf16.msra.mxu1 %v1530_v28 }
  0x4e   :  { %1416 = vmatprep.subr.bf16.mxu1 %v1531_v29 }
  0x4f   :  { %1397 = vmatpush3.bf16.msra.mxu0 %v1521_v19 }
  0x50   :  { %1398 = vmatprep.subr.bf16.mxu0 %v1522_v20 }
  0x51   :  { %1417 = vmatpush3.bf16.msra.mxu1 %v1531_v29 }
  0x52   :  { %1418 = vmatprep.subr.bf16.mxu1 %v1532_v30 }
  0x53   :  { %1399 = vmatpush3.bf16.msra.mxu0 %v1522_v20 }
  0x54   :  { %1400 = vmatprep.subr.bf16.mxu0 %v1523_v22 }
  0x55   :  { %1419 = vmatpush3.bf16.msra.mxu1 %v1532_v30 }
  0x56   :  { %1420 = vmatprep.subr.bf16.mxu1 %v1533_v31 }
  0x57   :  { %1401 = vmatpush3.bf16.msra.mxu0 %v1523_v22 }
  0x58   :  { %1402 = vmatprep.subr.bf16.mxu0 %v1524_v23 }
  0x59   :  { %1421 = vmatpush3.bf16.msra.mxu1 %v1533_v31 }
  0x5a   :  { %1422 = vmatprep.subr.bf16.mxu1 %v1534_v32 }
  0x5b   :  { %1403 = vmatpush3.bf16.msra.mxu0 %v1524_v23 }
  0x5c   :  { %1404 = vmatprep.subr.bf16.mxu0 %v1525_v24 }
  0x5d   :  { %1423 = vmatpush3.bf16.msra.mxu1 %v1534_v32 }
  0x5e   :  { %1424 = vmatprep.subr.bf16.mxu1 %v1535_v33 }
  0x5f   :  { %1405 = vmatpush3.bf16.msra.mxu0 %v1525_v24 }
  0x61   :  { %1425 = vmatpush3.bf16.msra.mxu1 %v1535_v33 }
  0x62   :  { %1407 = vmatmul.mubr.bf16.vlgmr.msra.gmra.mxu0 %v1527_v25 }
  0xe2   :  { %v1274_v34 = vpop.f32.mrf.mxu0 }
  0xe4   :  { %v1302_v35 = vpop.f32.mrf.mxu1  ;;  %v1275_v36 = vpop.f32.mrf.mxu0 }
  0xe5   :  { %v1276_v63 = vadd.f32 %v1275_v36, %v1274_v34 }
  0xe6   :  { %v1303_v37 = vpop.f32.mrf.mxu1  ;;  %v1277_v38 = vpop.f32.mrf.mxu0 }
  0xe7   :  { %v754_v6 = vadd.f32 %v1276_v63, %v1130_v1  ;;  %v1304_v7 = vadd.f32 %v1303_v37, %v1302_v35 }
  0xe8   :  { %v1305_v39 = vpop.f32.mrf.mxu1  ;;  %v1278_v40 = vpop.f32.mrf.mxu0 }
  0xe9   :  { %v1279_v2 = vadd.f32 %v1278_v40, %v1277_v38  ;;  %v803_v18 = vadd.f32 %v1304_v7, %v754_v6 }
  0xea   :  { %v1280_v41 = vpop.f32.mrf.mxu0  ;;  %v1306_v42 = vpop.f32.mrf.mxu1 }
  0xeb   :  { %v757_v10 = vadd.f32 %v1279_v2, %v1130_v1  ;;  %v1307_v11 = vadd.f32 %v1306_v42, %v1305_v39 }
  0xec   :  { %v1308_v43 = vpop.f32.mrf.mxu1  ;;  %v1281_v44 = vpop.f32.mrf.mxu0 }
  0xed   :  { %v1282_v3 = vadd.f32 %v1281_v44, %v1280_v41  ;;  %v806_v21 = vadd.f32 %v1307_v11, %v757_v10 }
  0xee   :  { %v1309_v45 = vpop.f32.mrf.mxu1  ;;  %v1283_v46 = vpop.f32.mrf.mxu0 }
  0xef   :  { %v762_v12 = vadd.f32 %v1282_v3, %v1130_v1  ;;  %v1310_v13 = vadd.f32 %v1309_v45, %v1308_v43 }
  0xf0   :  { %v1311_v47 = vpop.f32.mrf.mxu1  ;;  %v1284_v48 = vpop.f32.mrf.mxu0 }
  0xf1   :  { %v1285_v0 = vadd.f32 %v1284_v48, %v1283_v46  ;;  %v811_v22 = vadd.f32 %v1310_v13, %v762_v12 }
  0xf2   :  { %v1312_v50 = vpop.f32.mrf.mxu1 }
  0xf3   :  { %v765_v8 = vadd.f32 %v1285_v0, %v1130_v1  ;;  %v1313_v9 = vadd.f32 %v1312_v50, %v1311_v47  ;;  %v1256_v50 = vld [vmem:[%s1888_s5 + $0x8] sm:$0xff]  }
  0xf5   :  { %v814_v19 = vadd.f32 %v1313_v9, %v765_v8 }
 0x102   :  { %v1330_v49 = vpop.f32.mrf.mxu0 }
 0x104   :  { %v1331_v51 = vpop.f32.mrf.mxu0  ;;  %v1358_v52 = vpop.f32.mrf.mxu1 }
 0x105   :  { %v1332_v14 = vadd.f32 %v1331_v51, %v1330_v49  ;;  %v1221_v49 = vld [vmem:[%s1887_s4] ss:$0 sm:$0xff] }
 0x106   :  { %v1333_v53 = vpop.f32.mrf.mxu0  ;;  %v1359_v54 = vpop.f32.mrf.mxu1 }
 0x107   :  { %v852_v23 = vadd.f32 %v1332_v14, %v803_v18  ;;  %v1360_v24 = vadd.f32 %v1359_v54, %v1358_v52  ;;  %v1239_v52 = vld [vmem:[%s1888_s5] sm:$0xff]   ;;  %v1244_v54 = vunpack.c.l.bf16 %v1256_v50 }
 0x108   :  { %v1334_v55 = vpop.f32.mrf.mxu0  ;;  %v1361_v56 = vpop.f32.mrf.mxu1 }
 0x109   :  { %v1335_v20 = vadd.f32 %v1334_v55, %v1333_v53  ;;  %v901_v33 = vadd.f32 %v1360_v24, %v852_v23 }
 0x10a   :  { %v1336_v57 = vpop.f32.mrf.mxu0  ;;  %v1362_v58 = vpop.f32.mrf.mxu1 }
 0x10b   :  { %v855_v30 = vadd.f32 %v1335_v20, %v806_v21  ;;  %v1363_v31 = vadd.f32 %v1362_v58, %v1361_v56  ;;  %v1245_v58 = vunpack.c.h.bf16 %v1256_v50 }
 0x10c   :  { %v1337_v59 = vpop.f32.mrf.mxu0  ;;  %v1364_v60 = vpop.f32.mrf.mxu1 }
 0x10d   :  { %v1338_v16 = vadd.f32 %v1337_v59, %v1336_v57  ;;  %v904_v39 = vadd.f32 %v1363_v31, %v855_v30  ;;  %v1240_v57 = vunpack.c.l.bf16 %v1239_v52 }
 0x10e   :  { %v1339_v61 = vpop.f32.mrf.mxu0  ;;  %v1365_v62 = vpop.f32.mrf.mxu1 }
 0x10f   :  { %v860_v27 = vadd.f32 %v1338_v16, %v811_v22  ;;  %v1366_v28 = vadd.f32 %v1365_v62, %v1364_v60  ;;  %v1241_v62 = vunpack.c.h.bf16 %v1239_v52 }
 0x110   :  { %v1340_v4 = vpop.f32.mrf.mxu0  ;;  %v1367_v5 = vpop.f32.mrf.mxu1 }
 0x111   :  { %v1341_v15 = vadd.f32 %v1340_v4, %v1339_v61  ;;  %v909_v35 = vadd.f32 %v1366_v28, %v860_v27 }
 0x112   :  { %v1368_v17 = vpop.f32.mrf.mxu1 }
 0x113   :  { %v863_v25 = vadd.f32 %v1341_v15, %v814_v19  ;;  %v1369_v26 = vadd.f32 %v1368_v17, %v1367_v5 }
 0x115   :  { %v912_v34 = vadd.f32 %v1369_v26, %v863_v25 }
 0x122   :  { %v1408_v29 = vpop.f32.mrf.mxu0 }
 0x123   :  { %v958_v40 = vadd.f32 %v1408_v29, %v909_v35 }
 0x124   :  { %v949_v32 = vpop.f32.mrf.mxu0 }
 0x125   :  { %v950_v37 = vadd.f32 %v949_v32, %v901_v33  ;;  %v966_v46 = vmax.f32 %v958_v40, 0.0 }
 0x126   :  { %v1409_v36 = vpop.f32.mrf.mxu0 }
 0x127   :  { %v961_v38 = vadd.f32 %v1409_v36, %v912_v34  ;;  %v964_v44 = vmax.f32 %v950_v37, 0.0 }
 0x128   :  { %v952_v41 = vpop.f32.mrf.mxu0 }
 0x129   :  { %v953_v42 = vadd.f32 %v952_v41, %v904_v39  ;;  %v967_v43 = vmax.f32 %v961_v38, 0.0 }
 0x12b   :  { %v965_v45 = vmax.f32 %v953_v42, 0.0  ;;  %v969_v48 = vpack.c.bf16 %v967_v43, %v966_v46 }
 0x12d   :  { %v968_v47 = vpack.c.bf16 %v965_v45, %v964_v44 }
 0x12f   :  { %1426 = vmatprep.mubr.bf16.mxu1 %v968_v47 }
 0x130   :  { %1427 = vmatmul.mubr.bf16.vlgmr.msra.gmra.mxu1 %v969_v48 }
 0x1f0   :  { %v1428_v51 = vpop.f32.mrf.mxu1 }
 0x1f1   :  { %v1084_v53 = vadd.f32 %v1428_v51, %v1221_v49 }
 0x1f2   :  { %v1075_v55 = vpop.f32.mrf.mxu1 }
 0x1f3   :  { %v1076_v56 = vadd.f32 %v1221_v49, %v1075_v55  ;;  %v1100_v60 = vadd.f32 %v1244_v54, %v1084_v53 }
 0x1f4   :  { %v1429_v59 = vpop.f32.mrf.mxu1 }
 0x1f5   :  { %v1087_v61 = vadd.f32 %v1429_v59, %v1221_v49  ;;  %v1098_v0 = vadd.f32 %v1240_v57, %v1076_v56  ;;  %v1104_v3 = vmax.f32 %v1100_v60, 0.0 }
 0x1f6   :  { %v1078_v63 = vpop.f32.mrf.mxu1 }
 0x1f7   :  { %v1101_v1 = vadd.f32 %v1245_v58, %v1087_v61  ;;  %v1079_v2 = vadd.f32 %v1221_v49, %v1078_v63  ;;  %v1102_v6 = vmax.f32 %v1098_v0, 0.0 }
 0x1f9   :  { %v1105_v4 = vmax.f32 %v1101_v1, 0.0  ;;  %v1099_v5 = vadd.f32 %v1241_v62, %v1079_v2 }
 0x1fb   :  { %v1254_v7 = vpack.c.bf16 %v1105_v4, %v1104_v3  ;;  %v1103_v8 = vmax.f32 %v1099_v5, 0.0 }
 0x1fd   :  { %1257 = vst [vmem:[%s1889_s6 + $0x8] sm:$0xff] %v1254_v7   ;;  %v1249_v9 = vpack.c.bf16 %v1103_v8, %v1102_v6 }
 0x1ff   :  { %1250 = vst [vmem:[%s1889_s6] sm:$0xff] %v1249_v9  }

// kernel: _lambda_.53
= control target key start
LH: loop header
LB: loop body
LE: loop exit
PB: predicated region body
PF: predicated region fallthrough
CT: control target
= control target key end

     0   :  { %s574_s1 = inlined_call_operand.vmem [shape: bf16[128,128], index: 1, kind: input, shape index: {}]   ;;  %s575_s3 = inlined_call_operand.vmem [shape: bf16[128,128], index: 3, kind: input, shape index: {}]   ;;  %s576_s0 = inlined_call_operand.vmem [shape: bf16[32,128], index: 0, kind: input, shape index: {}]   ;;  %s577_s2 = inlined_call_operand.vmem [shape: f32[1,128], index: 2, kind: input, shape index: {}, may-alias: {2,4}]   ;;  %s578_s4 = inlined_call_operand.vmem [shape: f32[1,128], index: 4, kind: input, shape index: {}, may-alias: {2,4}]   ;;  %s579_s6 = inlined_call_operand.vmem [shape: bf16[32,128], index: 6, kind: output, shape index: {1}]   ;;  %s580_s5 = inlined_call_operand.vmem [shape: bf16[32,128], index: 5, kind: output, shape index: {0}]  }
   0x1   :  { %v449_v0 = vld [vmem:[%s574_s1 + $0x38] sm:$0xff]   ;;  %v451_v2 = vld [vmem:[%s574_s1 + $0x30] sm:$0xff]   ;;  %v453_v4 = vld [vmem:[%s574_s1 + $0x28] sm:$0xff]  }
   0x2   :  { %v450_v1 = vld [vmem:[%s575_s3 + $0x38] sm:$0xff]   ;;  %409 = vmatprep.subr.bf16.mxu0 %v449_v0  ;;  %v452_v3 = vld [vmem:[%s575_s3 + $0x30] sm:$0xff]   ;;  %v454_v5 = vld [vmem:[%s575_s3 + $0x28] sm:$0xff]  }
   0x3   :  { %429 = vmatprep.subr.bf16.mxu1 %v450_v1  ;;  %410 = vmatpush3.bf16.msra.mxu0 %v449_v0  ;;  %v455_v6 = vld [vmem:[%s574_s1 + $0x20] sm:$0xff]   ;;  %v457_v8 = vld [vmem:[%s574_s1 + $0x18] sm:$0xff]   ;;  %v459_v10 = vld [vmem:[%s574_s1 + $0x10] sm:$0xff]  }
   0x4   :  { %430 = vmatpush3.bf16.msra.mxu1 %v450_v1  ;;  %411 = vmatprep.subr.bf16.mxu0 %v451_v2  ;;  %v456_v7 = vld [vmem:[%s575_s3 + $0x20] sm:$0xff]   ;;  %v458_v9 = vld [vmem:[%s575_s3 + $0x18] sm:$0xff]   ;;  %v460_v12 = vld [vmem:[%s575_s3 + $0x10] sm:$0xff]  }
   0x5   :  { %431 = vmatprep.subr.bf16.mxu1 %v452_v3  ;;  %v465_v11 = vld [vmem:[%s576_s0] sm:$0xff]   ;;  %v461_v13 = vld [vmem:[%s574_s1 + $0x8] sm:$0xff]  }
   0x6   :  { %425 = vmatprep.mubr.bf16.mxu0 %v465_v11  ;;  %445 = vmatprep.mubr.bf16.mxu1 %v465_v11  ;;  %v462_v14 = vld [vmem:[%s575_s3 + $0x8] sm:$0xff]   ;;  %v463_v15 = vld [vmem:[%s574_s1] sm:$0xff]  }
   0x7   :  { %412 = vmatpush3.bf16.msra.mxu0 %v451_v2  ;;  %v464_v16 = vld [vmem:[%s575_s3] sm:$0xff]   ;;  %v466_v17 = vld [vmem:[%s576_s0 + $0x8] sm:$0xff]  }
   0x8   :  { %432 = vmatpush3.bf16.msra.mxu1 %v452_v3  ;;  %413 = vmatprep.subr.bf16.mxu0 %v453_v4  ;;  %v331_v19 = vld [vmem:[%s577_s2] ss:$0 sm:$0xff] }
   0x9   :  { %433 = vmatprep.subr.bf16.mxu1 %v454_v5  ;;  %v346_v23 = vld [vmem:[%s578_s4] ss:$0 sm:$0xff] }
   0xb   :  { %414 = vmatpush3.bf16.msra.mxu0 %v453_v4 }
   0xc   :  { %434 = vmatpush3.bf16.msra.mxu1 %v454_v5  ;;  %415 = vmatprep.subr.bf16.mxu0 %v455_v6 }
   0xd   :  { %435 = vmatprep.subr.bf16.mxu1 %v456_v7 }
   0xf   :  { %416 = vmatpush3.bf16.msra.mxu0 %v455_v6 }
  0x10   :  { %436 = vmatpush3.bf16.msra.mxu1 %v456_v7  ;;  %417 = vmatprep.subr.bf16.mxu0 %v457_v8 }
  0x11   :  { %437 = vmatprep.subr.bf16.mxu1 %v458_v9 }
  0x13   :  { %418 = vmatpush3.bf16.msra.mxu0 %v457_v8 }
  0x14   :  { %438 = vmatpush3.bf16.msra.mxu1 %v458_v9  ;;  %419 = vmatprep.subr.bf16.mxu0 %v459_v10 }
  0x15   :  { %439 = vmatprep.subr.bf16.mxu1 %v460_v12 }
  0x17   :  { %420 = vmatpush3.bf16.msra.mxu0 %v459_v10 }
  0x18   :  { %440 = vmatpush3.bf16.msra.mxu1 %v460_v12  ;;  %421 = vmatprep.subr.bf16.mxu0 %v461_v13 }
  0x19   :  { %441 = vmatprep.subr.bf16.mxu1 %v462_v14 }
  0x1b   :  { %422 = vmatpush3.bf16.msra.mxu0 %v461_v13 }
  0x1c   :  { %442 = vmatpush3.bf16.msra.mxu1 %v462_v14  ;;  %423 = vmatprep.subr.bf16.mxu0 %v463_v15 }
  0x1d   :  { %443 = vmatprep.subr.bf16.mxu1 %v464_v16 }
  0x1f   :  { %424 = vmatpush3.bf16.msra.mxu0 %v463_v15 }
  0x20   :  { %444 = vmatpush3.bf16.msra.mxu1 %v464_v16 }
  0x22   :  { %426 = vmatmul.mubr.bf16.vlgmr.msra.gmra.mxu0 %v466_v17 }
  0x23   :  { %446 = vmatmul.mubr.bf16.vlgmr.msra.gmra.mxu1 %v466_v17 }
  0xe2   :  { %v427_v18 = vpop.f32.mrf.mxu0 }
  0xe3   :  { %v447_v20 = vpop.f32.mrf.mxu1  ;;  %v153_v22 = vadd.f32 %v427_v18, %v331_v19 }
  0xe4   :  { %v144_v21 = vpop.f32.mrf.mxu0  ;;  %v297_v29 = vadd.f32 %v447_v20, %v346_v23 }
  0xe5   :  { %v288_v24 = vpop.f32.mrf.mxu1  ;;  %v145_v26 = vadd.f32 %v331_v19, %v144_v21  ;;  %v161_v32 = vmax.f32 %v153_v22, 0.0 }
  0xe6   :  { %v428_v25 = vpop.f32.mrf.mxu0  ;;  %v289_v36 = vadd.f32 %v346_v23, %v288_v24 }
  0xe7   :  { %v156_v27 = vadd.f32 %v428_v25, %v331_v19  ;;  %v448_v28 = vpop.f32.mrf.mxu1  ;;  %v159_v39 = vmax.f32 %v145_v26, 0.0 }
  0xe8   :  { %v300_v30 = vadd.f32 %v448_v28, %v346_v23  ;;  %v147_v31 = vpop.f32.mrf.mxu0 }
  0xe9   :  { %v162_v33 = vmax.f32 %v156_v27, 0.0  ;;  %v148_v34 = vadd.f32 %v331_v19, %v147_v31  ;;  %v291_v35 = vpop.f32.mrf.mxu1 }
  0xea   :  { %v385_v37 = vpack.c.bf16 %v300_v30, %v297_v29  ;;  %v292_v38 = vadd.f32 %v346_v23, %v291_v35 }
  0xeb   :  { %v375_v40 = vpack.c.bf16 %v162_v33, %v161_v32  ;;  %v160_v41 = vmax.f32 %v148_v34, 0.0 }
  0xec   :  { %388 = vst [vmem:[%s579_s6 + $0x8] sm:$0xff] %v385_v37   ;;  %v380_v42 = vpack.c.bf16 %v292_v38, %v289_v36 }
  0xed   :  { %387 = vst [vmem:[%s580_s5 + $0x8] sm:$0xff] %v375_v40   ;;  %v370_v43 = vpack.c.bf16 %v160_v41, %v159_v39 }
  0xee   :  { %381 = vst [vmem:[%s579_s6] sm:$0xff] %v380_v42  }
  0xef   :  { %371 = vst [vmem:[%s580_s5] sm:$0xff] %v370_v43  }

// kernel: _lambda_.55
= control target key start
LH: loop header
LB: loop body
LE: loop exit
PB: predicated region body
PF: predicated region fallthrough
CT: control target
= control target key end

     0   :  { %v182_v0 = vmov 0.0   ;;  %vm183_vm0 = vmmov 0   ;;  %s237_s1 = inlined_call_operand.vmem [shape: bf16[128,128], index: 1, kind: input, shape index: {}]   ;;  %s238_s0 = inlined_call_operand.vmem [shape: bf16[8,128], index: 0, kind: input, shape index: {}]   ;;  %s239_s2 = inlined_call_operand.vmem [shape: f32[1,128], index: 2, kind: input, shape index: {}]   ;;  %s240_s3 = inlined_call_operand.vmem [shape: bf16[8,128], index: 3, kind: output, shape index: {}]  }
   0x1   :  { %152 = vmatprep.subr.bf16.mxu0 %v182_v0  ;;  %v174_v1 = vld [vmem:[%s237_s1 + $0x38] sm:$0xff]   ;;  %168 = vmatprep.mubr.msk.bf16.mxu0 %vm183_vm0, %v182_v0  ;;  %v175_v2 = vld [vmem:[%s237_s1 + $0x30] sm:$0xff]   ;;  %v176_v3 = vld [vmem:[%s237_s1 + $0x28] sm:$0xff]  }
   0x2   :  { %153 = vmatpush3.bf16.msra.mxu0 %v174_v1  ;;  %v177_v4 = vld [vmem:[%s237_s1 + $0x20] sm:$0xff]   ;;  %v178_v5 = vld [vmem:[%s237_s1 + $0x18] sm:$0xff]   ;;  %v179_v6 = vld [vmem:[%s237_s1 + $0x10] sm:$0xff]  }
   0x3   :  { %154 = vmatprep.subr.bf16.mxu0 %v182_v0  ;;  %v180_v7 = vld [vmem:[%s237_s1 + $0x8] sm:$0xff]   ;;  %v181_v8 = vld [vmem:[%s237_s1] sm:$0xff]  }
   0x4   :  { %v15_v9 = vld [vmem:[%s238_s0] sm:$0xf] }
   0x5   :  { %v134_v10 = vld [vmem:[%s239_s2] ss:$0 sm:$0xff] }
   0x6   :  { %155 = vmatpush3.bf16.msra.mxu0 %v175_v2 }
   0x7   :  { %156 = vmatprep.subr.bf16.mxu0 %v182_v0 }
   0xa   :  { %157 = vmatpush3.bf16.msra.mxu0 %v176_v3 }
   0xb   :  { %158 = vmatprep.subr.bf16.mxu0 %v182_v0 }
   0xe   :  { %159 = vmatpush3.bf16.msra.mxu0 %v177_v4 }
   0xf   :  { %160 = vmatprep.subr.bf16.mxu0 %v182_v0 }
  0x12   :  { %161 = vmatpush3.bf16.msra.mxu0 %v178_v5 }
  0x13   :  { %162 = vmatprep.subr.bf16.mxu0 %v182_v0 }
  0x16   :  { %163 = vmatpush3.bf16.msra.mxu0 %v179_v6 }
  0x17   :  { %164 = vmatprep.subr.bf16.mxu0 %v182_v0 }
  0x1a   :  { %165 = vmatpush3.bf16.msra.mxu0 %v180_v7 }
  0x1b   :  { %166 = vmatprep.subr.bf16.mxu0 %v182_v0 }
  0x1e   :  { %167 = vmatpush3.bf16.msra.mxu0 %v181_v8 }
  0x21   :  { %169 = vmatmul.mubr.bf16.vlgmr.msra.gmra.mxu0 %v15_v9 }
  0xe1   :  { %v121_v11 = vpop.f32.mrf.mxu0 }
  0xe2   :  { %v122_v12 = vadd.f32 %v134_v10, %v121_v11 }
  0xe3   :  { %v170_v13 = vpop.f32.mrf.mxu0 }
  0xe4   :  { %v127_v14 = vmax.f32 %v122_v12, 0.0 }
  0xe5   :  { %v124_v15 = vpop.f32.mrf.mxu0 }
  0xe6   :  { %v128_v16 = vpack.c.bf16 %v127_v14, %v127_v14 }
  0xe7   :  { %v171_v17 = vpop.f32.mrf.mxu0 }
  0xe8   :  { %129 = vst [vmem:[%s240_s3] sm:$0xf] %v128_v16 }

// kernel: _lambda_.65
= control target key start
LH: loop header
LB: loop body
LE: loop exit
PB: predicated region body
PF: predicated region fallthrough
CT: control target
= control target key end

     0   :  { %v395_v0 = vmov 0.0   ;;  %vm396_vm0 = vmmov 0   ;;  %v397_v3 = vmov 0   ;;  %v156_v27 = vlaneseq  ;;  %s520_s1 = inlined_call_operand.vmem [shape: bf16[128,128], index: 1, kind: input, shape index: {}]   ;;  %s521_s3 = inlined_call_operand.vmem [shape: bf16[128,256], index: 3, kind: input, shape index: {}]   ;;  %s522_s0 = inlined_call_operand.vmem [shape: bf16[8,128], index: 0, kind: input, shape index: {}]   ;;  %s523_s2 = inlined_call_operand.vmem [shape: f32[1,128], index: 2, kind: input, shape index: {}]   ;;  %s524_s4 = inlined_call_operand.vmem [shape: f32[1,256], index: 4, kind: input, shape index: {}]   ;;  %s525_s5 = inlined_call_operand.vmem [shape: bf16[8,128], index: 5, kind: output, shape index: {0}]   ;;  %s526_s6 = inlined_call_operand.vmem [shape: bf16[8,256], index: 6, kind: output, shape index: {1}]  }
   0x1   :  { %340 = vmatprep.subr.bf16.mxu0 %v395_v0  ;;  %v363_v1 = vld [vmem:[%s520_s1 + $0x38] sm:$0xff]   ;;  %356 = vmatprep.mubr.msk.bf16.mxu0 %vm396_vm0, %v395_v0  ;;  %v367_v5 = vld [vmem:[%s520_s1 + $0x30] sm:$0xff]   ;;  %v368_v6 = vld [vmem:[%s521_s3 + $0x64] ss:$8 sps:$4 sm:$0xff]  }
   0x2   :  { %v364_v2 = vld [vmem:[%s521_s3 + $0x74] ss:$8 sps:$4 sm:$0xff]   ;;  %278 = vmatprep.mubr.bf16.mxu1 %v397_v3  ;;  %341 = vmatpush3.bf16.msra.mxu0 %v363_v1  ;;  %v366_v4 = vld [vmem:[%s521_s3 + $0x70] ss:$8 sps:$4 sm:$0xff]   ;;  %v370_v7 = vld [vmem:[%s521_s3 + $0x60] ss:$8 sps:$4 sm:$0xff]  }
   0x3   :  { %246 = vmatprep.subr.bf16.mxu1 %v364_v2  ;;  %342 = vmatprep.subr.bf16.mxu0 %v395_v0  ;;  %v371_v8 = vld [vmem:[%s520_s1 + $0x28] sm:$0xff]   ;;  %v372_v9 = vld [vmem:[%s521_s3 + $0x54] ss:$8 sps:$4 sm:$0xff]   ;;  %v374_v10 = vld [vmem:[%s521_s3 + $0x50] ss:$8 sps:$4 sm:$0xff]   ;;  %v157_v28 = vshrl.u32 %v156_v27, 7 }
   0x4   :  { %247 = vmatpush1.bf16.msra.mxu1 %v366_v4  ;;  %v376_v11 = vld [vmem:[%s521_s3 + $0x44] ss:$8 sps:$4 sm:$0xff]   ;;  %v378_v13 = vld [vmem:[%s521_s3 + $0x40] ss:$8 sps:$4 sm:$0xff]   ;;  %v380_v14 = vld [vmem:[%s521_s3 + $0x34] ss:$8 sps:$4 sm:$0xff]  }
   0x5   :  { %248 = vmatprep.subr.bf16.mxu1 %v368_v6  ;;  %v375_v12 = vld [vmem:[%s520_s1 + $0x20] sm:$0xff]   ;;  %v379_v15 = vld [vmem:[%s520_s1 + $0x18] sm:$0xff]   ;;  %v383_v18 = vld [vmem:[%s520_s1 + $0x10] sm:$0xff]   ;;  %v158_v29 = vsub.s32 0, %v157_v28  ;;  %v162_v30 = vsub.s32 1, %v157_v28 }
   0x6   :  { %343 = vmatpush3.bf16.msra.mxu0 %v367_v5  ;;  %v382_v16 = vld [vmem:[%s521_s3 + $0x30] ss:$8 sps:$4 sm:$0xff]   ;;  %v384_v17 = vld [vmem:[%s521_s3 + $0x24] ss:$8 sps:$4 sm:$0xff]   ;;  %v386_v19 = vld [vmem:[%s521_s3 + $0x20] ss:$8 sps:$4 sm:$0xff]  }
   0x7   :  { %344 = vmatprep.subr.bf16.mxu0 %v395_v0  ;;  %v388_v20 = vld [vmem:[%s521_s3 + $0x14] ss:$8 sps:$4 sm:$0xff]   ;;  %v387_v21 = vld [vmem:[%s520_s1 + $0x8] sm:$0xff]   ;;  %v390_v22 = vld [vmem:[%s521_s3 + $0x10] ss:$8 sps:$4 sm:$0xff]  }
   0x8   :  { %249 = vmatpush1.bf16.msra.mxu1 %v370_v7  ;;  %v392_v23 = vld [vmem:[%s521_s3 + $0x4] ss:$8 sps:$4 sm:$0xff]   ;;  %v394_v25 = vld [vmem:[%s521_s3] ss:$8 sps:$4 sm:$0xff]  }
   0x9   :  { %250 = vmatprep.subr.bf16.mxu1 %v372_v9  ;;  %v391_v24 = vld [vmem:[%s520_s1] sm:$0xff]  }
   0xa   :  { %345 = vmatpush3.bf16.msra.mxu0 %v371_v8  ;;  %v23_v26 = vld [vmem:[%s522_s0] sm:$0xf] }
   0xb   :  { %346 = vmatprep.subr.bf16.mxu0 %v395_v0  ;;  %v304_v31 = vld [vmem:[%s523_s2] ss:$0 sm:$0xff] }
   0xc   :  { %251 = vmatpush1.bf16.msra.mxu1 %v374_v10  ;;  %v154_v32 = vld [vmem:[%s524_s4] sm:$0x3] }
   0xd   :  { %252 = vmatprep.subr.bf16.mxu1 %v376_v11  ;;  %v159_v35 = vrot.slane %v154_v32, %v158_v29  ;;  %v163_v36 = vrot.slane %v154_v32, %v162_v30 }
   0xe   :  { %347 = vmatpush3.bf16.msra.mxu0 %v375_v12 }
   0xf   :  { %348 = vmatprep.subr.bf16.mxu0 %v395_v0 }
  0x10   :  { %253 = vmatpush1.bf16.msra.mxu1 %v378_v13 }
  0x11   :  { %254 = vmatprep.subr.bf16.mxu1 %v380_v14 }
  0x12   :  { %349 = vmatpush3.bf16.msra.mxu0 %v379_v15 }
  0x13   :  { %350 = vmatprep.subr.bf16.mxu0 %v395_v0 }
  0x14   :  { %255 = vmatpush1.bf16.msra.mxu1 %v382_v16 }
  0x15   :  { %256 = vmatprep.subr.bf16.mxu1 %v384_v17 }
  0x16   :  { %351 = vmatpush3.bf16.msra.mxu0 %v383_v18 }
  0x17   :  { %352 = vmatprep.subr.bf16.mxu0 %v395_v0 }
  0x18   :  { %257 = vmatpush1.bf16.msra.mxu1 %v386_v19 }
  0x19   :  { %258 = vmatprep.subr.bf16.mxu1 %v388_v20 }
  0x1a   :  { %353 = vmatpush3.bf16.msra.mxu0 %v387_v21 }
  0x1b   :  { %354 = vmatprep.subr.bf16.mxu0 %v395_v0 }
  0x1c   :  { %259 = vmatpush1.bf16.msra.mxu1 %v390_v22 }
  0x1d   :  { %260 = vmatprep.subr.bf16.mxu1 %v392_v23 }
  0x1e   :  { %355 = vmatpush3.bf16.msra.mxu0 %v391_v24 }
  0x20   :  { %261 = vmatpush1.bf16.msra.mxu1 %v394_v25 }
  0x21   :  { %357 = vmatmul.mubr.bf16.vlgmr.msra.gmra.mxu0 %v23_v26 }
  0x23   :  { %279 = vmatmul.mubr.bf16.vlgmr.msra.gmra.mxu1 %v23_v26 }
  0xe1   :  { %v129_v33 = vpop.f32.mrf.mxu0 }
  0xe2   :  { %v130_v34 = vadd.f32 %v304_v31, %v129_v33 }
  0xe3   :  { %v280_v37 = vpop.f32.mrf.mxu1  ;;  %v358_v38 = vpop.f32.mrf.mxu0 }
  0xe4   :  { %v135_v39 = vmax.f32 %v130_v34, 0.0  ;;  %v281_v43 = vadd.f32 %v280_v37, %v159_v35 }
  0xe5   :  { %v282_v40 = vpop.f32.mrf.mxu1  ;;  %v132_v41 = vpop.f32.mrf.mxu0 }
  0xe6   :  { %v136_v42 = vpack.c.bf16 %v135_v39, %v135_v39  ;;  %v283_v44 = vadd.f32 %v282_v40, %v163_v36 }
  0xe7   :  { %v284_v45 = vpop.f32.mrf.mxu1  ;;  %v359_v46 = vpop.f32.mrf.mxu0 }
  0xe8   :  { %137 = vst [vmem:[%s525_s5] sm:$0xf] %v136_v42  ;;  %v330_v47 = vpack.c.bf16 %v283_v44, %v281_v43 }
  0xe9   :  { %v285_v48 = vpop.f32.mrf.mxu1 }
  0xea   :  { %295 = vst [vmem:[%s526_s6] sm:$0xff] %v330_v47 }

// kernel: _lambda_.54
= control target key start
LH: loop header
LB: loop body
LE: loop exit
PB: predicated region body
PF: predicated region fallthrough
CT: control target
= control target key end

     0   :  { %vm1296_vm0 = vmmov 0   ;;  %s1599_s1 = inlined_call_operand.vmem [shape: bf16[1152,128], index: 1, kind: input, shape index: {}]   ;;  %s1600_s0 = inlined_call_operand.vmem [shape: bf16[8,1152], index: 0, kind: input, shape index: {}]   ;;  %s1601_s3 = inlined_call_operand.vmem [shape: bf16[128,128], index: 3, kind: input, shape index: {}]   ;;  %s1602_s2 = inlined_call_operand.vmem [shape: f32[1,128], index: 2, kind: input, shape index: {}, may-alias: {2,4}]   ;;  %s1603_s5 = inlined_call_operand.vmem [shape: bf16[8,128], index: 5, kind: input, shape index: {}]   ;;  %s1604_s4 = inlined_call_operand.vmem [shape: f32[1,128], index: 4, kind: input, shape index: {}, may-alias: {2,4}]   ;;  %s1605_s6 = inlined_call_operand.vmem [shape: bf16[8,128], index: 6, kind: output, shape index: {}]  }
   0x1   :  { %v1206_v0 = vld [vmem:[%s1599_s1 + $0x78] sm:$0xff]   ;;  %v1210_v4 = vld [vmem:[%s1599_s1 + $0x70] sm:$0xff]   ;;  %v1214_v8 = vld [vmem:[%s1599_s1 + $0x68] sm:$0xff]  }
   0x2   :  { %v1207_v1 = vld [vmem:[%s1599_s1 + $0x38] sm:$0xff]   ;;  %1058 = vmatprep.subr.bf16.mxu0 %v1206_v0  ;;  %v1211_v5 = vld [vmem:[%s1599_s1 + $0x30] sm:$0xff]   ;;  %v1215_v9 = vld [vmem:[%s1599_s1 + $0x28] sm:$0xff]  }
   0x3   :  { %v1208_v2 = vld [vmem:[%s1599_s1 + $0xf8] sm:$0xff]   ;;  %1059 = vmatpush3.bf16.msra.mxu0 %v1207_v1  ;;  %v1212_v6 = vld [vmem:[%s1599_s1 + $0xf0] sm:$0xff]   ;;  %v1216_v10 = vld [vmem:[%s1599_s1 + $0xe8] sm:$0xff]  }
   0x4   :  { %v1209_v3 = vld [vmem:[%s1599_s1 + $0xb8] sm:$0xff]   ;;  %1080 = vmatprep.subr.bf16.mxu1 %v1208_v2  ;;  %1060 = vmatprep.subr.bf16.mxu0 %v1210_v4  ;;  %v1213_v7 = vld [vmem:[%s1599_s1 + $0xb0] sm:$0xff]   ;;  %v1217_v11 = vld [vmem:[%s1599_s1 + $0xa8] sm:$0xff]  }
   0x5   :  { %1081 = vmatpush3.bf16.msra.mxu1 %v1209_v3  ;;  %v1218_v12 = vld [vmem:[%s1599_s1 + $0x60] sm:$0xff]   ;;  %v1222_v16 = vld [vmem:[%s1599_s1 + $0x58] sm:$0xff]   ;;  %v1226_v20 = vld [vmem:[%s1599_s1 + $0x50] sm:$0xff]  }
   0x6   :  { %1082 = vmatprep.subr.bf16.mxu1 %v1212_v6  ;;  %v1219_v13 = vld [vmem:[%s1599_s1 + $0x20] sm:$0xff]   ;;  %v1223_v17 = vld [vmem:[%s1599_s1 + $0x18] sm:$0xff]   ;;  %v1227_v21 = vld [vmem:[%s1599_s1 + $0x10] sm:$0xff]  }
   0x7   :  { %1061 = vmatpush3.bf16.msra.mxu0 %v1211_v5  ;;  %v1220_v14 = vld [vmem:[%s1599_s1 + $0xe0] sm:$0xff]   ;;  %v1224_v18 = vld [vmem:[%s1599_s1 + $0xd8] sm:$0xff]   ;;  %v1228_v22 = vld [vmem:[%s1599_s1 + $0xd0] sm:$0xff]  }
   0x8   :  { %1062 = vmatprep.subr.bf16.mxu0 %v1214_v8  ;;  %v1221_v15 = vld [vmem:[%s1599_s1 + $0xa0] sm:$0xff]   ;;  %v1225_v19 = vld [vmem:[%s1599_s1 + $0x98] sm:$0xff]   ;;  %v1229_v23 = vld [vmem:[%s1599_s1 + $0x90] sm:$0xff]  }
   0x9   :  { %1083 = vmatpush3.bf16.msra.mxu1 %v1213_v7  ;;  %v1230_v24 = vld [vmem:[%s1599_s1 + $0x48] sm:$0xff]   ;;  %v1234_v28 = vld [vmem:[%s1599_s1 + $0x40] sm:$0xff]   ;;  %v1240_v35 = vld [vmem:[%s1599_s1 + $0x178] sm:$0xff]  }
   0xa   :  { %1084 = vmatprep.subr.bf16.mxu1 %v1216_v10  ;;  %v1231_v25 = vld [vmem:[%s1599_s1 + $0x8] sm:$0xff]   ;;  %v1235_v29 = vld [vmem:[%s1599_s1] sm:$0xff]   ;;  %v1243_v39 = vld [vmem:[%s1599_s1 + $0x138] sm:$0xff]  }
   0xb   :  { %1063 = vmatpush3.bf16.msra.mxu0 %v1215_v9  ;;  %v1232_v26 = vld [vmem:[%s1599_s1 + $0xc8] sm:$0xff]   ;;  %v1236_v30 = vld [vmem:[%s1599_s1 + $0xc0] sm:$0xff]   ;;  %v1244_v40 = vld [vmem:[%s1599_s1 + $0x1f8] sm:$0xff]   ;;  %v1295_v9 = vmov 0.0  }
   0xc   :  { %1064 = vmatprep.subr.bf16.mxu0 %v1218_v12  ;;  %v1233_v27 = vld [vmem:[%s1599_s1 + $0x88] sm:$0xff]   ;;  %v24_v31 = vld [vmem:[%s1600_s0] sm:$0xff]  ;;  %v1245_v41 = vld [vmem:[%s1599_s1 + $0x1b8] sm:$0xff]  }
   0xd   :  { %1085 = vmatpush3.bf16.msra.mxu1 %v1217_v11  ;;  %v968_v32 = vcombine.low %v24_v31, %v24_v31  ;;  %v969_v33 = vcombine.high %v24_v31, %v24_v31  ;;  %v1239_v34 = vld [vmem:[%s1599_s1 + $0x80] sm:$0xff]   ;;  %v25_v36 = vld [vmem:[%s1600_s0 + $0x8] sm:$0xff]  ;;  %v1246_v42 = vld [vmem:[%s1599_s1 + $0x170] sm:$0xff]  }
   0xe   :  { %1086 = vmatprep.subr.bf16.mxu1 %v1220_v14  ;;  %v970_v37 = vcombine.low %v25_v36, %v25_v36  ;;  %v971_v38 = vcombine.high %v25_v36, %v25_v36  ;;  %v1247_v43 = vld [vmem:[%s1599_s1 + $0x130] sm:$0xff]   ;;  %v1250_v46 = vld [vmem:[%s1599_s1 + $0x168] sm:$0xff]   ;;  %v1254_v50 = vld [vmem:[%s1599_s1 + $0x160] sm:$0xff]  }
   0xf   :  { %1065 = vmatpush3.bf16.msra.mxu0 %v1219_v13  ;;  %676 = vmatprep.mubr.bf16.mxu0 %v969_v33  ;;  %v1248_v44 = vld [vmem:[%s1599_s1 + $0x1f0] sm:$0xff]   ;;  %v1251_v47 = vld [vmem:[%s1599_s1 + $0x128] sm:$0xff]   ;;  %v1255_v51 = vld [vmem:[%s1599_s1 + $0x120] sm:$0xff]  }
  0x10   :  { %1066 = vmatprep.subr.bf16.mxu0 %v1222_v16  ;;  %716 = vmatprep.mubr.bf16.mxu1 %v971_v38  ;;  %v1249_v45 = vld [vmem:[%s1599_s1 + $0x1b0] sm:$0xff]   ;;  %v1252_v48 = vld [vmem:[%s1599_s1 + $0x1e8] sm:$0xff]   ;;  %v1256_v52 = vld [vmem:[%s1599_s1 + $0x1e0] sm:$0xff]  }
  0x11   :  { %1087 = vmatpush3.bf16.msra.mxu1 %v1221_v15  ;;  %v1253_v49 = vld [vmem:[%s1599_s1 + $0x1a8] sm:$0xff]   ;;  %v1257_v53 = vld [vmem:[%s1599_s1 + $0x1a0] sm:$0xff]   ;;  %v1258_v54 = vld [vmem:[%s1599_s1 + $0x158] sm:$0xff]  }
  0x12   :  { %1088 = vmatprep.subr.bf16.mxu1 %v1224_v18  ;;  %v1259_v55 = vld [vmem:[%s1599_s1 + $0x118] sm:$0xff]   ;;  %v1262_v58 = vld [vmem:[%s1599_s1 + $0x150] sm:$0xff]   ;;  %v1266_v62 = vld [vmem:[%s1599_s1 + $0x148] sm:$0xff]  }
  0x13   :  { %1067 = vmatpush3.bf16.msra.mxu0 %v1223_v17  ;;  %v1260_v56 = vld [vmem:[%s1599_s1 + $0x1d8] sm:$0xff]   ;;  %v1263_v59 = vld [vmem:[%s1599_s1 + $0x110] sm:$0xff]   ;;  %v1267_v63 = vld [vmem:[%s1599_s1 + $0x108] sm:$0xff]  }
  0x14   :  { %1068 = vmatprep.subr.bf16.mxu0 %v1226_v20  ;;  %v1261_v57 = vld [vmem:[%s1599_s1 + $0x198] sm:$0xff]   ;;  %v1264_v60 = vld [vmem:[%s1599_s1 + $0x1d0] sm:$0xff]   ;;  %v1268_v0 = vld [vmem:[%s1599_s1 + $0x1c8] sm:$0xff]  }
  0x15   :  { %1089 = vmatpush3.bf16.msra.mxu1 %v1225_v19  ;;  %v1265_v61 = vld [vmem:[%s1599_s1 + $0x190] sm:$0xff]   ;;  %v1269_v1 = vld [vmem:[%s1599_s1 + $0x188] sm:$0xff]   ;;  %v1270_v2 = vld [vmem:[%s1599_s1 + $0x140] sm:$0xff]  }
  0x16   :  { %1090 = vmatprep.subr.bf16.mxu1 %v1228_v22  ;;  %v1271_v3 = vld [vmem:[%s1599_s1 + $0x100] sm:$0xff]   ;;  %v26_v5 = vld [vmem:[%s1600_s0 + $0x10] sm:$0xff]  ;;  %v27_v10 = vld [vmem:[%s1600_s0 + $0x18] sm:$0xff] }
  0x17   :  { %1069 = vmatpush3.bf16.msra.mxu0 %v1227_v21  ;;  %v1272_v4 = vld [vmem:[%s1599_s1 + $0x1c0] sm:$0xff]   ;;  %v972_v6 = vcombine.low %v26_v5, %v26_v5  ;;  %v973_v7 = vcombine.high %v26_v5, %v26_v5  ;;  %v974_v11 = vcombine.low %v27_v10, %v27_v10  ;;  %v975_v12 = vcombine.high %v27_v10, %v27_v10  ;;  %v1278_v13 = vld [vmem:[%s1599_s1 + $0x238] sm:$0xff]   ;;  %v1279_v14 = vld [vmem:[%s1599_s1 + $0x230] sm:$0xff]  }
  0x18   :  { %1070 = vmatprep.subr.bf16.mxu0 %v1230_v24  ;;  %v1275_v8 = vld [vmem:[%s1599_s1 + $0x180] sm:$0xff]   ;;  %v1280_v15 = vld [vmem:[%s1599_s1 + $0x228] sm:$0xff]   ;;  %v1282_v17 = vld [vmem:[%s1599_s1 + $0x218] sm:$0xff]  }
  0x19   :  { %1091 = vmatpush3.bf16.msra.mxu1 %v1229_v23  ;;  %v1281_v16 = vld [vmem:[%s1599_s1 + $0x220] sm:$0xff]   ;;  %v1283_v18 = vld [vmem:[%s1599_s1 + $0x210] sm:$0xff]   ;;  %v1284_v19 = vld [vmem:[%s1599_s1 + $0x208] sm:$0xff]  }
  0x1a   :  { %1092 = vmatprep.subr.bf16.mxu1 %v1232_v26  ;;  %v1285_v20 = vld [vmem:[%s1599_s1 + $0x200] sm:$0xff]   ;;  %v1287_v22 = vld [vmem:[%s1601_s3 + $0x38] sm:$0xff]   ;;  %v1288_v23 = vld [vmem:[%s1601_s3 + $0x30] sm:$0xff]  }
  0x1b   :  { %1071 = vmatpush3.bf16.msra.mxu0 %v1231_v25  ;;  %v1286_v21 = vld [vmem:[%s1600_s0 + $0x20] ss:$0 sps:$4 sm:$0xff]   ;;  %v1289_v24 = vld [vmem:[%s1601_s3 + $0x28] sm:$0xff]   ;;  %v1291_v26 = vld [vmem:[%s1601_s3 + $0x18] sm:$0xff]  }
  0x1c   :  { %1072 = vmatprep.subr.bf16.mxu0 %v1234_v28  ;;  %v1290_v25 = vld [vmem:[%s1601_s3 + $0x20] sm:$0xff]   ;;  %v1293_v28 = vld [vmem:[%s1601_s3 + $0x8] sm:$0xff]  }
  0x1d   :  { %1093 = vmatpush3.bf16.msra.mxu1 %v1233_v27  ;;  %v1292_v27 = vld [vmem:[%s1601_s3 + $0x10] sm:$0xff]  }
  0x1e   :  { %1094 = vmatprep.subr.bf16.mxu1 %v1236_v30 }
  0x1f   :  { %1073 = vmatpush3.bf16.msra.mxu0 %v1235_v29  ;;  %v1294_v29 = vld [vmem:[%s1601_s3] sm:$0xff]  }
  0x20   :  { %1102 = vmatprep.subr.bf16.mxu0 %v1240_v35 }
  0x21   :  { %1095 = vmatpush3.bf16.msra.mxu1 %v1239_v34 }
  0x22   :  { %677 = vmatmul.mubr.bf16.vlgmr.msra.gmra.mxu0 %v968_v32  ;;  %1124 = vmatprep.subr.bf16.mxu1 %v1244_v40 }
  0x23   :  { %1103 = vmatpush3.bf16.msra.mxu0 %v1243_v39  ;;  %756 = vmatprep.mubr.bf16.mxu0 %v973_v7 }
  0x24   :  { %717 = vmatmul.mubr.bf16.vlgmr.msra.gmra.mxu1 %v970_v37  ;;  %1104 = vmatprep.subr.bf16.mxu0 %v1246_v42 }
  0x25   :  { %1125 = vmatpush3.bf16.msra.mxu1 %v1245_v41  ;;  %796 = vmatprep.mubr.bf16.mxu1 %v975_v12 }
  0x26   :  { %1126 = vmatprep.subr.bf16.mxu1 %v1248_v44 }
  0x27   :  { %1105 = vmatpush3.bf16.msra.mxu0 %v1247_v43 }
  0x28   :  { %1106 = vmatprep.subr.bf16.mxu0 %v1250_v46 }
  0x29   :  { %1127 = vmatpush3.bf16.msra.mxu1 %v1249_v45 }
  0x2a   :  { %1128 = vmatprep.subr.bf16.mxu1 %v1252_v48 }
  0x2b   :  { %1107 = vmatpush3.bf16.msra.mxu0 %v1251_v47  ;;  %v967_v47 = vld [vmem:[%s1602_s2] ss:$0 sm:$0xff] }
  0x2c   :  { %1108 = vmatprep.subr.bf16.mxu0 %v1254_v50 }
  0x2d   :  { %1129 = vmatpush3.bf16.msra.mxu1 %v1253_v49 }
  0x2e   :  { %1130 = vmatprep.subr.bf16.mxu1 %v1256_v52 }
  0x2f   :  { %1109 = vmatpush3.bf16.msra.mxu0 %v1255_v51 }
  0x30   :  { %1110 = vmatprep.subr.bf16.mxu0 %v1258_v54 }
  0x31   :  { %1131 = vmatpush3.bf16.msra.mxu1 %v1257_v53 }
  0x32   :  { %1132 = vmatprep.subr.bf16.mxu1 %v1260_v56 }
  0x33   :  { %1111 = vmatpush3.bf16.msra.mxu0 %v1259_v55 }
  0x34   :  { %1112 = vmatprep.subr.bf16.mxu0 %v1262_v58 }
  0x35   :  { %1133 = vmatpush3.bf16.msra.mxu1 %v1261_v57 }
  0x36   :  { %1134 = vmatprep.subr.bf16.mxu1 %v1264_v60 }
  0x37   :  { %1113 = vmatpush3.bf16.msra.mxu0 %v1263_v59 }
  0x38   :  { %1114 = vmatprep.subr.bf16.mxu0 %v1266_v62  ;;  %v957_v62 = vld [vmem:[%s1603_s5] sm:$0xf] }
  0x39   :  { %1135 = vmatpush3.bf16.msra.mxu1 %v1265_v61 }
  0x3a   :  { %1136 = vmatprep.subr.bf16.mxu1 %v1268_v0  ;;  %v958_v0 = vunpack.c.l.bf16 %v957_v62 }
  0x3b   :  { %1115 = vmatpush3.bf16.msra.mxu0 %v1267_v63  ;;  %v1049_v63 = vld [vmem:[%s1604_s4] ss:$0 sm:$0xff] }
  0x3c   :  { %1116 = vmatprep.subr.bf16.mxu0 %v1270_v2 }
  0x3d   :  { %1137 = vmatpush3.bf16.msra.mxu1 %v1269_v1 }
  0x3e   :  { %1138 = vmatprep.subr.bf16.mxu1 %v1272_v4 }
  0x3f   :  { %1117 = vmatpush3.bf16.msra.mxu0 %v1271_v3 }
  0x40   :  { %1164 = vmatprep.subr.bf16.mxu0 %v1295_v9 }
  0x41   :  { %1139 = vmatpush3.bf16.msra.mxu1 %v1275_v8 }
  0x42   :  { %757 = vmatmul.mubr.bf16.vlgmr.msra.gmra.mxu0 %v972_v6  ;;  %1184 = vmatprep.subr.bf16.mxu1 %v1295_v9 }
  0x43   :  { %1165 = vmatpush3.bf16.msra.mxu0 %v1278_v13  ;;  %1180 = vmatprep.mubr.msk.bf16.mxu0 %vm1296_vm0, %v1295_v9 }
  0x44   :  { %797 = vmatmul.mubr.bf16.vlgmr.msra.gmra.mxu1 %v974_v11  ;;  %1166 = vmatprep.subr.bf16.mxu0 %v1295_v9 }
  0x45   :  { %1200 = vmatprep.mubr.msk.bf16.mxu1 %vm1296_vm0, %v1295_v9  ;;  %1185 = vmatpush3.bf16.msra.mxu1 %v1287_v22 }
  0x46   :  { %1186 = vmatprep.subr.bf16.mxu1 %v1295_v9 }
  0x47   :  { %1167 = vmatpush3.bf16.msra.mxu0 %v1279_v14 }
  0x48   :  { %1168 = vmatprep.subr.bf16.mxu0 %v1295_v9 }
  0x49   :  { %1187 = vmatpush3.bf16.msra.mxu1 %v1288_v23 }
  0x4a   :  { %1188 = vmatprep.subr.bf16.mxu1 %v1295_v9 }
  0x4b   :  { %1169 = vmatpush3.bf16.msra.mxu0 %v1280_v15 }
  0x4c   :  { %1170 = vmatprep.subr.bf16.mxu0 %v1295_v9 }
  0x4d   :  { %1189 = vmatpush3.bf16.msra.mxu1 %v1289_v24 }
  0x4e   :  { %1190 = vmatprep.subr.bf16.mxu1 %v1295_v9 }
  0x4f   :  { %1171 = vmatpush3.bf16.msra.mxu0 %v1281_v16 }
  0x50   :  { %1172 = vmatprep.subr.bf16.mxu0 %v1295_v9 }
  0x51   :  { %1191 = vmatpush3.bf16.msra.mxu1 %v1290_v25 }
  0x52   :  { %1192 = vmatprep.subr.bf16.mxu1 %v1295_v9 }
  0x53   :  { %1173 = vmatpush3.bf16.msra.mxu0 %v1282_v17 }
  0x54   :  { %1174 = vmatprep.subr.bf16.mxu0 %v1295_v9 }
  0x55   :  { %1193 = vmatpush3.bf16.msra.mxu1 %v1291_v26 }
  0x56   :  { %1194 = vmatprep.subr.bf16.mxu1 %v1295_v9 }
  0x57   :  { %1175 = vmatpush3.bf16.msra.mxu0 %v1283_v18 }
  0x58   :  { %1176 = vmatprep.subr.bf16.mxu0 %v1295_v9 }
  0x59   :  { %1195 = vmatpush3.bf16.msra.mxu1 %v1292_v27 }
  0x5a   :  { %1196 = vmatprep.subr.bf16.mxu1 %v1295_v9 }
  0x5b   :  { %1177 = vmatpush3.bf16.msra.mxu0 %v1284_v19 }
  0x5c   :  { %1178 = vmatprep.subr.bf16.mxu0 %v1295_v9 }
  0x5d   :  { %1197 = vmatpush3.bf16.msra.mxu1 %v1293_v28 }
  0x5e   :  { %1198 = vmatprep.subr.bf16.mxu1 %v1295_v9 }
  0x5f   :  { %1179 = vmatpush3.bf16.msra.mxu0 %v1285_v20 }
  0x61   :  { %1199 = vmatpush3.bf16.msra.mxu1 %v1294_v29 }
  0x62   :  { %1181 = vmatmul.mubr.bf16.vlgmr.msra.gmra.mxu0 %v1286_v21 }
  0xe2   :  { %v1074_v30 = vpop.f32.mrf.mxu0 }
  0xe4   :  { %v1075_v31 = vpop.f32.mrf.mxu0  ;;  %v1096_v32 = vpop.f32.mrf.mxu1 }
  0xe5   :  { %v1076_v46 = vadd.f32 %v1075_v31, %v1074_v30 }
  0xe6   :  { %v1077_v33 = vpop.f32.mrf.mxu0  ;;  %v1097_v34 = vpop.f32.mrf.mxu1 }
  0xe7   :  { %v679_v48 = vadd.f32 %v1076_v46, %v967_v47  ;;  %v1098_v49 = vadd.f32 %v1097_v34, %v1096_v32 }
  0xe8   :  { %v1078_v35 = vpop.f32.mrf.mxu0  ;;  %v1099_v36 = vpop.f32.mrf.mxu1 }
  0xe9   :  { %v719_v51 = vadd.f32 %v1098_v49, %v679_v48 }
  0xea   :  { %v1100_v37 = vpop.f32.mrf.mxu1 }
 0x102   :  { %v1118_v38 = vpop.f32.mrf.mxu0 }
 0x104   :  { %v1119_v39 = vpop.f32.mrf.mxu0  ;;  %v1140_v40 = vpop.f32.mrf.mxu1 }
 0x105   :  { %v1120_v50 = vadd.f32 %v1119_v39, %v1118_v38 }
 0x106   :  { %v1121_v41 = vpop.f32.mrf.mxu0  ;;  %v1141_v42 = vpop.f32.mrf.mxu1 }
 0x107   :  { %v759_v52 = vadd.f32 %v1120_v50, %v719_v51  ;;  %v1142_v53 = vadd.f32 %v1141_v42, %v1140_v40 }
 0x108   :  { %v1122_v43 = vpop.f32.mrf.mxu0  ;;  %v1143_v44 = vpop.f32.mrf.mxu1 }
 0x109   :  { %v799_v54 = vadd.f32 %v1142_v53, %v759_v52 }
 0x10a   :  { %v1144_v45 = vpop.f32.mrf.mxu1 }
 0x122   :  { %v838_v55 = vpop.f32.mrf.mxu0 }
 0x123   :  { %v839_v56 = vadd.f32 %v838_v55, %v799_v54 }
 0x124   :  { %v1182_v57 = vpop.f32.mrf.mxu0 }
 0x125   :  { %v844_v58 = vmax.f32 %v839_v56, 0.0 }
 0x126   :  { %v841_v59 = vpop.f32.mrf.mxu0 }
 0x127   :  { %v845_v60 = vpack.c.bf16 %v844_v58, %v844_v58 }
 0x128   :  { %v1183_v61 = vpop.f32.mrf.mxu0 }
 0x129   :  { %1201 = vmatmul.mubr.bf16.vlgmr.msra.gmra.mxu1 %v845_v60 }
 0x1e9   :  { %v951_v1 = vpop.f32.mrf.mxu1 }
 0x1ea   :  { %v952_v2 = vadd.f32 %v1049_v63, %v951_v1 }
 0x1eb   :  { %v1202_v3 = vpop.f32.mrf.mxu1 }
 0x1ec   :  { %v959_v4 = vadd.f32 %v958_v0, %v952_v2 }
 0x1ed   :  { %v954_v5 = vpop.f32.mrf.mxu1 }
 0x1ee   :  { %v960_v6 = vmax.f32 %v959_v4, 0.0 }
 0x1ef   :  { %v1203_v7 = vpop.f32.mrf.mxu1 }
 0x1f0   :  { %v961_v8 = vpack.c.bf16 %v960_v6, %v960_v6 }
 0x1f2   :  { %962 = vst [vmem:[%s1605_s6] sm:$0xf] %v961_v8 }

// kernel: _lambda_.70
= control target key start
LH: loop header
LB: loop body
LE: loop exit
PB: predicated region body
PF: predicated region fallthrough
CT: control target
= control target key end

     0   :  { %v69_v9 = vlaneseq  ;;  %v320_v13 = vmov 1966171168   ;;  %s403_s0 = inlined_call_operand.vmem [shape: bf16[2,1,1,9,128], index: 0, kind: input, shape index: {}, may-alias: {0,4}]   ;;  %s404_s1 = inlined_call_operand.vmem [shape: bf16[2,256], index: 1, kind: input, shape index: {}]   ;;  %s405_s2 = inlined_call_operand.vmem [shape: bf16[256,128], index: 2, kind: input, shape index: {}]   ;;  %s406_s3 = inlined_call_operand.vmem [shape: f32[1,128], index: 3, kind: input, shape index: {}]   ;;  %s407_s4 = inlined_call_operand.vmem [shape: bf16[2,1,1,9,128], index: 4, kind: output, shape index: {}, may-alias: {0,4}]  }
   0x1   :  { %v304_v0 = vld [vmem:[%s405_s2 + $0x78] sm:$0xff]   ;;  %v306_v2 = vld [vmem:[%s405_s2 + $0x70] sm:$0xff]   ;;  %v308_v4 = vld [vmem:[%s405_s2 + $0x68] sm:$0xff]   ;;  %v67_v14 = vunpack.c.l.s4 %v320_v13 }
   0x2   :  { %v305_v1 = vld [vmem:[%s405_s2 + $0x38] sm:$0xff]   ;;  %281 = vmatprep.subr.bf16.mxu0 %v304_v0  ;;  %v307_v3 = vld [vmem:[%s405_s2 + $0x30] sm:$0xff]   ;;  %v309_v5 = vld [vmem:[%s405_s2 + $0x28] sm:$0xff]   ;;  %v70_v15 = vshrl.u32 %v69_v9, 7 }
   0x3   :  { %282 = vmatpush3.bf16.msra.mxu0 %v305_v1  ;;  %v310_v6 = vld [vmem:[%s405_s2 + $0x60] sm:$0xff]   ;;  %v312_v8 = vld [vmem:[%s405_s2 + $0x58] sm:$0xff]   ;;  %v314_v11 = vld [vmem:[%s405_s2 + $0x50] sm:$0xff]   ;;  %v68_v18 = vunpack.c.0.s8 %v67_v14 }
   0x4   :  { %283 = vmatprep.subr.bf16.mxu0 %v306_v2  ;;  %v311_v7 = vld [vmem:[%s405_s2 + $0x20] sm:$0xff]   ;;  %v313_v10 = vld [vmem:[%s405_s2 + $0x18] sm:$0xff]   ;;  %v315_v16 = vld [vmem:[%s405_s2 + $0x10] sm:$0xff]  }
   0x5   :  { %v263_v12 = vld.sshfl [vmem:[%s404_s1] sm:$0x11 pattern:$0x75316420]  ;;  %v316_v19 = vld [vmem:[%s405_s2 + $0x48] sm:$0xff]   ;;  %v71_v20 = vsub.s32 %v68_v18, %v70_v15 }
   0x6   :  { %v65_v17 = vcombine.high %v263_v12, %v263_v12  ;;  %v317_v21 = vld [vmem:[%s405_s2 + $0x8] sm:$0xff]   ;;  %v318_v23 = vld [vmem:[%s405_s2 + $0x40] sm:$0xff]  }
   0x7   :  { %284 = vmatpush3.bf16.msra.mxu0 %v307_v3  ;;  %v319_v24 = vld [vmem:[%s405_s2] sm:$0xff]   ;;  %v72_v25 = vrot.slane %v263_v12, %v71_v20 }
   0x8   :  { %285 = vmatprep.subr.bf16.mxu0 %v308_v4  ;;  %v79_v22 = vrot.slane %v65_v17, %v71_v20  ;;  %v262_v27 = vld [vmem:[%s406_s3] ss:$0 sm:$0xff] }
   0xa   :  { %210 = vmatprep.mubr.bf16.mxu0 %v79_v22 }
   0xb   :  { %286 = vmatpush3.bf16.msra.mxu0 %v309_v5 }
   0xc   :  { %287 = vmatprep.subr.bf16.mxu0 %v310_v6 }
   0xf   :  { %288 = vmatpush3.bf16.msra.mxu0 %v311_v7 }
  0x10   :  { %289 = vmatprep.subr.bf16.mxu0 %v312_v8 }
  0x13   :  { %290 = vmatpush3.bf16.msra.mxu0 %v313_v10 }
  0x14   :  { %291 = vmatprep.subr.bf16.mxu0 %v314_v11 }
  0x17   :  { %292 = vmatpush3.bf16.msra.mxu0 %v315_v16 }
  0x18   :  { %293 = vmatprep.subr.bf16.mxu0 %v316_v19 }
  0x1b   :  { %294 = vmatpush3.bf16.msra.mxu0 %v317_v21 }
  0x1c   :  { %295 = vmatprep.subr.bf16.mxu0 %v318_v23 }
  0x1f   :  { %296 = vmatpush3.bf16.msra.mxu0 %v319_v24 }
  0x22   :  { %211 = vmatmul.mubr.bf16.vlgmr.msra.gmra.mxu0 %v72_v25 }
  0xe2   :  { %v297_v26 = vpop.f32.mrf.mxu0 }
  0xe4   :  { %v298_v28 = vpop.f32.mrf.mxu0 }
  0xe5   :  { %v299_v29 = vadd.f32 %v298_v28, %v297_v26 }
  0xe6   :  { %v300_v30 = vpop.f32.mrf.mxu0 }
  0xe7   :  { %v213_v31 = vadd.f32 %v299_v29, %v262_v27 }
  0xe8   :  { %v301_v32 = vpop.f32.mrf.mxu0 }
  0xe9   :  { %v218_v33 = vmax.f32 %v213_v31, 0.0 }
  0xeb   :  { %v219_v34 = vpack.c.bf16 %v218_v33, %v218_v33 }
  0xed   :  { %220 = vst [vmem:[#allocation2] sm:$0x1] %v219_v34 }
  0xf4   :  { %v239_v35 = vld [vmem:[#allocation2] sm:$0x1] }
  0xf5   :  { %280 = vst [vmem:[%s407_s4 + $0x4] sm:$0x1] %v239_v35 }

// kernel: _lambda_.69
= control target key start
LH: loop header
LB: loop body
LE: loop exit
PB: predicated region body
PF: predicated region fallthrough
CT: control target
= control target key end

     0   :  { %11 = vsyncpa [#allocation3], 0  ;;  %v30_v5 = vlaneseq  ;;  %s524_s0 = inlined_call_operand.vmem [shape: bf16[2,1,256], index: 0, kind: input, shape index: {}]   ;;  %s525_s1 = inlined_call_operand.vmem [shape: bf16[256,128], index: 1, kind: input, shape index: {}]   ;;  %s526_s2 = inlined_call_operand.vmem [shape: f32[1,128], index: 2, kind: input, shape index: {}]   ;;  %s527_s3 = inlined_call_operand.vmem [shape: s32[2,1], index: 3, kind: input, shape index: {}]   ;;  %s528_s4 = inlined_call_operand.hbm [shape: bf16[2,128], index: 4, kind: output, shape index: {0}]   ;;  %s529_s5 = inlined_call_operand.hbm [shape: f32[1,1], index: 5, kind: output, shape index: {1}]  }
   0x1   :  { %v357_v0 = vld [vmem:[%s525_s1 + $0x78] sm:$0xff]   ;;  %v359_v2 = vld [vmem:[%s525_s1 + $0x70] sm:$0xff]   ;;  %v361_v4 = vld [vmem:[%s525_s1 + $0x68] sm:$0xff]  }
   0x2   :  { %v358_v1 = vld [vmem:[%s525_s1 + $0x38] sm:$0xff]   ;;  %331 = vmatprep.subr.bf16.mxu0 %v357_v0  ;;  %v360_v3 = vld [vmem:[%s525_s1 + $0x30] sm:$0xff]   ;;  %v362_v6 = vld [vmem:[%s525_s1 + $0x28] sm:$0xff]   ;;  %v31_v8 = vshrl.u32 %v30_v5, 7 }
   0x3   :  { %332 = vmatpush3.bf16.msra.mxu0 %v358_v1  ;;  %v363_v7 = vld [vmem:[%s525_s1 + $0x60] sm:$0xff]   ;;  %v365_v10 = vld [vmem:[%s525_s1 + $0x58] sm:$0xff]   ;;  %v367_v13 = vld [vmem:[%s525_s1 + $0x50] sm:$0xff]  }
   0x4   :  { %333 = vmatprep.subr.bf16.mxu0 %v359_v2  ;;  %v364_v9 = vld [vmem:[%s525_s1 + $0x20] sm:$0xff]   ;;  %v366_v11 = vld [vmem:[%s525_s1 + $0x18] sm:$0xff]   ;;  %v36_v12 = vsub.s32 2, %v31_v8  ;;  %v32_v14 = vsub.s32 0, %v31_v8 }
   0x5   :  { %v22_v15 = vld [vmem:[%s524_s0] sm:$0x3]  ;;  %v23_v16 = vld [vmem:[%s524_s0 + $0x2] sm:$0x3] }
   0x7   :  { %334 = vmatpush3.bf16.msra.mxu0 %v360_v3 }
   0x8   :  { %335 = vmatprep.subr.bf16.mxu0 %v361_v4 }
   0xb   :  { %336 = vmatpush3.bf16.msra.mxu0 %v362_v6 }
   0xc   :  { %337 = vmatprep.subr.bf16.mxu0 %v363_v7 }
   0xf   :  { %338 = vmatpush3.bf16.msra.mxu0 %v364_v9 }
  0x10   :  { %339 = vmatprep.subr.bf16.mxu0 %v365_v10 }
  0x11   :  { %12 = vsyncpa [#allocation5], 0  ;;  %v24_v17 = vunpack.c.l.bf16 %v22_v15  ;;  %v25_v18 = vunpack.c.l.bf16 %v23_v16  ;;  %v368_v19 = vld [vmem:[%s525_s1 + $0x10] sm:$0xff]   ;;  %v369_v24 = vld [vmem:[%s525_s1 + $0x48] sm:$0xff]   ;;  %vm102_vm0 = vcmask 1041409   ;;  %v421_v42 = vmov 0  }
  0x12   :  { %v370_v29 = vld [vmem:[%s525_s1 + $0x8] sm:$0xff]   ;;  %v371_v34 = vld [vmem:[%s525_s1 + $0x40] sm:$0xff]   ;;  %356 = vset.pattern.permute.xlu0 %v421_v42  ;;  %v249_v44 = vand.u32 127, %v30_v5  ;;  %vm252_vm2 = vcmask 1041408  }
  0x13   :  { %340 = vmatpush3.bf16.msra.mxu0 %v366_v11  ;;  %v37_v20 = vrot.slane %v24_v17, %v36_v12  ;;  %v45_v21 = vrot.slane %v25_v18, %v36_v12  ;;  %v33_v22 = vrot.slane %v24_v17, %v32_v14  ;;  %v41_v23 = vrot.slane %v25_v18, %v32_v14  ;;  %v372_v37 = vld [vmem:[%s525_s1] sm:$0xff]  }
  0x14   :  { %341 = vmatprep.subr.bf16.mxu0 %v367_v13  ;;  %v314_v45 = vld [vmem:[%s526_s2] ss:$0 sm:$0xff]  ;;  %vm250_vm1 = vcmp.lt.s32.totalorder %v249_v44, 10  ;;  %s422_s2 = smov [#allocation2]  }
  0x15   :  { %v51_v25 = vpack.c.bf16 %v37_v20, %v37_v20  ;;  %v53_v26 = vpack.c.bf16 %v45_v21, %v45_v21  ;;  %v50_v27 = vpack.c.bf16 %v33_v22, %v33_v22  ;;  %v52_v28 = vpack.c.bf16 %v41_v23, %v41_v23  ;;  %v265_v54 = vld [vmem:[%s527_s3] sm:$0x3]  ;;  %s292_s6 = sshll.u32 %s422_s2, 4  ;;  %s293_s6 = int_to_ptr.vmem [resolvable:$true] %s292_s6 }
  0x16   :  { %s377_s7 = scalar_lea.vmem %s293_s6, 16  ;;  %s381_s3 = scalar_lea.vmem %s293_s6, 32 }
  0x17   :  { %342 = vmatpush3.bf16.msra.mxu0 %v368_v19  ;;  %v98_v30 = vunpack.c.l.b16 %v51_v25  ;;  %v100_v31 = vunpack.c.l.b16 %v53_v26  ;;  %v97_v32 = vunpack.c.l.b16 %v50_v27  ;;  %v99_v33 = vunpack.c.l.b16 %v52_v28  ;;  %p378_p0 = scmp.ne.s32.totalorder %s293_s6, %s377_s7  ;;  %p382_p1 = scmp.lt.s32.totalorder %s293_s6, %s293_s6 }
  0x18   :  { %343 = vmatprep.subr.bf16.mxu0 %v369_v24  ;;  %p383_p2 = scmp.lt.s32.totalorder %s381_s3, %s377_s7 }
  0x19   :  { %v104_v35 = vrot.slane %v100_v31, 7  ;;  %v101_v36 = vrot.slane %v99_v33, 7 }
  0x1a   :  { %p384_p3 = por %p383_p2, %p382_p1 }
  0x1b   :  { %344 = vmatpush3.bf16.msra.mxu0 %v370_v29  ;;  %v105_v38 = vsel %vm102_vm0, %v104_v35, %v98_v30  ;;  %v103_v39 = vsel %vm102_vm0, %v101_v36, %v97_v32 }
  0x1c   :  { %345 = vmatprep.subr.bf16.mxu0 %v371_v34  ;;  %v107_v40 = vpack.c.b16 %v105_v38, %v105_v38  ;;  %v106_v41 = vpack.c.b16 %v103_v39, %v103_v39  ;;  %p385_p4 = pnand %p384_p3, %p378_p0 }
  0x1e   :  { %238 = vmatprep.mubr.bf16.mxu0 %v107_v40 }
  0x1f   :  { %346 = vmatpush3.bf16.msra.mxu0 %v372_v37 }
  0x22   :  { %239 = vmatmul.mubr.bf16.vlgmr.msra.gmra.mxu0 %v106_v41 }
  0xe2   :  { %v347_v43 = vpop.f32.mrf.mxu0 }
  0xe4   :  { %v348_v46 = vpop.f32.mrf.mxu0 }
  0xe5   :  { %v349_v47 = vadd.f32 %v348_v46, %v347_v43 }
  0xe6   :  { %v350_v48 = vpop.f32.mrf.mxu0 }
  0xe7   :  { %v241_v49 = vadd.f32 %v349_v47, %v314_v45 }
  0xe8   :  { %v351_v50 = vpop.f32.mrf.mxu0 }
  0xe9   :  { %v251_v51 = vsel %vm250_vm1, %v241_v49, -1e+30  ;;  %v246_v52 = vpack.c.bf16 %v241_v49, %v241_v49 }
  0xea   :  { %v253_v53 = vsel %vm252_vm2, %v251_v51, -inf }
  0xeb   :  { %254 = vmax.xlane.f32.xlu0 %v253_v53  ;;  %247 = vst [vmem:[#allocation2] sm:$0x1] %v246_v52 }
 0x101   :  { %267 = vperm.xlu0 %356, %v265_v54  }
 0x174   :  { %v255_v55 = vpop.xlane.xlu0 %254 }
 0x175   :  { %v256_v56 = vsub.f32 %v251_v51, %v255_v55 }
 0x177   :  { %v257_v57 = vmul.f32 1.442695, %v256_v56 }
 0x179   :  { %373 = vpow2.f32 %v257_v57 }
 0x17c   :  { %v268_v58 = vpop.permute.xlu0 %267 }
 0x17d   :  { %vm269_vm3 = vcmp.eq.s32.totalorder %v249_v44, %v268_v58 }
 0x17e   :  { %v270_v61 = vsel %vm269_vm3, %v241_v49, 0.0 }
 0x17f   :  { %v271_v62 = vsel %vm252_vm2, %v270_v61, 0.0 }
 0x186   :  { %v374_v59 = vpop.eup %373 }
 0x187   :  { %v259_v60 = vsel %vm252_vm2, %v374_v59, 0.0 }
 0x188   :  { %260 = vadd.xlane.f32.xlu1 %v259_v60 }
 0x18c   :  { %272 = vadd.xlane.f32.xlu1 %v271_v62 }
 0x18d   :  { %388 = shalt.err (!%p385_p4)
}
 0x18e   :  { %295 = dma.vmem_to_hbm [thread:$0]  %s293_s6, 16, %s528_s4, [#allocation3]   ;;  %vm284_vm4 = vcmask 0  }
 0x18f   :  { %s423_s10 = smov [#allocation4]  }
 0x190   :  { %s302_s11 = sshll.u32 %s423_s10, 4  ;;  %s303_s11 = int_to_ptr.vmem [resolvable:$true] %s302_s11 }
 0x191   :  { %s397_s4 = scalar_lea.vmem %s303_s11, 16  ;;  %s401_s12 = scalar_lea.vmem %s303_s11, 32 }
 0x192   :  { %p398_p5 = scmp.ne.s32.totalorder %s303_s11, %s397_s4  ;;  %p402_p6 = scmp.lt.s32.totalorder %s303_s11, %s303_s11 }
 0x193   :  { %p403_p7 = scmp.lt.s32.totalorder %s401_s12, %s397_s4 }
 0x195   :  { %p404_p8 = por %p403_p7, %p402_p6 }
 0x197   :  { %p405_p9 = pnand %p404_p8, %p398_p5 }
 0x211   :  { %v261_v63 = vpop.xlane.xlu1 %260 }
 0x212   :  { %375 = vlog2.f32 %v261_v63 }
 0x215   :  { %v273_v3 = vpop.xlane.xlu1 %272 }
 0x21f   :  { %v376_v0 = vpop.eup %375 }
 0x220   :  { %v263_v1 = vmul.f32 0.6931472, %v376_v0 }
 0x222   :  { %v264_v2 = vadd.f32 %v263_v1, %v255_v55 }
 0x224   :  { %v274_v4 = vsub.f32 %v264_v2, %v273_v3 }
 0x226   :  { %v275_v5 = vsel %vm252_vm2, %v274_v4, 0.0 }
 0x227   :  { %v276_v6 = vrot.slane %v275_v5, 4 }
 0x229   :  { %v277_v7 = vadd.f32 %v276_v6, %v275_v5 }
 0x22b   :  { %v278_v8 = vrot.slane %v277_v7, 2 }
 0x22d   :  { %v279_v9 = vadd.f32 %v278_v8, %v277_v7 }
 0x22f   :  { %v280_v10 = vrot.slane %v279_v9, 1 }
 0x231   :  { %v281_v11 = vadd.f32 %v280_v10, %v279_v9 }
 0x233   :  { %v283_v12 = vmul.f32 0.5, %v281_v11 }
 0x235   :  { %285 = vst.msk [vmem:[#allocation4] sm:$0x1] %vm284_vm4, %v283_v12 }
 0x236   :  { %408 = shalt.err (!%p405_p9)
}
 0x237   :  { %305 = dma.vmem_to_hbm [thread:$0]  %s303_s11, 16, %s529_s5, [#allocation5]  }
 0x238   :  { %417 = dma.done.wait [#allocation3], 16  }
 0x239   :  { %418 = vsyncadd [#allocation3], 4294967280 }
 0x23a   :  { %419 = dma.done.wait [#allocation5], 16  }
 0x23b   :  { %420 = vsyncadd [#allocation5], 4294967280 }
 0x23c   :  { %312 = vsyncpa [#allocation3], 1 }
 0x23d   :  { %313 = vsyncpa [#allocation5], 1 }

// kernel: _lambda_.66
= control target key start
LH: loop header
LB: loop body
LE: loop exit
PB: predicated region body
PF: predicated region fallthrough
CT: control target
= control target key end

     0   :  { %v1387_v21 = vmov 1966171168   ;;  %v183_v23 = vlaneseq  ;;  %vm1389_vm0 = vmmov 0   ;;  %s1730_s1 = inlined_call_operand.vmem [shape: bf16[1152,128], index: 1, kind: input, shape index: {}]   ;;  %s1731_s0 = inlined_call_operand.vmem [shape: bf16[2,1152], index: 0, kind: input, shape index: {}]   ;;  %s1732_s3 = inlined_call_operand.vmem [shape: bf16[128,256], index: 3, kind: input, shape index: {}]   ;;  %s1733_s2 = inlined_call_operand.vmem [shape: f32[1,128], index: 2, kind: input, shape index: {}]   ;;  %s1734_s5 = inlined_call_operand.vmem [shape: bf16[2,256], index: 5, kind: input, shape index: {}]   ;;  %s1735_s4 = inlined_call_operand.vmem [shape: f32[1,256], index: 4, kind: input, shape index: {}]   ;;  %s1736_s6 = inlined_call_operand.vmem [shape: bf16[2,256], index: 6, kind: output, shape index: {}]  }
   0x1   :  { %v1290_v0 = vld [vmem:[%s1730_s1 + $0x78] sm:$0xff]   ;;  %v1294_v4 = vld [vmem:[%s1730_s1 + $0x70] sm:$0xff]   ;;  %v1298_v8 = vld [vmem:[%s1730_s1 + $0x68] sm:$0xff]   ;;  %v181_v22 = vunpack.c.l.s4 %v1387_v21 }
   0x2   :  { %v1291_v1 = vld [vmem:[%s1730_s1 + $0x38] sm:$0xff]   ;;  %1168 = vmatprep.subr.bf16.mxu0 %v1290_v0  ;;  %v1295_v5 = vld [vmem:[%s1730_s1 + $0x30] sm:$0xff]   ;;  %v1299_v9 = vld [vmem:[%s1730_s1 + $0x28] sm:$0xff]   ;;  %v1502_v29 = vshrl.u32 %v183_v23, 7 }
   0x3   :  { %v1292_v2 = vld [vmem:[%s1730_s1 + $0xf8] sm:$0xff]   ;;  %1169 = vmatpush3.bf16.msra.mxu0 %v1291_v1  ;;  %v1296_v6 = vld [vmem:[%s1730_s1 + $0xf0] sm:$0xff]   ;;  %v1300_v10 = vld [vmem:[%s1730_s1 + $0xe8] sm:$0xff]   ;;  %v182_v28 = vunpack.c.0.s8 %v181_v22 }
   0x4   :  { %v1293_v3 = vld [vmem:[%s1730_s1 + $0xb8] sm:$0xff]   ;;  %1190 = vmatprep.subr.bf16.mxu1 %v1292_v2  ;;  %1170 = vmatprep.subr.bf16.mxu0 %v1294_v4  ;;  %v1297_v7 = vld [vmem:[%s1730_s1 + $0xb0] sm:$0xff]   ;;  %v1301_v11 = vld [vmem:[%s1730_s1 + $0xa8] sm:$0xff]  }
   0x5   :  { %1191 = vmatpush3.bf16.msra.mxu1 %v1293_v3  ;;  %v1302_v12 = vld [vmem:[%s1730_s1 + $0x60] sm:$0xff]   ;;  %v1306_v16 = vld [vmem:[%s1730_s1 + $0x58] sm:$0xff]   ;;  %v1310_v20 = vld [vmem:[%s1730_s1 + $0x50] sm:$0xff]   ;;  %v1517_v34 = vsub.s32 %v182_v28, %v1502_v29 }
   0x6   :  { %1192 = vmatprep.subr.bf16.mxu1 %v1296_v6  ;;  %v1303_v13 = vld [vmem:[%s1730_s1 + $0x20] sm:$0xff]   ;;  %v1307_v17 = vld [vmem:[%s1730_s1 + $0x18] sm:$0xff]   ;;  %v1311_v24 = vld [vmem:[%s1730_s1 + $0x10] sm:$0xff]  }
   0x7   :  { %1171 = vmatpush3.bf16.msra.mxu0 %v1295_v5  ;;  %v1304_v14 = vld [vmem:[%s1730_s1 + $0xe0] sm:$0xff]   ;;  %v1308_v18 = vld [vmem:[%s1730_s1 + $0xd8] sm:$0xff]   ;;  %v1312_v25 = vld [vmem:[%s1730_s1 + $0xd0] sm:$0xff]  }
   0x8   :  { %1172 = vmatprep.subr.bf16.mxu0 %v1298_v8  ;;  %v1305_v15 = vld [vmem:[%s1730_s1 + $0xa0] sm:$0xff]   ;;  %v1309_v19 = vld [vmem:[%s1730_s1 + $0x98] sm:$0xff]   ;;  %v1313_v26 = vld [vmem:[%s1730_s1 + $0x90] sm:$0xff]  }
   0x9   :  { %1193 = vmatpush3.bf16.msra.mxu1 %v1297_v7  ;;  %v1314_v27 = vld [vmem:[%s1730_s1 + $0x48] sm:$0xff]   ;;  %v1318_v33 = vld [vmem:[%s1730_s1 + $0x40] sm:$0xff]   ;;  %v1323_v41 = vld [vmem:[%s1730_s1 + $0x178] sm:$0xff]  }
   0xa   :  { %1194 = vmatprep.subr.bf16.mxu1 %v1300_v10  ;;  %v1315_v30 = vld [vmem:[%s1730_s1 + $0x8] sm:$0xff]   ;;  %v1319_v35 = vld [vmem:[%s1730_s1] sm:$0xff]   ;;  %v1325_v45 = vld [vmem:[%s1730_s1 + $0x1f8] sm:$0xff]  }
   0xb   :  { %1173 = vmatpush3.bf16.msra.mxu0 %v1299_v9  ;;  %v1316_v31 = vld [vmem:[%s1730_s1 + $0xc8] sm:$0xff]   ;;  %v1320_v36 = vld [vmem:[%s1730_s1 + $0xc0] sm:$0xff]   ;;  %v1324_v47 = vld [vmem:[%s1730_s1 + $0x138] sm:$0xff]  }
   0xc   :  { %1174 = vmatprep.subr.bf16.mxu0 %v1302_v12  ;;  %v1317_v32 = vld [vmem:[%s1730_s1 + $0x88] sm:$0xff]   ;;  %v24_v37 = vld [vmem:[%s1731_s0] sm:$0xff]  ;;  %v1327_v50 = vld [vmem:[%s1730_s1 + $0x170] sm:$0xff]  }
   0xd   :  { %1195 = vmatpush3.bf16.msra.mxu1 %v1301_v11  ;;  %v179_v38 = vcombine.high %v24_v37, %v24_v37  ;;  %v186_v39 = vrot.slane %v24_v37, %v1517_v34  ;;  %v1322_v40 = vld [vmem:[%s1730_s1 + $0x80] sm:$0xff]   ;;  %v1326_v52 = vld [vmem:[%s1730_s1 + $0x1b8] sm:$0xff]   ;;  %v1329_v54 = vld [vmem:[%s1730_s1 + $0x1f0] sm:$0xff]  }
   0xe   :  { %1196 = vmatprep.subr.bf16.mxu1 %v1304_v14  ;;  %v1328_v55 = vld [vmem:[%s1730_s1 + $0x130] sm:$0xff]   ;;  %v1331_v57 = vld [vmem:[%s1730_s1 + $0x168] sm:$0xff]   ;;  %v1335_v61 = vld [vmem:[%s1730_s1 + $0x160] sm:$0xff]  }
   0xf   :  { %1175 = vmatpush3.bf16.msra.mxu0 %v1303_v13  ;;  %v194_v42 = vcombine.high %v186_v39, %v186_v39  ;;  %v202_v43 = vrot.slane %v186_v39, %v1517_v34  ;;  %v1537_v44 = vrot.slane %v179_v38, %v1517_v34  ;;  %v1330_v58 = vld [vmem:[%s1730_s1 + $0x1b0] sm:$0xff]   ;;  %v1333_v59 = vld [vmem:[%s1730_s1 + $0x1e8] sm:$0xff]   ;;  %v1337_v63 = vld [vmem:[%s1730_s1 + $0x1e0] sm:$0xff]  }
  0x10   :  { %1176 = vmatprep.subr.bf16.mxu0 %v1306_v16  ;;  %v1332_v60 = vld [vmem:[%s1730_s1 + $0x128] sm:$0xff]   ;;  %v1336_v0 = vld [vmem:[%s1730_s1 + $0x120] sm:$0xff]   ;;  %v1339_v1 = vld [vmem:[%s1730_s1 + $0x158] sm:$0xff]  }
  0x11   :  { %1197 = vmatpush3.bf16.msra.mxu1 %v1305_v15  ;;  %v216_v46 = vrot.slane %v194_v42, %v1517_v34  ;;  %v195_v48 = vcombine.high %v1537_v44, %v1537_v44  ;;  %v224_v49 = vcombine.high %v202_v43, %v202_v43  ;;  %v1334_v62 = vld [vmem:[%s1730_s1 + $0x1a8] sm:$0xff]   ;;  %v1338_v2 = vld [vmem:[%s1730_s1 + $0x1a0] sm:$0xff]   ;;  %v1341_v3 = vld [vmem:[%s1730_s1 + $0x1d8] sm:$0xff]  }
  0x12   :  { %1198 = vmatprep.subr.bf16.mxu1 %v1308_v18  ;;  %v1340_v4 = vld [vmem:[%s1730_s1 + $0x118] sm:$0xff]   ;;  %v1343_v5 = vld [vmem:[%s1730_s1 + $0x150] sm:$0xff]   ;;  %v1347_v9 = vld [vmem:[%s1730_s1 + $0x148] sm:$0xff]  }
  0x13   :  { %1177 = vmatpush3.bf16.msra.mxu0 %v1307_v17  ;;  %715 = vmatprep.mubr.bf16.mxu0 %v216_v46  ;;  %v226_v51 = vcombine.high %v216_v46, %v216_v46  ;;  %v223_v53 = vrot.slane %v195_v48, %v1517_v34  ;;  %v1342_v6 = vld [vmem:[%s1730_s1 + $0x198] sm:$0xff]   ;;  %v1345_v7 = vld [vmem:[%s1730_s1 + $0x1d0] sm:$0xff]   ;;  %v1349_v11 = vld [vmem:[%s1730_s1 + $0x1c8] sm:$0xff]   ;;  %v209_v17 = vrot.slane %v1537_v44, %v1517_v34 }
  0x14   :  { %1178 = vmatprep.subr.bf16.mxu0 %v1310_v20  ;;  %v1344_v8 = vld [vmem:[%s1730_s1 + $0x110] sm:$0xff]   ;;  %v1348_v12 = vld [vmem:[%s1730_s1 + $0x108] sm:$0xff]   ;;  %v1351_v13 = vld [vmem:[%s1730_s1 + $0x140] sm:$0xff]   ;;  %v1388_v20 = vmov 0.0  }
  0x15   :  { %1199 = vmatpush3.bf16.msra.mxu1 %v1309_v19  ;;  %755 = vmatprep.mubr.bf16.mxu1 %v226_v51  ;;  %v227_v56 = vcombine.high %v223_v53, %v223_v53  ;;  %v1346_v10 = vld [vmem:[%s1730_s1 + $0x190] sm:$0xff]   ;;  %v1350_v14 = vld [vmem:[%s1730_s1 + $0x188] sm:$0xff]   ;;  %v1353_v15 = vld [vmem:[%s1730_s1 + $0x1c0] sm:$0xff]   ;;  %v225_v21 = vcombine.high %v209_v17, %v209_v17 }
  0x16   :  { %1200 = vmatprep.subr.bf16.mxu1 %v1312_v25  ;;  %v1352_v16 = vld [vmem:[%s1730_s1 + $0x100] sm:$0xff]   ;;  %v1355_v19 = vld [vmem:[%s1730_s1 + $0x238] sm:$0xff]   ;;  %v1356_v22 = vld [vmem:[%s1730_s1 + $0x230] sm:$0xff]  }
  0x17   :  { %1179 = vmatpush3.bf16.msra.mxu0 %v1311_v24  ;;  %v1354_v18 = vld [vmem:[%s1730_s1 + $0x180] sm:$0xff]   ;;  %v1357_v23 = vld [vmem:[%s1730_s1 + $0x228] sm:$0xff]   ;;  %v1359_v25 = vld [vmem:[%s1730_s1 + $0x218] sm:$0xff]  }
  0x18   :  { %1180 = vmatprep.subr.bf16.mxu0 %v1314_v27  ;;  %v1358_v24 = vld [vmem:[%s1730_s1 + $0x220] sm:$0xff]   ;;  %v1361_v27 = vld [vmem:[%s1730_s1 + $0x208] sm:$0xff]   ;;  %v1371_v37 = vld [vmem:[%s1732_s3 + $0x54] ss:$8 sps:$4 sm:$0xff]  }
  0x19   :  { %1201 = vmatpush3.bf16.msra.mxu1 %v1313_v26  ;;  %v1360_v26 = vld [vmem:[%s1730_s1 + $0x210] sm:$0xff]   ;;  %v1362_v28 = vld [vmem:[%s1730_s1 + $0x200] sm:$0xff]  }
  0x1a   :  { %1202 = vmatprep.subr.bf16.mxu1 %v1316_v31  ;;  %v1369_v38 = vld [vmem:[%s1732_s3 + $0x50] ss:$8 sps:$4 sm:$0xff]   ;;  %v1374_v39 = vld [vmem:[%s1732_s3 + $0x44] ss:$8 sps:$4 sm:$0xff]   ;;  %v1378_v44 = vld [vmem:[%s1732_s3 + $0x20] ss:$8 sps:$4 sm:$0xff]  }
  0x1b   :  { %1181 = vmatpush3.bf16.msra.mxu0 %v1315_v30  ;;  %v1077_v30 = vld.sshfl [vmem:[%s1731_s0 + $0x8] sm:$0x1 pattern:$0x75316420]  ;;  %v1375_v42 = vld [vmem:[%s1732_s3 + $0x30] ss:$8 sps:$4 sm:$0xff]  }
  0x1c   :  { %1182 = vmatprep.subr.bf16.mxu0 %v1318_v33  ;;  %v241_v31 = vrot.slane %v1077_v30, %v1517_v34  ;;  %v1363_v33 = vld [vmem:[%s1732_s3 + $0x70] ss:$8 sps:$4 sm:$0xff]   ;;  %v1384_v48 = vld [vmem:[%s1732_s3] ss:$8 sps:$4 sm:$0xff]  }
  0x1d   :  { %1203 = vmatpush3.bf16.msra.mxu1 %v1317_v32  ;;  %v1365_v32 = vld [vmem:[%s1732_s3 + $0x74] ss:$8 sps:$4 sm:$0xff]   ;;  %v1381_v46 = vld [vmem:[%s1732_s3 + $0x10] ss:$8 sps:$4 sm:$0xff]  }
  0x1e   :  { %1204 = vmatprep.subr.bf16.mxu1 %v1320_v36  ;;  %v1366_v36 = vld [vmem:[%s1732_s3 + $0x60] ss:$8 sps:$4 sm:$0xff]  }
  0x1f   :  { %1183 = vmatpush3.bf16.msra.mxu0 %v1319_v35  ;;  %v1368_v35 = vld [vmem:[%s1732_s3 + $0x64] ss:$8 sps:$4 sm:$0xff]  }
  0x20   :  { %1212 = vmatprep.subr.bf16.mxu0 %v1323_v41  ;;  %v1377_v41 = vld [vmem:[%s1732_s3 + $0x34] ss:$8 sps:$4 sm:$0xff]  }
  0x21   :  { %1205 = vmatpush3.bf16.msra.mxu1 %v1322_v40  ;;  %v1372_v40 = vld [vmem:[%s1732_s3 + $0x40] ss:$8 sps:$4 sm:$0xff]  }
  0x22   :  { %1234 = vmatprep.subr.bf16.mxu1 %v1325_v45  ;;  %716 = vmatmul.mubr.bf16.vlgmr.msra.gmra.mxu0 %v202_v43  ;;  %v1380_v43 = vld [vmem:[%s1732_s3 + $0x24] ss:$8 sps:$4 sm:$0xff]   ;;  %v1383_v45 = vld [vmem:[%s1732_s3 + $0x14] ss:$8 sps:$4 sm:$0xff]  }
  0x23   :  { %1213 = vmatpush3.bf16.msra.mxu0 %v1324_v47  ;;  %795 = vmatprep.mubr.bf16.mxu0 %v223_v53  ;;  %v1386_v47 = vld [vmem:[%s1732_s3 + $0x4] ss:$8 sps:$4 sm:$0xff]  }
  0x24   :  { %756 = vmatmul.mubr.bf16.vlgmr.msra.gmra.mxu1 %v224_v49  ;;  %1214 = vmatprep.subr.bf16.mxu0 %v1327_v50  ;;  %v1390_v49 = vmov 0  }
  0x25   :  { %1235 = vmatpush3.bf16.msra.mxu1 %v1326_v52  ;;  %835 = vmatprep.mubr.bf16.mxu1 %v227_v56 }
  0x26   :  { %1236 = vmatprep.subr.bf16.mxu1 %v1329_v54 }
  0x27   :  { %1215 = vmatpush3.bf16.msra.mxu0 %v1328_v55 }
  0x28   :  { %1216 = vmatprep.subr.bf16.mxu0 %v1331_v57 }
  0x29   :  { %1237 = vmatpush3.bf16.msra.mxu1 %v1330_v58 }
  0x2a   :  { %1238 = vmatprep.subr.bf16.mxu1 %v1333_v59 }
  0x2b   :  { %1217 = vmatpush3.bf16.msra.mxu0 %v1332_v60 }
  0x2c   :  { %1218 = vmatprep.subr.bf16.mxu0 %v1335_v61 }
  0x2d   :  { %1239 = vmatpush3.bf16.msra.mxu1 %v1334_v62 }
  0x2e   :  { %1240 = vmatprep.subr.bf16.mxu1 %v1337_v63 }
  0x2f   :  { %1219 = vmatpush3.bf16.msra.mxu0 %v1336_v0 }
  0x30   :  { %1220 = vmatprep.subr.bf16.mxu0 %v1339_v1 }
  0x31   :  { %1241 = vmatpush3.bf16.msra.mxu1 %v1338_v2 }
  0x32   :  { %1242 = vmatprep.subr.bf16.mxu1 %v1341_v3  ;;  %v1076_v3 = vld [vmem:[%s1733_s2] ss:$0 sm:$0xff] }
  0x33   :  { %1221 = vmatpush3.bf16.msra.mxu0 %v1340_v4 }
  0x34   :  { %1222 = vmatprep.subr.bf16.mxu0 %v1343_v5 }
  0x35   :  { %1243 = vmatpush3.bf16.msra.mxu1 %v1342_v6 }
  0x36   :  { %1244 = vmatprep.subr.bf16.mxu1 %v1345_v7 }
  0x37   :  { %1223 = vmatpush3.bf16.msra.mxu0 %v1344_v8 }
  0x38   :  { %1224 = vmatprep.subr.bf16.mxu0 %v1347_v9 }
  0x39   :  { %1245 = vmatpush3.bf16.msra.mxu1 %v1346_v10 }
  0x3a   :  { %1246 = vmatprep.subr.bf16.mxu1 %v1349_v11 }
  0x3b   :  { %1225 = vmatpush3.bf16.msra.mxu0 %v1348_v12 }
  0x3c   :  { %1226 = vmatprep.subr.bf16.mxu0 %v1351_v13 }
  0x3d   :  { %1247 = vmatpush3.bf16.msra.mxu1 %v1350_v14 }
  0x3e   :  { %1248 = vmatprep.subr.bf16.mxu1 %v1353_v15 }
  0x3f   :  { %1227 = vmatpush3.bf16.msra.mxu0 %v1352_v16 }
  0x40   :  { %1265 = vmatprep.subr.bf16.mxu0 %v1388_v20 }
  0x41   :  { %1249 = vmatpush3.bf16.msra.mxu1 %v1354_v18  ;;  %v1391_v18 = vmov 1983009808  }
  0x42   :  { %796 = vmatmul.mubr.bf16.vlgmr.msra.gmra.mxu0 %v209_v17  ;;  %993 = vmatprep.subr.bf16.mxu1 %v1365_v32 }
  0x43   :  { %1266 = vmatpush3.bf16.msra.mxu0 %v1355_v19  ;;  %1281 = vmatprep.mubr.msk.bf16.mxu0 %vm1389_vm0, %v1388_v20  ;;  %v1038_v19 = vunpack.c.l.s4 %v1391_v18 }
  0x44   :  { %836 = vmatmul.mubr.bf16.vlgmr.msra.gmra.mxu1 %v225_v21  ;;  %1267 = vmatprep.subr.bf16.mxu0 %v1388_v20  ;;  %v1034_v21 = vld [vmem:[%s1734_s5] sm:$0x3] }
  0x45   :  { %994 = vmatpush1.bf16.msra.mxu1 %v1363_v33  ;;  %1025 = vmatprep.mubr.bf16.mxu1 %v1390_v49 }
  0x46   :  { %995 = vmatprep.subr.bf16.mxu1 %v1368_v35 }
  0x47   :  { %1268 = vmatpush3.bf16.msra.mxu0 %v1356_v22  ;;  %v905_v22 = vsub.s32 0, %v1502_v29 }
  0x48   :  { %1269 = vmatprep.subr.bf16.mxu0 %v1388_v20 }
  0x49   :  { %996 = vmatpush1.bf16.msra.mxu1 %v1366_v36 }
  0x4a   :  { %997 = vmatprep.subr.bf16.mxu1 %v1371_v37 }
  0x4b   :  { %1270 = vmatpush3.bf16.msra.mxu0 %v1357_v23  ;;  %v1035_v23 = vunpack.c.l.bf16 %v1034_v21 }
  0x4c   :  { %1271 = vmatprep.subr.bf16.mxu0 %v1388_v20 }
  0x4d   :  { %998 = vmatpush1.bf16.msra.mxu1 %v1369_v38 }
  0x4e   :  { %999 = vmatprep.subr.bf16.mxu1 %v1374_v39 }
  0x4f   :  { %1272 = vmatpush3.bf16.msra.mxu0 %v1358_v24 }
  0x50   :  { %1273 = vmatprep.subr.bf16.mxu0 %v1388_v20 }
  0x51   :  { %1000 = vmatpush1.bf16.msra.mxu1 %v1372_v40 }
  0x52   :  { %1001 = vmatprep.subr.bf16.mxu1 %v1377_v41 }
  0x53   :  { %1274 = vmatpush3.bf16.msra.mxu0 %v1359_v25  ;;  %v901_v25 = vld [vmem:[%s1735_s4] sm:$0x3] }
  0x54   :  { %1275 = vmatprep.subr.bf16.mxu0 %v1388_v20 }
  0x55   :  { %1002 = vmatpush1.bf16.msra.mxu1 %v1375_v42 }
  0x56   :  { %1003 = vmatprep.subr.bf16.mxu1 %v1380_v43 }
  0x57   :  { %1276 = vmatpush3.bf16.msra.mxu0 %v1360_v26  ;;  %v909_v26 = vsub.s32 1, %v1502_v29 }
  0x58   :  { %1277 = vmatprep.subr.bf16.mxu0 %v1388_v20 }
  0x59   :  { %1004 = vmatpush1.bf16.msra.mxu1 %v1378_v44  ;;  %v910_v30 = vrot.slane %v901_v25, %v909_v26 }
  0x5a   :  { %1005 = vmatprep.subr.bf16.mxu1 %v1383_v45 }
  0x5b   :  { %1278 = vmatpush3.bf16.msra.mxu0 %v1361_v27  ;;  %v906_v27 = vrot.slane %v901_v25, %v905_v22 }
  0x5c   :  { %1279 = vmatprep.subr.bf16.mxu0 %v1388_v20  ;;  %v1039_v20 = vunpack.c.0.s8 %v1038_v19 }
  0x5d   :  { %1006 = vmatpush1.bf16.msra.mxu1 %v1381_v46 }
  0x5e   :  { %1007 = vmatprep.subr.bf16.mxu1 %v1386_v47  ;;  %v1042_v24 = vsub.s32 %v1039_v20, %v1502_v29 }
  0x5f   :  { %1280 = vmatpush3.bf16.msra.mxu0 %v1362_v28 }
  0x60   :  { %v1043_v28 = vrot.slane %v1035_v23, %v1042_v24 }
  0x61   :  { %1008 = vmatpush1.bf16.msra.mxu1 %v1384_v48 }
  0x62   :  { %1282 = vmatmul.mubr.bf16.vlgmr.msra.gmra.mxu0 %v241_v31  ;;  %v1044_v33 = vcombine.high %v1043_v28, %v1043_v28 }
  0xe2   :  { %v1184_v50 = vpop.f32.mrf.mxu0 }
  0xe4   :  { %v1185_v51 = vpop.f32.mrf.mxu0  ;;  %v1206_v52 = vpop.f32.mrf.mxu1 }
  0xe5   :  { %v1186_v2 = vadd.f32 %v1185_v51, %v1184_v50 }
  0xe6   :  { %v1187_v53 = vpop.f32.mrf.mxu0  ;;  %v1207_v54 = vpop.f32.mrf.mxu1 }
  0xe7   :  { %v718_v4 = vadd.f32 %v1186_v2, %v1076_v3  ;;  %v1208_v5 = vadd.f32 %v1207_v54, %v1206_v52 }
  0xe8   :  { %v1188_v55 = vpop.f32.mrf.mxu0  ;;  %v1209_v56 = vpop.f32.mrf.mxu1 }
  0xe9   :  { %v758_v7 = vadd.f32 %v1208_v5, %v718_v4 }
  0xea   :  { %v1210_v57 = vpop.f32.mrf.mxu1 }
 0x102   :  { %v1228_v58 = vpop.f32.mrf.mxu0 }
 0x104   :  { %v1229_v59 = vpop.f32.mrf.mxu0  ;;  %v1250_v60 = vpop.f32.mrf.mxu1 }
 0x105   :  { %v1230_v6 = vadd.f32 %v1229_v59, %v1228_v58 }
 0x106   :  { %v1231_v61 = vpop.f32.mrf.mxu0  ;;  %v1251_v62 = vpop.f32.mrf.mxu1 }
 0x107   :  { %v798_v8 = vadd.f32 %v1230_v6, %v758_v7  ;;  %v1252_v9 = vadd.f32 %v1251_v62, %v1250_v60 }
 0x108   :  { %v1232_v63 = vpop.f32.mrf.mxu0  ;;  %v1253_v0 = vpop.f32.mrf.mxu1 }
 0x109   :  { %v838_v10 = vadd.f32 %v1252_v9, %v798_v8 }
 0x10a   :  { %v1254_v1 = vpop.f32.mrf.mxu1 }
 0x122   :  { %v877_v11 = vpop.f32.mrf.mxu0 }
 0x123   :  { %v878_v12 = vadd.f32 %v877_v11, %v838_v10 }
 0x124   :  { %v1283_v13 = vpop.f32.mrf.mxu0 }
 0x125   :  { %v883_v14 = vmax.f32 %v878_v12, 0.0 }
 0x126   :  { %v880_v15 = vpop.f32.mrf.mxu0 }
 0x127   :  { %v884_v16 = vpack.c.bf16 %v883_v14, %v883_v14 }
 0x128   :  { %v1284_v17 = vpop.f32.mrf.mxu0 }
 0x129   :  { %1026 = vmatmul.mubr.bf16.vlgmr.msra.gmra.mxu1 %v884_v16 }
 0x1e9   :  { %v1027_v31 = vpop.f32.mrf.mxu1 }
 0x1ea   :  { %v1028_v32 = vadd.f32 %v1027_v31, %v906_v27 }
 0x1eb   :  { %v1029_v35 = vpop.f32.mrf.mxu1 }
 0x1ec   :  { %v1047_v36 = vadd.f32 %v1043_v28, %v1028_v32  ;;  %v1030_v37 = vadd.f32 %v1029_v35, %v910_v30 }
 0x1ed   :  { %v1031_v38 = vpop.f32.mrf.mxu1 }
 0x1ee   :  { %v1048_v39 = vadd.f32 %v1044_v33, %v1030_v37  ;;  %v1049_v41 = vmax.f32 %v1047_v36, 0.0 }
 0x1ef   :  { %v1032_v40 = vpop.f32.mrf.mxu1 }
 0x1f0   :  { %v1050_v42 = vmax.f32 %v1048_v39, 0.0 }
 0x1f2   :  { %v1166_v43 = vpack.c.bf16 %v1050_v42, %v1049_v41 }
 0x1f4   :  { %v1062_v44 = vrot.slane %v1166_v43, %v1517_v34 }
 0x1f6   :  { %1167 = vst.sshfl [vmem:[%s1736_s6] sm:$0x5 pattern:$0x73625140] %v1062_v44 }

</bundles_post_ra>
